<compile_context>
chip_gen: v5e
topology: v5e:2x2
jax: 0.10.0
libtpu: 0.0.40
codegen_flags: <defaults>
</compile_context>

<pallas_src>
import jax
import jax.numpy as jnp
from jax import lax
from jax.experimental import pallas as pl
from jax.experimental.pallas import tpu as pltpu

HEADS = 4
DIM_HEAD = 16
INNER = HEADS * DIM_HEAD  # 64
LN_EPS = 1e-5
_INV_SQRT2 = 0.7071067811865476

VEC_ORDER = ["be1", "g1", "bt1", "be2", "g2", "bt2", "bo", "gn", "bn", "bf1", "bf2"]
WEIGHT_ORDER = ["we1", "we2", "wq1", "wk1", "wv1", "wq2", "wk2", "wv2", "wo", "wf1", "wf2"]


# ----------------------------- in-kernel helpers -----------------------------
def _layernorm(x, gamma, beta):
    mu = jnp.mean(x, axis=-1, keepdims=True)
    xc = x - mu
    var = jnp.mean(xc * xc, axis=-1, keepdims=True)
    return xc * lax.rsqrt(var + LN_EPS) * gamma + beta


def _softmax_last(x):
    m = jnp.max(x, axis=-1, keepdims=True)
    e = jnp.exp(x - m)
    # reciprocal on the EUP slot instead of a full-tile VPU divide
    return e * pl.reciprocal(jnp.sum(e, axis=-1, keepdims=True), approx=True)


def _gelu_exact(x):
    # PyTorch nn.GELU() default (erf-based)
    return 0.5 * x * (1.0 + lax.erf(x * jnp.float32(_INV_SQRT2)))


# --------------------------------- kernel ------------------------------------
def block_kernel(x_ref, y_ref, vec_ref,
                 we1_ref, we2_ref,
                 wq1_ref, wk1_ref, wv1_ref,
                 wq2_ref, wk2_ref, wv2_ref,
                 wo_ref, wf1_ref, wf2_ref,
                 out_ref):
    BT, _, N = x_ref.shape
    C = we1_ref.shape[1]
    M = BT * N
    bf16 = jnp.bfloat16
    f32 = jnp.float32

    vecs = vec_ref[...]                               # (11, C) f32, packed vectors
    be1, g1, bt1 = vecs[0:1], vecs[1:2], vecs[2:3]
    be2, g2, bt2 = vecs[3:4], vecs[4:5], vecs[5:6]
    bo, gn, bn = vecs[6:7], vecs[7:8], vecs[8:9]
    bias_f1, bias_f2 = vecs[9:10], vecs[10:11]

    # ---- Embedding1 / Embedding2: Linear + LayerNorm on the whole [BT*N, C] slab.
    # x_ref[b] is [c, N] (channels-major; the wrapper only reshaped, never transposed)
    # so we contract the channel axis directly.
    we1 = we1_ref[...]
    we2 = we2_ref[...]
    e1_blk, e2_blk = [], []
    for b in range(BT):                               # static unroll, BT is small
        e1_blk.append(lax.dot_general(x_ref[b], we1, (((0,), (0,)), ((), ())),
                                      preferred_element_type=f32))   # [N, C]
        e2_blk.append(lax.dot_general(y_ref[b], we2, (((0,), (0,)), ((), ())),
                                      preferred_element_type=f32))
    e1 = e1_blk[0] if BT == 1 else jnp.concatenate(e1_blk, axis=0)    # [M, C]
    e2 = e2_blk[0] if BT == 1 else jnp.concatenate(e2_blk, axis=0)
    e1 = _layernorm(e1 + be1, g1, bt1)
    e2 = _layernorm(e2 + be2, g2, bt2)
    e1_b = e1.astype(bf16)
    e2_b = e2.astype(bf16)

    # ---- DualT attention.  Heads live on the *leading* axis of the repacked
    # weights, so there is no 16-lane slicing and no lane-concatenate; each head's
    # output folds straight into the to_out projection.  The 1/sqrt(D) scale is
    # already baked into wq1/wq2.
    proj = jnp.zeros((M, C), f32)
    for h in range(wq1_ref.shape[0]):                 # static unroll over HEADS
        q1 = jnp.dot(e1_b, wq1_ref[h], preferred_element_type=f32).astype(bf16)  # [M, D]
        k1 = jnp.dot(e1_b, wk1_ref[h], preferred_element_type=f32).astype(bf16)
        v1 = jnp.dot(e1_b, wv1_ref[h], preferred_element_type=f32).astype(bf16)
        q2 = jnp.dot(e2_b, wq2_ref[h], preferred_element_type=f32).astype(bf16)
        k2 = jnp.dot(e2_b, wk2_ref[h], preferred_element_type=f32).astype(bf16)
        v2 = jnp.dot(e2_b, wv2_ref[h], preferred_element_type=f32).astype(bf16)

        o_blk = []
        for b in range(BT):                           # attention never mixes batches
            s = b * N                                 # sublane-aligned row slices
            q1b, k1b, v1b = q1[s:s + N], k1[s:s + N], v1[s:s + N]
            q2b, k2b, v2b = q2[s:s + N], k2[s:s + N], v2[s:s + N]

            # branch 1: attention over tokens                          [N, N]
            d1 = lax.dot_general(q1b, k1b, (((1,), (1,)), ((), ())),
                                 preferred_element_type=f32)
            a1 = _softmax_last(d1).astype(bf16)
            o1 = jnp.dot(a1, v1b, preferred_element_type=f32)         # [N, D]

            # branch 2: attention over the head dimension              [D, D]
            d2 = lax.dot_general(q2b, k2b, (((0,), (0,)), ((), ())),
                                 preferred_element_type=f32)
            a2 = _softmax_last(d2).astype(bf16)
            # o2[n, d] = sum_j v2b[n, j] * a2[d, j]   (token-major result)
            o2 = lax.dot_general(v2b, a2, (((1,), (1,)), ((), ())),
                                 preferred_element_type=f32)          # [N, D]
            o_blk.append(o1 + o2)

        inp_h = o_blk[0] if BT == 1 else jnp.concatenate(o_blk, axis=0)   # [M, D]
        # per-head slab of to_out, accumulated into the projection
        proj = proj + jnp.dot(inp_h.astype(bf16), wo_ref[h],
                              preferred_element_type=f32)                 # [M, C]

    attn_out = _layernorm(proj + bo, gn, bn)                              # [M, C]

    # ---- FFN (Linear -> GELU -> Linear) + residual
    h1 = _gelu_exact(jnp.dot(attn_out.astype(bf16), wf1_ref[...],
                             preferred_element_type=f32) + bias_f1)
    ff = jnp.dot(h1.astype(bf16), wf2_ref[...], preferred_element_type=f32) + bias_f2

    out_ref[...] = (ff + attn_out).reshape(BT, N, C)


# --------------------------------- wrapper -----------------------------------
def init_params(key, in_c1, in_c2, out_c):
    C = out_c
    ks = jax.random.split(key, 18)
    w = lambda k, shape, s=0.02: jax.random.normal(k, shape, jnp.float32) * s
    return {
        # Embedding1
        "we1": w(ks[0], (in_c1, C)), "be1": w(ks[1], (1, C)),
        "g1": 1.0 + w(ks[2], (1, C)), "bt1": w(ks[3], (1, C)),
        # Embedding2
        "we2": w(ks[4], (in_c2, C)), "be2": w(ks[5], (1, C)),
        "g2": 1.0 + w(ks[6], (1, C)), "bt2": w(ks[7], (1, C)),
        # DualT qkv projections (bias=False)
        "wqkv1": w(ks[8], (C, 3 * INNER)),
        "wqkv2": w(ks[9], (C, 3 * INNER)),
        # DualT to_out + norm
        "wo": w(ks[10], (INNER, C)), "bo": w(ks[11], (1, C)),
        "gn": 1.0 + w(ks[12], (1, C)), "bn": w(ks[13], (1, C)),
        # FFN (hidden_dim == out_c)
        "wf1": w(ks[14], (C, C)), "bf1": w(ks[15], (1, C)),
        "wf2": w(ks[16], (C, C)), "bf2": w(ks[17], (1, C)),
    }


def _repack_params(params):
    """Repack weights for the kernel: per-head leading axis, scale baked into Q,
    MXU operands in bf16, all small vectors packed into one (11, C) array."""
    C = params["we1"].shape[1]
    scale = jnp.float32(DIM_HEAD ** -0.5)

    def qkv_heads(wqkv):              # [C, 3*INNER] -> three [HEADS, C, DIM_HEAD]
        w4 = wqkv.reshape(C, 3, HEADS, DIM_HEAD)
        return (jnp.transpose(w4[:, 0], (1, 0, 2)),
                jnp.transpose(w4[:, 1], (1, 0, 2)),
                jnp.transpose(w4[:, 2], (1, 0, 2)))

    wq1, wk1, wv1 = qkv_heads(params["wqkv1"])
    wq2, wk2, wv2 = qkv_heads(params["wqkv2"])
    bf = lambda a: a.astype(jnp.bfloat16)
    weights = {
        "we1": params["we1"], "we2": params["we2"],      # tiny K, kept f32
        "wq1": bf(wq1 * scale), "wk1": bf(wk1), "wv1": bf(wv1),
        "wq2": bf(wq2 * scale), "wk2": bf(wk2), "wv2": bf(wv2),
        "wo": bf(params["wo"].reshape(HEADS, DIM_HEAD, C)),
        "wf1": bf(params["wf1"]), "wf2": bf(params["wf2"]),
    }
    vecs = jnp.concatenate([params[k] for k in VEC_ORDER], axis=0)   # (11, C) f32
    return vecs, weights


@jax.jit
def block_forward(X, Y, params):
    B, c1, H, W = X.shape
    c2 = Y.shape[1]
    N = H * W
    C = params["we1"].shape[1]

    vecs, wts = _repack_params(params)

    # NCHW -> [B, c, N]: a pure reshape (no HBM transpose); the kernel contracts the
    # channel axis itself, producing token-major activations on the fly.
    x = X.reshape(B, c1, N)
    y = Y.reshape(B, c2, N)

    # Fold batches into the token dim inside each grid step (bigger MXU tiles, fewer
    # grid steps), while keeping >=2 "parallel" grid steps when possible so v7x's
    # two TensorCores can split the batch axis.
    BT = B // 2 if (B % 2 == 0 and B >= 2) else 1
    grid = (B // BT,)

    def batch_tiled(shape):
        return pl.BlockSpec(shape, lambda i: (i, 0, 0))

    def whole(shape):
        nz = len(shape)
        return pl.BlockSpec(shape, lambda i, nz=nz: (0,) * nz)

    in_specs = ([batch_tiled((BT, c1, N)), batch_tiled((BT, c2, N)), whole(vecs.shape)]
                + [whole(wts[k].shape) for k in WEIGHT_ORDER])

    out = pl.pallas_call(
        block_kernel,
        out_shape=jax.ShapeDtypeStruct((B, N, C), jnp.float32),
        grid=grid,
        in_specs=in_specs,
        out_specs=pl.BlockSpec((BT, N, C), lambda i: (i, 0, 0)),
        compiler_params=pltpu.CompilerParams(
            dimension_semantics=("parallel",),       # batch tiles are independent
            vmem_limit_bytes=32 * 1024 * 1024,       # working set is ~1 MiB
        ),
    )(x, y, vecs, *[wts[k] for k in WEIGHT_ORDER])

    # [B, N, C] -> NCHW
    return out.reshape(B, H, W, C).transpose(0, 3, 1, 2)


# ------------------------------ pure-JAX reference ---------------------------
def block_forward_ref(X, Y, p):
    """Reference with the same mixed-precision policy as the kernel
    (bf16 MXU operands after the embeddings, f32 accumulation / normalizations)."""
    B, c1, H, W = X.shape
    c2 = Y.shape[1]
    N = H * W
    C = p["we1"].shape[1]
    f32 = jnp.float32
    bf = lambda a: a.astype(jnp.bfloat16)

    def ln(v, g, b):
        mu = v.mean(-1, keepdims=True)
        var = ((v - mu) ** 2).mean(-1, keepdims=True)
        return (v - mu) * lax.rsqrt(var + LN_EPS) * g + b

    def mm16(a, w):
        return jnp.einsum("...ij,jk->...ik", bf(a), bf(w), preferred_element_type=f32)

    x = jnp.transpose(X, (0, 2, 3, 1)).reshape(B, N, c1)
    y = jnp.transpose(Y, (0, 2, 3, 1)).reshape(B, N, c2)

    e1 = ln(jnp.einsum("bnc,ck->bnk", x, p["we1"]) + p["be1"], p["g1"], p["bt1"])
    e2 = ln(jnp.einsum("bnc,ck->bnk", y, p["we2"]) + p["be2"], p["g2"], p["bt2"])
    qkv1 = mm16(e1, p["wqkv1"])
    qkv2 = mm16(e2, p["wqkv2"])

    def heads_nd(t):                  # [B,N,INNER] -> [B,H,N,D]
        return t.reshape(B, N, HEADS, DIM_HEAD).transpose(0, 2, 1, 3)

    q1, k1, v1 = map(heads_nd, jnp.split(qkv1, 3, axis=-1))
    q2, k2, v2 = map(lambda t: heads_nd(t).transpose(0, 1, 3, 2), jnp.split(qkv2, 3, axis=-1))
    scale = DIM_HEAD ** -0.5

    d1 = jnp.einsum("bhid,bhjd->bhij", bf(q1), bf(k1), preferred_element_type=f32) * scale
    a1 = jax.nn.softmax(d1, axis=-1)
    o1 = jnp.einsum("bhij,bhjd->bhid", bf(a1), bf(v1), preferred_element_type=f32)
    o1 = o1.transpose(0, 2, 1, 3).reshape(B, N, INNER)

    d2 = jnp.einsum("bhid,bhjd->bhij", bf(q2), bf(k2), preferred_element_type=f32) * scale
    a2 = jax.nn.softmax(d2, axis=-1)
    o2 = jnp.einsum("bhij,bhjd->bhid", bf(a2), bf(v2), preferred_element_type=f32)
    o2 = o2.transpose(0, 3, 1, 2).reshape(B, N, INNER)

    attn = ln(mm16(o1 + o2, p["wo"]) + p["bo"], p["gn"], p["bn"])
    h1 = mm16(attn, p["wf1"]) + p["bf1"]
    h1 = 0.5 * h1 * (1.0 + lax.erf(h1 * jnp.float32(_INV_SQRT2)))
    out = mm16(h1, p["wf2"]) + p["bf2"] + attn
    return out.reshape(B, H, W, C).transpose(0, 3, 1, 2)


if __name__ == "__main__":
    key = jax.random.PRNGKey(0)
    kx, ky, kp = jax.random.split(key, 3)

    B, in_c1, in_c2, out_c, H, W = 4, 4, 8, 32, 8, 8
    X = jax.random.normal(kx, (B, in_c1, H, W), jnp.float32)
    Y = jax.random.normal(ky, (B, in_c2, H, W), jnp.float32)
    params = init_params(kp, in_c1, in_c2, out_c)

    out = jax.block_until_ready(block_forward(X, Y, params))
    ref = block_forward_ref(X, Y, params)

    assert out.shape == (B, out_c, H, W)
    err = float(jnp.max(jnp.abs(out - ref)))
    assert err < 2e-2, f"max abs error vs reference: {err}"
    print("KERNEL_OK")
</pallas_src>

<mosaic_0001>
module attributes {stable_mosaic.version = 11 : i64} {
  func.func @block_kernel(%arg0: i32, %arg1: memref<2x4x64xf32, #tpu.memory_space<vmem>>, %arg2: memref<2x8x64xf32, #tpu.memory_space<vmem>>, %arg3: memref<11x32xf32, #tpu.memory_space<vmem>>, %arg4: memref<4x32xf32, #tpu.memory_space<vmem>>, %arg5: memref<8x32xf32, #tpu.memory_space<vmem>>, %arg6: memref<4x32x16xbf16, #tpu.memory_space<vmem>>, %arg7: memref<4x32x16xbf16, #tpu.memory_space<vmem>>, %arg8: memref<4x32x16xbf16, #tpu.memory_space<vmem>>, %arg9: memref<4x32x16xbf16, #tpu.memory_space<vmem>>, %arg10: memref<4x32x16xbf16, #tpu.memory_space<vmem>>, %arg11: memref<4x32x16xbf16, #tpu.memory_space<vmem>>, %arg12: memref<4x16x32xbf16, #tpu.memory_space<vmem>>, %arg13: memref<32x32xbf16, #tpu.memory_space<vmem>>, %arg14: memref<32x32xbf16, #tpu.memory_space<vmem>>, %arg15: memref<2x64x32xf32, #tpu.memory_space<vmem>>) attributes {dimension_semantics = [#tpu.dimension_semantics<parallel>], iteration_bounds = array<i64: 2>, scalar_prefetch = 0 : i64, scratch_operands = 0 : i64, tpu.core_type = #tpu.core_type<tc>, window_params = [{transform_indices = @transform_0, window_bounds = array<i64: 2, 4, 64>}, {transform_indices = @transform_1, window_bounds = array<i64: 2, 8, 64>}, {pipeline_mode = #tpu.pipeline_mode<synchronous>, transform_indices = @transform_2, window_bounds = array<i64: 11, 32>}, {pipeline_mode = #tpu.pipeline_mode<synchronous>, transform_indices = @transform_3, window_bounds = array<i64: 4, 32>}, {pipeline_mode = #tpu.pipeline_mode<synchronous>, transform_indices = @transform_4, window_bounds = array<i64: 8, 32>}, {pipeline_mode = #tpu.pipeline_mode<synchronous>, transform_indices = @transform_5, window_bounds = array<i64: 4, 32, 16>}, {pipeline_mode = #tpu.pipeline_mode<synchronous>, transform_indices = @transform_6, window_bounds = array<i64: 4, 32, 16>}, {pipeline_mode = #tpu.pipeline_mode<synchronous>, transform_indices = @transform_7, window_bounds = array<i64: 4, 32, 16>}, {pipeline_mode = #tpu.pipeline_mode<synchronous>, transform_indices = @transform_8, window_bounds = array<i64: 4, 32, 16>}, {pipeline_mode = #tpu.pipeline_mode<synchronous>, transform_indices = @transform_9, window_bounds = array<i64: 4, 32, 16>}, {pipeline_mode = #tpu.pipeline_mode<synchronous>, transform_indices = @transform_10, window_bounds = array<i64: 4, 32, 16>}, {pipeline_mode = #tpu.pipeline_mode<synchronous>, transform_indices = @transform_11, window_bounds = array<i64: 4, 16, 32>}, {pipeline_mode = #tpu.pipeline_mode<synchronous>, transform_indices = @transform_12, window_bounds = array<i64: 32, 32>}, {pipeline_mode = #tpu.pipeline_mode<synchronous>, transform_indices = @transform_13, window_bounds = array<i64: 32, 32>}, {transform_indices = @transform_14, window_bounds = array<i64: 2, 64, 32>}]} {
    %c0 = arith.constant 0 : index
    %c0_0 = arith.constant 0 : index
    %0 = vector.load %arg3[%c0, %c0_0] : memref<11x32xf32, #tpu.memory_space<vmem>>, vector<11x32xf32>
    %1 = vector.extract_strided_slice %0 {offsets = [0, 0], sizes = [1, 32], strides = [1, 1]} : vector<11x32xf32> to vector<1x32xf32>
    %2 = vector.extract_strided_slice %0 {offsets = [1, 0], sizes = [1, 32], strides = [1, 1]} : vector<11x32xf32> to vector<1x32xf32>
    %3 = vector.extract_strided_slice %0 {offsets = [2, 0], sizes = [1, 32], strides = [1, 1]} : vector<11x32xf32> to vector<1x32xf32>
    %4 = vector.extract_strided_slice %0 {offsets = [3, 0], sizes = [1, 32], strides = [1, 1]} : vector<11x32xf32> to vector<1x32xf32>
    %5 = vector.extract_strided_slice %0 {offsets = [4, 0], sizes = [1, 32], strides = [1, 1]} : vector<11x32xf32> to vector<1x32xf32>
    %6 = vector.extract_strided_slice %0 {offsets = [5, 0], sizes = [1, 32], strides = [1, 1]} : vector<11x32xf32> to vector<1x32xf32>
    %7 = vector.extract_strided_slice %0 {offsets = [6, 0], sizes = [1, 32], strides = [1, 1]} : vector<11x32xf32> to vector<1x32xf32>
    %8 = vector.extract_strided_slice %0 {offsets = [7, 0], sizes = [1, 32], strides = [1, 1]} : vector<11x32xf32> to vector<1x32xf32>
    %9 = vector.extract_strided_slice %0 {offsets = [8, 0], sizes = [1, 32], strides = [1, 1]} : vector<11x32xf32> to vector<1x32xf32>
    %10 = vector.extract_strided_slice %0 {offsets = [9, 0], sizes = [1, 32], strides = [1, 1]} : vector<11x32xf32> to vector<1x32xf32>
    %11 = vector.extract_strided_slice %0 {offsets = [10, 0], sizes = [1, 32], strides = [1, 1]} : vector<11x32xf32> to vector<1x32xf32>
    %c0_1 = arith.constant 0 : index
    %c0_2 = arith.constant 0 : index
    %12 = vector.load %arg4[%c0_1, %c0_2] : memref<4x32xf32, #tpu.memory_space<vmem>>, vector<4x32xf32>
    %c0_3 = arith.constant 0 : index
    %c0_4 = arith.constant 0 : index
    %13 = vector.load %arg5[%c0_3, %c0_4] : memref<8x32xf32, #tpu.memory_space<vmem>>, vector<8x32xf32>
    %c0_5 = arith.constant 0 : index
    %c0_6 = arith.constant 0 : index
    %c0_7 = arith.constant 0 : index
    %14 = vector.load %arg1[%c0_5, %c0_6, %c0_7] : memref<2x4x64xf32, #tpu.memory_space<vmem>>, vector<1x4x64xf32>
    %15 = vector.shape_cast %14 : vector<1x4x64xf32> to vector<4x64xf32>
    %cst = arith.constant dense<0.000000e+00> : vector<64x32xf32>
    %16 = tpu.matmul %15, %12, %cst {dimension_numbers = #tpu.dot_dimension_numbers<[0], [0], [1], [1], [0, 1, 1, 1], [], []>} : vector<4x64xf32>, vector<4x32xf32>, vector<64x32xf32> -> vector<64x32xf32>
    %c0_8 = arith.constant 0 : index
    %c0_9 = arith.constant 0 : index
    %c0_10 = arith.constant 0 : index
    %17 = vector.load %arg2[%c0_8, %c0_9, %c0_10] : memref<2x8x64xf32, #tpu.memory_space<vmem>>, vector<1x8x64xf32>
    %18 = vector.shape_cast %17 : vector<1x8x64xf32> to vector<8x64xf32>
    %cst_11 = arith.constant dense<0.000000e+00> : vector<64x32xf32>
    %19 = tpu.matmul %18, %13, %cst_11 {dimension_numbers = #tpu.dot_dimension_numbers<[0], [0], [1], [1], [0, 1, 1, 1], [], []>} : vector<8x64xf32>, vector<8x32xf32>, vector<64x32xf32> -> vector<64x32xf32>
    %c1 = arith.constant 1 : index
    %c0_12 = arith.constant 0 : index
    %c0_13 = arith.constant 0 : index
    %20 = vector.load %arg1[%c1, %c0_12, %c0_13] : memref<2x4x64xf32, #tpu.memory_space<vmem>>, vector<1x4x64xf32>
    %21 = vector.shape_cast %20 : vector<1x4x64xf32> to vector<4x64xf32>
    %cst_14 = arith.constant dense<0.000000e+00> : vector<64x32xf32>
    %22 = tpu.matmul %21, %12, %cst_14 {dimension_numbers = #tpu.dot_dimension_numbers<[0], [0], [1], [1], [0, 1, 1, 1], [], []>} : vector<4x64xf32>, vector<4x32xf32>, vector<64x32xf32> -> vector<64x32xf32>
    %c1_15 = arith.constant 1 : index
    %c0_16 = arith.constant 0 : index
    %c0_17 = arith.constant 0 : index
    %23 = vector.load %arg2[%c1_15, %c0_16, %c0_17] : memref<2x8x64xf32, #tpu.memory_space<vmem>>, vector<1x8x64xf32>
    %24 = vector.shape_cast %23 : vector<1x8x64xf32> to vector<8x64xf32>
    %cst_18 = arith.constant dense<0.000000e+00> : vector<64x32xf32>
    %25 = tpu.matmul %24, %13, %cst_18 {dimension_numbers = #tpu.dot_dimension_numbers<[0], [0], [1], [1], [0, 1, 1, 1], [], []>} : vector<8x64xf32>, vector<8x32xf32>, vector<64x32xf32> -> vector<64x32xf32>
    %26 = tpu.concatenate %16, %22 in 0 : vector<64x32xf32>, vector<64x32xf32> -> vector<128x32xf32>
    %27 = tpu.concatenate %19, %25 in 0 : vector<64x32xf32>, vector<64x32xf32> -> vector<128x32xf32>
    %28 = vector.broadcast %1 : vector<1x32xf32> to vector<128x32xf32>
    %29 = arith.addf %26, %28 : vector<128x32xf32>
    %cst_19 = arith.constant dense<0.000000e+00> : vector<128xf32>
    %30 = vector.multi_reduction <add>, %29, %cst_19 [1] : vector<128x32xf32> to vector<128xf32>
    %31 = vector.shape_cast %30 : vector<128xf32> to vector<128x1xf32>
    %cst_20 = arith.constant 3.200000e+01 : f32
    %32 = vector.broadcast %cst_20 : f32 to vector<128x1xf32>
    %33 = arith.divf %31, %32 : vector<128x1xf32>
    %34 = vector.broadcast %33 : vector<128x1xf32> to vector<128x32xf32>
    %35 = arith.subf %29, %34 : vector<128x32xf32>
    %36 = arith.mulf %35, %35 : vector<128x32xf32>
    %cst_21 = arith.constant dense<0.000000e+00> : vector<128xf32>
    %37 = vector.multi_reduction <add>, %36, %cst_21 [1] : vector<128x32xf32> to vector<128xf32>
    %38 = vector.shape_cast %37 : vector<128xf32> to vector<128x1xf32>
    %cst_22 = arith.constant 3.200000e+01 : f32
    %39 = vector.broadcast %cst_22 : f32 to vector<128x1xf32>
    %40 = arith.divf %38, %39 : vector<128x1xf32>
    %cst_23 = arith.constant 9.99999974E-6 : f32
    %41 = vector.broadcast %cst_23 : f32 to vector<128x1xf32>
    %42 = arith.addf %40, %41 : vector<128x1xf32>
    %43 = math.rsqrt %42 : vector<128x1xf32>
    %44 = vector.broadcast %43 : vector<128x1xf32> to vector<128x32xf32>
    %45 = arith.mulf %35, %44 : vector<128x32xf32>
    %46 = vector.broadcast %2 : vector<1x32xf32> to vector<128x32xf32>
    %47 = arith.mulf %45, %46 : vector<128x32xf32>
    %48 = vector.broadcast %3 : vector<1x32xf32> to vector<128x32xf32>
    %49 = arith.addf %47, %48 : vector<128x32xf32>
    %50 = vector.broadcast %4 : vector<1x32xf32> to vector<128x32xf32>
    %51 = arith.addf %27, %50 : vector<128x32xf32>
    %cst_24 = arith.constant dense<0.000000e+00> : vector<128xf32>
    %52 = vector.multi_reduction <add>, %51, %cst_24 [1] : vector<128x32xf32> to vector<128xf32>
    %53 = vector.shape_cast %52 : vector<128xf32> to vector<128x1xf32>
    %cst_25 = arith.constant 3.200000e+01 : f32
    %54 = vector.broadcast %cst_25 : f32 to vector<128x1xf32>
    %55 = arith.divf %53, %54 : vector<128x1xf32>
    %56 = vector.broadcast %55 : vector<128x1xf32> to vector<128x32xf32>
    %57 = arith.subf %51, %56 : vector<128x32xf32>
    %58 = arith.mulf %57, %57 : vector<128x32xf32>
    %cst_26 = arith.constant dense<0.000000e+00> : vector<128xf32>
    %59 = vector.multi_reduction <add>, %58, %cst_26 [1] : vector<128x32xf32> to vector<128xf32>
    %60 = vector.shape_cast %59 : vector<128xf32> to vector<128x1xf32>
    %cst_27 = arith.constant 3.200000e+01 : f32
    %61 = vector.broadcast %cst_27 : f32 to vector<128x1xf32>
    %62 = arith.divf %60, %61 : vector<128x1xf32>
    %cst_28 = arith.constant 9.99999974E-6 : f32
    %63 = vector.broadcast %cst_28 : f32 to vector<128x1xf32>
    %64 = arith.addf %62, %63 : vector<128x1xf32>
    %65 = math.rsqrt %64 : vector<128x1xf32>
    %66 = vector.broadcast %65 : vector<128x1xf32> to vector<128x32xf32>
    %67 = arith.mulf %57, %66 : vector<128x32xf32>
    %68 = vector.broadcast %5 : vector<1x32xf32> to vector<128x32xf32>
    %69 = arith.mulf %67, %68 : vector<128x32xf32>
    %70 = vector.broadcast %6 : vector<1x32xf32> to vector<128x32xf32>
    %71 = arith.addf %69, %70 : vector<128x32xf32>
    %72 = arith.truncf %49 : vector<128x32xf32> to vector<128x32xbf16>
    %73 = arith.truncf %71 : vector<128x32xf32> to vector<128x32xbf16>
    %cst_29 = arith.constant 0.000000e+00 : f32
    %74 = vector.broadcast %cst_29 : f32 to vector<128x32xf32>
    %c0_30 = arith.constant 0 : index
    %c0_31 = arith.constant 0 : index
    %c0_32 = arith.constant 0 : index
    %75 = vector.load %arg6[%c0_30, %c0_31, %c0_32] : memref<4x32x16xbf16, #tpu.memory_space<vmem>>, vector<1x32x16xbf16>
    %76 = vector.shape_cast %75 : vector<1x32x16xbf16> to vector<32x16xbf16>
    %cst_33 = arith.constant dense<0.000000e+00> : vector<128x16xf32>
    %77 = tpu.matmul %72, %76, %cst_33 {dimension_numbers = #tpu.dot_dimension_numbers<[1], [0], [0], [1], [0, 0, 1, 1], [], []>} : vector<128x32xbf16>, vector<32x16xbf16>, vector<128x16xf32> -> vector<128x16xf32>
    %78 = arith.truncf %77 : vector<128x16xf32> to vector<128x16xbf16>
    %c0_34 = arith.constant 0 : index
    %c0_35 = arith.constant 0 : index
    %c0_36 = arith.constant 0 : index
    %79 = vector.load %arg7[%c0_34, %c0_35, %c0_36] : memref<4x32x16xbf16, #tpu.memory_space<vmem>>, vector<1x32x16xbf16>
    %80 = vector.shape_cast %79 : vector<1x32x16xbf16> to vector<32x16xbf16>
    %cst_37 = arith.constant dense<0.000000e+00> : vector<128x16xf32>
    %81 = tpu.matmul %72, %80, %cst_37 {dimension_numbers = #tpu.dot_dimension_numbers<[1], [0], [0], [1], [0, 0, 1, 1], [], []>} : vector<128x32xbf16>, vector<32x16xbf16>, vector<128x16xf32> -> vector<128x16xf32>
    %82 = arith.truncf %81 : vector<128x16xf32> to vector<128x16xbf16>
    %c0_38 = arith.constant 0 : index
    %c0_39 = arith.constant 0 : index
    %c0_40 = arith.constant 0 : index
    %83 = vector.load %arg8[%c0_38, %c0_39, %c0_40] : memref<4x32x16xbf16, #tpu.memory_space<vmem>>, vector<1x32x16xbf16>
    %84 = vector.shape_cast %83 : vector<1x32x16xbf16> to vector<32x16xbf16>
    %cst_41 = arith.constant dense<0.000000e+00> : vector<128x16xf32>
    %85 = tpu.matmul %72, %84, %cst_41 {dimension_numbers = #tpu.dot_dimension_numbers<[1], [0], [0], [1], [0, 0, 1, 1], [], []>} : vector<128x32xbf16>, vector<32x16xbf16>, vector<128x16xf32> -> vector<128x16xf32>
    %86 = arith.truncf %85 : vector<128x16xf32> to vector<128x16xbf16>
    %c0_42 = arith.constant 0 : index
    %c0_43 = arith.constant 0 : index
    %c0_44 = arith.constant 0 : index
    %87 = vector.load %arg9[%c0_42, %c0_43, %c0_44] : memref<4x32x16xbf16, #tpu.memory_space<vmem>>, vector<1x32x16xbf16>
    %88 = vector.shape_cast %87 : vector<1x32x16xbf16> to vector<32x16xbf16>
    %cst_45 = arith.constant dense<0.000000e+00> : vector<128x16xf32>
    %89 = tpu.matmul %73, %88, %cst_45 {dimension_numbers = #tpu.dot_dimension_numbers<[1], [0], [0], [1], [0, 0, 1, 1], [], []>} : vector<128x32xbf16>, vector<32x16xbf16>, vector<128x16xf32> -> vector<128x16xf32>
    %90 = arith.truncf %89 : vector<128x16xf32> to vector<128x16xbf16>
    %c0_46 = arith.constant 0 : index
    %c0_47 = arith.constant 0 : index
    %c0_48 = arith.constant 0 : index
    %91 = vector.load %arg10[%c0_46, %c0_47, %c0_48] : memref<4x32x16xbf16, #tpu.memory_space<vmem>>, vector<1x32x16xbf16>
    %92 = vector.shape_cast %91 : vector<1x32x16xbf16> to vector<32x16xbf16>
    %cst_49 = arith.constant dense<0.000000e+00> : vector<128x16xf32>
    %93 = tpu.matmul %73, %92, %cst_49 {dimension_numbers = #tpu.dot_dimension_numbers<[1], [0], [0], [1], [0, 0, 1, 1], [], []>} : vector<128x32xbf16>, vector<32x16xbf16>, vector<128x16xf32> -> vector<128x16xf32>
    %94 = arith.truncf %93 : vector<128x16xf32> to vector<128x16xbf16>
    %c0_50 = arith.constant 0 : index
    %c0_51 = arith.constant 0 : index
    %c0_52 = arith.constant 0 : index
    %95 = vector.load %arg11[%c0_50, %c0_51, %c0_52] : memref<4x32x16xbf16, #tpu.memory_space<vmem>>, vector<1x32x16xbf16>
    %96 = vector.shape_cast %95 : vector<1x32x16xbf16> to vector<32x16xbf16>
    %cst_53 = arith.constant dense<0.000000e+00> : vector<128x16xf32>
    %97 = tpu.matmul %73, %96, %cst_53 {dimension_numbers = #tpu.dot_dimension_numbers<[1], [0], [0], [1], [0, 0, 1, 1], [], []>} : vector<128x32xbf16>, vector<32x16xbf16>, vector<128x16xf32> -> vector<128x16xf32>
    %98 = arith.truncf %97 : vector<128x16xf32> to vector<128x16xbf16>
    %99 = vector.extract_strided_slice %78 {offsets = [0, 0], sizes = [64, 16], strides = [1, 1]} : vector<128x16xbf16> to vector<64x16xbf16>
    %100 = vector.extract_strided_slice %82 {offsets = [0, 0], sizes = [64, 16], strides = [1, 1]} : vector<128x16xbf16> to vector<64x16xbf16>
    %101 = vector.extract_strided_slice %86 {offsets = [0, 0], sizes = [64, 16], strides = [1, 1]} : vector<128x16xbf16> to vector<64x16xbf16>
    %102 = vector.extract_strided_slice %90 {offsets = [0, 0], sizes = [64, 16], strides = [1, 1]} : vector<128x16xbf16> to vector<64x16xbf16>
    %103 = vector.extract_strided_slice %94 {offsets = [0, 0], sizes = [64, 16], strides = [1, 1]} : vector<128x16xbf16> to vector<64x16xbf16>
    %104 = vector.extract_strided_slice %98 {offsets = [0, 0], sizes = [64, 16], strides = [1, 1]} : vector<128x16xbf16> to vector<64x16xbf16>
    %cst_54 = arith.constant dense<0.000000e+00> : vector<64x64xf32>
    %105 = tpu.matmul %99, %100, %cst_54 {dimension_numbers = #tpu.dot_dimension_numbers<[1], [1], [0], [0], [0, 0, 1, 0], [], []>} : vector<64x16xbf16>, vector<64x16xbf16>, vector<64x64xf32> -> vector<64x64xf32>
    %cst_55 = arith.constant dense<0xFF800000> : vector<64xf32>
    %106 = vector.multi_reduction <maximumf>, %105, %cst_55 [1] : vector<64x64xf32> to vector<64xf32>
    %107 = vector.shape_cast %106 : vector<64xf32> to vector<64x1xf32>
    %108 = vector.broadcast %107 : vector<64x1xf32> to vector<64x64xf32>
    %109 = arith.subf %105, %108 : vector<64x64xf32>
    %110 = math.exp %109 : vector<64x64xf32>
    %cst_56 = arith.constant dense<0.000000e+00> : vector<64xf32>
    %111 = vector.multi_reduction <add>, %110, %cst_56 [1] : vector<64x64xf32> to vector<64xf32>
    %112 = vector.shape_cast %111 : vector<64xf32> to vector<64x1xf32>
    %113 = tpu.reciprocal %112 {approx = true} : vector<64x1xf32> -> vector<64x1xf32>
    %114 = vector.broadcast %113 : vector<64x1xf32> to vector<64x64xf32>
    %115 = arith.mulf %110, %114 : vector<64x64xf32>
    %116 = arith.truncf %115 : vector<64x64xf32> to vector<64x64xbf16>
    %cst_57 = arith.constant dense<0.000000e+00> : vector<64x16xf32>
    %117 = tpu.matmul %116, %101, %cst_57 {dimension_numbers = #tpu.dot_dimension_numbers<[1], [0], [0], [1], [0, 0, 1, 1], [], []>} : vector<64x64xbf16>, vector<64x16xbf16>, vector<64x16xf32> -> vector<64x16xf32>
    %cst_58 = arith.constant dense<0.000000e+00> : vector<16x16xf32>
    %118 = tpu.matmul %102, %103, %cst_58 {dimension_numbers = #tpu.dot_dimension_numbers<[0], [0], [1], [1], [0, 1, 1, 1], [], []>} : vector<64x16xbf16>, vector<64x16xbf16>, vector<16x16xf32> -> vector<16x16xf32>
    %cst_59 = arith.constant dense<0xFF800000> : vector<16xf32>
    %119 = vector.multi_reduction <maximumf>, %118, %cst_59 [1] : vector<16x16xf32> to vector<16xf32>
    %120 = vector.shape_cast %119 : vector<16xf32> to vector<16x1xf32>
    %121 = vector.broadcast %120 : vector<16x1xf32> to vector<16x16xf32>
    %122 = arith.subf %118, %121 : vector<16x16xf32>
    %123 = math.exp %122 : vector<16x16xf32>
    %cst_60 = arith.constant dense<0.000000e+00> : vector<16xf32>
    %124 = vector.multi_reduction <add>, %123, %cst_60 [1] : vector<16x16xf32> to vector<16xf32>
    %125 = vector.shape_cast %124 : vector<16xf32> to vector<16x1xf32>
    %126 = tpu.reciprocal %125 {approx = true} : vector<16x1xf32> -> vector<16x1xf32>
    %127 = vector.broadcast %126 : vector<16x1xf32> to vector<16x16xf32>
    %128 = arith.mulf %123, %127 : vector<16x16xf32>
    %129 = arith.truncf %128 : vector<16x16xf32> to vector<16x16xbf16>
    %cst_61 = arith.constant dense<0.000000e+00> : vector<64x16xf32>
    %130 = tpu.matmul %104, %129, %cst_61 {dimension_numbers = #tpu.dot_dimension_numbers<[1], [1], [0], [0], [0, 0, 1, 0], [], []>} : vector<64x16xbf16>, vector<16x16xbf16>, vector<64x16xf32> -> vector<64x16xf32>
    %131 = arith.addf %117, %130 : vector<64x16xf32>
    %132 = vector.extract_strided_slice %78 {offsets = [64, 0], sizes = [64, 16], strides = [1, 1]} : vector<128x16xbf16> to vector<64x16xbf16>
    %133 = vector.extract_strided_slice %82 {offsets = [64, 0], sizes = [64, 16], strides = [1, 1]} : vector<128x16xbf16> to vector<64x16xbf16>
    %134 = vector.extract_strided_slice %86 {offsets = [64, 0], sizes = [64, 16], strides = [1, 1]} : vector<128x16xbf16> to vector<64x16xbf16>
    %135 = vector.extract_strided_slice %90 {offsets = [64, 0], sizes = [64, 16], strides = [1, 1]} : vector<128x16xbf16> to vector<64x16xbf16>
    %136 = vector.extract_strided_slice %94 {offsets = [64, 0], sizes = [64, 16], strides = [1, 1]} : vector<128x16xbf16> to vector<64x16xbf16>
    %137 = vector.extract_strided_slice %98 {offsets = [64, 0], sizes = [64, 16], strides = [1, 1]} : vector<128x16xbf16> to vector<64x16xbf16>
    %cst_62 = arith.constant dense<0.000000e+00> : vector<64x64xf32>
    %138 = tpu.matmul %132, %133, %cst_62 {dimension_numbers = #tpu.dot_dimension_numbers<[1], [1], [0], [0], [0, 0, 1, 0], [], []>} : vector<64x16xbf16>, vector<64x16xbf16>, vector<64x64xf32> -> vector<64x64xf32>
    %cst_63 = arith.constant dense<0xFF800000> : vector<64xf32>
    %139 = vector.multi_reduction <maximumf>, %138, %cst_63 [1] : vector<64x64xf32> to vector<64xf32>
    %140 = vector.shape_cast %139 : vector<64xf32> to vector<64x1xf32>
    %141 = vector.broadcast %140 : vector<64x1xf32> to vector<64x64xf32>
    %142 = arith.subf %138, %141 : vector<64x64xf32>
    %143 = math.exp %142 : vector<64x64xf32>
    %cst_64 = arith.constant dense<0.000000e+00> : vector<64xf32>
    %144 = vector.multi_reduction <add>, %143, %cst_64 [1] : vector<64x64xf32> to vector<64xf32>
    %145 = vector.shape_cast %144 : vector<64xf32> to vector<64x1xf32>
    %146 = tpu.reciprocal %145 {approx = true} : vector<64x1xf32> -> vector<64x1xf32>
    %147 = vector.broadcast %146 : vector<64x1xf32> to vector<64x64xf32>
    %148 = arith.mulf %143, %147 : vector<64x64xf32>
    %149 = arith.truncf %148 : vector<64x64xf32> to vector<64x64xbf16>
    %cst_65 = arith.constant dense<0.000000e+00> : vector<64x16xf32>
    %150 = tpu.matmul %149, %134, %cst_65 {dimension_numbers = #tpu.dot_dimension_numbers<[1], [0], [0], [1], [0, 0, 1, 1], [], []>} : vector<64x64xbf16>, vector<64x16xbf16>, vector<64x16xf32> -> vector<64x16xf32>
    %cst_66 = arith.constant dense<0.000000e+00> : vector<16x16xf32>
    %151 = tpu.matmul %135, %136, %cst_66 {dimension_numbers = #tpu.dot_dimension_numbers<[0], [0], [1], [1], [0, 1, 1, 1], [], []>} : vector<64x16xbf16>, vector<64x16xbf16>, vector<16x16xf32> -> vector<16x16xf32>
    %cst_67 = arith.constant dense<0xFF800000> : vector<16xf32>
    %152 = vector.multi_reduction <maximumf>, %151, %cst_67 [1] : vector<16x16xf32> to vector<16xf32>
    %153 = vector.shape_cast %152 : vector<16xf32> to vector<16x1xf32>
    %154 = vector.broadcast %153 : vector<16x1xf32> to vector<16x16xf32>
    %155 = arith.subf %151, %154 : vector<16x16xf32>
    %156 = math.exp %155 : vector<16x16xf32>
    %cst_68 = arith.constant dense<0.000000e+00> : vector<16xf32>
    %157 = vector.multi_reduction <add>, %156, %cst_68 [1] : vector<16x16xf32> to vector<16xf32>
    %158 = vector.shape_cast %157 : vector<16xf32> to vector<16x1xf32>
    %159 = tpu.reciprocal %158 {approx = true} : vector<16x1xf32> -> vector<16x1xf32>
    %160 = vector.broadcast %159 : vector<16x1xf32> to vector<16x16xf32>
    %161 = arith.mulf %156, %160 : vector<16x16xf32>
    %162 = arith.truncf %161 : vector<16x16xf32> to vector<16x16xbf16>
    %cst_69 = arith.constant dense<0.000000e+00> : vector<64x16xf32>
    %163 = tpu.matmul %137, %162, %cst_69 {dimension_numbers = #tpu.dot_dimension_numbers<[1], [1], [0], [0], [0, 0, 1, 0], [], []>} : vector<64x16xbf16>, vector<16x16xbf16>, vector<64x16xf32> -> vector<64x16xf32>
    %164 = arith.addf %150, %163 : vector<64x16xf32>
    %165 = tpu.concatenate %131, %164 in 0 : vector<64x16xf32>, vector<64x16xf32> -> vector<128x16xf32>
    %166 = arith.truncf %165 : vector<128x16xf32> to vector<128x16xbf16>
    %c0_70 = arith.constant 0 : index
    %c0_71 = arith.constant 0 : index
    %c0_72 = arith.constant 0 : index
    %167 = vector.load %arg12[%c0_70, %c0_71, %c0_72] : memref<4x16x32xbf16, #tpu.memory_space<vmem>>, vector<1x16x32xbf16>
    %168 = vector.shape_cast %167 : vector<1x16x32xbf16> to vector<16x32xbf16>
    %cst_73 = arith.constant dense<0.000000e+00> : vector<128x32xf32>
    %169 = tpu.matmul %166, %168, %cst_73 {dimension_numbers = #tpu.dot_dimension_numbers<[1], [0], [0], [1], [0, 0, 1, 1], [], []>} : vector<128x16xbf16>, vector<16x32xbf16>, vector<128x32xf32> -> vector<128x32xf32>
    %170 = arith.addf %74, %169 : vector<128x32xf32>
    %c1_74 = arith.constant 1 : index
    %c0_75 = arith.constant 0 : index
    %c0_76 = arith.constant 0 : index
    %171 = vector.load %arg6[%c1_74, %c0_75, %c0_76] : memref<4x32x16xbf16, #tpu.memory_space<vmem>>, vector<1x32x16xbf16>
    %172 = vector.shape_cast %171 : vector<1x32x16xbf16> to vector<32x16xbf16>
    %cst_77 = arith.constant dense<0.000000e+00> : vector<128x16xf32>
    %173 = tpu.matmul %72, %172, %cst_77 {dimension_numbers = #tpu.dot_dimension_numbers<[1], [0], [0], [1], [0, 0, 1, 1], [], []>} : vector<128x32xbf16>, vector<32x16xbf16>, vector<128x16xf32> -> vector<128x16xf32>
    %174 = arith.truncf %173 : vector<128x16xf32> to vector<128x16xbf16>
    %c1_78 = arith.constant 1 : index
    %c0_79 = arith.constant 0 : index
    %c0_80 = arith.constant 0 : index
    %175 = vector.load %arg7[%c1_78, %c0_79, %c0_80] : memref<4x32x16xbf16, #tpu.memory_space<vmem>>, vector<1x32x16xbf16>
    %176 = vector.shape_cast %175 : vector<1x32x16xbf16> to vector<32x16xbf16>
    %cst_81 = arith.constant dense<0.000000e+00> : vector<128x16xf32>
    %177 = tpu.matmul %72, %176, %cst_81 {dimension_numbers = #tpu.dot_dimension_numbers<[1], [0], [0], [1], [0, 0, 1, 1], [], []>} : vector<128x32xbf16>, vector<32x16xbf16>, vector<128x16xf32> -> vector<128x16xf32>
    %178 = arith.truncf %177 : vector<128x16xf32> to vector<128x16xbf16>
    %c1_82 = arith.constant 1 : index
    %c0_83 = arith.constant 0 : index
    %c0_84 = arith.constant 0 : index
    %179 = vector.load %arg8[%c1_82, %c0_83, %c0_84] : memref<4x32x16xbf16, #tpu.memory_space<vmem>>, vector<1x32x16xbf16>
    %180 = vector.shape_cast %179 : vector<1x32x16xbf16> to vector<32x16xbf16>
    %cst_85 = arith.constant dense<0.000000e+00> : vector<128x16xf32>
    %181 = tpu.matmul %72, %180, %cst_85 {dimension_numbers = #tpu.dot_dimension_numbers<[1], [0], [0], [1], [0, 0, 1, 1], [], []>} : vector<128x32xbf16>, vector<32x16xbf16>, vector<128x16xf32> -> vector<128x16xf32>
    %182 = arith.truncf %181 : vector<128x16xf32> to vector<128x16xbf16>
    %c1_86 = arith.constant 1 : index
    %c0_87 = arith.constant 0 : index
    %c0_88 = arith.constant 0 : index
    %183 = vector.load %arg9[%c1_86, %c0_87, %c0_88] : memref<4x32x16xbf16, #tpu.memory_space<vmem>>, vector<1x32x16xbf16>
    %184 = vector.shape_cast %183 : vector<1x32x16xbf16> to vector<32x16xbf16>
    %cst_89 = arith.constant dense<0.000000e+00> : vector<128x16xf32>
    %185 = tpu.matmul %73, %184, %cst_89 {dimension_numbers = #tpu.dot_dimension_numbers<[1], [0], [0], [1], [0, 0, 1, 1], [], []>} : vector<128x32xbf16>, vector<32x16xbf16>, vector<128x16xf32> -> vector<128x16xf32>
    %186 = arith.truncf %185 : vector<128x16xf32> to vector<128x16xbf16>
    %c1_90 = arith.constant 1 : index
    %c0_91 = arith.constant 0 : index
    %c0_92 = arith.constant 0 : index
    %187 = vector.load %arg10[%c1_90, %c0_91, %c0_92] : memref<4x32x16xbf16, #tpu.memory_space<vmem>>, vector<1x32x16xbf16>
    %188 = vector.shape_cast %187 : vector<1x32x16xbf16> to vector<32x16xbf16>
    %cst_93 = arith.constant dense<0.000000e+00> : vector<128x16xf32>
    %189 = tpu.matmul %73, %188, %cst_93 {dimension_numbers = #tpu.dot_dimension_numbers<[1], [0], [0], [1], [0, 0, 1, 1], [], []>} : vector<128x32xbf16>, vector<32x16xbf16>, vector<128x16xf32> -> vector<128x16xf32>
    %190 = arith.truncf %189 : vector<128x16xf32> to vector<128x16xbf16>
    %c1_94 = arith.constant 1 : index
    %c0_95 = arith.constant 0 : index
    %c0_96 = arith.constant 0 : index
    %191 = vector.load %arg11[%c1_94, %c0_95, %c0_96] : memref<4x32x16xbf16, #tpu.memory_space<vmem>>, vector<1x32x16xbf16>
    %192 = vector.shape_cast %191 : vector<1x32x16xbf16> to vector<32x16xbf16>
    %cst_97 = arith.constant dense<0.000000e+00> : vector<128x16xf32>
    %193 = tpu.matmul %73, %192, %cst_97 {dimension_numbers = #tpu.dot_dimension_numbers<[1], [0], [0], [1], [0, 0, 1, 1], [], []>} : vector<128x32xbf16>, vector<32x16xbf16>, vector<128x16xf32> -> vector<128x16xf32>
    %194 = arith.truncf %193 : vector<128x16xf32> to vector<128x16xbf16>
    %195 = vector.extract_strided_slice %174 {offsets = [0, 0], sizes = [64, 16], strides = [1, 1]} : vector<128x16xbf16> to vector<64x16xbf16>
    %196 = vector.extract_strided_slice %178 {offsets = [0, 0], sizes = [64, 16], strides = [1, 1]} : vector<128x16xbf16> to vector<64x16xbf16>
    %197 = vector.extract_strided_slice %182 {offsets = [0, 0], sizes = [64, 16], strides = [1, 1]} : vector<128x16xbf16> to vector<64x16xbf16>
    %198 = vector.extract_strided_slice %186 {offsets = [0, 0], sizes = [64, 16], strides = [1, 1]} : vector<128x16xbf16> to vector<64x16xbf16>
    %199 = vector.extract_strided_slice %190 {offsets = [0, 0], sizes = [64, 16], strides = [1, 1]} : vector<128x16xbf16> to vector<64x16xbf16>
    %200 = vector.extract_strided_slice %194 {offsets = [0, 0], sizes = [64, 16], strides = [1, 1]} : vector<128x16xbf16> to vector<64x16xbf16>
    %cst_98 = arith.constant dense<0.000000e+00> : vector<64x64xf32>
    %201 = tpu.matmul %195, %196, %cst_98 {dimension_numbers = #tpu.dot_dimension_numbers<[1], [1], [0], [0], [0, 0, 1, 0], [], []>} : vector<64x16xbf16>, vector<64x16xbf16>, vector<64x64xf32> -> vector<64x64xf32>
    %cst_99 = arith.constant dense<0xFF800000> : vector<64xf32>
    %202 = vector.multi_reduction <maximumf>, %201, %cst_99 [1] : vector<64x64xf32> to vector<64xf32>
    %203 = vector.shape_cast %202 : vector<64xf32> to vector<64x1xf32>
    %204 = vector.broadcast %203 : vector<64x1xf32> to vector<64x64xf32>
    %205 = arith.subf %201, %204 : vector<64x64xf32>
    %206 = math.exp %205 : vector<64x64xf32>
    %cst_100 = arith.constant dense<0.000000e+00> : vector<64xf32>
    %207 = vector.multi_reduction <add>, %206, %cst_100 [1] : vector<64x64xf32> to vector<64xf32>
    %208 = vector.shape_cast %207 : vector<64xf32> to vector<64x1xf32>
    %209 = tpu.reciprocal %208 {approx = true} : vector<64x1xf32> -> vector<64x1xf32>
    %210 = vector.broadcast %209 : vector<64x1xf32> to vector<64x64xf32>
    %211 = arith.mulf %206, %210 : vector<64x64xf32>
    %212 = arith.truncf %211 : vector<64x64xf32> to vector<64x64xbf16>
    %cst_101 = arith.constant dense<0.000000e+00> : vector<64x16xf32>
    %213 = tpu.matmul %212, %197, %cst_101 {dimension_numbers = #tpu.dot_dimension_numbers<[1], [0], [0], [1], [0, 0, 1, 1], [], []>} : vector<64x64xbf16>, vector<64x16xbf16>, vector<64x16xf32> -> vector<64x16xf32>
    %cst_102 = arith.constant dense<0.000000e+00> : vector<16x16xf32>
    %214 = tpu.matmul %198, %199, %cst_102 {dimension_numbers = #tpu.dot_dimension_numbers<[0], [0], [1], [1], [0, 1, 1, 1], [], []>} : vector<64x16xbf16>, vector<64x16xbf16>, vector<16x16xf32> -> vector<16x16xf32>
    %cst_103 = arith.constant dense<0xFF800000> : vector<16xf32>
    %215 = vector.multi_reduction <maximumf>, %214, %cst_103 [1] : vector<16x16xf32> to vector<16xf32>
    %216 = vector.shape_cast %215 : vector<16xf32> to vector<16x1xf32>
    %217 = vector.broadcast %216 : vector<16x1xf32> to vector<16x16xf32>
    %218 = arith.subf %214, %217 : vector<16x16xf32>
    %219 = math.exp %218 : vector<16x16xf32>
    %cst_104 = arith.constant dense<0.000000e+00> : vector<16xf32>
    %220 = vector.multi_reduction <add>, %219, %cst_104 [1] : vector<16x16xf32> to vector<16xf32>
    %221 = vector.shape_cast %220 : vector<16xf32> to vector<16x1xf32>
    %222 = tpu.reciprocal %221 {approx = true} : vector<16x1xf32> -> vector<16x1xf32>
    %223 = vector.broadcast %222 : vector<16x1xf32> to vector<16x16xf32>
    %224 = arith.mulf %219, %223 : vector<16x16xf32>
    %225 = arith.truncf %224 : vector<16x16xf32> to vector<16x16xbf16>
    %cst_105 = arith.constant dense<0.000000e+00> : vector<64x16xf32>
    %226 = tpu.matmul %200, %225, %cst_105 {dimension_numbers = #tpu.dot_dimension_numbers<[1], [1], [0], [0], [0, 0, 1, 0], [], []>} : vector<64x16xbf16>, vector<16x16xbf16>, vector<64x16xf32> -> vector<64x16xf32>
    %227 = arith.addf %213, %226 : vector<64x16xf32>
    %228 = vector.extract_strided_slice %174 {offsets = [64, 0], sizes = [64, 16], strides = [1, 1]} : vector<128x16xbf16> to vector<64x16xbf16>
    %229 = vector.extract_strided_slice %178 {offsets = [64, 0], sizes = [64, 16], strides = [1, 1]} : vector<128x16xbf16> to vector<64x16xbf16>
    %230 = vector.extract_strided_slice %182 {offsets = [64, 0], sizes = [64, 16], strides = [1, 1]} : vector<128x16xbf16> to vector<64x16xbf16>
    %231 = vector.extract_strided_slice %186 {offsets = [64, 0], sizes = [64, 16], strides = [1, 1]} : vector<128x16xbf16> to vector<64x16xbf16>
    %232 = vector.extract_strided_slice %190 {offsets = [64, 0], sizes = [64, 16], strides = [1, 1]} : vector<128x16xbf16> to vector<64x16xbf16>
    %233 = vector.extract_strided_slice %194 {offsets = [64, 0], sizes = [64, 16], strides = [1, 1]} : vector<128x16xbf16> to vector<64x16xbf16>
    %cst_106 = arith.constant dense<0.000000e+00> : vector<64x64xf32>
    %234 = tpu.matmul %228, %229, %cst_106 {dimension_numbers = #tpu.dot_dimension_numbers<[1], [1], [0], [0], [0, 0, 1, 0], [], []>} : vector<64x16xbf16>, vector<64x16xbf16>, vector<64x64xf32> -> vector<64x64xf32>
    %cst_107 = arith.constant dense<0xFF800000> : vector<64xf32>
    %235 = vector.multi_reduction <maximumf>, %234, %cst_107 [1] : vector<64x64xf32> to vector<64xf32>
    %236 = vector.shape_cast %235 : vector<64xf32> to vector<64x1xf32>
    %237 = vector.broadcast %236 : vector<64x1xf32> to vector<64x64xf32>
    %238 = arith.subf %234, %237 : vector<64x64xf32>
    %239 = math.exp %238 : vector<64x64xf32>
    %cst_108 = arith.constant dense<0.000000e+00> : vector<64xf32>
    %240 = vector.multi_reduction <add>, %239, %cst_108 [1] : vector<64x64xf32> to vector<64xf32>
    %241 = vector.shape_cast %240 : vector<64xf32> to vector<64x1xf32>
    %242 = tpu.reciprocal %241 {approx = true} : vector<64x1xf32> -> vector<64x1xf32>
    %243 = vector.broadcast %242 : vector<64x1xf32> to vector<64x64xf32>
    %244 = arith.mulf %239, %243 : vector<64x64xf32>
    %245 = arith.truncf %244 : vector<64x64xf32> to vector<64x64xbf16>
    %cst_109 = arith.constant dense<0.000000e+00> : vector<64x16xf32>
    %246 = tpu.matmul %245, %230, %cst_109 {dimension_numbers = #tpu.dot_dimension_numbers<[1], [0], [0], [1], [0, 0, 1, 1], [], []>} : vector<64x64xbf16>, vector<64x16xbf16>, vector<64x16xf32> -> vector<64x16xf32>
    %cst_110 = arith.constant dense<0.000000e+00> : vector<16x16xf32>
    %247 = tpu.matmul %231, %232, %cst_110 {dimension_numbers = #tpu.dot_dimension_numbers<[0], [0], [1], [1], [0, 1, 1, 1], [], []>} : vector<64x16xbf16>, vector<64x16xbf16>, vector<16x16xf32> -> vector<16x16xf32>
    %cst_111 = arith.constant dense<0xFF800000> : vector<16xf32>
    %248 = vector.multi_reduction <maximumf>, %247, %cst_111 [1] : vector<16x16xf32> to vector<16xf32>
    %249 = vector.shape_cast %248 : vector<16xf32> to vector<16x1xf32>
    %250 = vector.broadcast %249 : vector<16x1xf32> to vector<16x16xf32>
    %251 = arith.subf %247, %250 : vector<16x16xf32>
    %252 = math.exp %251 : vector<16x16xf32>
    %cst_112 = arith.constant dense<0.000000e+00> : vector<16xf32>
    %253 = vector.multi_reduction <add>, %252, %cst_112 [1] : vector<16x16xf32> to vector<16xf32>
    %254 = vector.shape_cast %253 : vector<16xf32> to vector<16x1xf32>
    %255 = tpu.reciprocal %254 {approx = true} : vector<16x1xf32> -> vector<16x1xf32>
    %256 = vector.broadcast %255 : vector<16x1xf32> to vector<16x16xf32>
    %257 = arith.mulf %252, %256 : vector<16x16xf32>
    %258 = arith.truncf %257 : vector<16x16xf32> to vector<16x16xbf16>
    %cst_113 = arith.constant dense<0.000000e+00> : vector<64x16xf32>
    %259 = tpu.matmul %233, %258, %cst_113 {dimension_numbers = #tpu.dot_dimension_numbers<[1], [1], [0], [0], [0, 0, 1, 0], [], []>} : vector<64x16xbf16>, vector<16x16xbf16>, vector<64x16xf32> -> vector<64x16xf32>
    %260 = arith.addf %246, %259 : vector<64x16xf32>
    %261 = tpu.concatenate %227, %260 in 0 : vector<64x16xf32>, vector<64x16xf32> -> vector<128x16xf32>
    %262 = arith.truncf %261 : vector<128x16xf32> to vector<128x16xbf16>
    %c1_114 = arith.constant 1 : index
    %c0_115 = arith.constant 0 : index
    %c0_116 = arith.constant 0 : index
    %263 = vector.load %arg12[%c1_114, %c0_115, %c0_116] : memref<4x16x32xbf16, #tpu.memory_space<vmem>>, vector<1x16x32xbf16>
    %264 = vector.shape_cast %263 : vector<1x16x32xbf16> to vector<16x32xbf16>
    %cst_117 = arith.constant dense<0.000000e+00> : vector<128x32xf32>
    %265 = tpu.matmul %262, %264, %cst_117 {dimension_numbers = #tpu.dot_dimension_numbers<[1], [0], [0], [1], [0, 0, 1, 1], [], []>} : vector<128x16xbf16>, vector<16x32xbf16>, vector<128x32xf32> -> vector<128x32xf32>
    %266 = arith.addf %170, %265 : vector<128x32xf32>
    %c2 = arith.constant 2 : index
    %c0_118 = arith.constant 0 : index
    %c0_119 = arith.constant 0 : index
    %267 = vector.load %arg6[%c2, %c0_118, %c0_119] : memref<4x32x16xbf16, #tpu.memory_space<vmem>>, vector<1x32x16xbf16>
    %268 = vector.shape_cast %267 : vector<1x32x16xbf16> to vector<32x16xbf16>
    %cst_120 = arith.constant dense<0.000000e+00> : vector<128x16xf32>
    %269 = tpu.matmul %72, %268, %cst_120 {dimension_numbers = #tpu.dot_dimension_numbers<[1], [0], [0], [1], [0, 0, 1, 1], [], []>} : vector<128x32xbf16>, vector<32x16xbf16>, vector<128x16xf32> -> vector<128x16xf32>
    %270 = arith.truncf %269 : vector<128x16xf32> to vector<128x16xbf16>
    %c2_121 = arith.constant 2 : index
    %c0_122 = arith.constant 0 : index
    %c0_123 = arith.constant 0 : index
    %271 = vector.load %arg7[%c2_121, %c0_122, %c0_123] : memref<4x32x16xbf16, #tpu.memory_space<vmem>>, vector<1x32x16xbf16>
    %272 = vector.shape_cast %271 : vector<1x32x16xbf16> to vector<32x16xbf16>
    %cst_124 = arith.constant dense<0.000000e+00> : vector<128x16xf32>
    %273 = tpu.matmul %72, %272, %cst_124 {dimension_numbers = #tpu.dot_dimension_numbers<[1], [0], [0], [1], [0, 0, 1, 1], [], []>} : vector<128x32xbf16>, vector<32x16xbf16>, vector<128x16xf32> -> vector<128x16xf32>
    %274 = arith.truncf %273 : vector<128x16xf32> to vector<128x16xbf16>
    %c2_125 = arith.constant 2 : index
    %c0_126 = arith.constant 0 : index
    %c0_127 = arith.constant 0 : index
    %275 = vector.load %arg8[%c2_125, %c0_126, %c0_127] : memref<4x32x16xbf16, #tpu.memory_space<vmem>>, vector<1x32x16xbf16>
    %276 = vector.shape_cast %275 : vector<1x32x16xbf16> to vector<32x16xbf16>
    %cst_128 = arith.constant dense<0.000000e+00> : vector<128x16xf32>
    %277 = tpu.matmul %72, %276, %cst_128 {dimension_numbers = #tpu.dot_dimension_numbers<[1], [0], [0], [1], [0, 0, 1, 1], [], []>} : vector<128x32xbf16>, vector<32x16xbf16>, vector<128x16xf32> -> vector<128x16xf32>
    %278 = arith.truncf %277 : vector<128x16xf32> to vector<128x16xbf16>
    %c2_129 = arith.constant 2 : index
    %c0_130 = arith.constant 0 : index
    %c0_131 = arith.constant 0 : index
    %279 = vector.load %arg9[%c2_129, %c0_130, %c0_131] : memref<4x32x16xbf16, #tpu.memory_space<vmem>>, vector<1x32x16xbf16>
    %280 = vector.shape_cast %279 : vector<1x32x16xbf16> to vector<32x16xbf16>
    %cst_132 = arith.constant dense<0.000000e+00> : vector<128x16xf32>
    %281 = tpu.matmul %73, %280, %cst_132 {dimension_numbers = #tpu.dot_dimension_numbers<[1], [0], [0], [1], [0, 0, 1, 1], [], []>} : vector<128x32xbf16>, vector<32x16xbf16>, vector<128x16xf32> -> vector<128x16xf32>
    %282 = arith.truncf %281 : vector<128x16xf32> to vector<128x16xbf16>
    %c2_133 = arith.constant 2 : index
    %c0_134 = arith.constant 0 : index
    %c0_135 = arith.constant 0 : index
    %283 = vector.load %arg10[%c2_133, %c0_134, %c0_135] : memref<4x32x16xbf16, #tpu.memory_space<vmem>>, vector<1x32x16xbf16>
    %284 = vector.shape_cast %283 : vector<1x32x16xbf16> to vector<32x16xbf16>
    %cst_136 = arith.constant dense<0.000000e+00> : vector<128x16xf32>
    %285 = tpu.matmul %73, %284, %cst_136 {dimension_numbers = #tpu.dot_dimension_numbers<[1], [0], [0], [1], [0, 0, 1, 1], [], []>} : vector<128x32xbf16>, vector<32x16xbf16>, vector<128x16xf32> -> vector<128x16xf32>
    %286 = arith.truncf %285 : vector<128x16xf32> to vector<128x16xbf16>
    %c2_137 = arith.constant 2 : index
    %c0_138 = arith.constant 0 : index
    %c0_139 = arith.constant 0 : index
    %287 = vector.load %arg11[%c2_137, %c0_138, %c0_139] : memref<4x32x16xbf16, #tpu.memory_space<vmem>>, vector<1x32x16xbf16>
    %288 = vector.shape_cast %287 : vector<1x32x16xbf16> to vector<32x16xbf16>
    %cst_140 = arith.constant dense<0.000000e+00> : vector<128x16xf32>
    %289 = tpu.matmul %73, %288, %cst_140 {dimension_numbers = #tpu.dot_dimension_numbers<[1], [0], [0], [1], [0, 0, 1, 1], [], []>} : vector<128x32xbf16>, vector<32x16xbf16>, vector<128x16xf32> -> vector<128x16xf32>
    %290 = arith.truncf %289 : vector<128x16xf32> to vector<128x16xbf16>
    %291 = vector.extract_strided_slice %270 {offsets = [0, 0], sizes = [64, 16], strides = [1, 1]} : vector<128x16xbf16> to vector<64x16xbf16>
    %292 = vector.extract_strided_slice %274 {offsets = [0, 0], sizes = [64, 16], strides = [1, 1]} : vector<128x16xbf16> to vector<64x16xbf16>
    %293 = vector.extract_strided_slice %278 {offsets = [0, 0], sizes = [64, 16], strides = [1, 1]} : vector<128x16xbf16> to vector<64x16xbf16>
    %294 = vector.extract_strided_slice %282 {offsets = [0, 0], sizes = [64, 16], strides = [1, 1]} : vector<128x16xbf16> to vector<64x16xbf16>
    %295 = vector.extract_strided_slice %286 {offsets = [0, 0], sizes = [64, 16], strides = [1, 1]} : vector<128x16xbf16> to vector<64x16xbf16>
    %296 = vector.extract_strided_slice %290 {offsets = [0, 0], sizes = [64, 16], strides = [1, 1]} : vector<128x16xbf16> to vector<64x16xbf16>
    %cst_141 = arith.constant dense<0.000000e+00> : vector<64x64xf32>
    %297 = tpu.matmul %291, %292, %cst_141 {dimension_numbers = #tpu.dot_dimension_numbers<[1], [1], [0], [0], [0, 0, 1, 0], [], []>} : vector<64x16xbf16>, vector<64x16xbf16>, vector<64x64xf32> -> vector<64x64xf32>
    %cst_142 = arith.constant dense<0xFF800000> : vector<64xf32>
    %298 = vector.multi_reduction <maximumf>, %297, %cst_142 [1] : vector<64x64xf32> to vector<64xf32>
    %299 = vector.shape_cast %298 : vector<64xf32> to vector<64x1xf32>
    %300 = vector.broadcast %299 : vector<64x1xf32> to vector<64x64xf32>
    %301 = arith.subf %297, %300 : vector<64x64xf32>
    %302 = math.exp %301 : vector<64x64xf32>
    %cst_143 = arith.constant dense<0.000000e+00> : vector<64xf32>
    %303 = vector.multi_reduction <add>, %302, %cst_143 [1] : vector<64x64xf32> to vector<64xf32>
    %304 = vector.shape_cast %303 : vector<64xf32> to vector<64x1xf32>
    %305 = tpu.reciprocal %304 {approx = true} : vector<64x1xf32> -> vector<64x1xf32>
    %306 = vector.broadcast %305 : vector<64x1xf32> to vector<64x64xf32>
    %307 = arith.mulf %302, %306 : vector<64x64xf32>
    %308 = arith.truncf %307 : vector<64x64xf32> to vector<64x64xbf16>
    %cst_144 = arith.constant dense<0.000000e+00> : vector<64x16xf32>
    %309 = tpu.matmul %308, %293, %cst_144 {dimension_numbers = #tpu.dot_dimension_numbers<[1], [0], [0], [1], [0, 0, 1, 1], [], []>} : vector<64x64xbf16>, vector<64x16xbf16>, vector<64x16xf32> -> vector<64x16xf32>
    %cst_145 = arith.constant dense<0.000000e+00> : vector<16x16xf32>
    %310 = tpu.matmul %294, %295, %cst_145 {dimension_numbers = #tpu.dot_dimension_numbers<[0], [0], [1], [1], [0, 1, 1, 1], [], []>} : vector<64x16xbf16>, vector<64x16xbf16>, vector<16x16xf32> -> vector<16x16xf32>
    %cst_146 = arith.constant dense<0xFF800000> : vector<16xf32>
    %311 = vector.multi_reduction <maximumf>, %310, %cst_146 [1] : vector<16x16xf32> to vector<16xf32>
    %312 = vector.shape_cast %311 : vector<16xf32> to vector<16x1xf32>
    %313 = vector.broadcast %312 : vector<16x1xf32> to vector<16x16xf32>
    %314 = arith.subf %310, %313 : vector<16x16xf32>
    %315 = math.exp %314 : vector<16x16xf32>
    %cst_147 = arith.constant dense<0.000000e+00> : vector<16xf32>
    %316 = vector.multi_reduction <add>, %315, %cst_147 [1] : vector<16x16xf32> to vector<16xf32>
    %317 = vector.shape_cast %316 : vector<16xf32> to vector<16x1xf32>
    %318 = tpu.reciprocal %317 {approx = true} : vector<16x1xf32> -> vector<16x1xf32>
    %319 = vector.broadcast %318 : vector<16x1xf32> to vector<16x16xf32>
    %320 = arith.mulf %315, %319 : vector<16x16xf32>
    %321 = arith.truncf %320 : vector<16x16xf32> to vector<16x16xbf16>
    %cst_148 = arith.constant dense<0.000000e+00> : vector<64x16xf32>
    %322 = tpu.matmul %296, %321, %cst_148 {dimension_numbers = #tpu.dot_dimension_numbers<[1], [1], [0], [0], [0, 0, 1, 0], [], []>} : vector<64x16xbf16>, vector<16x16xbf16>, vector<64x16xf32> -> vector<64x16xf32>
    %323 = arith.addf %309, %322 : vector<64x16xf32>
    %324 = vector.extract_strided_slice %270 {offsets = [64, 0], sizes = [64, 16], strides = [1, 1]} : vector<128x16xbf16> to vector<64x16xbf16>
    %325 = vector.extract_strided_slice %274 {offsets = [64, 0], sizes = [64, 16], strides = [1, 1]} : vector<128x16xbf16> to vector<64x16xbf16>
    %326 = vector.extract_strided_slice %278 {offsets = [64, 0], sizes = [64, 16], strides = [1, 1]} : vector<128x16xbf16> to vector<64x16xbf16>
    %327 = vector.extract_strided_slice %282 {offsets = [64, 0], sizes = [64, 16], strides = [1, 1]} : vector<128x16xbf16> to vector<64x16xbf16>
    %328 = vector.extract_strided_slice %286 {offsets = [64, 0], sizes = [64, 16], strides = [1, 1]} : vector<128x16xbf16> to vector<64x16xbf16>
    %329 = vector.extract_strided_slice %290 {offsets = [64, 0], sizes = [64, 16], strides = [1, 1]} : vector<128x16xbf16> to vector<64x16xbf16>
    %cst_149 = arith.constant dense<0.000000e+00> : vector<64x64xf32>
    %330 = tpu.matmul %324, %325, %cst_149 {dimension_numbers = #tpu.dot_dimension_numbers<[1], [1], [0], [0], [0, 0, 1, 0], [], []>} : vector<64x16xbf16>, vector<64x16xbf16>, vector<64x64xf32> -> vector<64x64xf32>
    %cst_150 = arith.constant dense<0xFF800000> : vector<64xf32>
    %331 = vector.multi_reduction <maximumf>, %330, %cst_150 [1] : vector<64x64xf32> to vector<64xf32>
    %332 = vector.shape_cast %331 : vector<64xf32> to vector<64x1xf32>
    %333 = vector.broadcast %332 : vector<64x1xf32> to vector<64x64xf32>
    %334 = arith.subf %330, %333 : vector<64x64xf32>
    %335 = math.exp %334 : vector<64x64xf32>
    %cst_151 = arith.constant dense<0.000000e+00> : vector<64xf32>
    %336 = vector.multi_reduction <add>, %335, %cst_151 [1] : vector<64x64xf32> to vector<64xf32>
    %337 = vector.shape_cast %336 : vector<64xf32> to vector<64x1xf32>
    %338 = tpu.reciprocal %337 {approx = true} : vector<64x1xf32> -> vector<64x1xf32>
    %339 = vector.broadcast %338 : vector<64x1xf32> to vector<64x64xf32>
    %340 = arith.mulf %335, %339 : vector<64x64xf32>
    %341 = arith.truncf %340 : vector<64x64xf32> to vector<64x64xbf16>
    %cst_152 = arith.constant dense<0.000000e+00> : vector<64x16xf32>
    %342 = tpu.matmul %341, %326, %cst_152 {dimension_numbers = #tpu.dot_dimension_numbers<[1], [0], [0], [1], [0, 0, 1, 1], [], []>} : vector<64x64xbf16>, vector<64x16xbf16>, vector<64x16xf32> -> vector<64x16xf32>
    %cst_153 = arith.constant dense<0.000000e+00> : vector<16x16xf32>
    %343 = tpu.matmul %327, %328, %cst_153 {dimension_numbers = #tpu.dot_dimension_numbers<[0], [0], [1], [1], [0, 1, 1, 1], [], []>} : vector<64x16xbf16>, vector<64x16xbf16>, vector<16x16xf32> -> vector<16x16xf32>
    %cst_154 = arith.constant dense<0xFF800000> : vector<16xf32>
    %344 = vector.multi_reduction <maximumf>, %343, %cst_154 [1] : vector<16x16xf32> to vector<16xf32>
    %345 = vector.shape_cast %344 : vector<16xf32> to vector<16x1xf32>
    %346 = vector.broadcast %345 : vector<16x1xf32> to vector<16x16xf32>
    %347 = arith.subf %343, %346 : vector<16x16xf32>
    %348 = math.exp %347 : vector<16x16xf32>
    %cst_155 = arith.constant dense<0.000000e+00> : vector<16xf32>
    %349 = vector.multi_reduction <add>, %348, %cst_155 [1] : vector<16x16xf32> to vector<16xf32>
    %350 = vector.shape_cast %349 : vector<16xf32> to vector<16x1xf32>
    %351 = tpu.reciprocal %350 {approx = true} : vector<16x1xf32> -> vector<16x1xf32>
    %352 = vector.broadcast %351 : vector<16x1xf32> to vector<16x16xf32>
    %353 = arith.mulf %348, %352 : vector<16x16xf32>
    %354 = arith.truncf %353 : vector<16x16xf32> to vector<16x16xbf16>
    %cst_156 = arith.constant dense<0.000000e+00> : vector<64x16xf32>
    %355 = tpu.matmul %329, %354, %cst_156 {dimension_numbers = #tpu.dot_dimension_numbers<[1], [1], [0], [0], [0, 0, 1, 0], [], []>} : vector<64x16xbf16>, vector<16x16xbf16>, vector<64x16xf32> -> vector<64x16xf32>
    %356 = arith.addf %342, %355 : vector<64x16xf32>
    %357 = tpu.concatenate %323, %356 in 0 : vector<64x16xf32>, vector<64x16xf32> -> vector<128x16xf32>
    %358 = arith.truncf %357 : vector<128x16xf32> to vector<128x16xbf16>
    %c2_157 = arith.constant 2 : index
    %c0_158 = arith.constant 0 : index
    %c0_159 = arith.constant 0 : index
    %359 = vector.load %arg12[%c2_157, %c0_158, %c0_159] : memref<4x16x32xbf16, #tpu.memory_space<vmem>>, vector<1x16x32xbf16>
    %360 = vector.shape_cast %359 : vector<1x16x32xbf16> to vector<16x32xbf16>
    %cst_160 = arith.constant dense<0.000000e+00> : vector<128x32xf32>
    %361 = tpu.matmul %358, %360, %cst_160 {dimension_numbers = #tpu.dot_dimension_numbers<[1], [0], [0], [1], [0, 0, 1, 1], [], []>} : vector<128x16xbf16>, vector<16x32xbf16>, vector<128x32xf32> -> vector<128x32xf32>
    %362 = arith.addf %266, %361 : vector<128x32xf32>
    %c3 = arith.constant 3 : index
    %c0_161 = arith.constant 0 : index
    %c0_162 = arith.constant 0 : index
    %363 = vector.load %arg6[%c3, %c0_161, %c0_162] : memref<4x32x16xbf16, #tpu.memory_space<vmem>>, vector<1x32x16xbf16>
    %364 = vector.shape_cast %363 : vector<1x32x16xbf16> to vector<32x16xbf16>
    %cst_163 = arith.constant dense<0.000000e+00> : vector<128x16xf32>
    %365 = tpu.matmul %72, %364, %cst_163 {dimension_numbers = #tpu.dot_dimension_numbers<[1], [0], [0], [1], [0, 0, 1, 1], [], []>} : vector<128x32xbf16>, vector<32x16xbf16>, vector<128x16xf32> -> vector<128x16xf32>
    %366 = arith.truncf %365 : vector<128x16xf32> to vector<128x16xbf16>
    %c3_164 = arith.constant 3 : index
    %c0_165 = arith.constant 0 : index
    %c0_166 = arith.constant 0 : index
    %367 = vector.load %arg7[%c3_164, %c0_165, %c0_166] : memref<4x32x16xbf16, #tpu.memory_space<vmem>>, vector<1x32x16xbf16>
    %368 = vector.shape_cast %367 : vector<1x32x16xbf16> to vector<32x16xbf16>
    %cst_167 = arith.constant dense<0.000000e+00> : vector<128x16xf32>
    %369 = tpu.matmul %72, %368, %cst_167 {dimension_numbers = #tpu.dot_dimension_numbers<[1], [0], [0], [1], [0, 0, 1, 1], [], []>} : vector<128x32xbf16>, vector<32x16xbf16>, vector<128x16xf32> -> vector<128x16xf32>
    %370 = arith.truncf %369 : vector<128x16xf32> to vector<128x16xbf16>
    %c3_168 = arith.constant 3 : index
    %c0_169 = arith.constant 0 : index
    %c0_170 = arith.constant 0 : index
    %371 = vector.load %arg8[%c3_168, %c0_169, %c0_170] : memref<4x32x16xbf16, #tpu.memory_space<vmem>>, vector<1x32x16xbf16>
    %372 = vector.shape_cast %371 : vector<1x32x16xbf16> to vector<32x16xbf16>
    %cst_171 = arith.constant dense<0.000000e+00> : vector<128x16xf32>
    %373 = tpu.matmul %72, %372, %cst_171 {dimension_numbers = #tpu.dot_dimension_numbers<[1], [0], [0], [1], [0, 0, 1, 1], [], []>} : vector<128x32xbf16>, vector<32x16xbf16>, vector<128x16xf32> -> vector<128x16xf32>
    %374 = arith.truncf %373 : vector<128x16xf32> to vector<128x16xbf16>
    %c3_172 = arith.constant 3 : index
    %c0_173 = arith.constant 0 : index
    %c0_174 = arith.constant 0 : index
    %375 = vector.load %arg9[%c3_172, %c0_173, %c0_174] : memref<4x32x16xbf16, #tpu.memory_space<vmem>>, vector<1x32x16xbf16>
    %376 = vector.shape_cast %375 : vector<1x32x16xbf16> to vector<32x16xbf16>
    %cst_175 = arith.constant dense<0.000000e+00> : vector<128x16xf32>
    %377 = tpu.matmul %73, %376, %cst_175 {dimension_numbers = #tpu.dot_dimension_numbers<[1], [0], [0], [1], [0, 0, 1, 1], [], []>} : vector<128x32xbf16>, vector<32x16xbf16>, vector<128x16xf32> -> vector<128x16xf32>
    %378 = arith.truncf %377 : vector<128x16xf32> to vector<128x16xbf16>
    %c3_176 = arith.constant 3 : index
    %c0_177 = arith.constant 0 : index
    %c0_178 = arith.constant 0 : index
    %379 = vector.load %arg10[%c3_176, %c0_177, %c0_178] : memref<4x32x16xbf16, #tpu.memory_space<vmem>>, vector<1x32x16xbf16>
    %380 = vector.shape_cast %379 : vector<1x32x16xbf16> to vector<32x16xbf16>
    %cst_179 = arith.constant dense<0.000000e+00> : vector<128x16xf32>
    %381 = tpu.matmul %73, %380, %cst_179 {dimension_numbers = #tpu.dot_dimension_numbers<[1], [0], [0], [1], [0, 0, 1, 1], [], []>} : vector<128x32xbf16>, vector<32x16xbf16>, vector<128x16xf32> -> vector<128x16xf32>
    %382 = arith.truncf %381 : vector<128x16xf32> to vector<128x16xbf16>
    %c3_180 = arith.constant 3 : index
    %c0_181 = arith.constant 0 : index
    %c0_182 = arith.constant 0 : index
    %383 = vector.load %arg11[%c3_180, %c0_181, %c0_182] : memref<4x32x16xbf16, #tpu.memory_space<vmem>>, vector<1x32x16xbf16>
    %384 = vector.shape_cast %383 : vector<1x32x16xbf16> to vector<32x16xbf16>
    %cst_183 = arith.constant dense<0.000000e+00> : vector<128x16xf32>
    %385 = tpu.matmul %73, %384, %cst_183 {dimension_numbers = #tpu.dot_dimension_numbers<[1], [0], [0], [1], [0, 0, 1, 1], [], []>} : vector<128x32xbf16>, vector<32x16xbf16>, vector<128x16xf32> -> vector<128x16xf32>
    %386 = arith.truncf %385 : vector<128x16xf32> to vector<128x16xbf16>
    %387 = vector.extract_strided_slice %366 {offsets = [0, 0], sizes = [64, 16], strides = [1, 1]} : vector<128x16xbf16> to vector<64x16xbf16>
    %388 = vector.extract_strided_slice %370 {offsets = [0, 0], sizes = [64, 16], strides = [1, 1]} : vector<128x16xbf16> to vector<64x16xbf16>
    %389 = vector.extract_strided_slice %374 {offsets = [0, 0], sizes = [64, 16], strides = [1, 1]} : vector<128x16xbf16> to vector<64x16xbf16>
    %390 = vector.extract_strided_slice %378 {offsets = [0, 0], sizes = [64, 16], strides = [1, 1]} : vector<128x16xbf16> to vector<64x16xbf16>
    %391 = vector.extract_strided_slice %382 {offsets = [0, 0], sizes = [64, 16], strides = [1, 1]} : vector<128x16xbf16> to vector<64x16xbf16>
    %392 = vector.extract_strided_slice %386 {offsets = [0, 0], sizes = [64, 16], strides = [1, 1]} : vector<128x16xbf16> to vector<64x16xbf16>
    %cst_184 = arith.constant dense<0.000000e+00> : vector<64x64xf32>
    %393 = tpu.matmul %387, %388, %cst_184 {dimension_numbers = #tpu.dot_dimension_numbers<[1], [1], [0], [0], [0, 0, 1, 0], [], []>} : vector<64x16xbf16>, vector<64x16xbf16>, vector<64x64xf32> -> vector<64x64xf32>
    %cst_185 = arith.constant dense<0xFF800000> : vector<64xf32>
    %394 = vector.multi_reduction <maximumf>, %393, %cst_185 [1] : vector<64x64xf32> to vector<64xf32>
    %395 = vector.shape_cast %394 : vector<64xf32> to vector<64x1xf32>
    %396 = vector.broadcast %395 : vector<64x1xf32> to vector<64x64xf32>
    %397 = arith.subf %393, %396 : vector<64x64xf32>
    %398 = math.exp %397 : vector<64x64xf32>
    %cst_186 = arith.constant dense<0.000000e+00> : vector<64xf32>
    %399 = vector.multi_reduction <add>, %398, %cst_186 [1] : vector<64x64xf32> to vector<64xf32>
    %400 = vector.shape_cast %399 : vector<64xf32> to vector<64x1xf32>
    %401 = tpu.reciprocal %400 {approx = true} : vector<64x1xf32> -> vector<64x1xf32>
    %402 = vector.broadcast %401 : vector<64x1xf32> to vector<64x64xf32>
    %403 = arith.mulf %398, %402 : vector<64x64xf32>
    %404 = arith.truncf %403 : vector<64x64xf32> to vector<64x64xbf16>
    %cst_187 = arith.constant dense<0.000000e+00> : vector<64x16xf32>
    %405 = tpu.matmul %404, %389, %cst_187 {dimension_numbers = #tpu.dot_dimension_numbers<[1], [0], [0], [1], [0, 0, 1, 1], [], []>} : vector<64x64xbf16>, vector<64x16xbf16>, vector<64x16xf32> -> vector<64x16xf32>
    %cst_188 = arith.constant dense<0.000000e+00> : vector<16x16xf32>
    %406 = tpu.matmul %390, %391, %cst_188 {dimension_numbers = #tpu.dot_dimension_numbers<[0], [0], [1], [1], [0, 1, 1, 1], [], []>} : vector<64x16xbf16>, vector<64x16xbf16>, vector<16x16xf32> -> vector<16x16xf32>
    %cst_189 = arith.constant dense<0xFF800000> : vector<16xf32>
    %407 = vector.multi_reduction <maximumf>, %406, %cst_189 [1] : vector<16x16xf32> to vector<16xf32>
    %408 = vector.shape_cast %407 : vector<16xf32> to vector<16x1xf32>
    %409 = vector.broadcast %408 : vector<16x1xf32> to vector<16x16xf32>
    %410 = arith.subf %406, %409 : vector<16x16xf32>
    %411 = math.exp %410 : vector<16x16xf32>
    %cst_190 = arith.constant dense<0.000000e+00> : vector<16xf32>
    %412 = vector.multi_reduction <add>, %411, %cst_190 [1] : vector<16x16xf32> to vector<16xf32>
    %413 = vector.shape_cast %412 : vector<16xf32> to vector<16x1xf32>
    %414 = tpu.reciprocal %413 {approx = true} : vector<16x1xf32> -> vector<16x1xf32>
    %415 = vector.broadcast %414 : vector<16x1xf32> to vector<16x16xf32>
    %416 = arith.mulf %411, %415 : vector<16x16xf32>
    %417 = arith.truncf %416 : vector<16x16xf32> to vector<16x16xbf16>
    %cst_191 = arith.constant dense<0.000000e+00> : vector<64x16xf32>
    %418 = tpu.matmul %392, %417, %cst_191 {dimension_numbers = #tpu.dot_dimension_numbers<[1], [1], [0], [0], [0, 0, 1, 0], [], []>} : vector<64x16xbf16>, vector<16x16xbf16>, vector<64x16xf32> -> vector<64x16xf32>
    %419 = arith.addf %405, %418 : vector<64x16xf32>
    %420 = vector.extract_strided_slice %366 {offsets = [64, 0], sizes = [64, 16], strides = [1, 1]} : vector<128x16xbf16> to vector<64x16xbf16>
    %421 = vector.extract_strided_slice %370 {offsets = [64, 0], sizes = [64, 16], strides = [1, 1]} : vector<128x16xbf16> to vector<64x16xbf16>
    %422 = vector.extract_strided_slice %374 {offsets = [64, 0], sizes = [64, 16], strides = [1, 1]} : vector<128x16xbf16> to vector<64x16xbf16>
    %423 = vector.extract_strided_slice %378 {offsets = [64, 0], sizes = [64, 16], strides = [1, 1]} : vector<128x16xbf16> to vector<64x16xbf16>
    %424 = vector.extract_strided_slice %382 {offsets = [64, 0], sizes = [64, 16], strides = [1, 1]} : vector<128x16xbf16> to vector<64x16xbf16>
    %425 = vector.extract_strided_slice %386 {offsets = [64, 0], sizes = [64, 16], strides = [1, 1]} : vector<128x16xbf16> to vector<64x16xbf16>
    %cst_192 = arith.constant dense<0.000000e+00> : vector<64x64xf32>
    %426 = tpu.matmul %420, %421, %cst_192 {dimension_numbers = #tpu.dot_dimension_numbers<[1], [1], [0], [0], [0, 0, 1, 0], [], []>} : vector<64x16xbf16>, vector<64x16xbf16>, vector<64x64xf32> -> vector<64x64xf32>
    %cst_193 = arith.constant dense<0xFF800000> : vector<64xf32>
    %427 = vector.multi_reduction <maximumf>, %426, %cst_193 [1] : vector<64x64xf32> to vector<64xf32>
    %428 = vector.shape_cast %427 : vector<64xf32> to vector<64x1xf32>
    %429 = vector.broadcast %428 : vector<64x1xf32> to vector<64x64xf32>
    %430 = arith.subf %426, %429 : vector<64x64xf32>
    %431 = math.exp %430 : vector<64x64xf32>
    %cst_194 = arith.constant dense<0.000000e+00> : vector<64xf32>
    %432 = vector.multi_reduction <add>, %431, %cst_194 [1] : vector<64x64xf32> to vector<64xf32>
    %433 = vector.shape_cast %432 : vector<64xf32> to vector<64x1xf32>
    %434 = tpu.reciprocal %433 {approx = true} : vector<64x1xf32> -> vector<64x1xf32>
    %435 = vector.broadcast %434 : vector<64x1xf32> to vector<64x64xf32>
    %436 = arith.mulf %431, %435 : vector<64x64xf32>
    %437 = arith.truncf %436 : vector<64x64xf32> to vector<64x64xbf16>
    %cst_195 = arith.constant dense<0.000000e+00> : vector<64x16xf32>
    %438 = tpu.matmul %437, %422, %cst_195 {dimension_numbers = #tpu.dot_dimension_numbers<[1], [0], [0], [1], [0, 0, 1, 1], [], []>} : vector<64x64xbf16>, vector<64x16xbf16>, vector<64x16xf32> -> vector<64x16xf32>
    %cst_196 = arith.constant dense<0.000000e+00> : vector<16x16xf32>
    %439 = tpu.matmul %423, %424, %cst_196 {dimension_numbers = #tpu.dot_dimension_numbers<[0], [0], [1], [1], [0, 1, 1, 1], [], []>} : vector<64x16xbf16>, vector<64x16xbf16>, vector<16x16xf32> -> vector<16x16xf32>
    %cst_197 = arith.constant dense<0xFF800000> : vector<16xf32>
    %440 = vector.multi_reduction <maximumf>, %439, %cst_197 [1] : vector<16x16xf32> to vector<16xf32>
    %441 = vector.shape_cast %440 : vector<16xf32> to vector<16x1xf32>
    %442 = vector.broadcast %441 : vector<16x1xf32> to vector<16x16xf32>
    %443 = arith.subf %439, %442 : vector<16x16xf32>
    %444 = math.exp %443 : vector<16x16xf32>
    %cst_198 = arith.constant dense<0.000000e+00> : vector<16xf32>
    %445 = vector.multi_reduction <add>, %444, %cst_198 [1] : vector<16x16xf32> to vector<16xf32>
    %446 = vector.shape_cast %445 : vector<16xf32> to vector<16x1xf32>
    %447 = tpu.reciprocal %446 {approx = true} : vector<16x1xf32> -> vector<16x1xf32>
    %448 = vector.broadcast %447 : vector<16x1xf32> to vector<16x16xf32>
    %449 = arith.mulf %444, %448 : vector<16x16xf32>
    %450 = arith.truncf %449 : vector<16x16xf32> to vector<16x16xbf16>
    %cst_199 = arith.constant dense<0.000000e+00> : vector<64x16xf32>
    %451 = tpu.matmul %425, %450, %cst_199 {dimension_numbers = #tpu.dot_dimension_numbers<[1], [1], [0], [0], [0, 0, 1, 0], [], []>} : vector<64x16xbf16>, vector<16x16xbf16>, vector<64x16xf32> -> vector<64x16xf32>
    %452 = arith.addf %438, %451 : vector<64x16xf32>
    %453 = tpu.concatenate %419, %452 in 0 : vector<64x16xf32>, vector<64x16xf32> -> vector<128x16xf32>
    %454 = arith.truncf %453 : vector<128x16xf32> to vector<128x16xbf16>
    %c3_200 = arith.constant 3 : index
    %c0_201 = arith.constant 0 : index
    %c0_202 = arith.constant 0 : index
    %455 = vector.load %arg12[%c3_200, %c0_201, %c0_202] : memref<4x16x32xbf16, #tpu.memory_space<vmem>>, vector<1x16x32xbf16>
    %456 = vector.shape_cast %455 : vector<1x16x32xbf16> to vector<16x32xbf16>
    %cst_203 = arith.constant dense<0.000000e+00> : vector<128x32xf32>
    %457 = tpu.matmul %454, %456, %cst_203 {dimension_numbers = #tpu.dot_dimension_numbers<[1], [0], [0], [1], [0, 0, 1, 1], [], []>} : vector<128x16xbf16>, vector<16x32xbf16>, vector<128x32xf32> -> vector<128x32xf32>
    %458 = arith.addf %362, %457 : vector<128x32xf32>
    %459 = vector.broadcast %7 : vector<1x32xf32> to vector<128x32xf32>
    %460 = arith.addf %458, %459 : vector<128x32xf32>
    %cst_204 = arith.constant dense<0.000000e+00> : vector<128xf32>
    %461 = vector.multi_reduction <add>, %460, %cst_204 [1] : vector<128x32xf32> to vector<128xf32>
    %462 = vector.shape_cast %461 : vector<128xf32> to vector<128x1xf32>
    %cst_205 = arith.constant 3.200000e+01 : f32
    %463 = vector.broadcast %cst_205 : f32 to vector<128x1xf32>
    %464 = arith.divf %462, %463 : vector<128x1xf32>
    %465 = vector.broadcast %464 : vector<128x1xf32> to vector<128x32xf32>
    %466 = arith.subf %460, %465 : vector<128x32xf32>
    %467 = arith.mulf %466, %466 : vector<128x32xf32>
    %cst_206 = arith.constant dense<0.000000e+00> : vector<128xf32>
    %468 = vector.multi_reduction <add>, %467, %cst_206 [1] : vector<128x32xf32> to vector<128xf32>
    %469 = vector.shape_cast %468 : vector<128xf32> to vector<128x1xf32>
    %cst_207 = arith.constant 3.200000e+01 : f32
    %470 = vector.broadcast %cst_207 : f32 to vector<128x1xf32>
    %471 = arith.divf %469, %470 : vector<128x1xf32>
    %cst_208 = arith.constant 9.99999974E-6 : f32
    %472 = vector.broadcast %cst_208 : f32 to vector<128x1xf32>
    %473 = arith.addf %471, %472 : vector<128x1xf32>
    %474 = math.rsqrt %473 : vector<128x1xf32>
    %475 = vector.broadcast %474 : vector<128x1xf32> to vector<128x32xf32>
    %476 = arith.mulf %466, %475 : vector<128x32xf32>
    %477 = vector.broadcast %8 : vector<1x32xf32> to vector<128x32xf32>
    %478 = arith.mulf %476, %477 : vector<128x32xf32>
    %479 = vector.broadcast %9 : vector<1x32xf32> to vector<128x32xf32>
    %480 = arith.addf %478, %479 : vector<128x32xf32>
    %481 = arith.truncf %480 : vector<128x32xf32> to vector<128x32xbf16>
    %c0_209 = arith.constant 0 : index
    %c0_210 = arith.constant 0 : index
    %482 = vector.load %arg13[%c0_209, %c0_210] : memref<32x32xbf16, #tpu.memory_space<vmem>>, vector<32x32xbf16>
    %cst_211 = arith.constant dense<0.000000e+00> : vector<128x32xf32>
    %483 = tpu.matmul %481, %482, %cst_211 {dimension_numbers = #tpu.dot_dimension_numbers<[1], [0], [0], [1], [0, 0, 1, 1], [], []>} : vector<128x32xbf16>, vector<32x32xbf16>, vector<128x32xf32> -> vector<128x32xf32>
    %484 = vector.broadcast %10 : vector<1x32xf32> to vector<128x32xf32>
    %485 = arith.addf %483, %484 : vector<128x32xf32>
    %cst_212 = arith.constant 5.000000e-01 : f32
    %486 = vector.broadcast %cst_212 : f32 to vector<128x32xf32>
    %487 = arith.mulf %486, %485 : vector<128x32xf32>
    %cst_213 = arith.constant 0.707106769 : f32
    %488 = vector.broadcast %cst_213 : f32 to vector<128x32xf32>
    %489 = arith.mulf %485, %488 : vector<128x32xf32>
    %490 = math.erf %489 : vector<128x32xf32>
    %cst_214 = arith.constant 1.000000e+00 : f32
    %491 = vector.broadcast %cst_214 : f32 to vector<128x32xf32>
    %492 = arith.addf %491, %490 : vector<128x32xf32>
    %493 = arith.mulf %487, %492 : vector<128x32xf32>
    %494 = arith.truncf %493 : vector<128x32xf32> to vector<128x32xbf16>
    %c0_215 = arith.constant 0 : index
    %c0_216 = arith.constant 0 : index
    %495 = vector.load %arg14[%c0_215, %c0_216] : memref<32x32xbf16, #tpu.memory_space<vmem>>, vector<32x32xbf16>
    %cst_217 = arith.constant dense<0.000000e+00> : vector<128x32xf32>
    %496 = tpu.matmul %494, %495, %cst_217 {dimension_numbers = #tpu.dot_dimension_numbers<[1], [0], [0], [1], [0, 0, 1, 1], [], []>} : vector<128x32xbf16>, vector<32x32xbf16>, vector<128x32xf32> -> vector<128x32xf32>
    %497 = vector.broadcast %11 : vector<1x32xf32> to vector<128x32xf32>
    %498 = arith.addf %496, %497 : vector<128x32xf32>
    %499 = arith.addf %498, %480 : vector<128x32xf32>
    %500 = vector.shape_cast %499 : vector<128x32xf32> to vector<2x64x32xf32>
    %c0_218 = arith.constant 0 : index
    %c0_219 = arith.constant 0 : index
    %c0_220 = arith.constant 0 : index
    %501 = vector.load %arg15[%c0_218, %c0_219, %c0_220] : memref<2x64x32xf32, #tpu.memory_space<vmem>>, vector<2x64x32xf32>
    tpu.vector_store %arg15[%c0_218, %c0_219, %c0_220], %500 {strides = array<i32>} : memref<2x64x32xf32, #tpu.memory_space<vmem>>, vector<2x64x32xf32>,
    return
  }
  func.func @transform_0(%arg0: i32) -> (i32, i32, i32) {
    %c0_i32 = arith.constant 0 : i32
    %c0_i32_0 = arith.constant 0 : i32
    %c0_i32_1 = arith.constant 0 : i32
    return %arg0, %c0_i32, %c0_i32_0 : i32, i32, i32
  }
  func.func @transform_1(%arg0: i32) -> (i32, i32, i32) {
    %c0_i32 = arith.constant 0 : i32
    %c0_i32_0 = arith.constant 0 : i32
    %c0_i32_1 = arith.constant 0 : i32
    return %arg0, %c0_i32, %c0_i32_0 : i32, i32, i32
  }
  func.func @transform_2(%arg0: i32) -> (i32, i32) {
    %c0_i32 = arith.constant 0 : i32
    %c0_i32_0 = arith.constant 0 : i32
    %c0_i32_1 = arith.constant 0 : i32
    return %c0_i32, %c0_i32_0 : i32, i32
  }
  func.func @transform_3(%arg0: i32) -> (i32, i32) {
    %c0_i32 = arith.constant 0 : i32
    %c0_i32_0 = arith.constant 0 : i32
    %c0_i32_1 = arith.constant 0 : i32
    return %c0_i32, %c0_i32_0 : i32, i32
  }
  func.func @transform_4(%arg0: i32) -> (i32, i32) {
    %c0_i32 = arith.constant 0 : i32
    %c0_i32_0 = arith.constant 0 : i32
    %c0_i32_1 = arith.constant 0 : i32
    return %c0_i32, %c0_i32_0 : i32, i32
  }
  func.func @transform_5(%arg0: i32) -> (i32, i32, i32) {
    %c0_i32 = arith.constant 0 : i32
    %c0_i32_0 = arith.constant 0 : i32
    %c0_i32_1 = arith.constant 0 : i32
    %c0_i32_2 = arith.constant 0 : i32
    return %c0_i32, %c0_i32_0, %c0_i32_1 : i32, i32, i32
  }
  func.func @transform_6(%arg0: i32) -> (i32, i32, i32) {
    %c0_i32 = arith.constant 0 : i32
    %c0_i32_0 = arith.constant 0 : i32
    %c0_i32_1 = arith.constant 0 : i32
    %c0_i32_2 = arith.constant 0 : i32
    return %c0_i32, %c0_i32_0, %c0_i32_1 : i32, i32, i32
  }
  func.func @transform_7(%arg0: i32) -> (i32, i32, i32) {
    %c0_i32 = arith.constant 0 : i32
    %c0_i32_0 = arith.constant 0 : i32
    %c0_i32_1 = arith.constant 0 : i32
    %c0_i32_2 = arith.constant 0 : i32
    return %c0_i32, %c0_i32_0, %c0_i32_1 : i32, i32, i32
  }
  func.func @transform_8(%arg0: i32) -> (i32, i32, i32) {
    %c0_i32 = arith.constant 0 : i32
    %c0_i32_0 = arith.constant 0 : i32
    %c0_i32_1 = arith.constant 0 : i32
    %c0_i32_2 = arith.constant 0 : i32
    return %c0_i32, %c0_i32_0, %c0_i32_1 : i32, i32, i32
  }
  func.func @transform_9(%arg0: i32) -> (i32, i32, i32) {
    %c0_i32 = arith.constant 0 : i32
    %c0_i32_0 = arith.constant 0 : i32
    %c0_i32_1 = arith.constant 0 : i32
    %c0_i32_2 = arith.constant 0 : i32
    return %c0_i32, %c0_i32_0, %c0_i32_1 : i32, i32, i32
  }
  func.func @transform_10(%arg0: i32) -> (i32, i32, i32) {
    %c0_i32 = arith.constant 0 : i32
    %c0_i32_0 = arith.constant 0 : i32
    %c0_i32_1 = arith.constant 0 : i32
    %c0_i32_2 = arith.constant 0 : i32
    return %c0_i32, %c0_i32_0, %c0_i32_1 : i32, i32, i32
  }
  func.func @transform_11(%arg0: i32) -> (i32, i32, i32) {
    %c0_i32 = arith.constant 0 : i32
    %c0_i32_0 = arith.constant 0 : i32
    %c0_i32_1 = arith.constant 0 : i32
    %c0_i32_2 = arith.constant 0 : i32
    return %c0_i32, %c0_i32_0, %c0_i32_1 : i32, i32, i32
  }
  func.func @transform_12(%arg0: i32) -> (i32, i32) {
    %c0_i32 = arith.constant 0 : i32
    %c0_i32_0 = arith.constant 0 : i32
    %c0_i32_1 = arith.constant 0 : i32
    return %c0_i32, %c0_i32_0 : i32, i32
  }
  func.func @transform_13(%arg0: i32) -> (i32, i32) {
    %c0_i32 = arith.constant 0 : i32
    %c0_i32_0 = arith.constant 0 : i32
    %c0_i32_1 = arith.constant 0 : i32
    return %c0_i32, %c0_i32_0 : i32, i32
  }
  func.func @transform_14(%arg0: i32) -> (i32, i32, i32) {
    %c0_i32 = arith.constant 0 : i32
    %c0_i32_0 = arith.constant 0 : i32
    %c0_i32_1 = arith.constant 0 : i32
    return %arg0, %c0_i32, %c0_i32_0 : i32, i32, i32
  }
}

</mosaic_0001>

<bundles_post_ra>
// kernel: block_forward.1
= control target key start
LH: loop header
LB: loop body
LE: loop exit
PB: predicated region body
PF: predicated region fallthrough
CT: control target
= control target key end

     0   :  { %s14627_s0 = inlined_call_operand.vmem [shape: f32[4,4,64], index: 0, kind: input, shape index: {}]   ;;  %s14628_s1 = inlined_call_operand.vmem [shape: f32[4,8,64], index: 1, kind: input, shape index: {}]   ;;  %s14629_s2 = inlined_call_operand.vmem [shape: f32[11,32], index: 2, kind: input, shape index: {}]   ;;  %s14630_s3 = inlined_call_operand.vmem [shape: f32[4,32], index: 3, kind: input, shape index: {}]   ;;  %s14631_s4 = inlined_call_operand.vmem [shape: f32[8,32], index: 4, kind: input, shape index: {}]   ;;  %s14632_s5 = inlined_call_operand.vmem [shape: bf16[4,32,16], index: 5, kind: input, shape index: {}]   ;;  %s14633_s6 = inlined_call_operand.vmem [shape: bf16[4,32,16], index: 6, kind: input, shape index: {}]   ;;  %s14634_s7 = inlined_call_operand.vmem [shape: bf16[4,32,16], index: 7, kind: input, shape index: {}]   ;;  %s14635_s8 = inlined_call_operand.vmem [shape: bf16[4,32,16], index: 8, kind: input, shape index: {}]   ;;  %s14636_s9 = inlined_call_operand.vmem [shape: bf16[4,32,16], index: 9, kind: input, shape index: {}]   ;;  %s14637_s10 = inlined_call_operand.vmem [shape: bf16[4,32,16], index: 10, kind: input, shape index: {}]   ;;  %s14638_s11 = inlined_call_operand.vmem [shape: bf16[4,16,32], index: 11, kind: input, shape index: {}]   ;;  %s14639_s12 = inlined_call_operand.vmem [shape: bf16[32,32], index: 12, kind: input, shape index: {}]   ;;  %s14640_s13 = inlined_call_operand.vmem [shape: bf16[32,32], index: 13, kind: input, shape index: {}]   ;;  %s14641_s14 = inlined_call_operand.hbm [shape: f32[4,64,32], index: 14, kind: output, shape index: {}]  }
   0x1   :  { %14700 = sst [smem:[#allocation66_spill]] %s14627_s0 }
   0x2   :  { %19 = vsyncpa [#allocation3], 0 }
   0x3   :  { %21 = vsyncpa [#allocation3 + $0x1], 0  ;;  %s10310_s29 = smov 0   ;;  %s10312_s30 = smov 0  }
   0x4   :  { %s10314_s15 = smov 0   ;;  %s10316_s16 = smov 0  }
   0x5 LB: > { %14701 = sst [smem:[#allocation5_spill]] %s10226_s15  ;;  %s10331_s17 = sadd.s32 4294967295, %s10230_s16   ;;  %s10230_s16 = sphi %s10316_s16, %s14912_s16   ;;  %s10226_s15 = sphi %s10314_s15, %s14914_s15   ;;  %s10222_s30 = sphi %s10312_s30, %s14916_s30   ;;  %s10218_s29 = sphi %s10310_s29, %s14915_s29  }
   0x6   : > { %s8899_s18 = sadd.s32 4294967294, %s10230_s16   ;;  %s10335_s19 = sadd.s32 1, %s10230_s16  }
   0x7   : > { %14702 = sst [smem:[#allocation6_spill]] %s10335_s19  ;;  %s338_s20 = sadd.s32 1, %s10226_s15 }
   0x8   : > { %s335_s21 = ssub.s32 %s10230_s16, %s10335_s19  ;;  %p348_p0 = scmp.ne.s32.totalorder %s10226_s15, %s10222_s30 }
   0x9   : > { %p336_p1 = scmp.eq.s32.totalorder %s335_s21, 0  ;;  %p349_p2 = scmp.eq.s32.totalorder %s10331_s17, 1 }
   0xa   : > { %p354_p3 = scmp.ne.s32.totalorder %s10222_s30, %s10218_s29  ;;  %p355_p4 = scmp.eq.s32.totalorder %s8899_s18, 1 }
   0xb   : > { %s10346_s22 = scalar_select %p336_p1, %s10226_s15, %s338_s20  }
   0xc   : > { %p10348_p5 = por %p349_p2, %p348_p0  ;;  %p10352_p6 = por %p355_p4, %p354_p3 }
   0xd   : > { %14703 = sst [smem:[#allocation7_spill]] %s10346_s22  ;;  %p8902_p7 = scmp.ge.s32.totalorder %s10230_s16, 1 }
   0xe   : > { %s14705_s24 = scalar_select %p10352_p6, 1, 0 }
   0xf   : > { %p427_p8 = scmp.lt.s32.totalorder %s10230_s16, 3 }
  0x10   : > { %14706 = sst [smem:[#allocation8_spill]] %s14705_s24 }
  0x11   : > { %p428_p9 = pnand %p8902_p7, %p427_p8 }
  0x13   : > { %431 = sbr.rel (%p428_p9) target bundleno = 6929 (0x1b11), region = 76 }
  0x18   : > { %s8904_s25 = sshll.u32 %s10331_s17, 1  ;;  %s14707_s0 = sld [smem:[#allocation66_spill]]  ;;  %v494_v2 = vld [vmem:[%s14630_s3] sm:$0xf]  ;;  %vm554_vm0 = vcmask 1043456   ;;  %vm529_vm1 = vcmask 31744  }
  0x19   : > { %p479_p10 = scmp.lt.s32.totalorder %s8904_s25, 3  ;;  %8908 = vmatpush.msk.msra.mxu0 %vm554_vm0, %v494_v2  ;;  %8926 = vmatpush.msk.msra.mxu2 %vm554_vm0, %v494_v2  ;;  %v495_v12 = vld [vmem:[%s14631_s4] sm:$0xff]  ;;  %vm632_vm2 = vcmask 64512   ;;  %vm913_vm3 = vcmask 261120   ;;  %v10232_v53 = vmov 32.0   ;;  %s475_s22 = sand.u32 1, %s10222_s30  }
  0x1a   : > { %672 = vmatpush.msra.mxu1 %v495_v12  ;;  %9670 = vmatpush.msra.mxu3 %v495_v12  ;;  %v10391_v19 = vld [vmem:[%s14629_s2] sm:$0xff]  ;;  %9715 = vrcp.f32 %v10232_v53  ;;  %s9669_s28 = sshll.u32 %s10331_s17, 7  ;;  %s8809_s17 = scalar_lea.sflag [#allocation3], %s475_s22 }
  0x1b   : > { %s14918_s25 = smov (!%p479_p10, %s8904_s25), 3  ;;  %870 = vmatpush.msrb.mxu0 %v495_v12  ;;  %v10394_v21 = vperm.slane %v10391_v19, 0  ;;  %s8821_s21 = scalar_lea.hbm %s14641_s14, %s9669_s28 }
  0x1c   : > { %s8905_s26 = sshll.u32 %s14918_s25, 2  ;;  %s8907_s27 = sshll.u32 %s14918_s25, 3 }
  0x1d   : > { %s10365_s15 = scalar_lea.vmem %s14628_s1, %s8907_s27  ;;  %s8824_s19 = sshll.u32 %s8821_s21, 4  ;;  %s8825_s19 = int_to_ptr.hbm [resolvable:$true] %s8824_s19 }
  0x1e   : > { %s482_s20 = scalar_lea.vmem %s14707_s0, %s8905_s26  ;;  %v599_v1 = vld [vmem:[%s10365_s15] sm:$0xff]  ;;  %s8903_s26 = sshll.u32 %s475_s22, 7 }
  0x1f   : > { %v496_v0 = vld [vmem:[%s482_s20] sm:$0xf]  ;;  %600 = vxpose.xlu1.b32.start.end [1/1] (short) (narrow) %v599_v1, 64  ;;  %v8925_v3 = vld [vmem:[%s482_s20 + $0x4] sm:$0xf]  ;;  %s14399_s27 = scalar_lea.vmem [#allocation2], %s8903_s26 }
  0x20   : > { %497 = vxpose.xlu0.b32.start.end [1/1] (short) (narrow) %v496_v0, 64  ;;  %v9716_v54 = vpop.eup %9715  ;;  %s10182_s24 = sshra.s32 %s8825_s19, 4  ;;  %s10188_s18 = scalar_lea.hbm %s14641_s14, 256  ;;  %s10183_s24 = int_to_ptr.hbm [resolvable:$true] %s10182_s24 }
  0x21   : > { %v963_v55 = vmul.f32 32.0, %v9716_v54  ;;  %vm967_vm4 = vweird.f32 %v9716_v54  ;;  %s10184_s25 = scalar_lea.hbm %s10183_s24, 128  ;;  %p10189_p0 = scmp.lt.s32.totalorder %s10183_s24, %s14641_s14 }
  0x22   : > { %p10185_p11 = scmp.ne.s32.totalorder %s10183_s24, %s10184_s25  ;;  %p10190_p1 = scmp.lt.s32.totalorder %s10188_s18, %s10184_s25 }
  0x23   : > { %v964_v56 = vsub.f32 1.0, %v963_v55 }
  0x24   : > { %p10186_p12 = pnand %p10185_p11, %p10348_p5  ;;  %p10191_p2 = por %p10190_p1, %p10189_p0 }
  0x25   : > { %v965_v57 = vmul.f32 %v9716_v54, %v964_v56  ;;  %v8935_v56 = vld [vmem:[%s10365_s15 + $0x8] sm:$0xff]  ;;  %s8822_s15 = sshll.u32 %s14399_s27, 4  ;;  %s8823_s15 = int_to_ptr.vmem [resolvable:$true] %s8822_s15 }
  0x26   : > { %p10187_p13 = pneg %p10186_p12 }
  0x27   : > { %v966_v58 = vadd.f32 %v9716_v54, %v965_v57 }
  0x28   : > { %p10192_p3 = pnand %p10191_p2, %p10187_p13 }
  0x29   : > { %v10442_v60 = vsel %vm967_vm4, %v9716_v54, %v966_v58  ;;  %v9617_v58 = vld [vmem:[%s14634_s7 + $0x8] sm:$0xff] }
  0x2a   : > { %14708 = vst [vmem:[#allocation9_spill] sm:$0xff] %v10442_v60  ;;  %1934 = vmatpush.bf16.msrb.mxu2 %v9617_v58 }
  0x60   : > { %700 = vxpose.xlu0.b32.start.end [1/1] (short) (narrow) %v8925_v3, 64 }
  0xc3   : > { %v616_v13 = vpop.trf.xlu1 }
  0xc4   : > { %v513_v4 = vpop.trf.xlu0  ;;  %8917 = vmatmul.msk.f32.vlgmr.msra.gmra.mxu1 %vm632_vm2, %v616_v13 }
  0xc5   : > { %8909 = vmatmul.msk.f32.vlgmr.msra.gmra.mxu0 %vm529_vm1, %v513_v4 }
  0xcb   : > { %v617_v15 = vpop.trf.xlu1 }
  0xcc   : > { %v514_v5 = vpop.trf.xlu0  ;;  %8918 = vmatmul.msk.f32.gmra.mxu1 %vm632_vm2, %v617_v15 }
  0xcd   : > { %8910 = vmatmul.msk.f32.gmra.mxu0 %vm529_vm1, %v514_v5 }
  0xd3   : > { %v618_v17 = vpop.trf.xlu1 }
  0xd4   : > { %v515_v6 = vpop.trf.xlu0  ;;  %8919 = vmatmul.msk.f32.gmra.mxu1 %vm632_vm2, %v618_v17 }
  0xd5   : > { %8911 = vmatmul.msk.f32.gmra.mxu0 %vm529_vm1, %v515_v6 }
  0xdb   : > { %v619_v34 = vpop.trf.xlu1 }
  0xdc   : > { %v516_v7 = vpop.trf.xlu0  ;;  %8920 = vmatmul.msk.f32.gmra.mxu1 %vm632_vm2, %v619_v34 }
  0xdd   : > { %8912 = vmatmul.msk.f32.gmra.mxu0 %vm529_vm1, %v516_v7 }
  0xe3   : > { %v620_v39 = vpop.trf.xlu1 }
  0xe4   : > { %v517_v8 = vpop.trf.xlu0  ;;  %8921 = vmatmul.msk.f32.gmra.mxu1 %vm632_vm2, %v620_v39 }
  0xe5   : > { %8913 = vmatmul.msk.f32.gmra.mxu0 %vm529_vm1, %v517_v8 }
  0xeb   : > { %v621_v44 = vpop.trf.xlu1 }
  0xec   : > { %v518_v9 = vpop.trf.xlu0  ;;  %8922 = vmatmul.msk.f32.gmra.mxu1 %vm632_vm2, %v621_v44 }
  0xed   : > { %8914 = vmatmul.msk.f32.gmra.mxu0 %vm529_vm1, %v518_v9 }
  0xf3   : > { %v622_v48 = vpop.trf.xlu1 }
  0xf4   : > { %v519_v10 = vpop.trf.xlu0  ;;  %8923 = vmatmul.msk.f32.gmra.mxu1 %vm632_vm2, %v622_v48 }
  0xf5   : > { %8915 = vmatmul.msk.f32.gmra.mxu0 %vm529_vm1, %v519_v10 }
  0xfb   : > { %v623_v52 = vpop.trf.xlu1 }
  0xfc   : > { %v520_v11 = vpop.trf.xlu0  ;;  %8924 = vmatmul.msk.f32.gmra.mxu1 %vm632_vm2, %v623_v52 }
  0xfd   : > { %8916 = vmatmul.msk.f32.gmra.mxu0 %vm529_vm1, %v520_v11 }
 0x104   : > { %v716_v14 = vpop.trf.xlu0 }
 0x105   : > { %8927 = vmatmul.msk.f32.vlgmr.msra.gmra.mxu2 %vm529_vm1, %v716_v14 }
 0x10c   : > { %v717_v16 = vpop.trf.xlu0 }
 0x10d   : > { %8928 = vmatmul.msk.f32.gmra.mxu2 %vm529_vm1, %v717_v16  ;;  %v10470_v16 = vperm.slane %v10391_v19, 3 }
 0x114   : > { %v718_v18 = vpop.trf.xlu0 }
 0x115   : > { %8929 = vmatmul.msk.f32.gmra.mxu2 %vm529_vm1, %v718_v18 }
 0x11c   : > { %v719_v20 = vpop.trf.xlu0 }
 0x11d   : > { %8930 = vmatmul.msk.f32.gmra.mxu2 %vm529_vm1, %v719_v20 }
 0x124   : > { %v720_v35 = vpop.trf.xlu0 }
 0x125   : > { %8931 = vmatmul.msk.f32.gmra.mxu2 %vm529_vm1, %v720_v35 }
 0x12c   : > { %v721_v40 = vpop.trf.xlu0 }
 0x12d   : > { %8932 = vmatmul.msk.f32.gmra.mxu2 %vm529_vm1, %v721_v40 }
 0x134   : > { %v722_v59 = vpop.trf.xlu0 }
 0x135   : > { %8933 = vmatmul.msk.f32.gmra.mxu2 %vm529_vm1, %v722_v59 }
 0x13c   : > { %v723_v2 = vpop.trf.xlu0 }
 0x13d   : > { %8934 = vmatmul.msk.f32.gmra.mxu2 %vm529_vm1, %v723_v2 }
 0x141   : > { %v10445_v63 = vpop.f32.mrf.mxu1 }
 0x142   : > { %v575_v22 = vpop.f32.mrf.mxu0 }
 0x143   : > { %v897_v23 = vadd.f32 %v10394_v21, %v575_v22 }
 0x145   : > { %v914_v24 = vsel %vm913_vm3, %v897_v23, 0.0 }
 0x146   : > { %915 = vadd.xlane.f32.xlu1 %v914_v24 }
 0x149   : > { %v10457_v8 = vpop.f32.mrf.mxu1 }
 0x14a   : > { %v578_v25 = vpop.f32.mrf.mxu0 }
 0x14b   : > { %v10400_v26 = vadd.f32 %v10394_v21, %v578_v25 }
 0x14d   : > { %v917_v27 = vsel %vm913_vm3, %v10400_v26, 0.0 }
 0x14e   : > { %918 = vadd.xlane.f32.xlu2 %v917_v27 }
 0x151   : > { %v680_v20 = vpop.f32.mrf.mxu1 }
 0x152   : > { %v581_v28 = vpop.f32.mrf.mxu0  ;;  %v10478_v24 = vadd.f32 %v10470_v16, %v680_v20 }
 0x153   : > { %v10405_v29 = vadd.f32 %v10394_v21, %v581_v28 }
 0x155   : > { %v920_v30 = vsel %vm913_vm3, %v10405_v29, 0.0 }
 0x156   : > { %921 = vadd.xlane.f32.xlu2 %v920_v30 }
 0x15a   : > { %v584_v31 = vpop.f32.mrf.mxu0 }
 0x15b   : > { %v10410_v32 = vadd.f32 %v10394_v21, %v584_v31 }
 0x15d   : > { %v923_v33 = vsel %vm913_vm3, %v10410_v32, 0.0 }
 0x15e   : > { %924 = vadd.xlane.f32.xlu2 %v923_v33 }
 0x162   : > { %v587_v36 = vpop.f32.mrf.mxu0 }
 0x163   : > { %v10417_v37 = vadd.f32 %v10394_v21, %v587_v36 }
 0x165   : > { %v926_v38 = vsel %vm913_vm3, %v10417_v37, 0.0 }
 0x166   : > { %927 = vadd.xlane.f32.xlu2 %v926_v38 }
 0x16a   : > { %v590_v41 = vpop.f32.mrf.mxu0 }
 0x16b   : > { %v10424_v42 = vadd.f32 %v10394_v21, %v590_v41 }
 0x16d   : > { %v929_v43 = vsel %vm913_vm3, %v10424_v42, 0.0 }
 0x16e   : > { %930 = vadd.xlane.f32.xlu2 %v929_v43 }
 0x172   : > { %v593_v45 = vpop.f32.mrf.mxu0 }
 0x173   : > { %v10430_v46 = vadd.f32 %v10394_v21, %v593_v45 }
 0x175   : > { %v932_v47 = vsel %vm913_vm3, %v10430_v46, 0.0 }
 0x176   : > { %933 = vadd.xlane.f32.xlu2 %v932_v47 }
 0x17a   : > { %v596_v49 = vpop.f32.mrf.mxu0 }
 0x17b   : > { %v10436_v50 = vadd.f32 %v10394_v21, %v596_v49 }
 0x17d   : > { %v935_v51 = vsel %vm913_vm3, %v10436_v50, 0.0 }
 0x17e   : > { %936 = vadd.xlane.f32.xlu2 %v935_v51 }
 0x188   : > { %v773_v1 = vpop.f32.mrf.mxu2 }
 0x189   : > { %v10464_v14 = vadd.f32 %v10394_v21, %v773_v1  ;;  %v9616_v1 = vld [vmem:[%s14634_s7] sm:$0xff] }
 0x18a   : > { %1935 = vmatpush.bf16.msrb.mxu2 %v9616_v1 }
 0x18b   : > { %v938_v18 = vsel %vm913_vm3, %v10464_v14, 0.0 }
 0x190   : > { %v776_v10 = vpop.f32.mrf.mxu2 }
 0x191   : > { %v10481_v25 = vadd.f32 %v10394_v21, %v776_v10 }
 0x193   : > { %v941_v27 = vsel %vm913_vm3, %v10481_v25, 0.0 }
 0x1b9   : > { %v916_v61 = vpop.xlane.xlu1 %915 }
 0x1ba   : > { %v969_v62 = vmul.f32 %v10442_v60, %v916_v61 }
 0x1bc   : > { %v10447_v0 = vsub.f32 %v897_v23, %v969_v62  ;;  %v779_v23 = vpop.f32.mrf.mxu2  ;;  %v9614_v62 = vld [vmem:[%s14633_s6] sm:$0xff] }
 0x1bd   : > { %v10488_v28 = vadd.f32 %v10394_v21, %v779_v23 }
 0x1be   : > { %v1001_v3 = vmul.f32 %v10447_v0, %v10447_v0 }
 0x1bf   : > { %v944_v31 = vsel %vm913_vm3, %v10488_v28, 0.0 }
 0x1c0   : > { %v1017_v4 = vsel %vm913_vm3, %v1001_v3, 0.0 }
 0x1c1   : > { %v919_v5 = vpop.xlane.xlu2 %918  ;;  %1018 = vadd.xlane.f32.xlu2 %v1017_v4 }
 0x1c2   : > { %v970_v6 = vmul.f32 %v10442_v60, %v919_v5 }
 0x1c4   : > { %v10455_v7 = vsub.f32 %v10400_v26, %v970_v6  ;;  %v1330_v26 = vsel %vm913_vm3, %v10478_v24, 0.0 }
 0x1c6   : > { %v1002_v9 = vmul.f32 %v10455_v7, %v10455_v7 }
 0x1c8   : > { %v1020_v11 = vsel %vm913_vm3, %v1002_v9, 0.0 }
 0x1c9   : > { %v922_v12 = vpop.xlane.xlu2 %921  ;;  %1021 = vadd.xlane.f32.xlu2 %v1020_v11 }
 0x1ca   : > { %v971_v13 = vmul.f32 %v10442_v60, %v922_v12 }
 0x1cc   : > { %v10467_v15 = vsub.f32 %v10405_v29, %v971_v13  ;;  %v782_v29 = vpop.f32.mrf.mxu2 }
 0x1cd   : > { %v10493_v33 = vadd.f32 %v10394_v21, %v782_v29 }
 0x1ce   : > { %v1003_v17 = vmul.f32 %v10467_v15, %v10467_v15 }
 0x1cf   : > { %v947_v36 = vsel %vm913_vm3, %v10493_v33, 0.0 }
 0x1d0   : > { %v1023_v22 = vsel %vm913_vm3, %v1003_v17, 0.0 }
 0x1d1   : > { %1024 = vadd.xlane.f32.xlu0 %v1023_v22  ;;  %939 = vadd.xlane.f32.xlu2 %v938_v18  ;;  %v925_v30 = vpop.xlane.xlu2 %924 }
 0x1d2   : > { %v972_v35 = vmul.f32 %v10442_v60, %v925_v30 }
 0x1d4   : > { %v10495_v34 = vpop.f32.mrf.mxu2  ;;  %v10501_v39 = vsub.f32 %v10410_v32, %v972_v35 }
 0x1d6   : > { %v1004_v44 = vmul.f32 %v10501_v39, %v10501_v39 }
 0x1d8   : > { %v1026_v32 = vsel %vm913_vm3, %v1004_v44, 0.0 }
 0x1d9   : > { %1331 = vadd.xlane.f32.xlu0 %v1330_v26  ;;  %942 = vadd.xlane.f32.xlu2 %v941_v27  ;;  %v928_v38 = vpop.xlane.xlu2 %927 }
 0x1da   : > { %v973_v43 = vmul.f32 %v10442_v60, %v928_v38 }
 0x1dc   : > { %v788_v40 = vpop.f32.mrf.mxu2  ;;  %v10512_v47 = vsub.f32 %v10417_v37, %v973_v43 }
 0x1dd   : > { %v10504_v41 = vadd.f32 %v10394_v21, %v788_v40  ;;  %v10553_v40 = vperm.slane %v10391_v19, 1 }
 0x1de   : > { %v1005_v51 = vmul.f32 %v10512_v47, %v10512_v47 }
 0x1df   : > { %v953_v45 = vsel %vm913_vm3, %v10504_v41, 0.0 }
 0x1e0   : > { %954 = vadd.xlane.f32.xlu1 %v953_v45  ;;  %v1029_v53 = vsel %vm913_vm3, %v1005_v51, 0.0  ;;  %v10563_v51 = vperm.slane %v10391_v19, 2 }
 0x1e1   : > { %945 = vadd.xlane.f32.xlu2 %v944_v31  ;;  %v931_v48 = vpop.xlane.xlu2 %930 }
 0x1e2   : > { %v974_v49 = vmul.f32 %v10442_v60, %v931_v48 }
 0x1e4   : > { %v10519_v52 = vsub.f32 %v10424_v42, %v974_v49  ;;  %v9615_v42 = vld [vmem:[%s14633_s6 + $0x8] sm:$0xff]  ;;  %v791_v48 = vpop.f32.mrf.mxu2 }
 0x1e5   : > { %1853 = vmatpush.bf16.msrb.mxu1 %v9615_v42  ;;  %v10572_v58 = vadd.f32 %v10394_v21, %v791_v48 }
 0x1e6   : > { %v1006_v54 = vmul.f32 %v10519_v52, %v10519_v52 }
 0x1e8   : > { %v1032_v37 = vsel %vm913_vm3, %v1006_v54, 0.0 }
 0x1e9   : > { %948 = vadd.xlane.f32.xlu2 %v947_v36  ;;  %v10525_v55 = vpop.xlane.xlu2 %933  ;;  %1854 = vmatpush.bf16.msrb.mxu1 %v9614_v62 }
 0x1ec   : > { %v794_v62 = vpop.f32.mrf.mxu2 }
 0x1f1   : > { %1027 = vadd.xlane.f32.xlu2 %v1026_v32  ;;  %v10528_v57 = vpop.xlane.xlu2 %936 }
 0x1f9   : > { %1030 = vadd.xlane.f32.xlu2 %v1029_v53 }
 0x201   : > { %1033 = vadd.xlane.f32.xlu2 %v1032_v37 }
 0x22a   : > { %799 = vxpose.xlu2.b32.start.end [1/1] (short) (narrow) %v8935_v56, 64 }
 0x234   : > { %v1019_v59 = vpop.xlane.xlu2 %1018 }
 0x235   : > { %v1065_v61 = vmul.f32 %v1019_v59, %v10442_v60 }
 0x237   : > { %v1081_v2 = vadd.f32 1e-05, %v1065_v61 }
 0x239   : > { %9717 = vrsqrt.f32 %v1081_v2  ;;  %vm1103_vm6 = vweird.f32 %v1081_v2 }
 0x23c   : > { %v1022_v3 = vpop.xlane.xlu2 %1021 }
 0x23d   : > { %v1066_v4 = vmul.f32 %v1022_v3, %v10442_v60  ;;  %v10587_v3 = vadd.f32 %v10394_v21, %v794_v62 }
 0x23f   : > { %v9718_v5 = vpop.eup %9717  ;;  %v1082_v6 = vadd.f32 1e-05, %v1066_v4 }
 0x240   : > { %v1098_v9 = vmul.f32 %v9718_v5, %v1081_v2  ;;  %vm1104_vm5 = vweird.f32 %v9718_v5 }
 0x241   : > { %9719 = vrsqrt.f32 %v1082_v6  ;;  %vm1105_vm7 = vmor %vm1103_vm6, %vm1104_vm5  ;;  %vm1113_vm9 = vweird.f32 %v1082_v6 }
 0x242   : > { %v1099_v10 = vmul.f32 %v9718_v5, %v1098_v9 }
 0x244   : > { %v1100_v11 = vmul.f32 0.5, %v1099_v10  ;;  %v940_v12 = vpop.xlane.xlu2 %939  ;;  %v1025_v35 = vpop.xlane.xlu0 %1024 }
 0x245   : > { %v977_v13 = vmul.f32 %v10442_v60, %v940_v12  ;;  %v1067_v44 = vmul.f32 %v1025_v35, %v10442_v60  ;;  %v975_v12 = vmul.f32 %v10442_v60, %v10525_v55 }
 0x246   : > { %v1101_v17 = vsub.f32 1.5, %v1100_v11  ;;  %v10594_v11 = vadd.f32 %v10470_v16, %v10445_v63  ;;  %v976_v63 = vmul.f32 %v10442_v60, %v10528_v57 }
 0x247   : > { %v9720_v18 = vpop.eup %9719  ;;  %v10546_v20 = vsub.f32 %v10464_v14, %v977_v13  ;;  %v1083_v37 = vadd.f32 1e-05, %v1067_v44 }
 0x248   : > { %v1102_v22 = vmul.f32 %v9718_v5, %v1101_v17  ;;  %v1108_v23 = vmul.f32 %v9720_v18, %v1082_v6  ;;  %vm1114_vm8 = vweird.f32 %v9720_v18 }
 0x249   : > { %v1009_v26 = vmul.f32 %v10546_v20, %v10546_v20  ;;  %vm1115_vm10 = vmor %vm1113_vm9, %vm1114_vm8  ;;  %9721 = vrsqrt.f32 %v1083_v37  ;;  %vm1123_vm12 = vweird.f32 %v1083_v37 }
 0x24a   : > { %v1109_v27 = vmul.f32 %v9720_v18, %v1108_v23  ;;  %v1106_v30 = vsel %vm1105_vm7, %v9718_v5, %v1102_v22  ;;  %v959_v5 = vsel %vm913_vm3, %v10587_v3, 0.0  ;;  %v1324_v22 = vsel %vm913_vm3, %v10594_v11, 0.0 }
 0x24b   : > { %v1041_v29 = vsel %vm913_vm3, %v1009_v26, 0.0  ;;  %v1257_v43 = vmul.f32 %v1106_v30, %v10447_v0 }
 0x24c   : > { %v1110_v31 = vmul.f32 0.5, %v1109_v27  ;;  %v943_v36 = vpop.xlane.xlu2 %942  ;;  %1042 = vadd.xlane.f32.xlu1 %v1041_v29 }
 0x24d   : > { %v978_v38 = vmul.f32 %v10442_v60, %v943_v36  ;;  %v1274_v54 = vmul.f32 %v10553_v40, %v1257_v43  ;;  %v10609_v36 = vsub.f32 %v10436_v50, %v976_v63 }
 0x24e   : > { %v1111_v14 = vsub.f32 1.5, %v1110_v31 }
 0x24f   : > { %v10558_v45 = vsub.f32 %v10481_v25, %v978_v38  ;;  %v1291_v59 = vadd.f32 %v10563_v51, %v1274_v54  ;;  %v9722_v2 = vpop.eup %9721  ;;  %v1008_v54 = vmul.f32 %v10609_v36, %v10609_v36 }
 0x250   : > { %v1112_v32 = vmul.f32 %v9720_v18, %v1111_v14  ;;  %v1118_v4 = vmul.f32 %v9722_v2, %v1083_v37  ;;  %vm1124_vm11 = vweird.f32 %v9722_v2 }
 0x251   : > { %v1010_v49 = vmul.f32 %v10558_v45, %v10558_v45  ;;  %vm1125_vm13 = vmor %vm1123_vm12, %vm1124_vm11 }
 0x252   : > { %v1116_v53 = vsel %vm1115_vm10, %v9720_v18, %v1112_v32  ;;  %v1119_v6 = vmul.f32 %v9722_v2, %v1118_v4  ;;  %v10599_v18 = vsub.f32 %v10430_v46, %v975_v12  ;;  %v10622_v4 = vadd.f32 %v10470_v16, %v10457_v8 }
 0x253   : > { %v1258_v0 = vmul.f32 %v1116_v53, %v10455_v7  ;;  %v1044_v56 = vsel %vm913_vm3, %v1010_v49, 0.0  ;;  %v956_v7 = vsel %vm913_vm3, %v10572_v58, 0.0 }
 0x254   : > { %v10568_v25 = vpop.xlane.xlu2 %945  ;;  %1045 = vadd.xlane.f32.xlu1 %v1044_v56  ;;  %v1120_v17 = vmul.f32 0.5, %v1119_v6  ;;  %v1007_v55 = vmul.f32 %v10599_v18, %v10599_v18  ;;  %v1327_v8 = vsel %vm913_vm3, %v10622_v4, 0.0 }
 0x255   : > { %v1275_v42 = vmul.f32 %v10553_v40, %v1258_v0  ;;  %v979_v6 = vmul.f32 %v10442_v60, %v10568_v25 }
 0x256   : > { %v1121_v23 = vsub.f32 1.5, %v1120_v17  ;;  %v1035_v38 = vsel %vm913_vm3, %v1007_v55, 0.0 }
 0x257   : > { %v1292_v19 = vadd.f32 %v10563_v51, %v1275_v42  ;;  %v10631_v17 = vsub.f32 %v10488_v28, %v979_v6 }
 0x258   : > { %v1122_v31 = vmul.f32 %v9722_v2, %v1121_v23 }
 0x259   : > { %v10576_v61 = vpack.c.bf16 %v1292_v19, %v1291_v59  ;;  %v1038_v19 = vsel %vm913_vm3, %v1008_v54, 0.0 }
 0x25a   : > { %v1126_v14 = vsel %vm1125_vm13, %v9722_v2, %v1122_v31 }
 0x25b   : > { %8968 = vmatmul.msk.bf16.vlgmr.msrb.gmra.mxu1 %vm913_vm3, %v10576_v61  ;;  %8984 = vmatmul.msk.bf16.vlgmr.msrb.gmra.mxu2 %vm913_vm3, %v10576_v61  ;;  %v1259_v49 = vmul.f32 %v1126_v14, %v10467_v15  ;;  %v683_v14 = vpop.f32.mrf.mxu1 }
 0x25c   : > { %v10584_v1 = vpop.xlane.xlu2 %948  ;;  %957 = vadd.xlane.f32.xlu1 %v956_v7 }
 0x25d   : > { %v1276_v42 = vmul.f32 %v10553_v40, %v1259_v49 }
 0x264   : > { %v1028_v9 = vpop.xlane.xlu2 %1027  ;;  %960 = vadd.xlane.f32.xlu1 %v959_v5  ;;  %v1293_v5 = vadd.f32 %v10563_v51, %v1276_v42 }
 0x265   : > { %v1068_v10 = vmul.f32 %v1028_v9, %v10442_v60 }
 0x267   : > { %v1084_v13 = vadd.f32 1e-05, %v1068_v10 }
 0x269   : > { %9723 = vrsqrt.f32 %v1084_v13  ;;  %vm1133_vm15 = vweird.f32 %v1084_v13 }
 0x26c   : > { %v1031_v26 = vpop.xlane.xlu2 %1030  ;;  %1325 = vadd.xlane.f32.xlu1 %v1324_v22 }
 0x26d   : > { %v1069_v27 = vmul.f32 %v1031_v26, %v10442_v60  ;;  %v980_v26 = vmul.f32 %v10442_v60, %v10584_v1 }
 0x26f   : > { %v9724_v29 = vpop.eup %9723  ;;  %v1085_v30 = vadd.f32 1e-05, %v1069_v27  ;;  %v1011_v27 = vmul.f32 %v10631_v17, %v10631_v17 }
 0x270   : > { %v1128_v46 = vmul.f32 %v9724_v29, %v1084_v13  ;;  %vm1134_vm14 = vweird.f32 %v9724_v29 }
 0x271   : > { %9725 = vrsqrt.f32 %v1085_v30  ;;  %vm1135_vm0 = vmor %vm1133_vm15, %vm1134_vm14  ;;  %vm1143_vm4 = vweird.f32 %v1085_v30 }
 0x272   : > { %v1129_v35 = vmul.f32 %v9724_v29, %v1128_v46  ;;  %v1047_v46 = vsel %vm913_vm3, %v1011_v27, 0.0 }
 0x274   : > { %v1130_v43 = vmul.f32 0.5, %v1129_v35  ;;  %v1034_v44 = vpop.xlane.xlu2 %1033  ;;  %1036 = vadd.xlane.f32.xlu1 %v1035_v38 }
 0x275   : > { %v1070_v57 = vmul.f32 %v1034_v44, %v10442_v60 }
 0x276   : > { %v1131_v32 = vsub.f32 1.5, %v1130_v43 }
 0x277   : > { %v9726_v48 = vpop.eup %9725  ;;  %v1086_v53 = vadd.f32 1e-05, %v1070_v57  ;;  %v10664_v57 = vadd.f32 %v10470_v16, %v683_v14 }
 0x278   : > { %v1132_v50 = vmul.f32 %v9724_v29, %v1131_v32  ;;  %v1138_v0 = vmul.f32 %v9726_v48, %v1085_v30  ;;  %vm1144_vm1 = vweird.f32 %v9726_v48  ;;  %v10645_v30 = vsub.f32 %v10493_v33, %v980_v26  ;;  %v955_v33 = vpop.xlane.xlu1 %954 }
 0x279   : > { %9727 = vrsqrt.f32 %v1086_v53  ;;  %vm1145_vm5 = vmor %vm1143_vm4, %vm1144_vm1  ;;  %vm1153_vm7 = vweird.f32 %v1086_v53  ;;  %v982_v44 = vmul.f32 %v10442_v60, %v955_v33  ;;  %v1333_v49 = vsel %vm913_vm3, %v10664_v57, 0.0 }
 0x27a   : > { %v1136_v37 = vsel %vm1135_vm0, %v9724_v29, %v1132_v50  ;;  %v1139_v56 = vmul.f32 %v9726_v48, %v1138_v0  ;;  %v1012_v38 = vmul.f32 %v10645_v30, %v10645_v30  ;;  %v9613_v50 = vld [vmem:[%s14632_s5 + $0x8] sm:$0xff] }
 0x27b   : > { %v1260_v59 = vmul.f32 %v1136_v37, %v10501_v39  ;;  %v10667_v32 = vsub.f32 %v10504_v41, %v982_v44  ;;  %1772 = vmatpush.bf16.msra.mxu0 %v9613_v50  ;;  %v9612_v37 = vld [vmem:[%s14632_s5] sm:$0xff] }
 0x27c   : > { %v1140_v7 = vmul.f32 0.5, %v1139_v56  ;;  %1039 = vadd.xlane.f32.xlu1 %v1038_v19 }
 0x27d   : > { %v1277_v15 = vmul.f32 %v10553_v40, %v1260_v59 }
 0x27e   : > { %v1141_v62 = vsub.f32 1.5, %v1140_v7  ;;  %v10692_v7 = vadd.f32 %v10394_v21, %v10495_v34 }
 0x27f   : > { %v9728_v2 = vpop.eup %9727  ;;  %v1294_v9 = vadd.f32 %v10563_v51, %v1277_v15  ;;  %1773 = vmatpush.bf16.msra.mxu0 %v9612_v37 }
 0x280   : > { %v1142_v39 = vmul.f32 %v9726_v48, %v1141_v62  ;;  %v1148_v10 = vmul.f32 %v9728_v2, %v1086_v53  ;;  %vm1154_vm6 = vweird.f32 %v9728_v2  ;;  %v1014_v53 = vmul.f32 %v10667_v32, %v10667_v32 }
 0x281   : > { %v10628_v12 = vpack.c.bf16 %v1294_v9, %v1293_v5  ;;  %vm1155_vm8 = vmor %vm1153_vm7, %vm1154_vm6  ;;  %v950_v62 = vsel %vm913_vm3, %v10692_v7, 0.0 }
 0x282   : > { %v1149_v13 = vmul.f32 %v9728_v2, %v1148_v10  ;;  %v1146_v25 = vsel %vm1145_vm5, %v9726_v48, %v1142_v39  ;;  %v10669_v48 = vpop.f32.mrf.mxu1  ;;  %v1056_v54 = vsel %vm913_vm3, %v1014_v53, 0.0 }
 0x283   : > { %8969 = vmatmul.msk.bf16.gmra.mxu1 %vm913_vm3, %v10628_v12  ;;  %8985 = vmatmul.msk.bf16.gmra.mxu2 %vm913_vm3, %v10628_v12  ;;  %v1261_v28 = vmul.f32 %v1146_v25, %v10512_v47 }
 0x284   : > { %v1150_v22 = vmul.f32 0.5, %v1149_v13  ;;  %1328 = vadd.xlane.f32.xlu1 %v1327_v8 }
 0x285   : > { %v1278_v55 = vmul.f32 %v10553_v40, %v1261_v28 }
 0x286   : > { %v1151_v23 = vsub.f32 1.5, %v1150_v22 }
 0x287   : > { %v1295_v47 = vadd.f32 %v10563_v51, %v1278_v55 }
 0x288   : > { %v1152_v29 = vmul.f32 %v9728_v2, %v1151_v23 }
 0x28a   : > { %v1156_v63 = vsel %vm1155_vm8, %v9728_v2, %v1152_v29  ;;  %v689_v0 = vpop.f32.mrf.mxu1 }
 0x28b   : > { %v1262_v31 = vmul.f32 %v1156_v63, %v10519_v52  ;;  %v1050_v52 = vsel %vm913_vm3, %v1012_v38, 0.0  ;;  %v10680_v41 = vadd.f32 %v10470_v16, %v689_v0 }
 0x28c   : > { %1048 = vadd.xlane.f32.xlu1 %v1047_v46 }
 0x28d   : > { %v1279_v1 = vmul.f32 %v10553_v40, %v1262_v31  ;;  %v1339_v56 = vsel %vm913_vm3, %v10680_v41, 0.0 }
 0x28f   : > { %v1296_v35 = vadd.f32 %v10563_v51, %v1279_v1 }
 0x291   : > { %v10655_v43 = vpack.c.bf16 %v1296_v35, %v1295_v47 }
 0x292   : > { %v10734_v37 = vpop.f32.mrf.mxu1 }
 0x293   : > { %14709 = vst [vmem:[#allocation10_spill] sm:$0xff] %v10655_v43  ;;  %8970 = vmatmul.msk.bf16.gmra.mxu1 %vm913_vm3, %v10655_v43  ;;  %8986 = vmatmul.msk.bf16.gmra.mxu2 %vm913_vm3, %v10655_v43 }
 0x294   : > { %1051 = vadd.xlane.f32.xlu1 %v1050_v52 }
 0x29c   : > { %1334 = vadd.xlane.f32.xlu1 %v1333_v49 }
 0x2a4   : > { %1057 = vadd.xlane.f32.xlu1 %v1056_v54 }
 0x2ac   : > { %1340 = vadd.xlane.f32.xlu1 %v1339_v56 }
 0x2bf   : > { %v1043_v42 = vpop.xlane.xlu1 %1042 }
 0x2c0   : > { %v1073_v10 = vmul.f32 %v1043_v42, %v10442_v60 }
 0x2c2   : > { %v10712_v22 = vadd.f32 1e-05, %v1073_v10 }
 0x2c3   : > { %v815_v59 = vpop.trf.xlu2 }
 0x2c4   : > { %8936 = vmatmul.msk.f32.vlgmr.msrb.gmra.mxu0 %vm632_vm2, %v815_v59  ;;  %vm1183_vm5 = vweird.f32 %v10712_v22 }
 0x2c7   : > { %v1046_v19 = vpop.xlane.xlu1 %1045 }
 0x2c8   : > { %v1074_v34 = vmul.f32 %v1046_v19, %v10442_v60 }
 0x2ca   : > { %v10708_v25 = vadd.f32 1e-05, %v1074_v34 }
 0x2cb   : > { %v816_v5 = vpop.trf.xlu2 }
 0x2cc   : > { %8952 = vmatmul.msk.bf16.vlgmr.msra.gmra.mxu0 %vm913_vm3, %v10576_v61  ;;  %8937 = vmatmul.msk.f32.vlgmr.msra.gmra.mxu3 %vm632_vm2, %v816_v5  ;;  %vm1193_vm1 = vweird.f32 %v10708_v25 }
 0x2cf   : > { %v10694_v15 = vpop.xlane.xlu1 %957 }
 0x2d3   : > { %951 = vadd.xlane.f32.xlu2 %v950_v62  ;;  %v817_v9 = vpop.trf.xlu2 }
 0x2d4   : > { %8938 = vmatmul.msk.f32.gmra.mxu3 %vm632_vm2, %v817_v9 }
 0x2d7   : > { %v961_v2 = vpop.xlane.xlu1 %960 }
 0x2d8   : > { %v984_v52 = vmul.f32 %v10442_v60, %v961_v2 }
 0x2db   : > { %v818_v8 = vpop.trf.xlu2 }
 0x2dc   : > { %8953 = vmatmul.msk.bf16.gmra.mxu0 %vm913_vm3, %v10628_v12  ;;  %8939 = vmatmul.msk.f32.gmra.mxu3 %vm632_vm2, %v818_v8 }
 0x2df   : > { %v10701_v6 = vpop.xlane.xlu1 %1325 }
 0x2e3   : > { %v819_v63 = vpop.trf.xlu2 }
 0x2e4   : > { %8940 = vmatmul.msk.f32.gmra.mxu3 %vm632_vm2, %v819_v63 }
 0x2e7   : > { %v1037_v21 = vpop.xlane.xlu1 %1036 }
 0x2e8   : > { %v1071_v39 = vmul.f32 %v1037_v21, %v10442_v60 }
 0x2ea   : > { %v1087_v13 = vadd.f32 1e-05, %v1071_v39 }
 0x2eb   : > { %v820_v50 = vpop.trf.xlu2 }
 0x2ec   : > { %9729 = vrsqrt.f32 %v1087_v13  ;;  %8954 = vmatmul.msk.bf16.gmra.mxu0 %vm913_vm3, %v10655_v43  ;;  %8941 = vmatmul.msk.f32.gmra.mxu3 %vm632_vm2, %v820_v50  ;;  %vm1163_vm10 = vweird.f32 %v1087_v13 }
 0x2ed   : > { %9731 = vrsqrt.f32 %v10708_v25 }
 0x2ee   : > { %9733 = vrsqrt.f32 %v10712_v22 }
 0x2ef   : > { %v1040_v23 = vpop.xlane.xlu1 %1039 }
 0x2f0   : > { %v1072_v26 = vmul.f32 %v1040_v23, %v10442_v60 }
 0x2f2   : > { %v9730_v28 = vpop.eup %9729  ;;  %v1088_v27 = vadd.f32 1e-05, %v1072_v26 }
 0x2f3   : > { %v1158_v29 = vmul.f32 %v9730_v28, %v1087_v13  ;;  %v10718_v31 = vpop.eup %9731  ;;  %vm1164_vm9 = vweird.f32 %v9730_v28  ;;  %v821_v23 = vpop.trf.xlu2 }
 0x2f4   : > { %9735 = vrsqrt.f32 %v1088_v27  ;;  %v10720_v47 = vpop.eup %9733  ;;  %v1188_v38 = vmul.f32 %v10718_v31, %v10708_v25  ;;  %vm1165_vm11 = vmor %vm1163_vm10, %vm1164_vm9  ;;  %vm1173_vm13 = vweird.f32 %v1088_v27  ;;  %8942 = vmatmul.msk.f32.gmra.mxu3 %vm632_vm2, %v821_v23  ;;  %vm1194_vm15 = vweird.f32 %v10718_v31 }
 0x2f5   : > { %v1159_v55 = vmul.f32 %v9730_v28, %v1158_v29  ;;  %v1178_v49 = vmul.f32 %v10720_v47, %v10712_v22  ;;  %vm1184_vm0 = vweird.f32 %v10720_v47  ;;  %vm1195_vm4 = vmor %vm1193_vm1, %vm1194_vm15 }
 0x2f6   : > { %v1189_v56 = vmul.f32 %v10718_v31, %v1188_v38  ;;  %vm1185_vm6 = vmor %vm1183_vm5, %vm1184_vm0 }
 0x2f7   : > { %v1160_v46 = vmul.f32 0.5, %v1159_v55  ;;  %v1329_v1 = vpop.xlane.xlu1 %1328  ;;  %v1179_v19 = vmul.f32 %v10720_v47, %v1178_v49  ;;  %v695_v55 = vpop.f32.mrf.mxu1 }
 0x2f8   : > { %v1373_v35 = vmul.f32 %v1329_v1, %v10442_v60  ;;  %v1190_v21 = vmul.f32 0.5, %v1189_v56 }
 0x2f9   : > { %v1161_v14 = vsub.f32 1.5, %v1160_v46  ;;  %v1180_v13 = vmul.f32 0.5, %v1179_v19 }
 0x2fa   : > { %v9736_v33 = vpop.eup %9735  ;;  %v10727_v44 = vsub.f32 %v10622_v4, %v1373_v35  ;;  %v10738_v4 = vsub.f32 %v10587_v3, %v984_v52  ;;  %v1191_v26 = vsub.f32 1.5, %v1190_v21 }
 0x2fb   : > { %v1162_v53 = vmul.f32 %v9730_v28, %v1161_v14  ;;  %v1168_v54 = vmul.f32 %v9736_v33, %v1088_v27  ;;  %vm1174_vm12 = vweird.f32 %v9736_v33  ;;  %v1181_v46 = vsub.f32 1.5, %v1180_v13 }
 0x2fc   : > { %v1405_v0 = vmul.f32 %v10727_v44, %v10727_v44  ;;  %v1016_v3 = vmul.f32 %v10738_v4, %v10738_v4  ;;  %vm1175_vm14 = vmor %vm1173_vm13, %vm1174_vm12  ;;  %v1192_v38 = vmul.f32 %v10718_v31, %v1191_v26  ;;  %vm2300_vm12 = vcmask 130048  }
 0x2fd   : > { %v1169_v42 = vmul.f32 %v9736_v33, %v1168_v54  ;;  %v1166_v62 = vsel %vm1165_vm11, %v9730_v28, %v1162_v53  ;;  %v1182_v53 = vmul.f32 %v10720_v47, %v1181_v46 }
 0x2fe   : > { %v1423_v59 = vsel %vm913_vm3, %v1405_v0, 0.0  ;;  %v1263_v39 = vmul.f32 %v1166_v62, %v10599_v18  ;;  %v1062_v63 = vsel %vm913_vm3, %v1016_v3, 0.0  ;;  %v1196_v0 = vsel %vm1195_vm4, %v10718_v31, %v1192_v38 }
 0x2ff   : > { %v1170_v2 = vmul.f32 0.5, %v1169_v42  ;;  %1424 = vadd.xlane.f32.xlu1 %v1423_v59  ;;  %v1049_v5 = vpop.xlane.xlu1 %1048  ;;  %v1186_v56 = vsel %vm1185_vm6, %v10720_v47, %v1182_v53  ;;  %v1266_v31 = vmul.f32 %v1196_v0, %v10558_v45 }
 0x300   : > { %v1075_v9 = vmul.f32 %v1049_v5, %v10442_v60  ;;  %v1280_v29 = vmul.f32 %v10553_v40, %v1263_v39  ;;  %v1265_v62 = vmul.f32 %v1186_v56, %v10546_v20  ;;  %v822_v5 = vpop.trf.xlu2  ;;  %v10834_v56 = vadd.f32 %v10470_v16, %v10669_v48 }
 0x301   : > { %v1171_v34 = vsub.f32 1.5, %v1170_v2  ;;  %8943 = vmatmul.msk.f32.gmra.mxu3 %vm632_vm2, %v822_v5  ;;  %v1283_v47 = vmul.f32 %v10553_v40, %v1266_v31  ;;  %v10857_v5 = vpop.f32.mrf.mxu2 }
 0x302   : > { %v10744_v10 = vadd.f32 1e-05, %v1075_v9  ;;  %v1282_v45 = vmul.f32 %v10553_v40, %v1265_v62 }
 0x303   : > { %v1172_v8 = vmul.f32 %v9736_v33, %v1171_v34 }
 0x304   : > { %9737 = vrsqrt.f32 %v10744_v10  ;;  %v1299_v26 = vadd.f32 %v10563_v51, %v1282_v45  ;;  %vm1203_vm10 = vweird.f32 %v10744_v10 }
 0x305   : > { %v1176_v28 = vsel %vm1175_vm14, %v9736_v33, %v1172_v8  ;;  %v10758_v33 = vadd.f32 %v10470_v16, %v695_v55  ;;  %v1300_v8 = vadd.f32 %v10563_v51, %v1283_v47 }
 0x306   : > { %v1264_v18 = vmul.f32 %v1176_v28, %v10609_v36  ;;  %v1297_v36 = vadd.f32 %v10563_v51, %v1280_v29 }
 0x307   : > { %1063 = vadd.xlane.f32.xlu1 %v1062_v63  ;;  %v1052_v1 = vpop.xlane.xlu1 %1051  ;;  %v1345_v25 = vsel %vm913_vm3, %v10758_v33, 0.0 }
 0x308   : > { %v1281_v27 = vmul.f32 %v10553_v40, %v1264_v18  ;;  %v1076_v35 = vmul.f32 %v1052_v1, %v10442_v60  ;;  %v10795_v18 = vpack.c.bf16 %v1300_v8, %v1299_v26 }
 0x30a   : > { %v9738_v14 = vpop.eup %9737  ;;  %v1298_v52 = vadd.f32 %v10563_v51, %v1281_v27  ;;  %v1092_v49 = vadd.f32 1e-05, %v1076_v35  ;;  %14711 = vst [vmem:[#allocation12_spill] sm:$0xff] %v10795_v18 }
 0x30b   : > { %v1198_v54 = vmul.f32 %v9738_v14, %v10744_v10  ;;  %vm1204_vm2 = vweird.f32 %v9738_v14 }
 0x30c   : > { %v10766_v50 = vpack.c.bf16 %v1298_v52, %v1297_v36  ;;  %9739 = vrsqrt.f32 %v1092_v49  ;;  %vm1213_vm8 = vweird.f32 %v1092_v49  ;;  %vm1205_vm11 = vmor %vm1203_vm10, %vm1204_vm2 }
 0x30d   : > { %v1199_v42 = vmul.f32 %v9738_v14, %v1198_v54 }
 0x30e   : > { %14710 = vst [vmem:[#allocation11_spill] sm:$0xff] %v10766_v50  ;;  %8955 = vmatmul.msk.bf16.gmra.mxu0 %vm913_vm3, %v10766_v50  ;;  %8971 = vmatmul.msk.bf16.gmra.mxu1 %vm913_vm3, %v10766_v50 }
 0x30f   : > { %8987 = vmatmul.msk.bf16.gmra.mxu2 %vm913_vm3, %v10766_v50  ;;  %1346 = vadd.xlane.f32.xlu1 %v1345_v25  ;;  %v1335_v22 = vpop.xlane.xlu1 %1334  ;;  %v1200_v9 = vmul.f32 0.5, %v1199_v42  ;;  %v983_v42 = vmul.f32 %v10442_v60, %v10694_v15 }
 0x310   : > { %v1375_v59 = vmul.f32 %v1335_v22, %v10442_v60  ;;  %v10838_v22 = vpop.f32.mrf.mxu1 }
 0x311   : > { %v1201_v13 = vsub.f32 1.5, %v1200_v9  ;;  %v10841_v31 = vsub.f32 %v10572_v58, %v983_v42 }
 0x312   : > { %v9740_v19 = vpop.eup %9739  ;;  %v10783_v2 = vsub.f32 %v10664_v57, %v1375_v59  ;;  %v1372_v59 = vmul.f32 %v10701_v6, %v10442_v60 }
 0x313   : > { %v1208_v21 = vmul.f32 %v9740_v19, %v1092_v49  ;;  %vm1214_vm7 = vweird.f32 %v9740_v19  ;;  %v1202_v28 = vmul.f32 %v9738_v14, %v1201_v13 }
 0x314   : > { %v1407_v34 = vmul.f32 %v10783_v2, %v10783_v2  ;;  %vm1215_vm9 = vmor %vm1213_vm8, %vm1214_vm7  ;;  %v10850_v48 = vsub.f32 %v10594_v11, %v1372_v59  ;;  %v10864_v11 = vadd.f32 %v10470_v16, %v10734_v37 }
 0x315   : > { %v1209_v39 = vmul.f32 %v9740_v19, %v1208_v21  ;;  %v1206_v55 = vsel %vm1205_vm11, %v9738_v14, %v1202_v28  ;;  %v1332_v21 = vpop.xlane.xlu0 %1331 }
 0x316   : > { %v1429_v3 = vsel %vm913_vm3, %v1407_v34, 0.0  ;;  %v1267_v35 = vmul.f32 %v1206_v55, %v10631_v17  ;;  %v1404_v58 = vmul.f32 %v10850_v48, %v10850_v48  ;;  %v1374_v47 = vmul.f32 %v1332_v21, %v10442_v60 }
 0x317   : > { %v1210_v20 = vmul.f32 0.5, %v1209_v39  ;;  %1430 = vadd.xlane.f32.xlu1 %v1429_v3  ;;  %v10791_v57 = vpop.xlane.xlu1 %1057  ;;  %v1342_v39 = vsel %vm913_vm3, %v10864_v11, 0.0  ;;  %v10872_v3 = vpop.f32.mrf.mxu2 }
 0x318   : > { %v1284_v14 = vmul.f32 %v10553_v40, %v1267_v35  ;;  %v10852_v62 = vpop.f32.mrf.mxu1  ;;  %v1420_v6 = vsel %vm913_vm3, %v1404_v58, 0.0  ;;  %v10868_v34 = vsub.f32 %v10478_v24, %v1374_v47 }
 0x319   : > { %v1211_v23 = vsub.f32 1.5, %v1210_v20 }
 0x31a   : > { %v1406_v20 = vmul.f32 %v10868_v34, %v10868_v34 }
 0x31b   : > { %v1212_v29 = vmul.f32 %v9740_v19, %v1211_v23 }
 0x31c   : > { %v1426_v37 = vsel %vm913_vm3, %v1406_v20, 0.0 }
 0x31d   : > { %v1216_v63 = vsel %vm1215_vm9, %v9740_v19, %v1212_v29  ;;  %v1015_v19 = vmul.f32 %v10841_v31, %v10841_v31 }
 0x31e   : > { %8956 = vmatmul.msk.bf16.gmra.mxu0 %vm913_vm3, %v10795_v18  ;;  %8972 = vmatmul.msk.bf16.gmra.mxu1 %vm913_vm3, %v10795_v18  ;;  %v1268_v1 = vmul.f32 %v1216_v63, %v10645_v30  ;;  %v1301_v30 = vadd.f32 %v10563_v51, %v1284_v14 }
 0x31f   : > { %8988 = vmatmul.msk.bf16.gmra.mxu2 %vm913_vm3, %v10795_v18  ;;  %v1341_v46 = vpop.xlane.xlu1 %1340  ;;  %v1059_v15 = vsel %vm913_vm3, %v1015_v19, 0.0  ;;  %v10879_v23 = vpop.f32.mrf.mxu2 }
 0x320   : > { %v1377_v27 = vmul.f32 %v1341_v46, %v10442_v60  ;;  %v1285_v38 = vmul.f32 %v10553_v40, %v1268_v1  ;;  %v10859_v9 = vpop.f32.mrf.mxu1 }
 0x322   : > { %v10808_v10 = vsub.f32 %v10680_v41, %v1377_v27  ;;  %v1302_v49 = vadd.f32 %v10563_v51, %v1285_v38 }
 0x324   : > { %v1409_v36 = vmul.f32 %v10808_v10, %v10808_v10  ;;  %v10817_v53 = vpack.c.bf16 %v1302_v49, %v1301_v30 }
 0x326   : > { %v1435_v52 = vsel %vm913_vm3, %v1409_v36, 0.0  ;;  %14712 = vst [vmem:[#allocation13_spill] sm:$0xff] %v10817_v53 }
 0x327   : > { %1436 = vadd.xlane.f32.xlu1 %v1435_v52  ;;  %v10885_v29 = vpop.f32.mrf.mxu2 }
 0x328   : > { %v1863_v13 = vpop.f32.mrf.mxu1 }
 0x32e   : > { %8957 = vmatmul.msk.bf16.gmra.mxu0 %vm913_vm3, %v10817_v53  ;;  %8973 = vmatmul.msk.bf16.gmra.mxu1 %vm913_vm3, %v10817_v53 }
 0x32f   : > { %8989 = vmatmul.msk.bf16.gmra.mxu2 %vm913_vm3, %v10817_v53  ;;  %v10894_v36 = vpop.f32.mrf.mxu2 }
 0x330   : > { %v1866_v26 = vpop.f32.mrf.mxu1 }
 0x331   : > { %v1900_v58 = vpack.c.bf16 %v1866_v26, %v1866_v26  ;;  %v1898_v26 = vpack.c.bf16 %v10859_v9, %v10859_v9  ;;  %v1896_v9 = vpack.c.bf16 %v10838_v22, %v10838_v22  ;;  %v1980_v22 = vpack.c.bf16 %v10885_v29, %v10885_v29 }
 0x338   : > { %v1868_v46 = vpop.f32.mrf.mxu1 }
 0x339   : > { %v1901_v42 = vpack.c.bf16 %v1868_v46, %v1868_v46 }
 0x33b   : > { %v2293_v21 = vunpack.c.l.b16 %v1901_v42 }
 0x346   : > { %v952_v17 = vpop.xlane.xlu2 %951 }
 0x347   : > { %v981_v41 = vmul.f32 %v10442_v60, %v952_v17 }
 0x349   : > { %v10827_v54 = vsub.f32 %v10692_v7, %v981_v41  ;;  %v1336_v7 = vsel %vm913_vm3, %v10834_v56, 0.0 }
 0x34b   : > { %v1013_v0 = vmul.f32 %v10827_v54, %v10827_v54 }
 0x34d   : > { %v1053_v25 = vsel %vm913_vm3, %v1013_v0, 0.0 }
 0x34e   : > { %1054 = vadd.xlane.f32.xlu0 %v1053_v25  ;;  %v1949_v25 = vpop.f32.mrf.mxu2 }
 0x34f   : > { %v875_v45 = vpop.f32.mrf.mxu3 }
 0x350   : > { %v10897_v14 = vadd.f32 %v10470_v16, %v875_v45  ;;  %v2292_v45 = vunpack.c.l.b16 %v1900_v58 }
 0x352   : > { %v1351_v30 = vsel %vm913_vm3, %v10897_v14, 0.0 }
 0x356   : > { %1337 = vadd.xlane.f32.xlu0 %v1336_v7 }
 0x357   : > { %v10881_v24 = vpop.f32.mrf.mxu3 }
 0x35e   : > { %1060 = vadd.xlane.f32.xlu0 %v1059_v15 }
 0x35f   : > { %v881_v55 = vpop.f32.mrf.mxu3 }
 0x366   : > { %1421 = vadd.xlane.f32.xlu0 %v1420_v6 }
 0x367   : > { %v10899_v49 = vpop.f32.mrf.mxu3 }
 0x36e   : > { %1343 = vadd.xlane.f32.xlu0 %v1342_v39 }
 0x36f   : > { %v887_v19 = vpop.f32.mrf.mxu3 }
 0x370   : > { %v10910_v39 = vadd.f32 %v10470_v16, %v887_v19  ;;  %v2288_v19 = vunpack.c.l.b16 %v1896_v9 }
 0x372   : > { %v10876_v8 = vpop.xlane.xlu1 %1424 }
 0x376   : > { %1427 = vadd.xlane.f32.xlu0 %v1426_v37  ;;  %v1899_v37 = vpack.c.bf16 %v1863_v13, %v1863_v13  ;;  %v1897_v13 = vpack.c.bf16 %v10852_v62, %v10852_v62  ;;  %v1982_v62 = vpack.c.bf16 %v1949_v25, %v1949_v25 }
 0x377   : > { %v890_v46 = vpop.f32.mrf.mxu3 }
 0x37a   : > { %v10883_v28 = vpop.xlane.xlu1 %1063 }
 0x382   : > { %v1347_v63 = vpop.xlane.xlu1 %1346 }
 0x383   : > { %v1379_v1 = vmul.f32 %v1347_v63, %v10442_v60  ;;  %v2298_v63 = vpack.c.b16 %v2293_v21, %v2292_v45 }
 0x385   : > { %v10889_v27 = vsub.f32 %v10758_v33, %v1379_v1  ;;  %v10904_v33 = vadd.f32 %v10470_v16, %v881_v55  ;;  %v1363_v55 = vsel %vm913_vm3, %v10910_v39, 0.0  ;;  %v2291_v1 = vunpack.c.l.b16 %v1899_v37 }
 0x386   : > { %v2628_v37 = vunpack.c.l.b16 %v1982_v62 }
 0x387   : > { %v1411_v35 = vmul.f32 %v10889_v27, %v10889_v27  ;;  %v1357_v15 = vsel %vm913_vm3, %v10904_v33, 0.0 }
 0x389   : > { %v1441_v38 = vsel %vm913_vm3, %v1411_v35, 0.0  ;;  %v2320_v35 = vsel %vm2300_vm12, %v2298_v63, 0 }
 0x38a   : > { %1442 = vadd.xlane.f32.xlu1 %v1441_v38  ;;  %v10918_v38 = vadd.f32 %v10470_v16, %v890_v46  ;;  %v1977_v46 = vpack.c.bf16 %v10857_v5, %v10857_v5  ;;  %v1469_v5 = vmul.f32 %v10876_v8, %v10442_v60 }
 0x38b   : > { %v1871_v52 = vpop.f32.mrf.mxu1 }
 0x38c   : > { %v1902_v17 = vpack.c.bf16 %v1871_v52, %v1871_v52  ;;  %v2290_v52 = vunpack.c.l.b16 %v1898_v26  ;;  %v2626_v26 = vunpack.c.l.b16 %v1980_v22 }
 0x38e   : > { %v2294_v7 = vunpack.c.l.b16 %v1902_v17 }
 0x392   : > { %1352 = vadd.xlane.f32.xlu1 %v1351_v30  ;;  %v1952_v20 = vpop.f32.mrf.mxu2  ;;  %v2297_v30 = vpack.c.b16 %v2291_v1, %v2290_v52 }
 0x393   : > { %v1873_v41 = vpop.f32.mrf.mxu1 }
 0x394   : > { %v1903_v0 = vpack.c.bf16 %v1873_v41, %v1873_v41  ;;  %v1366_v41 = vsel %vm913_vm3, %v10918_v38, 0.0 }
 0x396   : > { %v2295_v59 = vunpack.c.l.b16 %v1903_v0  ;;  %v2289_v0 = vunpack.c.l.b16 %v1897_v13  ;;  %v2623_v13 = vunpack.c.l.b16 %v1977_v46 }
 0x398   : > { %v2299_v6 = vpack.c.b16 %v2295_v59, %v2294_v7  ;;  %v2317_v7 = vsel %vm2300_vm12, %v2297_v30, 0  ;;  %v1078_v59 = vmul.f32 %v10791_v57, %v10442_v60  ;;  %v1979_v57 = vpack.c.bf16 %v10879_v23, %v10879_v23 }
 0x399   : > { %v1080_v23 = vmul.f32 %v10883_v28, %v10442_v60 }
 0x39a   : > { %1358 = vadd.xlane.f32.xlu1 %v1357_v15  ;;  %v2323_v47 = vsel %vm2300_vm12, %v2299_v6, 0  ;;  %v1954_v17 = vpop.f32.mrf.mxu2  ;;  %v1983_v15 = vpack.c.bf16 %v1952_v20, %v1952_v20  ;;  %v2296_v6 = vpack.c.b16 %v2289_v0, %v2288_v19  ;;  %v1094_v21 = vadd.f32 1e-05, %v1078_v59 }
 0x39b   : > { %2329 = vmatpush.bf16.xpose.msra.mxu2 %v2323_v47  ;;  %v1984_v42 = vpack.c.bf16 %v1954_v17, %v1954_v17  ;;  %v1981_v47 = vpack.c.bf16 %v10894_v36, %v10894_v36  ;;  %v1978_v20 = vpack.c.bf16 %v10872_v3, %v10872_v3  ;;  %v2625_v29 = vunpack.c.l.b16 %v1979_v57 }
 0x39c   : > { %v2629_v45 = vunpack.c.l.b16 %v1983_v15  ;;  %9741 = vrsqrt.f32 %v1094_v21  ;;  %v10942_v9 = vadd.f32 1e-05, %v1080_v23  ;;  %v10948_v59 = vadd.f32 1e-05, %v1469_v5 }
 0x39d   : > { %v2630_v58 = vunpack.c.l.b16 %v1984_v42  ;;  %v2627_v25 = vunpack.c.l.b16 %v1981_v47  ;;  %v2632_v52 = vpack.c.b16 %v2626_v26, %v2625_v29  ;;  %vm1233_vm13 = vweird.f32 %v1094_v21 }
 0x39e   : > { %9743 = vrsqrt.f32 %v10942_v9  ;;  %vm1253_vm6 = vweird.f32 %v10942_v9  ;;  %vm1516_vm11 = vweird.f32 %v10948_v59 }
 0x39f   : > { %v2634_v63 = vpack.c.b16 %v2630_v58, %v2629_v45  ;;  %v2633_v36 = vpack.c.b16 %v2628_v37, %v2627_v25 }
 0x3a2   : > { %1364 = vadd.xlane.f32.xlu1 %v1363_v55  ;;  %v2314_v55 = vsel %vm2300_vm12, %v2296_v6, 0  ;;  %v9742_v1 = vpop.eup %9741 }
 0x3a3   : > { %2330 = vmatpush.bf16.xpose.msra.mxu2 %v2320_v35  ;;  %v2624_v35 = vunpack.c.l.b16 %v1978_v20  ;;  %v1228_v30 = vmul.f32 %v9742_v1, %v1094_v21  ;;  %vm1234_vm14 = vweird.f32 %v9742_v1  ;;  %v1431_v20 = vpop.xlane.xlu1 %1430 }
 0x3a4   : > { %v10950_v15 = vpop.eup %9743  ;;  %vm10957_vm15 = vmor %vm1233_vm13, %vm1234_vm14 }
 0x3a5   : > { %v2631_v17 = vpack.c.b16 %v2624_v35, %v2623_v13  ;;  %v1248_v45 = vmul.f32 %v10950_v15, %v10942_v9  ;;  %vm1254_vm5 = vweird.f32 %v10950_v15 }
 0x3a6   : > { %vm1255_vm7 = vmor %vm1253_vm6, %vm1254_vm5 }
 0x3a7   : > { %v1249_v25 = vmul.f32 %v10950_v15, %v1248_v45 }
 0x3a9   : > { %v1250_v23 = vmul.f32 0.5, %v1249_v25 }
 0x3aa   : > { %1367 = vadd.xlane.f32.xlu1 %v1366_v41  ;;  %v1229_v41 = vmul.f32 %v9742_v1, %v1228_v30  ;;  %v9618_v30 = vld [vmem:[%s14635_s8] sm:$0xff] }
 0x3ab   : > { %2331 = vmatpush.bf16.xpose.msra.mxu2 %v2317_v7 }
 0x3ac   : > { %v1230_v42 = vmul.f32 0.5, %v1229_v41  ;;  %v10982_v41 = vpop.f32.mrf.mxu0 }
 0x3ae   : > { %v1231_v28 = vsub.f32 1.5, %v1230_v42 }
 0x3b0   : > { %v1232_v6 = vmul.f32 %v9742_v1, %v1231_v28  ;;  %v9621_v28 = vld [vmem:[%s14636_s9 + $0x8] sm:$0xff] }
 0x3b1   : > { %2120 = vmatpush.bf16.msrb.mxu0 %v9621_v28 }
 0x3b3   : > { %2332 = vmatpush.bf16.xpose.msra.mxu2 %v2314_v55 }
 0x3bb   : > { %2655 = vmatpush.bf16.msrb.mxu2 %v2634_v63  ;;  %v1236_v63 = vsel %vm10957_vm15, %v9742_v1, %v1232_v6 }
 0x3bc   : > { %v1270_v29 = vmul.f32 %v1236_v63, %v10667_v32  ;;  %v9622_v63 = vld [vmem:[%s14637_s10] sm:$0xff] }
 0x3be   : > { %v1287_v32 = vmul.f32 %v10553_v40, %v1270_v29 }
 0x3bf   : > { %2656 = vmatpush.bf16.msrb.mxu2 %v2633_v36 }
 0x3c0   : > { %v1304_v47 = vadd.f32 %v10563_v51, %v1287_v32 }
 0x3c1   : > { %v1055_v3 = vpop.xlane.xlu0 %1054 }
 0x3c2   : > { %v1077_v0 = vmul.f32 %v1055_v3, %v10442_v60 }
 0x3c3   : > { %2657 = vmatpush.bf16.msrb.mxu2 %v2632_v52  ;;  %v1471_v52 = vmul.f32 %v1431_v20, %v10442_v60 }
 0x3c4   : > { %v1093_v7 = vadd.f32 1e-05, %v1077_v0 }
 0x3c5   : > { %v10986_v5 = vadd.f32 1e-05, %v1471_v52 }
 0x3c6   : > { %9745 = vrsqrt.f32 %v1093_v7  ;;  %vm1223_vm1 = vweird.f32 %v1093_v7 }
 0x3c7   : > { %2658 = vmatpush.bf16.msrb.mxu2 %v2631_v17  ;;  %9747 = vrsqrt.f32 %v10948_v59 }
 0x3c9   : > { %v1338_v19 = vpop.xlane.xlu0 %1337 }
 0x3ca   : > { %v1376_v62 = vmul.f32 %v1338_v19, %v10442_v60  ;;  %v1251_v19 = vsub.f32 1.5, %v1250_v23 }
 0x3cc   : > { %v9746_v58 = vpop.eup %9745  ;;  %v10955_v8 = vsub.f32 %v10834_v56, %v1376_v62  ;;  %v9619_v56 = vld [vmem:[%s14635_s8 + $0x8] sm:$0xff] }
 0x3cd   : > { %v1218_v22 = vmul.f32 %v9746_v58, %v1093_v7  ;;  %v10971_v57 = vpop.eup %9747  ;;  %2039 = vmatpush.bf16.msrb.mxu3 %v9619_v56  ;;  %vm1224_vm0 = vweird.f32 %v9746_v58  ;;  %v9623_v7 = vld [vmem:[%s14637_s10 + $0x8] sm:$0xff] }
 0x3ce   : > { %v1408_v21 = vmul.f32 %v10955_v8, %v10955_v8  ;;  %v1511_v35 = vmul.f32 %v10971_v57, %v10948_v59  ;;  %vm1225_vm4 = vmor %vm1223_vm1, %vm1224_vm0  ;;  %2201 = vmatpush.bf16.msra.mxu1 %v9623_v7  ;;  %vm1517_vm8 = vweird.f32 %v10971_v57 }
 0x3cf   : > { %v1219_v37 = vmul.f32 %v9746_v58, %v1218_v22  ;;  %vm11038_vm13 = vmor %vm1516_vm11, %vm1517_vm8 }
 0x3d0   : > { %v1432_v55 = vsel %vm913_vm3, %v1408_v21, 0.0  ;;  %v1512_v0 = vmul.f32 %v10971_v57, %v1511_v35 }
 0x3d1   : > { %v1220_v26 = vmul.f32 0.5, %v1219_v37  ;;  %1433 = vadd.xlane.f32.xlu0 %v1432_v55  ;;  %v1061_v36 = vpop.xlane.xlu0 %1060  ;;  %2040 = vmatpush.bf16.msrb.mxu3 %v9618_v30  ;;  %v9620_v37 = vld [vmem:[%s14636_s9] sm:$0xff]  ;;  %v1252_v55 = vmul.f32 %v10950_v15, %v1251_v19 }
 0x3d2   : > { %v1079_v46 = vmul.f32 %v1061_v36, %v10442_v60  ;;  %2121 = vmatpush.bf16.msrb.mxu0 %v9620_v37  ;;  %2202 = vmatpush.bf16.msra.mxu1 %v9622_v63 }
 0x3d3   : > { %v1221_v1 = vsub.f32 1.5, %v1220_v26  ;;  %v11014_v26 = vpop.f32.mrf.mxu0 }
 0x3d4   : > { %v1095_v13 = vadd.f32 1e-05, %v1079_v46  ;;  %v1256_v46 = vsel %vm1255_vm7, %v10950_v15, %v1252_v55 }
 0x3d5   : > { %v1222_v17 = vmul.f32 %v9746_v58, %v1221_v1 }
 0x3d6   : > { %9749 = vrsqrt.f32 %v1095_v13  ;;  %vm1243_vm9 = vweird.f32 %v1095_v13 }
 0x3d7   : > { %v1226_v3 = vsel %vm1225_vm4, %v9746_v58, %v1222_v17  ;;  %9751 = vrsqrt.f32 %v10986_v5  ;;  %v1272_v17 = vmul.f32 %v1256_v46, %v10738_v4  ;;  %vm1536_vm4 = vweird.f32 %v10986_v5 }
 0x3d8   : > { %v1269_v42 = vmul.f32 %v1226_v3, %v10827_v54  ;;  %v1513_v54 = vmul.f32 0.5, %v1512_v0  ;;  %v1815_v4 = vpack.c.bf16 %v11014_v26, %v11014_v26 }
 0x3d9   : > { %v1422_v62 = vpop.xlane.xlu0 %1421 }
 0x3da   : > { %v1286_v6 = vmul.f32 %v10553_v40, %v1269_v42  ;;  %v1468_v58 = vmul.f32 %v1422_v62, %v10442_v60  ;;  %v1514_v36 = vsub.f32 1.5, %v1513_v54 }
 0x3dc   : > { %v9750_v45 = vpop.eup %9749  ;;  %v1303_v22 = vadd.f32 %v10563_v51, %v1286_v6  ;;  %v11000_v21 = vadd.f32 1e-05, %v1468_v58  ;;  %v1515_v23 = vmul.f32 %v10971_v57, %v1514_v36 }
 0x3dd   : > { %v1238_v56 = vmul.f32 %v9750_v45, %v1095_v13  ;;  %v11023_v35 = vpop.eup %9751  ;;  %vm1244_vm2 = vweird.f32 %v9750_v45 }
 0x3de   : > { %v11010_v25 = vpack.c.bf16 %v1304_v47, %v1303_v22  ;;  %9753 = vrsqrt.f32 %v11000_v21  ;;  %v1531_v32 = vmul.f32 %v11023_v35, %v10986_v5  ;;  %vm1245_vm10 = vmor %vm1243_vm9, %vm1244_vm2  ;;  %v1519_v62 = vsel %vm11038_vm13, %v10971_v57, %v1515_v23  ;;  %v1777_v47 = vpop.f32.mrf.mxu0 }
 0x3df   : > { %v1239_v20 = vmul.f32 %v9750_v45, %v1238_v56  ;;  %v11053_v22 = vadd.f32 %v10470_v16, %v10982_v41  ;;  %v1661_v63 = vmul.f32 %v1519_v62, %v10727_v44  ;;  %vm1506_vm15 = vweird.f32 %v11000_v21 }
 0x3e0   : > { %14715 = vst [vmem:[#allocation14_spill] sm:$0xff] %v11010_v25  ;;  %8958 = vmatmul.msk.bf16.gmra.mxu0 %vm913_vm3, %v11010_v25  ;;  %8974 = vmatmul.msk.bf16.gmra.mxu1 %vm913_vm3, %v11010_v25  ;;  %v1532_v6 = vmul.f32 %v11023_v35, %v1531_v32  ;;  %v11082_v23 = vadd.f32 %v10470_v16, %v10881_v24  ;;  %vm1537_vm1 = vweird.f32 %v11023_v35 }
 0x3e1   : > { %v1240_v29 = vmul.f32 0.5, %v1239_v20  ;;  %8990 = vmatmul.msk.bf16.gmra.mxu2 %vm913_vm3, %v11010_v25  ;;  %v1344_v1 = vpop.xlane.xlu0 %1343  ;;  %vm1538_vm5 = vmor %vm1536_vm4, %vm1537_vm1 }
 0x3e2   : > { %v1378_v9 = vmul.f32 %v1344_v1, %v10442_v60  ;;  %v1533_v20 = vmul.f32 0.5, %v1532_v6  ;;  %v1354_v24 = vsel %vm913_vm3, %v11082_v23, 0.0  ;;  %v11102_v6 = vadd.f32 %v10470_v16, %v10899_v49 }
 0x3e3   : > { %v1241_v52 = vsub.f32 1.5, %v1240_v29 }
 0x3e4   : > { %v9754_v30 = vpop.eup %9753  ;;  %v11030_v15 = vsub.f32 %v10864_v11, %v1378_v9  ;;  %v1289_v11 = vmul.f32 %v10553_v40, %v1272_v17 }
 0x3e5   : > { %v1242_v3 = vmul.f32 %v9750_v45, %v1241_v52  ;;  %v1501_v0 = vmul.f32 %v9754_v30, %v11000_v21  ;;  %vm1507_vm14 = vweird.f32 %v9754_v30  ;;  %v1534_v21 = vsub.f32 1.5, %v1533_v20 }
 0x3e6   : > { %v1410_v42 = vmul.f32 %v11030_v15, %v11030_v15  ;;  %v1306_v55 = vadd.f32 %v10563_v51, %v1289_v11  ;;  %vm1508_vm0 = vmor %vm1506_vm15, %vm1507_vm14 }
 0x3e7   : > { %v1246_v28 = vsel %vm1245_vm10, %v9750_v45, %v1242_v3  ;;  %v1502_v7 = vmul.f32 %v9754_v30, %v1501_v0  ;;  %v1535_v32 = vmul.f32 %v11023_v35, %v1534_v21  ;;  %v11087_v3 = vpop.xlane.xlu1 %1436 }
 0x3e8   : > { %v1271_v19 = vmul.f32 %v1246_v28, %v10841_v31  ;;  %v1438_v13 = vsel %vm913_vm3, %v1410_v42, 0.0  ;;  %v10165_v31 = vld [vmem:[%s14629_s2] sm:$0xff]  ;;  %v1816_v28 = vpack.c.bf16 %v1777_v47, %v1777_v47 }
 0x3e9   : > { %v1503_v58 = vmul.f32 0.5, %v1502_v7  ;;  %1439 = vadd.xlane.f32.xlu0 %v1438_v13  ;;  %v1428_v59 = vpop.xlane.xlu0 %1427  ;;  %v11058_v37 = vperm.slane %v10165_v31, 4  ;;  %v11066_v29 = vperm.slane %v10165_v31, 5  ;;  %v1539_v11 = vsel %vm1538_vm5, %v11023_v35, %v1535_v32 }
 0x3ea   : > { %v1288_v45 = vmul.f32 %v10553_v40, %v1271_v19  ;;  %v1470_v54 = vmul.f32 %v1428_v59, %v10442_v60  ;;  %v2269_v13 = vunpack.c.l.b16 %v1816_v28  ;;  %v1663_v5 = vmul.f32 %v1539_v11, %v10783_v2 }
 0x3eb   : > { %v1504_v57 = vsub.f32 1.5, %v1503_v58  ;;  %v1678_v1 = vmul.f32 %v11058_v37, %v1661_v63  ;;  %v2268_v58 = vunpack.c.l.b16 %v1815_v4  ;;  %v1360_v2 = vsel %vm913_vm3, %v11102_v6, 0.0 }
 0x3ec   : > { %v1305_v40 = vadd.f32 %v10563_v51, %v1288_v45  ;;  %v1486_v56 = vadd.f32 1e-05, %v1470_v54  ;;  %v1348_v51 = vsel %vm913_vm3, %v11053_v22, 0.0  ;;  %v1680_v54 = vmul.f32 %v11058_v37, %v1663_v5 }
 0x3ed   : > { %v1505_v36 = vmul.f32 %v9754_v30, %v1504_v57  ;;  %v2276_v26 = vpack.c.b16 %v2269_v13, %v2268_v58 }
 0x3ee   : > { %v11064_v41 = vpack.c.bf16 %v1306_v55, %v1305_v40  ;;  %9755 = vrsqrt.f32 %v1486_v56  ;;  %vm1526_vm7 = vweird.f32 %v1486_v56  ;;  %v1697_v57 = vadd.f32 %v11066_v29, %v1680_v54 }
 0x3ef   : > { %v1509_v46 = vsel %vm1508_vm0, %v9754_v30, %v1505_v36  ;;  %v1780_v30 = vpop.f32.mrf.mxu0 }
 0x3f0   : > { %14718 = vst [vmem:[#allocation15_spill] sm:$0xff] %v11064_v41  ;;  %v1660_v44 = vmul.f32 %v1509_v46, %v10850_v48  ;;  %8959 = vmatmul.msk.bf16.gmra.mxu0 %vm913_vm3, %v11064_v41  ;;  %8975 = vmatmul.msk.bf16.gmra.mxu1 %vm913_vm3, %v11064_v41  ;;  %v1695_v48 = vadd.f32 %v11066_v29, %v1678_v1 }
 0x3f1   : > { %8991 = vmatmul.msk.bf16.gmra.mxu2 %vm913_vm3, %v11064_v41  ;;  %1349 = vadd.xlane.f32.xlu0 %v1348_v51  ;;  %v1817_v46 = vpack.c.bf16 %v1780_v30, %v1780_v30 }
 0x3f2   : > { %v1677_v9 = vmul.f32 %v11058_v37, %v1660_v44 }
 0x3f3   : > { %v2270_v21 = vunpack.c.l.b16 %v1817_v46 }
 0x3f4   : > { %v9756_v52 = vpop.eup %9755  ;;  %v1694_v17 = vadd.f32 %v11066_v29, %v1677_v9 }
 0x3f5   : > { %v1521_v0 = vmul.f32 %v9756_v52, %v1486_v56  ;;  %vm1527_vm6 = vweird.f32 %v9756_v52 }
 0x3f6   : > { %v11089_v42 = vpack.c.bf16 %v1695_v48, %v1694_v17  ;;  %vm1528_vm2 = vmor %vm1526_vm7, %vm1527_vm6 }
 0x3f7   : > { %v1522_v7 = vmul.f32 %v9756_v52, %v1521_v0  ;;  %v1782_v45 = vpop.f32.mrf.mxu0 }
 0x3f8   : > { %14719 = vst [vmem:[#allocation16_spill] sm:$0xff] %v11089_v42  ;;  %9000 = vmatmul.msk.bf16.vlgmr.msrb.gmra.mxu3 %vm913_vm3, %v11089_v42  ;;  %v1818_v56 = vpack.c.bf16 %v1782_v45, %v1782_v45 }
 0x3f9   : > { %v1523_v19 = vmul.f32 0.5, %v1522_v7  ;;  %1355 = vadd.xlane.f32.xlu0 %v1354_v24 }
 0x3fa   : > { %v2271_v44 = vunpack.c.l.b16 %v1818_v56 }
 0x3fb   : > { %v1524_v62 = vsub.f32 1.5, %v1523_v19 }
 0x3fc   : > { %v2277_v48 = vpack.c.b16 %v2271_v44, %v2270_v21 }
 0x3fd   : > { %v1525_v59 = vmul.f32 %v9756_v52, %v1524_v62  ;;  %v11104_v47 = vpop.xlane.xlu1 %1442 }
 0x3ff   : > { %v1529_v35 = vsel %vm1528_vm2, %v9756_v52, %v1525_v59  ;;  %v1785_v20 = vpop.f32.mrf.mxu0 }
 0x400   : > { %v1662_v31 = vmul.f32 %v1529_v35, %v10868_v34  ;;  %9016 = vmatmul.msk.bf16.vlgmr.msrb.gmra.mxu0 %vm913_vm3, %v11089_v42  ;;  %9032 = vmatmul.msk.bf16.vlgmr.msra.gmra.mxu1 %vm913_vm3, %v11089_v42 }
 0x401   : > { %9040 = vmatmul.msk.bf16.vlgmr.msra.gmra.mxu2 %vm2300_vm12, %v2276_v26  ;;  %1361 = vadd.xlane.f32.xlu0 %v1360_v2  ;;  %v1473_v2 = vmul.f32 %v11087_v3, %v10442_v60 }
 0x402   : > { %v1679_v49 = vmul.f32 %v11058_v37, %v1662_v31 }
 0x404   : > { %v1696_v63 = vadd.f32 %v11066_v29, %v1679_v49 }
 0x405   : > { %v1353_v55 = vpop.xlane.xlu1 %1352 }
 0x406   : > { %v11118_v34 = vpack.c.bf16 %v1697_v57, %v1696_v63  ;;  %v1381_v40 = vmul.f32 %v1353_v55, %v10442_v60  ;;  %v11154_v57 = vpop.f32.mrf.mxu2 }
 0x408   : > { %14720 = vst [vmem:[#allocation17_spill] sm:$0xff] %v11118_v34  ;;  %v11122_v36 = vsub.f32 %v10897_v14, %v1381_v40  ;;  %9001 = vmatmul.msk.bf16.gmra.mxu3 %vm913_vm3, %v11118_v34  ;;  %v1787_v14 = vpop.f32.mrf.mxu0 }
 0x409   : > { %v1820_v28 = vpack.c.bf16 %v1787_v14, %v1787_v14 }
 0x40a   : > { %v1413_v1 = vmul.f32 %v11122_v36, %v11122_v36 }
 0x40b   : > { %v2273_v24 = vunpack.c.l.b16 %v1820_v28 }
 0x40c   : > { %v1447_v51 = vsel %vm913_vm3, %v1413_v1, 0.0 }
 0x40d   : > { %1448 = vadd.xlane.f32.xlu2 %v1447_v51  ;;  %v1359_v9 = vpop.xlane.xlu1 %1358 }
 0x40e   : > { %v1383_v52 = vmul.f32 %v1359_v9, %v10442_v60  ;;  %v11159_v44 = vpop.f32.mrf.mxu2 }
 0x410   : > { %v11131_v17 = vsub.f32 %v10904_v33, %v1383_v52  ;;  %9017 = vmatmul.msk.bf16.gmra.mxu0 %vm913_vm3, %v11118_v34  ;;  %9033 = vmatmul.msk.bf16.gmra.mxu1 %vm913_vm3, %v11118_v34  ;;  %v1819_v33 = vpack.c.bf16 %v1785_v20, %v1785_v20  ;;  %v1790_v7 = vpop.f32.mrf.mxu0  ;;  %v1475_v20 = vmul.f32 %v11104_v47, %v10442_v60 }
 0x411   : > { %9041 = vmatmul.msk.bf16.gmra.mxu2 %vm2300_vm12, %v2277_v48  ;;  %v1821_v26 = vpack.c.bf16 %v1790_v7, %v1790_v7 }
 0x412   : > { %v1415_v30 = vmul.f32 %v11131_v17, %v11131_v17  ;;  %v2272_v4 = vunpack.c.l.b16 %v1819_v33  ;;  %v1491_v3 = vadd.f32 1e-05, %v1475_v20 }
 0x413   : > { %v2274_v54 = vunpack.c.l.b16 %v1821_v26 }
 0x414   : > { %v1453_v32 = vsel %vm913_vm3, %v1415_v30, 0.0  ;;  %v2278_v13 = vpack.c.b16 %v2273_v24, %v2272_v4  ;;  %vm1576_vm0 = vweird.f32 %v1491_v3 }
 0x415   : > { %1454 = vadd.xlane.f32.xlu1 %v1453_v32  ;;  %v11141_v0 = vpop.xlane.xlu1 %1364 }
 0x416   : > { %v11161_v48 = vpop.f32.mrf.mxu2 }
 0x418   : > { %v1792_v58 = vpop.f32.mrf.mxu0 }
 0x419   : > { %v1822_v45 = vpack.c.bf16 %v1792_v58, %v1792_v58 }
 0x41b   : > { %v2275_v35 = vunpack.c.l.b16 %v1822_v45 }
 0x41d   : > { %v1368_v11 = vpop.xlane.xlu1 %1367  ;;  %v2279_v31 = vpack.c.b16 %v2275_v35, %v2274_v54 }
 0x41e   : > { %v1386_v19 = vmul.f32 %v1368_v11, %v10442_v60 }
 0x420   : > { %v11145_v62 = vsub.f32 %v10918_v38, %v1386_v19  ;;  %v1489_v38 = vadd.f32 1e-05, %v1473_v2 }
 0x421   : > { %9042 = vmatmul.msk.bf16.gmra.mxu2 %vm2300_vm12, %v2278_v13  ;;  %v11166_v13 = vpop.f32.mrf.mxu2 }
 0x422   : > { %v1418_v5 = vmul.f32 %v11145_v62, %v11145_v62  ;;  %9757 = vrsqrt.f32 %v1489_v38  ;;  %vm1556_vm9 = vweird.f32 %v1489_v38 }
 0x424   : > { %v1462_v59 = vsel %vm913_vm3, %v1418_v5, 0.0 }
 0x425   : > { %1463 = vadd.xlane.f32.xlu1 %v1462_v59 }
 0x428   : > { %v9758_v49 = vpop.eup %9757 }
 0x429   : > { %v1551_v63 = vmul.f32 %v9758_v49, %v1489_v38  ;;  %vm1557_vm8 = vweird.f32 %v9758_v49 }
 0x42a   : > { %vm1558_vm10 = vmor %vm1556_vm9, %vm1557_vm8 }
 0x42b   : > { %v1552_v55 = vmul.f32 %v9758_v49, %v1551_v63 }
 0x42d   : > { %v1553_v1 = vmul.f32 0.5, %v1552_v55 }
 0x42f   : > { %v1554_v51 = vsub.f32 1.5, %v1553_v1  ;;  %v893_v1 = vpop.f32.mrf.mxu3 }
 0x431   : > { %9043 = vmatmul.msk.bf16.gmra.mxu2 %vm2300_vm12, %v2279_v31  ;;  %v1555_v9 = vmul.f32 %v9758_v49, %v1554_v51 }
 0x433   : > { %v1559_v30 = vsel %vm1558_vm10, %v9758_v49, %v1555_v9 }
 0x434   : > { %v1665_v33 = vmul.f32 %v1559_v30, %v10808_v10  ;;  %v11191_v30 = vadd.f32 %v10470_v16, %v893_v1  ;;  %v1988_v1 = vpack.c.bf16 %v11166_v13, %v11166_v13 }
 0x436   : > { %v1682_v11 = vmul.f32 %v11058_v37, %v1665_v33 }
 0x438   : > { %v1699_v26 = vadd.f32 %v11066_v29, %v1682_v11 }
 0x444   : > { %v1434_v40 = vpop.xlane.xlu0 %1433 }
 0x445   : > { %v1472_v56 = vmul.f32 %v1434_v40, %v10442_v60 }
 0x447   : > { %v1488_v46 = vadd.f32 1e-05, %v1472_v56 }
 0x449   : > { %9759 = vrsqrt.f32 %v1488_v46  ;;  %vm1546_vm13 = vweird.f32 %v1488_v46 }
 0x44a   : > { %9761 = vrsqrt.f32 %v1491_v3 }
 0x44f   : > { %v9760_v21 = vpop.eup %9759 }
 0x450   : > { %v1541_v52 = vmul.f32 %v9760_v21, %v1488_v46  ;;  %v9762_v47 = vpop.eup %9761  ;;  %vm1547_vm11 = vweird.f32 %v9760_v21 }
 0x451   : > { %v1571_v7 = vmul.f32 %v9762_v47, %v1491_v3  ;;  %vm1548_vm14 = vmor %vm1546_vm13, %vm1547_vm11  ;;  %vm1577_vm15 = vweird.f32 %v9762_v47  ;;  %v1385_v3 = vmul.f32 %v11141_v0, %v10442_v60 }
 0x452   : > { %v1542_v14 = vmul.f32 %v9760_v21, %v1541_v52  ;;  %vm1578_vm1 = vmor %vm1576_vm0, %vm1577_vm15 }
 0x453   : > { %v1572_v5 = vmul.f32 %v9762_v47, %v1571_v7  ;;  %v11207_v11 = vsub.f32 %v10910_v39, %v1385_v3 }
 0x454   : > { %v1543_v32 = vmul.f32 0.5, %v1542_v14 }
 0x455   : > { %v1573_v54 = vmul.f32 0.5, %v1572_v5  ;;  %v1417_v39 = vmul.f32 %v11207_v11, %v11207_v11 }
 0x456   : > { %v1544_v28 = vsub.f32 1.5, %v1543_v32 }
 0x458   : > { %v1545_v24 = vmul.f32 %v9760_v21, %v1544_v28 }
 0x45a   : > { %v1549_v4 = vsel %vm1548_vm14, %v9760_v21, %v1545_v24  ;;  %v11201_v24 = vpop.f32.mrf.mxu0 }
 0x45b   : > { %v1664_v19 = vmul.f32 %v1549_v4, %v10955_v8  ;;  %v1574_v8 = vsub.f32 1.5, %v1573_v54  ;;  %v1369_v4 = vsel %vm913_vm3, %v11191_v30, 0.0 }
 0x45c   : > { %v1440_v58 = vpop.xlane.xlu0 %1439 }
 0x45d   : > { %v1681_v59 = vmul.f32 %v11058_v37, %v1664_v19  ;;  %v1474_v45 = vmul.f32 %v1440_v58, %v10442_v60  ;;  %v1575_v40 = vmul.f32 %v9762_v47, %v1574_v8  ;;  %v1459_v8 = vsel %vm913_vm3, %v1417_v39, 0.0 }
 0x45f   : > { %v1698_v10 = vadd.f32 %v11066_v29, %v1681_v59  ;;  %v1490_v35 = vadd.f32 1e-05, %v1474_v45  ;;  %v1579_v21 = vsel %vm1578_vm1, %v9762_v47, %v1575_v40 }
 0x460   : > { %v1667_v28 = vmul.f32 %v1579_v21, %v10889_v27 }
 0x461   : > { %v11172_v31 = vpack.c.bf16 %v1699_v26, %v1698_v10  ;;  %9763 = vrsqrt.f32 %v1490_v35  ;;  %vm1566_vm5 = vweird.f32 %v1490_v35 }
 0x462   : > { %v1684_v27 = vmul.f32 %v11058_v37, %v1667_v28 }
 0x463   : > { %14721 = vst [vmem:[#allocation18_spill] sm:$0xff] %v11172_v31  ;;  %9002 = vmatmul.msk.bf16.gmra.mxu3 %vm913_vm3, %v11172_v31  ;;  %9018 = vmatmul.msk.bf16.gmra.mxu0 %vm913_vm3, %v11172_v31 }
 0x464   : > { %v11178_v2 = vpop.f32.mrf.mxu2  ;;  %9034 = vmatmul.msk.bf16.gmra.mxu1 %vm913_vm3, %v11172_v31  ;;  %v1350_v38 = vpop.xlane.xlu0 %1349  ;;  %v1701_v45 = vadd.f32 %v11066_v29, %v1684_v27 }
 0x465   : > { %v1380_v49 = vmul.f32 %v1350_v38, %v10442_v60  ;;  %v11230_v38 = vpop.f32.mrf.mxu0 }
 0x467   : > { %v9764_v63 = vpop.eup %9763  ;;  %v11184_v55 = vsub.f32 %v11053_v22, %v1380_v49 }
 0x468   : > { %v1561_v56 = vmul.f32 %v9764_v63, %v1490_v35  ;;  %vm1567_vm4 = vweird.f32 %v9764_v63 }
 0x469   : > { %v1412_v20 = vmul.f32 %v11184_v55, %v11184_v55  ;;  %vm1568_vm6 = vmor %vm1566_vm5, %vm1567_vm4 }
 0x46a   : > { %v1562_v46 = vmul.f32 %v9764_v63, %v1561_v56  ;;  %v1989_v56 = vpack.c.bf16 %v11178_v2, %v11178_v2  ;;  %v1985_v2 = vpack.c.bf16 %v11154_v57, %v11154_v57 }
 0x46b   : > { %v1444_v51 = vsel %vm913_vm3, %v1412_v20, 0.0 }
 0x46c   : > { %v1563_v9 = vmul.f32 0.5, %v1562_v46  ;;  %v1969_v52 = vpop.f32.mrf.mxu2  ;;  %1445 = vadd.xlane.f32.xlu0 %v1444_v51  ;;  %v1356_v14 = vpop.xlane.xlu0 %1355 }
 0x46d   : > { %v1382_v22 = vmul.f32 %v1356_v14, %v10442_v60  ;;  %v3045_v14 = vunpack.c.l.b16 %v1989_v56  ;;  %v11242_v28 = vpop.f32.mrf.mxu0 }
 0x46e   : > { %v1564_v32 = vsub.f32 1.5, %v1563_v9  ;;  %v1987_v9 = vpack.c.bf16 %v11161_v48, %v11161_v48 }
 0x46f   : > { %v11197_v33 = vsub.f32 %v11082_v23, %v1382_v22  ;;  %v3044_v22 = vunpack.c.l.b16 %v1988_v1 }
 0x470   : > { %v1565_v47 = vmul.f32 %v9764_v63, %v1564_v32  ;;  %v3043_v3 = vunpack.c.l.b16 %v1987_v9 }
 0x471   : > { %v1414_v7 = vmul.f32 %v11197_v33, %v11197_v33 }
 0x472   : > { %v1569_v16 = vsel %vm1568_vm6, %v9764_v63, %v1565_v47  ;;  %v1990_v63 = vpack.c.bf16 %v1969_v52, %v1969_v52  ;;  %v1986_v52 = vpack.c.bf16 %v11159_v44, %v11159_v44  ;;  %v3050_v47 = vpack.c.b16 %v3044_v22, %v3043_v3 }
 0x473   : > { %v1666_v23 = vmul.f32 %v1569_v16, %v11030_v15  ;;  %v1450_v0 = vsel %vm913_vm3, %v1414_v7, 0.0  ;;  %v3041_v16 = vunpack.c.l.b16 %v1985_v2 }
 0x474   : > { %v1972_v19 = vpop.f32.mrf.mxu2  ;;  %1370 = vadd.xlane.f32.xlu0 %v1369_v4  ;;  %1451 = vadd.xlane.f32.xlu2 %v1450_v0  ;;  %v1362_v5 = vpop.xlane.xlu0 %1361  ;;  %v3046_v51 = vunpack.c.l.b16 %v1990_v63  ;;  %v3042_v13 = vunpack.c.l.b16 %v1986_v52 }
 0x475   : > { %v1683_v58 = vmul.f32 %v11058_v37, %v1666_v23  ;;  %v1384_v59 = vmul.f32 %v1362_v5, %v10442_v60  ;;  %v1991_v54 = vpack.c.bf16 %v1972_v19, %v1972_v19  ;;  %v11246_v4 = vpop.f32.mrf.mxu0 }
 0x476   : > { %v3051_v32 = vpack.c.b16 %v3046_v51, %v3045_v14  ;;  %v3049_v48 = vpack.c.b16 %v3042_v13, %v3041_v16 }
 0x477   : > { %v1700_v26 = vadd.f32 %v11066_v29, %v1683_v58  ;;  %v11216_v10 = vsub.f32 %v11102_v6, %v1384_v59  ;;  %v3047_v20 = vunpack.c.l.b16 %v1991_v54 }
 0x479   : > { %v11220_v15 = vpack.c.bf16 %v1701_v45, %v1700_v26  ;;  %v1416_v35 = vmul.f32 %v11216_v10, %v11216_v10 }
 0x47b   : > { %14722 = vst [vmem:[#allocation19_spill] sm:$0xff] %v11220_v15  ;;  %9003 = vmatmul.msk.bf16.gmra.mxu3 %vm913_vm3, %v11220_v15  ;;  %9019 = vmatmul.msk.bf16.gmra.mxu0 %vm913_vm3, %v11220_v15  ;;  %v1456_v6 = vsel %vm913_vm3, %v1416_v35, 0.0  ;;  %v2042_v7 = vpop.f32.mrf.mxu3 }
 0x47c   : > { %v1974_v49 = vpop.f32.mrf.mxu2  ;;  %9035 = vmatmul.msk.bf16.gmra.mxu1 %vm913_vm3, %v11220_v15  ;;  %1460 = vadd.xlane.f32.xlu2 %v1459_v8  ;;  %v2082_v0 = vpack.c.bf16 %v2042_v7, %v2042_v7 }
 0x47d   : > { %v1992_v40 = vpack.c.bf16 %v1974_v49, %v1974_v49  ;;  %1457 = vadd.xlane.f32.xlu0 %v1456_v6  ;;  %v11248_v44 = vpop.f32.mrf.mxu0 }
 0x47e   : > { %v2455_v58 = vunpack.c.l.b16 %v2082_v0 }
 0x47f   : > { %v3048_v46 = vunpack.c.l.b16 %v1992_v40 }
 0x480   : > { %v1449_v40 = vpop.xlane.xlu2 %1448 }
 0x481   : > { %v3052_v21 = vpack.c.b16 %v3048_v46, %v3047_v20  ;;  %v1477_v56 = vmul.f32 %v1449_v40, %v10442_v60 }
 0x483   : > { %3073 = vmatpush.bf16.msra.mxu2 %v3052_v21  ;;  %v2044_v27 = vpop.f32.mrf.mxu3  ;;  %v1493_v46 = vadd.f32 1e-05, %v1477_v56 }
 0x484   : > { %v2083_v23 = vpack.c.bf16 %v2044_v27, %v2044_v27 }
 0x485   : > { %v11250_v57 = vpop.f32.mrf.mxu0  ;;  %9765 = vrsqrt.f32 %v1493_v46  ;;  %vm1596_vm2 = vweird.f32 %v1493_v46 }
 0x486   : > { %v2456_v5 = vunpack.c.l.b16 %v2083_v23 }
 0x487   : > { %3074 = vmatpush.bf16.msra.mxu2 %v3051_v32 }
 0x488   : > { %v2463_v59 = vpack.c.b16 %v2456_v5, %v2455_v58  ;;  %v1455_v51 = vpop.xlane.xlu1 %1454 }
 0x489   : > { %v1479_v9 = vmul.f32 %v1455_v51, %v10442_v60 }
 0x48b   : > { %3075 = vmatpush.bf16.msra.mxu2 %v3050_v47  ;;  %v2047_v19 = vpop.f32.mrf.mxu3  ;;  %v9766_v21 = vpop.eup %9765  ;;  %v11264_v52 = vadd.f32 1e-05, %v1479_v9 }
 0x48c   : > { %v2084_v35 = vpack.c.bf16 %v2047_v19, %v2047_v19  ;;  %v1591_v14 = vmul.f32 %v9766_v21, %v1493_v46  ;;  %vm1597_vm7 = vweird.f32 %v9766_v21 }
 0x48d   : > { %v11252_v39 = vpop.f32.mrf.mxu0  ;;  %9767 = vrsqrt.f32 %v11264_v52  ;;  %vm11283_vm8 = vmor %vm1596_vm2, %vm1597_vm7  ;;  %vm1616_vm1 = vweird.f32 %v11264_v52 }
 0x48e   : > { %v2457_v8 = vunpack.c.l.b16 %v2084_v35  ;;  %v1592_v32 = vmul.f32 %v9766_v21, %v1591_v14 }
 0x48f   : > { %3076 = vmatpush.bf16.msra.mxu2 %v3049_v48 }
 0x490   : > { %v1593_v47 = vmul.f32 0.5, %v1592_v32 }
 0x492   : > { %v1594_v27 = vsub.f32 1.5, %v1593_v47 }
 0x493   : > { %v2049_v45 = vpop.f32.mrf.mxu3  ;;  %v11272_v48 = vpop.eup %9767 }
 0x494   : > { %v2085_v26 = vpack.c.bf16 %v2049_v45, %v2049_v45  ;;  %v1595_v35 = vmul.f32 %v9766_v21, %v1594_v27  ;;  %vm1617_vm14 = vweird.f32 %v11272_v48 }
 0x495   : > { %v11254_v49 = vpop.f32.mrf.mxu0  ;;  %vm1618_vm4 = vmor %vm1616_vm1, %vm1617_vm14  ;;  %vm2354_vm1 = vcmask 523264  }
 0x496   : > { %v2458_v54 = vunpack.c.l.b16 %v2085_v26  ;;  %v1599_v14 = vsel %vm11283_vm8, %v9766_v21, %v1595_v35 }
 0x498   : > { %v2464_v6 = vpack.c.b16 %v2458_v54, %v2457_v8 }
 0x49d   : > { %v11256_v63 = vpop.f32.mrf.mxu0 }
 0x4a5   : > { %2471 = vxpose.xlu2.c.b16.start [1/4] (short) (narrow) %v2463_v59, 16  ;;  %v11259_v20 = vpop.f32.mrf.mxu0  ;;  %v1611_v59 = vmul.f32 %v11272_v48, %v11264_v52 }
 0x4a7   : > { %v1612_v51 = vmul.f32 %v11272_v48, %v1611_v59  ;;  %v1669_v59 = vmul.f32 %v1599_v14, %v11122_v36 }
 0x4ad   : > { %v11261_v1 = vpop.f32.mrf.mxu0 }
 0x4b5   : > { %2472 = vxpose.xlu2.c.b16.cont [2/4] (short) (narrow) %v2464_v6, 16  ;;  %v11266_v22 = vpop.f32.mrf.mxu0 }
 0x4df   : > { %v1446_v2 = vpop.xlane.xlu0 %1445 }
 0x4e0   : > { %v1476_v3 = vmul.f32 %v1446_v2, %v10442_v60  ;;  %v11270_v7 = vpop.f32.mrf.mxu0 }
 0x4e2   : > { %v1492_v13 = vadd.f32 1e-05, %v1476_v3 }
 0x4e4   : > { %9769 = vrsqrt.f32 %v1492_v13  ;;  %vm1586_vm10 = vweird.f32 %v1492_v13 }
 0x4e6   : > { %v2052_v16 = vpop.f32.mrf.mxu3 }
 0x4e7   : > { %v1452_v23 = vpop.xlane.xlu2 %1451  ;;  %v1371_v0 = vpop.xlane.xlu0 %1370  ;;  %v2086_v8 = vpack.c.bf16 %v2052_v16, %v2052_v16 }
 0x4e8   : > { %v1478_v19 = vmul.f32 %v1452_v23, %v10442_v60  ;;  %v1387_v5 = vmul.f32 %v1371_v0, %v10442_v60  ;;  %v11291_v16 = vpop.f32.mrf.mxu0 }
 0x4e9   : > { %v2459_v47 = vunpack.c.l.b16 %v2086_v8 }
 0x4ea   : > { %v9770_v58 = vpop.eup %9769  ;;  %v1494_v45 = vadd.f32 1e-05, %v1478_v19  ;;  %v11279_v26 = vsub.f32 %v11191_v30, %v1387_v5 }
 0x4eb   : > { %v1581_v54 = vmul.f32 %v9770_v58, %v1492_v13  ;;  %vm1587_vm9 = vweird.f32 %v9770_v58 }
 0x4ec   : > { %9771 = vrsqrt.f32 %v1494_v45  ;;  %v1419_v6 = vmul.f32 %v11279_v26, %v11279_v26  ;;  %vm1588_vm11 = vmor %vm1586_vm10, %vm1587_vm9  ;;  %vm1606_vm15 = vweird.f32 %v1494_v45 }
 0x4ed   : > { %v1582_v40 = vmul.f32 %v9770_v58, %v1581_v54  ;;  %v1613_v54 = vmul.f32 0.5, %v1612_v51 }
 0x4ee   : > { %v2054_v9 = vpop.f32.mrf.mxu3  ;;  %v1465_v30 = vsel %vm913_vm3, %v1419_v6, 0.0 }
 0x4ef   : > { %v1583_v32 = vmul.f32 0.5, %v1582_v40  ;;  %v2087_v2 = vpack.c.bf16 %v2054_v9, %v2054_v9  ;;  %v1461_v3 = vpop.xlane.xlu2 %1460  ;;  %1466 = vadd.xlane.f32.xlu0 %v1465_v30  ;;  %v1686_v30 = vmul.f32 %v11058_v37, %v1669_v59  ;;  %v1614_v36 = vsub.f32 1.5, %v1613_v54 }
 0x4f0   : > { %v1481_v46 = vmul.f32 %v1461_v3, %v10442_v60  ;;  %v1458_v27 = vpop.xlane.xlu0 %1457 }
 0x4f1   : > { %v1584_v23 = vsub.f32 1.5, %v1583_v32  ;;  %v2460_v0 = vunpack.c.l.b16 %v2087_v2  ;;  %v1480_v19 = vmul.f32 %v1458_v27, %v10442_v60 }
 0x4f2   : > { %v9772_v5 = vpop.eup %9771  ;;  %v11296_v21 = vadd.f32 1e-05, %v1481_v46  ;;  %v1615_v46 = vmul.f32 %v11272_v48, %v1614_v36 }
 0x4f3   : > { %v1585_v35 = vmul.f32 %v9770_v58, %v1584_v23  ;;  %v1601_v6 = vmul.f32 %v9772_v5, %v1494_v45  ;;  %v2465_v8 = vpack.c.b16 %v2460_v0, %v2459_v47  ;;  %v11299_v40 = vadd.f32 1e-05, %v1480_v19 }
 0x4f4   : > { %9773 = vrsqrt.f32 %v11296_v21  ;;  %vm1607_vm13 = vweird.f32 %v9772_v5  ;;  %v1703_v47 = vadd.f32 %v11066_v29, %v1686_v30  ;;  %v1619_v45 = vsel %vm1618_vm4, %v11272_v48, %v1615_v46 }
 0x4f5   : > { %v1589_v56 = vsel %vm1588_vm11, %v9770_v58, %v1585_v35  ;;  %v1602_v9 = vmul.f32 %v9772_v5, %v1601_v6  ;;  %2473 = vxpose.xlu2.c.b16.cont [3/4] (short) (narrow) %v2465_v8, 16  ;;  %9775 = vrsqrt.f32 %v11299_v40  ;;  %vm1608_vm0 = vmor %vm1606_vm15, %vm1607_vm13  ;;  %v1671_v36 = vmul.f32 %v1619_v45, %v11131_v17 }
 0x4f6   : > { %v1668_v32 = vmul.f32 %v1589_v56, %v11184_v55  ;;  %v2167_v48 = vpack.c.bf16 %v11270_v7, %v11270_v7  ;;  %v2164_v17 = vpack.c.bf16 %v11259_v20, %v11259_v20  ;;  %v2165_v7 = vpack.c.bf16 %v11261_v1, %v11261_v1 }
 0x4f7   : > { %v1603_v51 = vmul.f32 0.5, %v1602_v9  ;;  %vm1636_vm7 = vweird.f32 %v11296_v21  ;;  %v2163_v1 = vpack.c.bf16 %v11256_v63, %v11256_v63  ;;  %vm1626_vm8 = vweird.f32 %v11299_v40 }
 0x4f8   : > { %v1685_v13 = vmul.f32 %v11058_v37, %v1668_v32  ;;  %v2138_v14 = vpop.f32.mrf.mxu0 }
 0x4f9   : > { %v1604_v2 = vsub.f32 1.5, %v1603_v51  ;;  %v2169_v8 = vpack.c.bf16 %v2138_v14, %v2138_v14  ;;  %v2166_v51 = vpack.c.bf16 %v11266_v22, %v11266_v22 }
 0x4fa   : > { %v11305_v3 = vpop.eup %9773  ;;  %v1702_v58 = vadd.f32 %v11066_v29, %v1685_v13 }
 0x4fb   : > { %v1605_v55 = vmul.f32 %v9772_v5, %v1604_v2  ;;  %v1631_v27 = vmul.f32 %v11305_v3, %v11296_v21  ;;  %v11313_v23 = vpop.eup %9775  ;;  %v2501_v13 = vunpack.c.l.b16 %v2169_v8  ;;  %v2498_v22 = vunpack.c.l.b16 %v2166_v51 }
 0x4fc   : > { %v11315_v0 = vpack.c.bf16 %v1703_v47, %v1702_v58  ;;  %v1621_v54 = vmul.f32 %v11313_v23, %v11299_v40  ;;  %vm1637_vm5 = vweird.f32 %v11305_v3  ;;  %vm1627_vm6 = vweird.f32 %v11313_v23 }
 0x4fd   : > { %v1609_v19 = vsel %vm1608_vm0, %v9772_v5, %v1605_v55  ;;  %v1632_v59 = vmul.f32 %v11305_v3, %v1631_v27  ;;  %v2168_v5 = vpack.c.bf16 %v11291_v16, %v11291_v16  ;;  %v1688_v55 = vmul.f32 %v11058_v37, %v1671_v36  ;;  %vm11352_vm2 = vmor %vm1636_vm7, %vm1637_vm5 }
 0x4fe   : > { %14725 = vst [vmem:[#allocation20_spill] sm:$0xff] %v11315_v0  ;;  %v2057_v35 = vpop.f32.mrf.mxu3  ;;  %9004 = vmatmul.msk.bf16.gmra.mxu3 %vm913_vm3, %v11315_v0  ;;  %9020 = vmatmul.msk.bf16.gmra.mxu0 %vm913_vm3, %v11315_v0  ;;  %v1622_v6 = vmul.f32 %v11313_v23, %v1621_v54  ;;  %v1670_v52 = vmul.f32 %v1609_v19, %v11197_v33  ;;  %v2499_v27 = vunpack.c.l.b16 %v2167_v48  ;;  %vm1628_vm9 = vmor %vm1626_vm8, %vm1627_vm6  ;;  %v2495_v40 = vunpack.c.l.b16 %v2163_v1 }
 0x4ff   : > { %9036 = vmatmul.msk.bf16.gmra.mxu1 %vm913_vm3, %v11315_v0  ;;  %v1633_v9 = vmul.f32 0.5, %v1632_v59  ;;  %v2500_v33 = vunpack.c.l.b16 %v2168_v5  ;;  %v2088_v16 = vpack.c.bf16 %v2057_v35, %v2057_v35  ;;  %v1705_v20 = vadd.f32 %v11066_v29, %v1688_v55 }
 0x500   : > { %v2140_v56 = vpop.f32.mrf.mxu0  ;;  %v1623_v30 = vmul.f32 0.5, %v1622_v6  ;;  %v1687_v2 = vmul.f32 %v11058_v37, %v1670_v52  ;;  %v2497_v5 = vunpack.c.l.b16 %v2165_v7 }
 0x501   : > { %v2170_v32 = vpack.c.bf16 %v2140_v56, %v2140_v56  ;;  %v1634_v47 = vsub.f32 1.5, %v1633_v9  ;;  %v2505_v35 = vpack.c.b16 %v2500_v33, %v2499_v27  ;;  %v2461_v8 = vunpack.c.l.b16 %v2088_v16 }
 0x502   : > { %v1624_v58 = vsub.f32 1.5, %v1623_v30  ;;  %v1704_v54 = vadd.f32 %v11066_v29, %v1687_v2  ;;  %v2504_v36 = vpack.c.b16 %v2498_v22, %v2497_v5 }
 0x503   : > { %v2502_v14 = vunpack.c.l.b16 %v2170_v32  ;;  %v1635_v45 = vmul.f32 %v11305_v3, %v1634_v47  ;;  %v2496_v32 = vunpack.c.l.b16 %v2164_v17 }
 0x504   : > { %v1625_v6 = vmul.f32 %v11313_v23, %v1624_v58  ;;  %v11357_v30 = vpack.c.bf16 %v1705_v20, %v1704_v54 }
 0x505   : > { %v2506_v46 = vpack.c.b16 %v2502_v14, %v2501_v13  ;;  %v1639_v21 = vsel %vm11352_vm2, %v11305_v3, %v1635_v45  ;;  %v2503_v3 = vpack.c.b16 %v2496_v32, %v2495_v40 }
 0x506   : > { %v2059_v19 = vpop.f32.mrf.mxu3  ;;  %14728 = vst [vmem:[#allocation21_spill] sm:$0xff] %v11357_v30  ;;  %v1629_v63 = vsel %vm1628_vm9, %v11313_v23, %v1625_v6  ;;  %v1673_v48 = vmul.f32 %v1639_v21, %v11207_v11  ;;  %v1464_v11 = vpop.xlane.xlu1 %1463 }
 0x507   : > { %v2089_v59 = vpack.c.bf16 %v2059_v19, %v2059_v19  ;;  %2518 = vmatpush.bf16.msra.mxu3 %v2506_v46  ;;  %v1672_v51 = vmul.f32 %v1629_v63, %v11216_v10  ;;  %v1482_v10 = vmul.f32 %v1464_v11, %v10442_v60 }
 0x508   : > { %v1690_v23 = vmul.f32 %v11058_v37, %v1673_v48 }
 0x509   : > { %v2462_v52 = vunpack.c.l.b16 %v2089_v59  ;;  %v1689_v13 = vmul.f32 %v11058_v37, %v1672_v51  ;;  %v1498_v47 = vadd.f32 1e-05, %v1482_v10 }
 0x50a   : > { %v1707_v14 = vadd.f32 %v11066_v29, %v1690_v23 }
 0x50b   : > { %v2466_v9 = vpack.c.b16 %v2462_v52, %v2461_v8  ;;  %2519 = vmatpush.bf16.msra.mxu3 %v2505_v35  ;;  %v1706_v2 = vadd.f32 %v11066_v29, %v1689_v13  ;;  %9777 = vrsqrt.f32 %v1498_v47  ;;  %vm1646_vm11 = vweird.f32 %v1498_v47 }
 0x50d   : > { %2474 = vxpose.xlu2.c.b16.end [4/4] (short) (narrow) %v2466_v9, 16  ;;  %v11377_v33 = vpack.c.bf16 %v1707_v14, %v1706_v2 }
 0x50e   : > { %9005 = vmatmul.msk.bf16.gmra.mxu3 %vm913_vm3, %v11357_v30  ;;  %9021 = vmatmul.msk.bf16.gmra.mxu0 %vm913_vm3, %v11357_v30 }
 0x50f   : > { %9037 = vmatmul.msk.bf16.gmra.mxu1 %vm913_vm3, %v11357_v30  ;;  %2520 = vmatpush.bf16.msra.mxu3 %v2504_v36  ;;  %14729 = vst [vmem:[#allocation22_spill] sm:$0xff] %v11377_v33 }
 0x511   : > { %v9778_v58 = vpop.eup %9777 }
 0x512   : > { %v1641_v16 = vmul.f32 %v9778_v58, %v1498_v47  ;;  %vm1647_vm10 = vweird.f32 %v9778_v58 }
 0x513   : > { %2521 = vmatpush.bf16.msra.mxu3 %v2503_v3  ;;  %vm1648_vm13 = vmor %vm1646_vm11, %vm1647_vm10 }
 0x514   : > { %v1642_v46 = vmul.f32 %v9778_v58, %v1641_v16 }
 0x516   : > { %v1643_v17 = vmul.f32 0.5, %v1642_v46 }
 0x518   : > { %v1644_v7 = vsub.f32 1.5, %v1643_v17 }
 0x51a   : > { %v1645_v59 = vmul.f32 %v9778_v58, %v1644_v7 }
 0x51c   : > { %v1649_v45 = vsel %vm1648_vm13, %v9778_v58, %v1645_v59 }
 0x51d   : > { %v1674_v52 = vmul.f32 %v1649_v45, %v11145_v62 }
 0x51e   : > { %9006 = vmatmul.msk.bf16.gmra.mxu3 %vm913_vm3, %v11377_v33  ;;  %9022 = vmatmul.msk.bf16.gmra.mxu0 %vm913_vm3, %v11377_v33 }
 0x51f   : > { %9038 = vmatmul.msk.bf16.gmra.mxu1 %vm913_vm3, %v11377_v33  ;;  %v1691_v5 = vmul.f32 %v11058_v37, %v1674_v52 }
 0x521   : > { %v1708_v32 = vadd.f32 %v11066_v29, %v1691_v5 }
 0x562   : > { %v1467_v55 = vpop.xlane.xlu0 %1466 }
 0x563   : > { %v1483_v27 = vmul.f32 %v1467_v55, %v10442_v60 }
 0x565   : > { %v1499_v19 = vadd.f32 1e-05, %v1483_v27 }
 0x567   : > { %9779 = vrsqrt.f32 %v1499_v19  ;;  %vm1656_vm15 = vweird.f32 %v1499_v19 }
 0x56d   : > { %v9780_v22 = vpop.eup %9779 }
 0x56e   : > { %v1651_v54 = vmul.f32 %v9780_v22, %v1499_v19  ;;  %vm1657_vm14 = vweird.f32 %v9780_v22 }
 0x56f   : > { %vm1658_vm0 = vmor %vm1656_vm15, %vm1657_vm14 }
 0x570   : > { %v1652_v35 = vmul.f32 %v9780_v22, %v1651_v54 }
 0x572   : > { %v1653_v6 = vmul.f32 0.5, %v1652_v35 }
 0x574   : > { %v1654_v8 = vsub.f32 1.5, %v1653_v6 }
 0x576   : > { %v1655_v20 = vmul.f32 %v9780_v22, %v1654_v8 }
 0x578   : > { %v1659_v1 = vsel %vm1658_vm0, %v9780_v22, %v1655_v20 }
 0x579   : > { %v1675_v56 = vmul.f32 %v1659_v1, %v11279_v26 }
 0x57b   : > { %v1692_v9 = vmul.f32 %v11058_v37, %v1675_v56  ;;  %v2143_v37 = vpop.f32.mrf.mxu0 }
 0x57c   : > { %v2171_v52 = vpack.c.bf16 %v2143_v37, %v2143_v37 }
 0x57d   : > { %v1709_v21 = vadd.f32 %v11066_v29, %v1692_v9 }
 0x57e   : > { %v2479_v62 = vpop.trf.xlu2  ;;  %v2913_v9 = vunpack.c.l.b16 %v2171_v52 }
 0x57f   : > { %v11393_v63 = vpack.c.bf16 %v1709_v21, %v1708_v32 }
 0x581   : > { %14730 = vst [vmem:[#allocation23_spill] sm:$0xff] %v11393_v63  ;;  %9007 = vmatmul.msk.bf16.gmra.mxu3 %vm913_vm3, %v11393_v63  ;;  %9023 = vmatmul.msk.bf16.gmra.mxu0 %vm913_vm3, %v11393_v63  ;;  %v11402_v26 = vpop.f32.mrf.mxu3 }
 0x582   : > { %9039 = vmatmul.msk.bf16.gmra.mxu1 %vm913_vm3, %v11393_v63 }
 0x583   : > { %v2145_v36 = vpop.f32.mrf.mxu0 }
 0x584   : > { %v2172_v45 = vpack.c.bf16 %v2145_v36, %v2145_v36  ;;  %v2334_v36 = vpop.f32.mrf.mxu2 }
 0x586   : > { %v2914_v1 = vunpack.c.l.b16 %v2172_v45 }
 0x588   : > { %v2921_v21 = vpack.c.b16 %v2914_v1, %v2913_v9 }
 0x589   : > { %v11404_v29 = vpop.f32.mrf.mxu3 }
 0x58b   : > { %v2148_v40 = vpop.f32.mrf.mxu0 }
 0x58c   : > { %v2173_v54 = vpack.c.bf16 %v2148_v40, %v2148_v40 }
 0x58e   : > { %v2915_v20 = vunpack.c.l.b16 %v2173_v54 }
 0x591   : > { %9044 = vmatmul.msk.bf16.vlgmr.msra.gmra.mxu3 %vm2354_vm1, %v2479_v62  ;;  %v11406_v48 = vpop.f32.mrf.mxu3 }
 0x593   : > { %v2150_v51 = vpop.f32.mrf.mxu0 }
 0x594   : > { %v2174_v17 = vpack.c.bf16 %v2150_v51, %v2150_v51  ;;  %v11420_v51 = vpop.f32.mrf.mxu2 }
 0x596   : > { %v2916_v6 = vunpack.c.l.b16 %v2174_v17 }
 0x598   : > { %v2922_v5 = vpack.c.b16 %v2916_v6, %v2915_v20 }
 0x599   : > { %v11408_v3 = vpop.f32.mrf.mxu3 }
 0x59b   : > { %v2153_v23 = vpop.f32.mrf.mxu0 }
 0x59c   : > { %v2175_v55 = vpack.c.bf16 %v2153_v23, %v2153_v23  ;;  %v11422_v37 = vpop.f32.mrf.mxu2 }
 0x59d   : > { %v2361_v54 = vsel %vm2354_vm1, %v11422_v37, -inf }
 0x59e   : > { %v2917_v35 = vunpack.c.l.b16 %v2175_v55 }
 0x5a1   : > { %v11410_v13 = vpop.f32.mrf.mxu3 }
 0x5a3   : > { %v2155_v14 = vpop.f32.mrf.mxu0 }
 0x5a4   : > { %v2176_v16 = vpack.c.bf16 %v2155_v14, %v2155_v14 }
 0x5a6   : > { %v2918_v7 = vunpack.c.l.b16 %v2176_v16 }
 0x5a8   : > { %v2923_v8 = vpack.c.b16 %v2918_v7, %v2917_v35  ;;  %v2355_v7 = vsel %vm2354_vm1, %v2334_v36, -inf  ;;  %v2358_v35 = vsel %vm2354_vm1, %v11420_v51, -inf }
 0x5a9   : > { %v11412_v2 = vpop.f32.mrf.mxu3 }
 0x5fe   : > { %v2158_v11 = vpop.f32.mrf.mxu0 }
 0x5ff   : > { %v2177_v47 = vpack.c.bf16 %v2158_v11, %v2158_v11 }
 0x601   : > { %v2919_v27 = vunpack.c.l.b16 %v2177_v47 }
 0x604   : > { %v11414_v10 = vpop.f32.mrf.mxu3 }
 0x605   : > { %14731 = vst [vmem:[#allocation24_spill] sm:$0xff] %v11414_v10 }
 0x606   : > { %v2160_v58 = vpop.f32.mrf.mxu0 }
 0x607   : > { %v2178_v46 = vpack.c.bf16 %v2160_v58, %v2160_v58  ;;  %v11424_v58 = vpop.f32.mrf.mxu2 }
 0x609   : > { %v2920_v19 = vunpack.c.l.b16 %v2178_v46 }
 0x60b   : > { %v2924_v22 = vpack.c.b16 %v2920_v19, %v2919_v27 }
 0x60c   : > { %v11416_v59 = vpop.f32.mrf.mxu3 }
 0x60d   : > { %2936 = vmatpush.bf16.msra.mxu0 %v2924_v22 }
 0x60f   : > { %v11427_v17 = vpop.f32.mrf.mxu2 }
 0x610   : > { %v2367_v6 = vsel %vm2354_vm1, %v11427_v17, -inf }
 0x611   : > { %2937 = vmatpush.bf16.msra.mxu0 %v2923_v8  ;;  %v2364_v8 = vsel %vm2354_vm1, %v11424_v58, -inf }
 0x614   : > { %v2523_v56 = vpop.f32.mrf.mxu3 }
 0x615   : > { %2938 = vmatpush.bf16.msra.mxu0 %v2922_v5  ;;  %v2528_v32 = vsel %vm2300_vm12, %v2523_v56, -inf  ;;  %v11447_v5 = vpop.f32.mrf.mxu1 }
 0x616   : > { %2529 = vmax.xlane.f32.xlu1 %v2528_v32 }
 0x617   : > { %v11435_v45 = vpop.f32.mrf.mxu2 }
 0x618   : > { %v2370_v1 = vsel %vm2354_vm1, %v11435_v45, -inf }
 0x619   : > { %2939 = vmatpush.bf16.msra.mxu0 %v2921_v21 }
 0x61c   : > { %v2525_v62 = vpop.f32.mrf.mxu3 }
 0x61d   : > { %v2531_v40 = vsel %vm2300_vm12, %v2525_v62, -inf  ;;  %v11453_v32 = vpop.f32.mrf.mxu1 }
 0x61e   : > { %2532 = vmax.xlane.f32.xlu0 %v2531_v40 }
 0x61f   : > { %v11441_v52 = vpop.f32.mrf.mxu2 }
 0x620   : > { %v2373_v20 = vsel %vm2354_vm1, %v11441_v52, -inf }
 0x625   : > { %v11455_v21 = vpop.f32.mrf.mxu1 }
 0x689   : > { %v2530_v23 = vpop.xlane.xlu1 %2529 }
 0x68a   : > { %v2534_v14 = vsub.f32 %v2523_v56, %v2530_v23  ;;  %v11449_v56 = vpop.f32.mrf.mxu2 }
 0x68b   : > { %v2376_v9 = vsel %vm2354_vm1, %v11449_v56, -inf }
 0x68c   : > { %v2536_v11 = vmul.f32 1.442695, %v2534_v14 }
 0x68e   : > { %9781 = vpow2.f32 %v2536_v11 }
 0x691   : > { %v2533_v47 = vpop.xlane.xlu0 %2532 }
 0x692   : > { %v2535_v16 = vsub.f32 %v2525_v62, %v2533_v47  ;;  %v11457_v62 = vpop.f32.mrf.mxu1 }
 0x694   : > { %v9782_v46 = vpop.eup %9781  ;;  %v2538_v55 = vmul.f32 1.442695, %v2535_v16 }
 0x695   : > { %v2540_v27 = vsel %vm2300_vm12, %v9782_v46, 0.0 }
 0x696   : > { %9783 = vpow2.f32 %v2538_v55  ;;  %2541 = vadd.xlane.f32.xlu1 %v2540_v27 }
 0x69a   : > { %v1886_v40 = vpop.f32.mrf.mxu1 }
 0x69c   : > { %v9784_v19 = vpop.eup %9783 }
 0x69d   : > { %v2543_v22 = vsel %vm2300_vm12, %v9784_v19, 0.0 }
 0x69e   : > { %2356 = vmax.xlane.f32.xlu1 %v2355_v7  ;;  %2544 = vadd.xlane.f32.xlu0 %v2543_v22 }
 0x6a2   : > { %v1888_v23 = vpop.f32.mrf.mxu1 }
 0x6a3   : > { %v1909_v0 = vpack.c.bf16 %v1888_v23, %v1888_v23 }
 0x6a5   : > { %v2713_v23 = vunpack.c.l.b16 %v1909_v0 }
 0x6a6   : > { %2362 = vmax.xlane.f32.xlu1 %v2361_v54  ;;  %2359 = vmax.xlane.f32.xlu0 %v2358_v35 }
 0x6aa   : > { %v1891_v14 = vpop.f32.mrf.mxu1 }
 0x6ab   : > { %v1910_v35 = vpack.c.bf16 %v1891_v14, %v1891_v14 }
 0x6ae   : > { %2368 = vmax.xlane.f32.xlu1 %v2367_v6  ;;  %2365 = vmax.xlane.f32.xlu0 %v2364_v8 }
 0x6b2   : > { %v1893_v11 = vpop.f32.mrf.mxu1 }
 0x6b3   : > { %v1911_v22 = vpack.c.bf16 %v1893_v11, %v1893_v11 }
 0x6b6   : > { %2374 = vmax.xlane.f32.xlu1 %v2373_v20  ;;  %2371 = vmax.xlane.f32.xlu0 %v2370_v1  ;;  %v2715_v20 = vunpack.c.l.b16 %v1911_v22 }
 0x6ba   : > { %v2204_v47 = vpop.f32.mrf.mxu1 }
 0x6be   : > { %2377 = vmax.xlane.f32.xlu0 %v2376_v9  ;;  %v2714_v9 = vunpack.c.l.b16 %v1910_v35  ;;  %v2244_v35 = vpack.c.bf16 %v2204_v47, %v2204_v47 }
 0x6c0   : > { %v2719_v15 = vpack.c.b16 %v2715_v20, %v2714_v9 }
 0x6c2   : > { %v2206_v55 = vpop.f32.mrf.mxu1 }
 0x6c3   : > { %v2245_v11 = vpack.c.bf16 %v2206_v55, %v2206_v55 }
 0x6ca   : > { %v11459_v10 = vpop.f32.mrf.mxu1 }
 0x6d2   : > { %v2211_v20 = vpop.f32.mrf.mxu1 }
 0x709   : > { %v2542_v16 = vpop.xlane.xlu1 %2541 }
 0x70a   : > { %9785 = vrcp.f32 %v2542_v16 }
 0x710   : > { %v9786_v8 = vpop.eup %9785 }
 0x711   : > { %v2357_v27 = vpop.xlane.xlu1 %2356  ;;  %v2545_v7 = vpop.xlane.xlu0 %2544  ;;  %v2548_v33 = vmul.f32 %v9786_v8, %v9782_v46 }
 0x712   : > { %v2379_v54 = vsub.f32 %v2334_v36, %v2357_v27  ;;  %9787 = vrcp.f32 %v2545_v7  ;;  %v1908_v7 = vpack.c.bf16 %v1886_v40, %v1886_v40  ;;  %v1907_v40 = vpack.c.bf16 %v11457_v62, %v11457_v62 }
 0x714   : > { %v2387_v6 = vmul.f32 1.442695, %v2379_v54 }
 0x716   : > { %9789 = vpow2.f32 %v2387_v6 }
 0x718   : > { %v9788_v1 = vpop.eup %9787 }
 0x719   : > { %v2363_v60 = vpop.xlane.xlu1 %2362  ;;  %v2360_v63 = vpop.xlane.xlu0 %2359  ;;  %v2549_v30 = vmul.f32 %v9788_v1, %v9784_v19 }
 0x71a   : > { %v2381_v16 = vsub.f32 %v11422_v37, %v2363_v60  ;;  %v2380_v36 = vsub.f32 %v11420_v51, %v2360_v63  ;;  %v2742_v60 = vsel %vm2300_vm12, %v2719_v15, 0  ;;  %v2560_v63 = vunpack.c.l.b16 %v2245_v11 }
 0x71b   : > { %v2550_v14 = vpack.c.bf16 %v2549_v30, %v2548_v33  ;;  %v2712_v30 = vunpack.c.l.b16 %v1908_v7  ;;  %v2559_v33 = vunpack.c.l.b16 %v2244_v35  ;;  %v1906_v15 = vpack.c.bf16 %v11455_v21, %v11455_v21 }
 0x71c   : > { %v11463_v27 = vpop.eup %9789  ;;  %v2391_v22 = vmul.f32 1.442695, %v2381_v16  ;;  %v2389_v54 = vmul.f32 1.442695, %v2380_v36  ;;  %v2247_v35 = vpack.c.bf16 %v2211_v20, %v2211_v20 }
 0x71d   : > { %v2403_v46 = vsel %vm2354_vm1, %v11463_v27, 0.0  ;;  %v2584_v19 = vsel %vm2300_vm12, %v2550_v14, 0  ;;  %v2718_v0 = vpack.c.b16 %v2713_v23, %v2712_v30  ;;  %v2567_v6 = vpack.c.b16 %v2560_v63, %v2559_v33  ;;  %v2214_v23 = vpop.f32.mrf.mxu1 }
 0x71e   : > { %9791 = vpow2.f32 %v2391_v22  ;;  %2404 = vadd.xlane.f32.xlu1 %v2403_v46  ;;  %2593 = vmatpush.bf16.xpose.msrb.mxu3 %v2584_v19  ;;  %v2710_v21 = vunpack.c.l.b16 %v1906_v15  ;;  %v1905_v14 = vpack.c.bf16 %v11453_v32, %v11453_v32  ;;  %v1904_v19 = vpack.c.bf16 %v11447_v5, %v11447_v5 }
 0x71f   : > { %9793 = vpow2.f32 %v2389_v54  ;;  %v2739_v36 = vsel %vm2300_vm12, %v2718_v0, 0  ;;  %v2246_v30 = vpack.c.bf16 %v11459_v10, %v11459_v10  ;;  %v2562_v5 = vunpack.c.l.b16 %v2247_v35 }
 0x721   : > { %v2369_v51 = vpop.xlane.xlu1 %2368  ;;  %v2366_v37 = vpop.xlane.xlu0 %2365 }
 0x722   : > { %v2383_v47 = vsub.f32 %v11427_v17, %v2369_v51  ;;  %v2382_v55 = vsub.f32 %v11424_v58, %v2366_v37  ;;  %v2711_v17 = vunpack.c.l.b16 %v1907_v40  ;;  %v2708_v40 = vunpack.c.l.b16 %v1904_v19 }
 0x724   : > { %v11473_v8 = vpop.eup %9791  ;;  %v2395_v1 = vmul.f32 1.442695, %v2383_v47  ;;  %v2393_v9 = vmul.f32 1.442695, %v2382_v55  ;;  %v2717_v54 = vpack.c.b16 %v2711_v17, %v2710_v21  ;;  %v2561_v47 = vunpack.c.l.b16 %v2246_v30 }
 0x725   : > { %v11477_v16 = vpop.eup %9793  ;;  %9045 = vmatmul.msk.bf16.vlgmr.msrb.gmra.mxu3 %vm2300_vm12, %v2567_v6  ;;  %v2409_v62 = vsel %vm2354_vm1, %v11473_v8, 0.0  ;;  %v2216_v20 = vpop.f32.mrf.mxu1 }
 0x726   : > { %2748 = vmatpush.bf16.xpose.msra.mxu3 %v2742_v60  ;;  %9795 = vpow2.f32 %v2395_v1  ;;  %2410 = vadd.xlane.f32.xlu1 %v2409_v62  ;;  %v2406_v58 = vsel %vm2354_vm1, %v11477_v16, 0.0  ;;  %v2736_v37 = vsel %vm2300_vm12, %v2717_v54, 0 }
 0x727   : > { %9797 = vpow2.f32 %v2393_v9  ;;  %2407 = vadd.xlane.f32.xlu0 %v2406_v58  ;;  %v2249_v58 = vpack.c.bf16 %v2216_v20, %v2216_v20 }
 0x729   : > { %v2372_v11 = vpop.xlane.xlu0 %2371  ;;  %v2375_v7 = vpop.xlane.xlu1 %2374 }
 0x72a   : > { %v2384_v22 = vsub.f32 %v11435_v45, %v2372_v11  ;;  %v2385_v33 = vsub.f32 %v11441_v52, %v2375_v7  ;;  %v2709_v45 = vunpack.c.l.b16 %v1905_v14  ;;  %v2568_v52 = vpack.c.b16 %v2562_v5, %v2561_v47 }
 0x72b   : > { %v2564_v11 = vunpack.c.l.b16 %v2249_v58  ;;  %v1825_v47 = vpack.c.bf16 %v11242_v28, %v11242_v28  ;;  %v9627_v28 = vld [vmem:[%s14633_s6 + $0x10] sm:$0xff] }
 0x72c   : > { %v11488_v46 = vpop.eup %9795  ;;  %v2397_v60 = vmul.f32 1.442695, %v2384_v22  ;;  %v2399_v55 = vmul.f32 1.442695, %v2385_v33  ;;  %v2716_v0 = vpack.c.b16 %v2709_v45, %v2708_v40  ;;  %v1823_v45 = vpack.c.bf16 %v11201_v24, %v11201_v24 }
 0x72d   : > { %v11492_v63 = vpop.eup %9797  ;;  %v2415_v32 = vsel %vm2354_vm1, %v11488_v46, 0.0  ;;  %v2219_v21 = vpop.f32.mrf.mxu1  ;;  %v1826_v40 = vpack.c.bf16 %v11246_v4, %v11246_v4  ;;  %v1827_v24 = vpack.c.bf16 %v11248_v44, %v11248_v44  ;;  %v1829_v44 = vpack.c.bf16 %v11252_v39, %v11252_v39 }
 0x72e   : > { %2749 = vmatpush.bf16.xpose.msra.mxu3 %v2739_v36  ;;  %2416 = vadd.xlane.f32.xlu2 %v2415_v32  ;;  %v2412_v51 = vsel %vm2354_vm1, %v11492_v63, 0.0  ;;  %9799 = vpow2.f32 %v2397_v60  ;;  %v2733_v9 = vsel %vm2300_vm12, %v2716_v0, 0  ;;  %v2248_v36 = vpack.c.bf16 %v2214_v23, %v2214_v23 }
 0x72f   : > { %2413 = vadd.xlane.f32.xlu0 %v2412_v51  ;;  %9801 = vpow2.f32 %v2399_v55  ;;  %v2250_v23 = vpack.c.bf16 %v2219_v21, %v2219_v21  ;;  %v1824_v32 = vpack.c.bf16 %v11230_v38, %v11230_v38  ;;  %v2691_v55 = vunpack.c.l.b16 %v1826_v40 }
 0x730   : > { %v2563_v14 = vunpack.c.l.b16 %v2248_v36  ;;  %v1828_v38 = vpack.c.bf16 %v11250_v57, %v11250_v57  ;;  %v2692_v4 = vunpack.c.l.b16 %v1827_v24  ;;  %v1830_v57 = vpack.c.bf16 %v11254_v49, %v11254_v49 }
 0x731   : > { %v2378_v10 = vpop.xlane.xlu0 %2377  ;;  %v2565_v30 = vunpack.c.l.b16 %v2250_v23  ;;  %v2689_v51 = vunpack.c.l.b16 %v1824_v32 }
 0x732   : > { %v2386_v15 = vsub.f32 %v11449_v56, %v2378_v10  ;;  %v2569_v22 = vpack.c.b16 %v2564_v11, %v2563_v14  ;;  %v2690_v10 = vunpack.c.l.b16 %v1825_v47 }
 0x734   : > { %v11502_v6 = vpop.eup %9799  ;;  %v2401_v62 = vmul.f32 1.442695, %v2386_v15  ;;  %v2697_v0 = vpack.c.b16 %v2691_v55, %v2690_v10  ;;  %v2693_v15 = vunpack.c.l.b16 %v1828_v38 }
 0x735   : > { %9046 = vmatmul.msk.bf16.gmra.mxu3 %vm2300_vm12, %v2568_v52  ;;  %v2418_v1 = vsel %vm2354_vm1, %v11502_v6, 0.0  ;;  %v11509_v17 = vpop.eup %9801  ;;  %v2221_v35 = vpop.f32.mrf.mxu1  ;;  %v9628_v52 = vld [vmem:[%s14633_s6 + $0x18] sm:$0xff] }
 0x736   : > { %2750 = vmatpush.bf16.xpose.msra.mxu3 %v2736_v37  ;;  %9803 = vpow2.f32 %v2401_v62  ;;  %v2421_v56 = vsel %vm2354_vm1, %v11509_v17, 0.0  ;;  %v2251_v19 = vpack.c.bf16 %v2221_v35, %v2221_v35  ;;  %v2688_v37 = vunpack.c.l.b16 %v1823_v45 }
 0x737   : > { %2419 = vadd.xlane.f32.xlu0 %v2418_v1  ;;  %v2698_v20 = vpack.c.b16 %v2693_v15, %v2692_v4  ;;  %v2695_v1 = vunpack.c.l.b16 %v1830_v57 }
 0x738   : > { %v2566_v60 = vunpack.c.l.b16 %v2251_v19  ;;  %v2696_v5 = vpack.c.b16 %v2689_v51, %v2688_v37 }
 0x73a   : > { %v2570_v33 = vpack.c.b16 %v2566_v60, %v2565_v30 }
 0x73c   : > { %v11513_v7 = vpop.eup %9803 }
 0x73d   : > { %v2424_v54 = vsel %vm2354_vm1, %v11513_v7, 0.0 }
 0x73e   : > { %2751 = vmatpush.bf16.xpose.msra.mxu3 %v2733_v9  ;;  %v2694_v9 = vunpack.c.l.b16 %v1829_v44  ;;  %v9636_v44 = vld [vmem:[%s14637_s10 + $0x18] sm:$0xff] }
 0x73f   : > { %2422 = vadd.xlane.f32.xlu0 %v2421_v56 }
 0x740   : > { %v2699_v62 = vpack.c.b16 %v2695_v1, %v2694_v9  ;;  %v9635_v9 = vld [vmem:[%s14637_s10 + $0x10] sm:$0xff] }
 0x745   : > { %9047 = vmatmul.msk.bf16.gmra.mxu3 %vm2300_vm12, %v2569_v22 }
 0x746   : > { %3213 = vmatpush.bf16.msrb.mxu3 %v9628_v52 }
 0x747   : > { %2425 = vadd.xlane.f32.xlu0 %v2424_v54 }
 0x74a   : > { %3214 = vmatpush.bf16.msrb.mxu3 %v9627_v28 }
 0x755   : > { %9048 = vmatmul.msk.bf16.gmra.mxu3 %vm2300_vm12, %v2570_v33 }
 0x765   : > { %9053 = vmatmul.msk.bf16.vlgmr.msra.gmra.mxu3 %vm2300_vm12, %v2696_v5 }
 0x766   : > { %3541 = vmatpush.bf16.msra.mxu3 %v9636_v44 }
 0x76a   : > { %3542 = vmatpush.bf16.msra.mxu3 %v9635_v9 }
 0x775   : > { %9054 = vmatmul.msk.bf16.gmra.mxu3 %vm2300_vm12, %v2697_v0 }
 0x785   : > { %9055 = vmatmul.msk.bf16.gmra.mxu3 %vm2300_vm12, %v2698_v20 }
 0x791   : > { %v2405_v58 = vpop.xlane.xlu1 %2404 }
 0x792   : > { %9805 = vrcp.f32 %v2405_v58 }
 0x795   : > { %9056 = vmatmul.msk.bf16.gmra.mxu3 %vm2300_vm12, %v2699_v62 }
 0x798   : > { %v9806_v21 = vpop.eup %9805 }
 0x799   : > { %v2435_v11 = vmul.f32 %v9806_v21, %v11463_v27  ;;  %v2411_v39 = vpop.xlane.xlu1 %2410 }
 0x79a   : > { %v2408_v36 = vpop.xlane.xlu0 %2407 }
 0x79b   : > { %9807 = vrcp.f32 %v2408_v36 }
 0x7a1   : > { %v9808_v56 = vpop.eup %9807  ;;  %v2417_v33 = vpop.xlane.xlu2 %2416 }
 0x7a2   : > { %v2436_v14 = vmul.f32 %v9808_v56, %v11477_v16  ;;  %v2414_v49 = vpop.xlane.xlu0 %2413 }
 0x7a3   : > { %9809 = vrcp.f32 %v2414_v49  ;;  %v2090_v49 = vpack.c.bf16 %v11402_v26, %v11402_v26  ;;  %v2092_v26 = vpack.c.bf16 %v11406_v48, %v11406_v48  ;;  %v2095_v48 = vpack.c.bf16 %v11412_v2, %v11412_v2 }
 0x7a4   : > { %v2443_v22 = vpack.c.bf16 %v2436_v14, %v2435_v11  ;;  %9811 = vrcp.f32 %v2411_v39 }
 0x7a5   : > { %9098 = vmatmul.msk.bf16.vlgmr.msrb.gmra.mxu3 %vm913_vm3, %v10576_v61 }
 0x7a6   : > { %9049 = vmatmul.msk.bf16.vlgmr.msrb.gmra.mxu2 %vm2354_vm1, %v2443_v22  ;;  %v2091_v22 = vpack.c.bf16 %v11404_v29, %v11404_v29  ;;  %v2093_v29 = vpack.c.bf16 %v11408_v3, %v11408_v3 }
 0x7a8   : > { %v11550_v54 = vpop.f32.mrf.mxu3  ;;  %v2874_v39 = vunpack.c.l.b16 %v2091_v22 }
 0x7a9   : > { %v9810_v35 = vpop.eup %9809 }
 0x7aa   : > { %v9812_v19 = vpop.eup %9811  ;;  %v2438_v23 = vmul.f32 %v9810_v35, %v11492_v63  ;;  %v2420_v60 = vpop.xlane.xlu0 %2419  ;;  %v2873_v35 = vunpack.c.l.b16 %v2090_v49 }
 0x7ab   : > { %v2437_v16 = vmul.f32 %v9812_v19, %v11473_v8  ;;  %9813 = vrcp.f32 %v2420_v60 }
 0x7ac   : > { %9815 = vrcp.f32 %v2417_v33  ;;  %v2881_v60 = vpack.c.b16 %v2874_v39, %v2873_v35 }
 0x7ad   : > { %v2444_v30 = vpack.c.bf16 %v2438_v23, %v2437_v16 }
 0x7b0   : > { %v11553_v27 = vpop.f32.mrf.mxu3 }
 0x7b1   : > { %v9814_v51 = vpop.eup %9813 }
 0x7b2   : > { %v2423_v45 = vpop.xlane.xlu0 %2422  ;;  %v9816_v37 = vpop.eup %9815  ;;  %v2440_v63 = vmul.f32 %v9814_v51, %v11502_v6 }
 0x7b3   : > { %v2439_v8 = vmul.f32 %v9816_v37, %v11488_v46 }
 0x7b5   : > { %9099 = vmatmul.msk.bf16.gmra.mxu3 %vm913_vm3, %v10628_v12  ;;  %v2445_v47 = vpack.c.bf16 %v2440_v63, %v2439_v8 }
 0x7b6   : > { %9050 = vmatmul.msk.bf16.gmra.mxu2 %vm2354_vm1, %v2444_v30  ;;  %v2876_v30 = vunpack.c.l.b16 %v2093_v29 }
 0x7b8   : > { %v11559_v32 = vpop.f32.mrf.mxu3 }
 0x7ba   : > { %v2426_v40 = vpop.xlane.xlu0 %2425 }
 0x7bb   : > { %9817 = vrcp.f32 %v2426_v40 }
 0x7bc   : > { %9819 = vrcp.f32 %v2423_v45  ;;  %v2875_v45 = vunpack.c.l.b16 %v2092_v26 }
 0x7be   : > { %v2882_v63 = vpack.c.b16 %v2876_v30, %v2875_v45 }
 0x7c0   : > { %v11562_v5 = vpop.f32.mrf.mxu3 }
 0x7c1   : > { %v9818_v10 = vpop.eup %9817 }
 0x7c2   : > { %v9820_v0 = vpop.eup %9819  ;;  %v2442_v38 = vmul.f32 %v9818_v10, %v11513_v7  ;;  %v2094_v10 = vpack.c.bf16 %v11410_v13, %v11410_v13  ;;  %v2097_v13 = vpack.c.bf16 %v11416_v59, %v11416_v59 }
 0x7c3   : > { %v2441_v24 = vmul.f32 %v9820_v0, %v11509_v17  ;;  %v2878_v0 = vunpack.c.l.b16 %v2095_v48 }
 0x7c5   : > { %9100 = vmatmul.msk.bf16.gmra.mxu3 %vm913_vm3, %v10655_v43  ;;  %v2446_v46 = vpack.c.bf16 %v2442_v38, %v2441_v24  ;;  %v2877_v24 = vunpack.c.l.b16 %v2094_v10  ;;  %v14734_v10 = vld [vmem:[#allocation20_spill] sm:$0xff] }
 0x7c6   : > { %9051 = vmatmul.msk.bf16.gmra.mxu2 %vm2354_vm1, %v2445_v47 }
 0x7c8   : > { %v11568_v55 = vpop.f32.mrf.mxu3 }
 0x7d0   : > { %v11571_v6 = vpop.f32.mrf.mxu3 }
 0x7d5   : > { %9101 = vmatmul.msk.bf16.gmra.mxu3 %vm913_vm3, %v10766_v50 }
 0x7d6   : > { %9052 = vmatmul.msk.bf16.gmra.mxu2 %vm2354_vm1, %v2446_v46 }
 0x7d8   : > { %v11577_v52 = vpop.f32.mrf.mxu3 }
 0x7e0   : > { %v11579_v15 = vpop.f32.mrf.mxu3 }
 0x7e5   : > { %9102 = vmatmul.msk.bf16.gmra.mxu3 %vm913_vm3, %v10795_v18 }
 0x7e8   : > { %v11583_v4 = vpop.f32.mrf.mxu3 }
 0x7e9   : > { %v2773_v7 = vsel %vm2354_vm1, %v11583_v4, -inf }
 0x7ea   : > { %2774 = vmax.xlane.f32.xlu1 %v2773_v7 }
 0x7f0   : > { %v11587_v17 = vpop.f32.mrf.mxu3 }
 0x7f1   : > { %v2776_v28 = vsel %vm2354_vm1, %v11587_v17, -inf }
 0x7f2   : > { %2777 = vmax.xlane.f32.xlu0 %v2776_v28  ;;  %v2883_v28 = vpack.c.b16 %v2878_v0, %v2877_v24 }
 0x7f5   : > { %9103 = vmatmul.msk.bf16.gmra.mxu3 %vm913_vm3, %v10817_v53 }
 0x7f8   : > { %v11593_v20 = vpop.f32.mrf.mxu3 }
 0x7f9   : > { %v2779_v57 = vsel %vm2354_vm1, %v11593_v20, -inf }
 0x7fa   : > { %2780 = vmax.xlane.f32.xlu0 %v2779_v57 }
 0x800   : > { %v11600_v1 = vpop.f32.mrf.mxu3 }
 0x801   : > { %v2782_v62 = vsel %vm2354_vm1, %v11600_v1, -inf }
 0x802   : > { %2783 = vmax.xlane.f32.xlu0 %v2782_v62  ;;  %v14732_v62 = vld [vmem:[#allocation24_spill] sm:$0xff] }
 0x805   : > { %9104 = vmatmul.msk.bf16.gmra.mxu3 %vm913_vm3, %v11010_v25 }
 0x808   : > { %v11609_v58 = vpop.f32.mrf.mxu3 }
 0x809   : > { %v2785_v36 = vsel %vm2354_vm1, %v11609_v58, -inf }
 0x80a   : > { %2786 = vmax.xlane.f32.xlu0 %v2785_v36  ;;  %v2096_v36 = vpack.c.bf16 %v14732_v62, %v14732_v62 }
 0x80c   : > { %v2879_v22 = vunpack.c.l.b16 %v2096_v36  ;;  %v14735_v36 = vld [vmem:[#allocation21_spill] sm:$0xff] }
 0x810   : > { %v11613_v21 = vpop.f32.mrf.mxu3 }
 0x811   : > { %v2788_v56 = vsel %vm2354_vm1, %v11613_v21, -inf }
 0x812   : > { %2789 = vmax.xlane.f32.xlu0 %v2788_v56  ;;  %v2880_v56 = vunpack.c.l.b16 %v2097_v13 }
 0x814   : > { %v2884_v35 = vpack.c.b16 %v2880_v56, %v2879_v22 }
 0x815   : > { %9105 = vmatmul.msk.bf16.gmra.mxu3 %vm913_vm3, %v11064_v41 }
 0x818   : > { %v11619_v11 = vpop.f32.mrf.mxu3 }
 0x819   : > { %v2791_v14 = vsel %vm2354_vm1, %v11619_v11, -inf }
 0x81a   : > { %2792 = vmax.xlane.f32.xlu0 %v2791_v14 }
 0x820   : > { %v11627_v19 = vpop.f32.mrf.mxu3 }
 0x821   : > { %v2794_v23 = vsel %vm2354_vm1, %v11627_v19, -inf }
 0x822   : > { %2795 = vmax.xlane.f32.xlu0 %v2794_v23 }
 0x824   : > { %2889 = vxpose.xlu1.c.b16.start [1/4] (short) (narrow) %v2881_v60, 16 }
 0x825   : > { %9178 = vmatmul.msk.bf16.vlgmr.msra.gmra.mxu3 %vm913_vm3, %v11089_v42 }
 0x828   : > { %v3216_v16 = vpop.f32.mrf.mxu3 }
 0x829   : > { %v3256_v33 = vpack.c.bf16 %v3216_v16, %v3216_v16  ;;  %v14733_v16 = vld [vmem:[#allocation19_spill] sm:$0xff] }
 0x82b   : > { %v11637_v8 = vunpack.c.l.b16 %v3256_v33 }
 0x830   : > { %v3218_v51 = vpop.f32.mrf.mxu3 }
 0x831   : > { %v3257_v37 = vpack.c.bf16 %v3218_v51, %v3218_v51 }
 0x833   : > { %v11639_v40 = vunpack.c.l.b16 %v3257_v37 }
 0x834   : > { %2890 = vxpose.xlu1.c.b16.cont [2/4] (short) (narrow) %v2882_v63, 16 }
 0x835   : > { %9179 = vmatmul.msk.bf16.gmra.mxu3 %vm913_vm3, %v11118_v34 }
 0x838   : > { %v3221_v47 = vpop.f32.mrf.mxu3 }
 0x839   : > { %v3258_v38 = vpack.c.bf16 %v3221_v47, %v3221_v47 }
 0x83b   : > { %v11649_v57 = vunpack.c.l.b16 %v3258_v38 }
 0x840   : > { %v3223_v46 = vpop.f32.mrf.mxu3 }
 0x841   : > { %v3259_v7 = vpack.c.bf16 %v3223_v46, %v3223_v46 }
 0x843   : > { %v11651_v44 = vunpack.c.l.b16 %v3259_v7 }
 0x844   : > { %2891 = vxpose.xlu1.c.b16.cont [3/4] (short) (narrow) %v2883_v28, 16 }
 0x845   : > { %9180 = vmatmul.msk.bf16.gmra.mxu3 %vm913_vm3, %v11172_v31 }
 0x848   : > { %v3226_v9 = vpop.f32.mrf.mxu3 }
 0x849   : > { %v3260_v14 = vpack.c.bf16 %v3226_v9, %v3226_v9 }
 0x84b   : > { %v11661_v23 = vunpack.c.l.b16 %v3260_v14 }
 0x850   : > { %v3228_v49 = vpop.f32.mrf.mxu3 }
 0x851   : > { %v3261_v39 = vpack.c.bf16 %v3228_v49, %v3228_v49 }
 0x853   : > { %v11663_v60 = vunpack.c.l.b16 %v3261_v39 }
 0x854   : > { %2892 = vxpose.xlu1.c.b16.end [4/4] (short) (narrow) %v2884_v35, 16 }
 0x855   : > { %9181 = vmatmul.msk.bf16.gmra.mxu3 %vm913_vm3, %v14733_v16 }
 0x858   : > { %v3231_v29 = vpop.f32.mrf.mxu3 }
 0x859   : > { %v3262_v33 = vpack.c.bf16 %v3231_v29, %v3231_v29 }
 0x85b   : > { %v11670_v63 = vunpack.c.l.b16 %v3262_v33 }
 0x85d   : > { %v2775_v26 = vpop.xlane.xlu1 %2774 }
 0x85e   : > { %v2797_v30 = vsub.f32 %v11583_v4, %v2775_v26 }
 0x860   : > { %v2805_v45 = vmul.f32 1.442695, %v2797_v30  ;;  %v3233_v51 = vpop.f32.mrf.mxu3  ;;  %v14736_v30 = vld [vmem:[#allocation22_spill] sm:$0xff] }
 0x861   : > { %v3263_v37 = vpack.c.bf16 %v3233_v51, %v3233_v51 }
 0x862   : > { %9821 = vpow2.f32 %v2805_v45 }
 0x863   : > { %v11672_v47 = vunpack.c.l.b16 %v3263_v37 }
 0x865   : > { %9182 = vmatmul.msk.bf16.gmra.mxu3 %vm913_vm3, %v14734_v10  ;;  %v2778_v0 = vpop.xlane.xlu0 %2777 }
 0x866   : > { %v2798_v38 = vsub.f32 %v11587_v17, %v2778_v0  ;;  %v14737_v0 = vld [vmem:[#allocation23_spill] sm:$0xff] }
 0x868   : > { %v11679_v24 = vpop.eup %9821  ;;  %v2807_v4 = vmul.f32 1.442695, %v2798_v38 }
 0x869   : > { %v2821_v46 = vsel %vm2354_vm1, %v11679_v24, 0.0 }
 0x86a   : > { %9823 = vpow2.f32 %v2807_v4  ;;  %2822 = vadd.xlane.f32.xlu0 %v2821_v46 }
 0x86d   : > { %v2781_v7 = vpop.xlane.xlu0 %2780 }
 0x86e   : > { %v2799_v28 = vsub.f32 %v11593_v20, %v2781_v7 }
 0x870   : > { %v9824_v9 = vpop.eup %9823  ;;  %v2809_v13 = vmul.f32 1.442695, %v2799_v28 }
 0x871   : > { %v2824_v62 = vsel %vm2354_vm1, %v9824_v9, 0.0 }
 0x872   : > { %9825 = vpow2.f32 %v2809_v13  ;;  %2825 = vadd.xlane.f32.xlu0 %v2824_v62 }
 0x875   : > { %9183 = vmatmul.msk.bf16.gmra.mxu3 %vm913_vm3, %v14735_v36  ;;  %v2784_v17 = vpop.xlane.xlu0 %2783 }
 0x876   : > { %v2800_v56 = vsub.f32 %v11600_v1, %v2784_v17 }
 0x878   : > { %v9826_v14 = vpop.eup %9825  ;;  %v2811_v22 = vmul.f32 1.442695, %v2800_v56 }
 0x879   : > { %v2827_v49 = vsel %vm2354_vm1, %v9826_v14, 0.0 }
 0x87a   : > { %9827 = vpow2.f32 %v2811_v22  ;;  %2828 = vadd.xlane.f32.xlu0 %v2827_v49  ;;  %v9626_v22 = vld [vmem:[%s14632_s5 + $0x18] sm:$0xff]  ;;  %v9625_v49 = vld [vmem:[%s14632_s5 + $0x10] sm:$0xff] }
 0x87b   : > { %3131 = vmatpush.bf16.msrb.mxu0 %v9626_v22 }
 0x87d   : > { %v2787_v39 = vpop.xlane.xlu0 %2786 }
 0x87e   : > { %v2801_v20 = vsub.f32 %v11609_v58, %v2787_v39 }
 0x87f   : > { %3132 = vmatpush.bf16.msrb.mxu0 %v9625_v49 }
 0x880   : > { %v9828_v35 = vpop.eup %9827  ;;  %v2813_v29 = vmul.f32 1.442695, %v2801_v20 }
 0x881   : > { %v2830_v26 = vsel %vm2354_vm1, %v9828_v35, 0.0 }
 0x882   : > { %9829 = vpow2.f32 %v2813_v29  ;;  %2831 = vadd.xlane.f32.xlu0 %v2830_v26 }
 0x885   : > { %9184 = vmatmul.msk.bf16.gmra.mxu3 %vm913_vm3, %v14736_v30  ;;  %v2790_v33 = vpop.xlane.xlu0 %2789 }
 0x886   : > { %v2802_v62 = vsub.f32 %v11613_v21, %v2790_v33 }
 0x888   : > { %v11693_v1 = vpop.eup %9829  ;;  %v2815_v17 = vmul.f32 1.442695, %v2802_v62 }
 0x889   : > { %v2833_v45 = vsel %vm2354_vm1, %v11693_v1, 0.0 }
 0x88a   : > { %2834 = vadd.xlane.f32.xlu0 %v2833_v45 }
 0x88d   : > { %v2793_v51 = vpop.xlane.xlu0 %2792 }
 0x88e   : > { %v2803_v37 = vsub.f32 %v11619_v11, %v2793_v51 }
 0x890   : > { %v2817_v58 = vmul.f32 1.442695, %v2803_v37 }
 0x892   : > { %9831 = vpow2.f32 %v2817_v58 }
 0x895   : > { %9185 = vmatmul.msk.bf16.gmra.mxu3 %vm913_vm3, %v14737_v0  ;;  %v2796_v38 = vpop.xlane.xlu0 %2795 }
 0x896   : > { %v2804_v4 = vsub.f32 %v11627_v19, %v2796_v38 }
 0x898   : > { %v11701_v46 = vpop.eup %9831  ;;  %v2819_v7 = vmul.f32 1.442695, %v2804_v4 }
 0x899   : > { %v2839_v28 = vsel %vm2354_vm1, %v11701_v46, 0.0 }
 0x89a   : > { %9833 = vpow2.f32 %v2819_v7  ;;  %2840 = vadd.xlane.f32.xlu0 %v2839_v28 }
 0x89b   : > { %9835 = vpow2.f32 %v2815_v17 }
 0x8a0   : > { %v11705_v13 = vpop.eup %9833 }
 0x8a1   : > { %v2842_v11 = vsel %vm2354_vm1, %v11705_v13, 0.0  ;;  %v9836_v56 = vpop.eup %9835 }
 0x8a2   : > { %2843 = vadd.xlane.f32.xlu0 %v2842_v11  ;;  %v2836_v19 = vsel %vm2354_vm1, %v9836_v56, 0.0 }
 0x8b4   : > { %2837 = vadd.xlane.f32.xlu1 %v2836_v19  ;;  %v9631_v19 = vld [vmem:[%s14635_s8 + $0x10] sm:$0xff] }
 0x8d0   : > { %v2897_v39 = vpop.trf.xlu1 }
 0x8d1   : > { %9057 = vmatmul.msk.bf16.vlgmr.msra.gmra.mxu0 %vm2354_vm1, %v2897_v39 }
 0x8dd   : > { %v2823_v21 = vpop.xlane.xlu0 %2822 }
 0x8de   : > { %9837 = vrcp.f32 %v2823_v21 }
 0x8e1   : > { %9078 = vmatmul.msk.bf16.vlgmr.msrb.gmra.mxu0 %vm913_vm3, %v10576_v61 }
 0x8e4   : > { %v9838_v29 = vpop.eup %9837 }
 0x8e5   : > { %v2826_v20 = vpop.xlane.xlu0 %2825  ;;  %v2853_v33 = vmul.f32 %v9838_v29, %v11679_v24 }
 0x8e6   : > { %9839 = vrcp.f32 %v2826_v20  ;;  %v9634_v20 = vld [vmem:[%s14636_s9 + $0x18] sm:$0xff] }
 0x8e7   : > { %3459 = vmatpush.bf16.msra.mxu0 %v9634_v20 }
 0x8ec   : > { %v9840_v26 = vpop.eup %9839 }
 0x8ed   : > { %v2854_v45 = vmul.f32 %v9840_v26, %v9824_v9  ;;  %v2829_v51 = vpop.xlane.xlu0 %2828  ;;  %v9632_v9 = vld [vmem:[%s14635_s8 + $0x18] sm:$0xff] }
 0x8ee   : > { %9841 = vrcp.f32 %v2829_v51  ;;  %3377 = vmatpush.bf16.msrb.mxu2 %v9632_v9  ;;  %v11751_v51 = vpop.f32.mrf.mxu2 }
 0x8ef   : > { %v2861_v37 = vpack.c.bf16 %v2854_v45, %v2853_v33 }
 0x8f1   : > { %9062 = vmatmul.msk.bf16.vlgmr.msra.gmra.mxu2 %vm2354_vm1, %v2861_v37  ;;  %9079 = vmatmul.msk.bf16.gmra.mxu0 %vm913_vm3, %v10628_v12 }
 0x8f2   : > { %3378 = vmatpush.bf16.msrb.mxu2 %v9631_v19 }
 0x8f4   : > { %v9842_v38 = vpop.eup %9841 }
 0x8f5   : > { %v2832_v58 = vpop.xlane.xlu0 %2831  ;;  %v2855_v7 = vmul.f32 %v9842_v38, %v9826_v14 }
 0x8f6   : > { %9843 = vrcp.f32 %v2832_v58  ;;  %v11754_v37 = vpop.f32.mrf.mxu2 }
 0x8fc   : > { %v9844_v4 = vpop.eup %9843 }
 0x8fd   : > { %v2856_v28 = vmul.f32 %v9844_v4, %v9828_v35  ;;  %v2835_v24 = vpop.xlane.xlu0 %2834 }
 0x8fe   : > { %9845 = vrcp.f32 %v2835_v24 }
 0x8ff   : > { %v2862_v11 = vpack.c.bf16 %v2856_v28, %v2855_v7 }
 0x901   : > { %9063 = vmatmul.msk.bf16.gmra.mxu2 %vm2354_vm1, %v2862_v11  ;;  %9080 = vmatmul.msk.bf16.gmra.mxu0 %vm913_vm3, %v10655_v43 }
 0x904   : > { %v9846_v62 = vpop.eup %9845 }
 0x905   : > { %v2857_v22 = vmul.f32 %v9846_v62, %v11693_v1 }
 0x90d   : > { %v2841_v14 = vpop.xlane.xlu0 %2840 }
 0x911   : > { %9081 = vmatmul.msk.bf16.gmra.mxu0 %vm913_vm3, %v10766_v50 }
 0x915   : > { %v2844_v39 = vpop.xlane.xlu0 %2843 }
 0x921   : > { %9082 = vmatmul.msk.bf16.gmra.mxu0 %vm913_vm3, %v10795_v18 }
 0x927   : > { %v2838_v35 = vpop.xlane.xlu1 %2837 }
 0x928   : > { %9847 = vrcp.f32 %v2838_v35 }
 0x929   : > { %9849 = vrcp.f32 %v2844_v39 }
 0x92a   : > { %9851 = vrcp.f32 %v2841_v14 }
 0x92e   : > { %v9848_v17 = vpop.eup %9847 }
 0x92f   : > { %v2858_v49 = vmul.f32 %v9848_v17, %v9836_v56  ;;  %v9850_v29 = vpop.eup %9849  ;;  %v9633_v56 = vld [vmem:[%s14636_s9 + $0x10] sm:$0xff] }
 0x930   : > { %v9852_v26 = vpop.eup %9851  ;;  %v2860_v1 = vmul.f32 %v9850_v29, %v11705_v13  ;;  %3460 = vmatpush.bf16.msra.mxu0 %v9633_v56 }
 0x931   : > { %9083 = vmatmul.msk.bf16.gmra.mxu0 %vm913_vm3, %v10817_v53  ;;  %v2863_v21 = vpack.c.bf16 %v2858_v49, %v2857_v22  ;;  %v2859_v33 = vmul.f32 %v9852_v26, %v11701_v46  ;;  %v11764_v46 = vpop.f32.mrf.mxu2 }
 0x933   : > { %9064 = vmatmul.msk.bf16.gmra.mxu2 %vm2354_vm1, %v2863_v21  ;;  %v2864_v45 = vpack.c.bf16 %v2860_v1, %v2859_v33 }
 0x939   : > { %v11770_v28 = vpop.f32.mrf.mxu2 }
 0x941   : > { %9084 = vmatmul.msk.bf16.gmra.mxu0 %vm913_vm3, %v11010_v25  ;;  %v11780_v62 = vpop.f32.mrf.mxu2 }
 0x943   : > { %9065 = vmatmul.msk.bf16.gmra.mxu2 %vm2354_vm1, %v2864_v45 }
 0x949   : > { %v11788_v22 = vpop.f32.mrf.mxu2 }
 0x94e   : > { %v11756_v58 = vpop.f32.mrf.mxu0 }
 0x94f   : > { %v2946_v13 = vsel %vm2300_vm12, %v11756_v58, -inf }
 0x950   : > { %2947 = vmax.xlane.f32.xlu2 %v2946_v13 }
 0x951   : > { %9085 = vmatmul.msk.bf16.gmra.mxu0 %vm913_vm3, %v11064_v41  ;;  %v11796_v1 = vpop.f32.mrf.mxu2 }
 0x953   : > { %9138 = vmatmul.msk.bf16.vlgmr.msrb.gmra.mxu2 %vm913_vm3, %v11089_v42 }
 0x956   : > { %v11766_v38 = vpop.f32.mrf.mxu0 }
 0x957   : > { %v2949_v4 = vsel %vm2300_vm12, %v11766_v38, -inf }
 0x958   : > { %2950 = vmax.xlane.f32.xlu0 %v2949_v4 }
 0x959   : > { %v11802_v4 = vpop.f32.mrf.mxu2 }
 0x95e   : > { %v3134_v7 = vpop.f32.mrf.mxu0 }
 0x95f   : > { %v3174_v11 = vpack.c.bf16 %v3134_v7, %v3134_v7 }
 0x961   : > { %9158 = vmatmul.msk.bf16.vlgmr.msra.gmra.mxu0 %vm913_vm3, %v11089_v42  ;;  %v11776_v14 = vunpack.c.l.b16 %v3174_v11 }
 0x963   : > { %9139 = vmatmul.msk.bf16.gmra.mxu2 %vm913_vm3, %v11118_v34 }
 0x966   : > { %v3136_v24 = vpop.f32.mrf.mxu0 }
 0x967   : > { %v3175_v9 = vpack.c.bf16 %v3136_v24, %v3136_v24 }
 0x969   : > { %v11778_v35 = vunpack.c.l.b16 %v3175_v9 }
 0x96e   : > { %v3139_v19 = vpop.f32.mrf.mxu0 }
 0x96f   : > { %v3176_v49 = vpack.c.bf16 %v3139_v19, %v3139_v19 }
 0x971   : > { %9159 = vmatmul.msk.bf16.gmra.mxu0 %vm913_vm3, %v11118_v34  ;;  %v11790_v20 = vunpack.c.l.b16 %v3176_v49 }
 0x973   : > { %9140 = vmatmul.msk.bf16.gmra.mxu2 %vm913_vm3, %v11172_v31 }
 0x974   : > { %v11810_v19 = vpop.f32.mrf.mxu2 }
 0x976   : > { %v3141_v39 = vpop.f32.mrf.mxu0 }
 0x977   : > { %v3177_v21 = vpack.c.bf16 %v3141_v39, %v3141_v39 }
 0x979   : > { %v11792_v29 = vunpack.c.l.b16 %v3177_v21 }
 0x97e   : > { %v3144_v56 = vpop.f32.mrf.mxu0 }
 0x97f   : > { %v3178_v33 = vpack.c.bf16 %v3144_v56, %v3144_v56 }
 0x981   : > { %9160 = vmatmul.msk.bf16.gmra.mxu0 %vm913_vm3, %v11172_v31  ;;  %v11804_v7 = vunpack.c.l.b16 %v3178_v33 }
 0x983   : > { %9141 = vmatmul.msk.bf16.gmra.mxu2 %vm913_vm3, %v14733_v16 }
 0x986   : > { %v3146_v45 = vpop.f32.mrf.mxu0 }
 0x987   : > { %v3179_v13 = vpack.c.bf16 %v3146_v45, %v3146_v45  ;;  %v11820_v45 = vpop.f32.mrf.mxu2 }
 0x989   : > { %v11806_v11 = vunpack.c.l.b16 %v3179_v13 }
 0x98e   : > { %v3149_v9 = vpop.f32.mrf.mxu0 }
 0x98f   : > { %v3180_v49 = vpack.c.bf16 %v3149_v9, %v3149_v9  ;;  %v11828_v26 = vpop.f32.mrf.mxu2 }
 0x991   : > { %9161 = vmatmul.msk.bf16.gmra.mxu0 %vm913_vm3, %v14733_v16  ;;  %v11816_v56 = vunpack.c.l.b16 %v3180_v49 }
 0x993   : > { %9142 = vmatmul.msk.bf16.gmra.mxu2 %vm913_vm3, %v14734_v10  ;;  %14738 = vst [vmem:[#allocation24_spill] sm:$0xff] %v11816_v56 }
 0x996   : > { %v3151_v39 = vpop.f32.mrf.mxu0 }
 0x997   : > { %v3181_v21 = vpack.c.bf16 %v3151_v39, %v3151_v39  ;;  %v11836_v13 = vpop.f32.mrf.mxu2 }
 0x999   : > { %v11818_v33 = vunpack.c.l.b16 %v3181_v21 }
 0x99b   : > { %14739 = vst [vmem:[#allocation25_spill] sm:$0xff] %v11818_v33 }
 0x99e   : > { %v3154_v24 = vpop.f32.mrf.mxu0 }
 0x99f   : > { %v3182_v9 = vpack.c.bf16 %v3154_v24, %v3154_v24 }
 0x9a1   : > { %9162 = vmatmul.msk.bf16.gmra.mxu0 %vm913_vm3, %v14734_v10  ;;  %v11830_v17 = vunpack.c.l.b16 %v3182_v9 }
 0x9a3   : > { %9143 = vmatmul.msk.bf16.gmra.mxu2 %vm913_vm3, %v14735_v36  ;;  %14740 = vst [vmem:[#allocation26_spill] sm:$0xff] %v11830_v17 }
 0x9a6   : > { %v3156_v39 = vpop.f32.mrf.mxu0 }
 0x9a7   : > { %v3183_v49 = vpack.c.bf16 %v3156_v39, %v3156_v39 }
 0x9a9   : > { %v11832_v21 = vunpack.c.l.b16 %v3183_v49 }
 0x9ab   : > { %14741 = vst [vmem:[#allocation27_spill] sm:$0xff] %v11832_v21 }
 0x9ae   : > { %v3159_v2 = vpop.f32.mrf.mxu0 }
 0x9af   : > { %v3184_v59 = vpack.c.bf16 %v3159_v2, %v3159_v2 }
 0x9b1   : > { %9163 = vmatmul.msk.bf16.gmra.mxu0 %vm913_vm3, %v14735_v36  ;;  %v11844_v48 = vunpack.c.l.b16 %v3184_v59  ;;  %v9624_v36 = vld [vmem:[%s14638_s11] sm:$0xff] }
 0x9b2   : > { %4563 = vmatpush.bf16.msrb.mxu0 %v9624_v36 }
 0x9b3   : > { %9144 = vmatmul.msk.bf16.gmra.mxu2 %vm913_vm3, %v14736_v30  ;;  %14742 = vst [vmem:[#allocation28_spill] sm:$0xff] %v11844_v48 }
 0x9b6   : > { %v11842_v24 = vpop.f32.mrf.mxu2  ;;  %v3161_v39 = vpop.f32.mrf.mxu0 }
 0x9b7   : > { %v3185_v9 = vpack.c.bf16 %v3161_v39, %v3161_v39 }
 0x9b9   : > { %v11846_v49 = vunpack.c.l.b16 %v3185_v9 }
 0x9bb   : > { %14743 = vst [vmem:[#allocation29_spill] sm:$0xff] %v11846_v49 }
 0x9be   : > { %v11850_v17 = vpop.f32.mrf.mxu2  ;;  %v3164_v21 = vpop.f32.mrf.mxu0 }
 0x9bf   : > { %v3186_v39 = vpack.c.bf16 %v3164_v21, %v3164_v21 }
 0x9c1   : > { %9164 = vmatmul.msk.bf16.gmra.mxu0 %vm913_vm3, %v14736_v30  ;;  %v11862_v10 = vunpack.c.l.b16 %v3186_v39 }
 0x9c3   : > { %v2948_v2 = vpop.xlane.xlu2 %2947  ;;  %9145 = vmatmul.msk.bf16.gmra.mxu2 %vm913_vm3, %v14737_v0  ;;  %14744 = vst [vmem:[#allocation30_spill] sm:$0xff] %v11862_v10 }
 0x9c4   : > { %v2952_v59 = vsub.f32 %v11756_v58, %v2948_v2 }
 0x9c6   : > { %v2954_v9 = vmul.f32 1.442695, %v2952_v59  ;;  %v11860_v3 = vpop.f32.mrf.mxu2  ;;  %v3166_v48 = vpop.f32.mrf.mxu0 }
 0x9c7   : > { %v3187_v49 = vpack.c.bf16 %v3166_v48, %v3166_v48 }
 0x9c8   : > { %9853 = vpow2.f32 %v2954_v9 }
 0x9c9   : > { %v11864_v16 = vunpack.c.l.b16 %v3187_v49 }
 0x9cb   : > { %14745 = vst [vmem:[#allocation31_spill] sm:$0xff] %v11864_v16  ;;  %v2951_v30 = vpop.xlane.xlu0 %2950 }
 0x9cc   : > { %v2953_v56 = vsub.f32 %v11766_v38, %v2951_v30 }
 0x9ce   : > { %v11869_v33 = vpop.eup %9853  ;;  %v2956_v58 = vmul.f32 1.442695, %v2953_v56  ;;  %v11871_v21 = vpop.f32.mrf.mxu2 }
 0x9cf   : > { %v3169_v2 = vpop.f32.mrf.mxu0  ;;  %v2958_v48 = vsel %vm2300_vm12, %v11869_v33, 0.0 }
 0x9d0   : > { %9855 = vpow2.f32 %v2956_v58  ;;  %2959 = vadd.xlane.f32.xlu2 %v2958_v48  ;;  %v3188_v49 = vpack.c.bf16 %v3169_v2, %v3169_v2  ;;  %v2663_v58 = vadd.f32 %v11754_v37, %v11553_v27  ;;  %v2661_v2 = vadd.f32 %v11751_v51, %v11550_v54 }
 0x9d1   : > { %9165 = vmatmul.msk.bf16.gmra.mxu0 %vm913_vm3, %v14737_v0  ;;  %v2666_v27 = vadd.f32 %v11764_v46, %v11559_v32  ;;  %v2673_v0 = vadd.f32 %v11788_v22, %v11571_v6  ;;  %v2676_v6 = vadd.f32 %v11796_v1, %v11577_v52 }
 0x9d2   : > { %v11881_v56 = vunpack.c.l.b16 %v3188_v49 }
 0x9d4   : > { %14746 = vst [vmem:[#allocation32_spill] sm:$0xff] %v11881_v56 }
 0x9d6   : > { %v11877_v59 = vpop.eup %9855  ;;  %v3380_v9 = vpop.f32.mrf.mxu2 }
 0x9d7   : > { %v3171_v39 = vpop.f32.mrf.mxu0  ;;  %v2961_v38 = vsel %vm2300_vm12, %v11877_v59, 0.0 }
 0x9d8   : > { %v3189_v30 = vpack.c.bf16 %v3171_v39, %v3171_v39  ;;  %2962 = vadd.xlane.f32.xlu0 %v2961_v38  ;;  %v3098_v39 = vpack.c.bf16 %v2663_v58, %v2661_v2 }
 0x9da   : > { %v11883_v36 = vunpack.c.l.b16 %v3189_v30  ;;  %v2668_v30 = vadd.f32 %v11770_v28, %v11562_v5  ;;  %v2671_v5 = vadd.f32 %v11780_v62, %v11568_v55 }
 0x9dc   : > { %14747 = vst [vmem:[#allocation33_spill] sm:$0xff] %v11883_v36  ;;  %v3099_v48 = vpack.c.bf16 %v2668_v30, %v2666_v27  ;;  %v3420_v36 = vpack.c.bf16 %v3380_v9, %v3380_v9  ;;  %v3100_v46 = vpack.c.bf16 %v2673_v0, %v2671_v5 }
 0x9de   : > { %v3382_v16 = vpop.f32.mrf.mxu2  ;;  %v3793_v58 = vunpack.c.l.b16 %v3420_v36 }
 0x9df   : > { %v11891_v10 = vpop.f32.mrf.mxu0  ;;  %v3421_v56 = vpack.c.bf16 %v3382_v16, %v3382_v16 }
 0x9e1   : > { %9230 = vmatmul.msk.bf16.vlgmr.msrb.gmra.mxu0 %vm2300_vm12, %v3098_v39  ;;  %v3794_v54 = vunpack.c.l.b16 %v3421_v56 }
 0x9e3   : > { %v3801_v39 = vpack.c.b16 %v3794_v54, %v3793_v58  ;;  %v2678_v54 = vadd.f32 %v11802_v4, %v11579_v15 }
 0x9e5   : > { %v3101_v62 = vpack.c.bf16 %v2678_v54, %v2676_v6 }
 0x9e6   : > { %v3385_v49 = vpop.f32.mrf.mxu2 }
 0x9e7   : > { %v11894_v38 = vpop.f32.mrf.mxu0  ;;  %v3422_v16 = vpack.c.bf16 %v3385_v49, %v3385_v49 }
 0x9e8   : > { %v3503_v54 = vpack.c.bf16 %v11894_v38, %v11894_v38  ;;  %v2224_v38 = vpop.f32.mrf.mxu1 }
 0x9e9   : > { %v3795_v56 = vunpack.c.l.b16 %v3422_v16 }
 0x9ee   : > { %v3387_v51 = vpop.f32.mrf.mxu2 }
 0x9ef   : > { %v3467_v37 = vpop.f32.mrf.mxu0  ;;  %v3423_v30 = vpack.c.bf16 %v3387_v51, %v3387_v51 }
 0x9f1   : > { %9231 = vmatmul.msk.bf16.gmra.mxu0 %vm2300_vm12, %v3099_v48  ;;  %v3796_v9 = vunpack.c.l.b16 %v3423_v30 }
 0x9f3   : > { %v3802_v36 = vpack.c.b16 %v3796_v9, %v3795_v56 }
 0x9f6   : > { %v3390_v28 = vpop.f32.mrf.mxu2 }
 0x9f7   : > { %v3469_v2 = vpop.f32.mrf.mxu0  ;;  %v3424_v0 = vpack.c.bf16 %v3390_v28, %v3390_v28 }
 0x9f8   : > { %v3505_v4 = vpack.c.bf16 %v3469_v2, %v3469_v2 }
 0x9f9   : > { %3809 = vxpose.xlu2.c.b16.start [1/4] (short) (narrow) %v3801_v39, 16  ;;  %v3797_v58 = vunpack.c.l.b16 %v3424_v0  ;;  %v3834_v0 = vunpack.c.l.b16 %v3503_v54  ;;  %v9629_v54 = vld [vmem:[%s14634_s7 + $0x10] sm:$0xff] }
 0x9fa   : > { %v3836_v6 = vunpack.c.l.b16 %v3505_v4 }
 0x9fe   : > { %v3392_v27 = vpop.f32.mrf.mxu2 }
 0x9ff   : > { %v3472_v32 = vpop.f32.mrf.mxu0  ;;  %v3425_v22 = vpack.c.bf16 %v3392_v27, %v3392_v27  ;;  %v3504_v27 = vpack.c.bf16 %v3467_v37, %v3467_v37 }
 0xa00   : > { %v3506_v9 = vpack.c.bf16 %v3472_v32, %v3472_v32 }
 0xa01   : > { %9232 = vmatmul.msk.bf16.gmra.mxu0 %vm2300_vm12, %v3100_v46  ;;  %v3798_v51 = vunpack.c.l.b16 %v3425_v22  ;;  %v3835_v32 = vunpack.c.l.b16 %v3504_v27 }
 0xa02   : > { %v3837_v28 = vunpack.c.l.b16 %v3506_v9 }
 0xa03   : > { %v3803_v46 = vpack.c.b16 %v3798_v51, %v3797_v58  ;;  %v3842_v51 = vpack.c.b16 %v3836_v6, %v3835_v32 }
 0xa06   : > { %v3395_v49 = vpop.f32.mrf.mxu2 }
 0xa07   : > { %v3474_v48 = vpop.f32.mrf.mxu0  ;;  %v3426_v22 = vpack.c.bf16 %v3395_v49, %v3395_v49 }
 0xa08   : > { %v3507_v30 = vpack.c.bf16 %v3474_v48, %v3474_v48  ;;  %v3502_v48 = vpack.c.bf16 %v11891_v10, %v11891_v10 }
 0xa09   : > { %3810 = vxpose.xlu2.c.b16.cont [2/4] (short) (narrow) %v3802_v36, 16 }
 0xa0a   : > { %v3838_v52 = vunpack.c.l.b16 %v3507_v30  ;;  %v3833_v58 = vunpack.c.l.b16 %v3502_v48  ;;  %v2226_v30 = vpop.f32.mrf.mxu1 }
 0xa0b   : > { %v2253_v4 = vpack.c.bf16 %v2226_v30, %v2226_v30 }
 0xa0e   : > { %v3397_v36 = vpop.f32.mrf.mxu2 }
 0xa0f   : > { %v3477_v55 = vpop.f32.mrf.mxu0 }
 0xa10   : > { %v3508_v39 = vpack.c.bf16 %v3477_v55, %v3477_v55  ;;  %v3427_v55 = vpack.c.bf16 %v3397_v36, %v3397_v36  ;;  %v2252_v36 = vpack.c.bf16 %v2224_v38, %v2224_v38 }
 0xa11   : > { %9233 = vmatmul.msk.bf16.gmra.mxu0 %vm2300_vm12, %v3101_v62  ;;  %v3843_v62 = vpack.c.b16 %v3838_v52, %v3837_v28  ;;  %v2978_v28 = vunpack.c.l.b16 %v2253_v4 }
 0xa12   : > { %v3839_v56 = vunpack.c.l.b16 %v3508_v39  ;;  %v3800_v2 = vunpack.c.l.b16 %v3427_v55  ;;  %v3799_v39 = vunpack.c.l.b16 %v3426_v22  ;;  %v2229_v49 = vpop.f32.mrf.mxu1  ;;  %v2977_v6 = vunpack.c.l.b16 %v2252_v36 }
 0xa13   : > { %v2254_v22 = vpack.c.bf16 %v2229_v49, %v2229_v49 }
 0xa14   : > { %v3804_v37 = vpack.c.b16 %v3800_v2, %v3799_v39  ;;  %v2985_v55 = vpack.c.b16 %v2978_v28, %v2977_v6 }
 0xa17   : > { %v3479_v5 = vpop.f32.mrf.mxu0 }
 0xa18   : > { %v3509_v16 = vpack.c.bf16 %v3479_v5, %v3479_v5  ;;  %v3841_v5 = vpack.c.b16 %v3834_v0, %v3833_v58  ;;  %v14749_v0 = vpack.c.b16 %v11663_v60, %v11661_v23  ;;  %v2979_v58 = vunpack.c.l.b16 %v2254_v22 }
 0xa19   : > { %3811 = vxpose.xlu2.c.b16.cont [3/4] (short) (narrow) %v3803_v46, 16  ;;  %v14751_v23 = vpack.c.b16 %v11639_v40, %v11637_v8  ;;  %v11953_v8 = vpop.f32.mrf.mxu2 }
 0xa1a   : > { %v3840_v15 = vunpack.c.l.b16 %v3509_v16  ;;  %v3659_v2 = vsel %vm2300_vm12, %v14749_v0, 0 }
 0xa1b   : > { %v3653_v60 = vsel %vm2300_vm12, %v14751_v23, 0 }
 0xa1c   : > { %v3844_v1 = vpack.c.b16 %v3840_v15, %v3839_v56 }
 0xa1e   : > { %3856 = vmatpush.bf16.msra.mxu2 %v3844_v1  ;;  %v9630_v1 = vld [vmem:[%s14634_s7 + $0x18] sm:$0xff] }
 0xa1f   : > { %v11980_v0 = vpop.f32.mrf.mxu0 }
 0xa21   : > { %v11955_v40 = vpop.f32.mrf.mxu2 }
 0xa22   : > { %3857 = vmatpush.bf16.msra.mxu2 %v3843_v62 }
 0xa26   : > { %3858 = vmatpush.bf16.msra.mxu2 %v3842_v51 }
 0xa29   : > { %3812 = vxpose.xlu2.c.b16.end [4/4] (short) (narrow) %v3804_v37, 16 }
 0xa2a   : > { %3859 = vmatpush.bf16.msra.mxu2 %v3841_v5 }
 0xa43   : > { %v2960_v46 = vpop.xlane.xlu2 %2959 }
 0xa44   : > { %9857 = vrcp.f32 %v2960_v46 }
 0xa4a   : > { %v9858_v10 = vpop.eup %9857 }
 0xa4b   : > { %v2963_v16 = vpop.xlane.xlu0 %2962  ;;  %v2966_v56 = vmul.f32 %v9858_v10, %v11869_v33  ;;  %v2231_v33 = vpop.f32.mrf.mxu1 }
 0xa4c   : > { %9859 = vrcp.f32 %v2963_v16  ;;  %v2255_v48 = vpack.c.bf16 %v2231_v33, %v2231_v33 }
 0xa4e   : > { %v2980_v51 = vunpack.c.l.b16 %v2255_v48 }
 0xa50   : > { %v2986_v39 = vpack.c.b16 %v2980_v51, %v2979_v58  ;;  %v9644_v51 = vld [vmem:[%s14635_s8 + $0x20] sm:$0xff] }
 0xa52   : > { %v9860_v9 = vpop.eup %9859 }
 0xa53   : > { %v2967_v15 = vmul.f32 %v9860_v9, %v11877_v59  ;;  %v14748_v59 = vpack.c.b16 %v11672_v47, %v11670_v63  ;;  %v2234_v32 = vpop.f32.mrf.mxu1  ;;  %v14750_v63 = vpack.c.b16 %v11651_v44, %v11649_v57 }
 0xa54   : > { %v2256_v38 = vpack.c.bf16 %v2234_v32, %v2234_v32 }
 0xa55   : > { %v2968_v52 = vpack.c.bf16 %v2967_v15, %v2966_v56  ;;  %v3662_v62 = vsel %vm2300_vm12, %v14748_v59, 0  ;;  %v3656_v47 = vsel %vm2300_vm12, %v14750_v63, 0 }
 0xa56   : > { %v2981_v16 = vunpack.c.l.b16 %v2256_v38 }
 0xa57   : > { %v3002_v27 = vsel %vm2300_vm12, %v2968_v52, 0 }
 0xa58   : > { %3011 = vmatpush.bf16.xpose.msrb.mxu1 %v3002_v27 }
 0xa5b   : > { %v2236_v37 = vpop.f32.mrf.mxu1 }
 0xa5c   : > { %v2257_v5 = vpack.c.bf16 %v2236_v37, %v2236_v37  ;;  %v11994_v37 = vpop.f32.mrf.mxu3 }
 0xa5e   : > { %v2982_v30 = vunpack.c.l.b16 %v2257_v5 }
 0xa5f   : > { %9058 = vmatmul.msk.bf16.vlgmr.msrb.gmra.mxu1 %vm2300_vm12, %v2985_v55 }
 0xa60   : > { %3295 = vmatpush.bf16.msra.mxu1 %v9630_v1  ;;  %v2987_v10 = vpack.c.b16 %v2982_v30, %v2981_v16  ;;  %v11959_v1 = vpop.f32.mrf.mxu2 }
 0xa63   : > { %v2239_v46 = vpop.f32.mrf.mxu1 }
 0xa64   : > { %3296 = vmatpush.bf16.msra.mxu1 %v9629_v54  ;;  %v2258_v44 = vpack.c.bf16 %v2239_v46, %v2239_v46  ;;  %v12003_v46 = vpop.f32.mrf.mxu3 }
 0xa66   : > { %v2983_v56 = vunpack.c.l.b16 %v2258_v44 }
 0xa68   : > { %3668 = vmatpush.bf16.xpose.msrb.mxu1 %v3662_v62  ;;  %v11964_v33 = vpop.f32.mrf.mxu2 }
 0xa6b   : > { %v2241_v9 = vpop.f32.mrf.mxu1 }
 0xa6c   : > { %v2259_v57 = vpack.c.bf16 %v2241_v9, %v2241_v9 }
 0xa6e   : > { %v2984_v49 = vunpack.c.l.b16 %v2259_v57  ;;  %v12015_v57 = vpop.f32.mrf.mxu3 }
 0xa6f   : > { %9059 = vmatmul.msk.bf16.gmra.mxu1 %vm2300_vm12, %v2986_v39 }
 0xa70   : > { %3669 = vmatpush.bf16.xpose.msrb.mxu1 %v3659_v2  ;;  %v2988_v15 = vpack.c.b16 %v2984_v49, %v2983_v56  ;;  %v11970_v32 = vpop.f32.mrf.mxu2  ;;  %v14753_v56 = vpack.c.b16 %v11792_v29, %v11790_v20 }
 0xa78   : > { %3670 = vmatpush.bf16.xpose.msrb.mxu1 %v3656_v47  ;;  %v11978_v22 = vpop.f32.mrf.mxu2  ;;  %v11990_v47 = vpop.f32.mrf.mxu0 }
 0xa7f   : > { %9060 = vmatmul.msk.bf16.gmra.mxu1 %vm2300_vm12, %v2987_v10  ;;  %v14752_v10 = vpack.c.b16 %v11778_v35, %v11776_v14 }
 0xa80   : > { %3671 = vmatpush.bf16.xpose.msrb.mxu1 %v3653_v60  ;;  %v11988_v39 = vpop.f32.mrf.mxu2  ;;  %v12000_v23 = vpop.f32.mrf.mxu0 }
 0xa88   : > { %v11998_v38 = vpop.f32.mrf.mxu2 }
 0xa8f   : > { %9061 = vmatmul.msk.bf16.gmra.mxu1 %vm2300_vm12, %v2988_v15  ;;  %v12029_v15 = vpop.f32.mrf.mxu3 }
 0xa9a   : > { %v3817_v4 = vpop.trf.xlu2 }
 0xa9b   : > { %9190 = vmatmul.msk.bf16.vlgmr.msra.gmra.mxu2 %vm2354_vm1, %v3817_v4 }
 0xa9f   : > { %9118 = vmatmul.msk.bf16.vlgmr.msra.gmra.mxu1 %vm913_vm3, %v10576_v61 }
 0xaaf   : > { %9119 = vmatmul.msk.bf16.gmra.mxu1 %vm913_vm3, %v10628_v12 }
 0xabf   : > { %9120 = vmatmul.msk.bf16.gmra.mxu1 %vm913_vm3, %v10655_v43 }
 0xacf   : > { %9121 = vmatmul.msk.bf16.gmra.mxu1 %vm913_vm3, %v10766_v50 }
 0xadc   : > { %v3013_v52 = vpop.f32.mrf.mxu1 }
 0xadd   : > { %v3079_v27 = vadd.f32 %v11810_v19, %v3013_v52 }
 0xadf   : > { %9122 = vmatmul.msk.bf16.gmra.mxu1 %vm913_vm3, %v10795_v18 }
 0xae4   : > { %v3015_v36 = vpop.f32.mrf.mxu1 }
 0xae5   : > { %v3081_v28 = vadd.f32 %v11820_v45, %v3015_v36  ;;  %v9645_v45 = vld [vmem:[%s14635_s8 + $0x28] sm:$0xff]  ;;  %v3246_v36 = vpop.f32.mrf.mxu3 }
 0xae6   : > { %4874 = vmatpush.bf16.msra.mxu0 %v9645_v45 }
 0xae7   : > { %v3102_v54 = vpack.c.bf16 %v3081_v28, %v3079_v27 }
 0xae9   : > { %9234 = vmatmul.msk.bf16.gmra.mxu0 %vm2300_vm12, %v3102_v54  ;;  %v14754_v54 = vpack.c.b16 %v11806_v11, %v11804_v7 }
 0xaea   : > { %4875 = vmatpush.bf16.msra.mxu0 %v9644_v51 }
 0xaec   : > { %v3018_v6 = vpop.f32.mrf.mxu1 }
 0xaed   : > { %v3084_v59 = vadd.f32 %v11828_v26, %v3018_v6  ;;  %v3248_v20 = vpop.f32.mrf.mxu3 }
 0xaef   : > { %9123 = vmatmul.msk.bf16.gmra.mxu1 %vm913_vm3, %v10817_v53 }
 0xaf4   : > { %v3020_v55 = vpop.f32.mrf.mxu1 }
 0xaf5   : > { %v3086_v62 = vadd.f32 %v11836_v13, %v3020_v55 }
 0xaf7   : > { %v3103_v48 = vpack.c.bf16 %v3086_v62, %v3084_v59  ;;  %v3251_v59 = vpop.f32.mrf.mxu3  ;;  %v14755_v62 = vld [vmem:[#allocation25_spill] sm:$0xff] }
 0xaf9   : > { %9235 = vmatmul.msk.bf16.gmra.mxu0 %vm2300_vm12, %v3103_v48  ;;  %v14756_v48 = vld [vmem:[#allocation24_spill] sm:$0xff] }
 0xafc   : > { %v3023_v19 = vpop.f32.mrf.mxu1 }
 0xafd   : > { %v3089_v13 = vadd.f32 %v11842_v24, %v3023_v19  ;;  %v14757_v19 = vpack.c.b16 %v14755_v62, %v14756_v48 }
 0xaff   : > { %9124 = vmatmul.msk.bf16.gmra.mxu1 %vm913_vm3, %v11010_v25 }
 0xb04   : > { %v3025_v26 = vpop.f32.mrf.mxu1 }
 0xb05   : > { %v3091_v2 = vadd.f32 %v11850_v17, %v3025_v26 }
 0xb07   : > { %v3104_v58 = vpack.c.bf16 %v3091_v2, %v3089_v13 }
 0xb09   : > { %9236 = vmatmul.msk.bf16.gmra.mxu0 %vm2300_vm12, %v3104_v58 }
 0xb0c   : > { %v3028_v63 = vpop.f32.mrf.mxu1 }
 0xb0d   : > { %v3094_v17 = vadd.f32 %v11860_v3, %v3028_v63  ;;  %v3253_v63 = vpop.f32.mrf.mxu3 }
 0xb0f   : > { %9125 = vmatmul.msk.bf16.gmra.mxu1 %vm913_vm3, %v11064_v41 }
 0xb14   : > { %v3030_v24 = vpop.f32.mrf.mxu1 }
 0xb15   : > { %v3096_v5 = vadd.f32 %v11871_v21, %v3030_v24  ;;  %v12013_v21 = vpop.f32.mrf.mxu0 }
 0xb17   : > { %v3105_v60 = vpack.c.bf16 %v3096_v5, %v3094_v17 }
 0xb19   : > { %9237 = vmatmul.msk.bf16.gmra.mxu0 %vm2300_vm12, %v3105_v60  ;;  %v14759_v60 = vld [vmem:[#allocation19_spill] sm:$0xff] }
 0xb1c   : > { %v3298_v30 = vpop.f32.mrf.mxu1 }
 0xb1d   : > { %v12023_v14 = vpop.f32.mrf.mxu0 }
 0xb1e   : > { %v12005_v16 = vpop.f32.mrf.mxu2 }
 0xb1f   : > { %9186 = vmatmul.msk.bf16.vlgmr.msrb.gmra.mxu1 %vm2300_vm12, %v14752_v10  ;;  %v3866_v3 = vsel %vm2300_vm12, %v12005_v16, -inf  ;;  %v3271_v10 = vpack.c.bf16 %v3253_v63, %v3253_v63 }
 0xb20   : > { %3867 = vmax.xlane.f32.xlu0 %v3866_v3 }
 0xb21   : > { %v4053_v48 = vunpack.c.l.b16 %v3271_v10 }
 0xb24   : > { %v3300_v9 = vpop.f32.mrf.mxu1 }
 0xb25   : > { %v12031_v52 = vpop.f32.mrf.mxu0 }
 0xb26   : > { %v12017_v44 = vpop.f32.mrf.mxu2 }
 0xb27   : > { %v3869_v49 = vsel %vm2300_vm12, %v12017_v44, -inf }
 0xb28   : > { %3870 = vmax.xlane.f32.xlu0 %v3869_v49 }
 0xb29   : > { %9310 = vmatmul.msk.bf16.vlgmr.msra.gmra.mxu0 %vm913_vm3, %v11089_v42 }
 0xb2c   : > { %v3303_v35 = vpop.f32.mrf.mxu1 }
 0xb2d   : > { %v12035_v28 = vpop.f32.mrf.mxu0  ;;  %v3340_v3 = vpack.c.bf16 %v3303_v35, %v3303_v35 }
 0xb2f   : > { %9187 = vmatmul.msk.bf16.gmra.mxu1 %vm2300_vm12, %v14753_v56 }
 0xb34   : > { %v3305_v4 = vpop.f32.mrf.mxu1 }
 0xb35   : > { %v12041_v6 = vpop.f32.mrf.mxu0  ;;  %v3341_v24 = vpack.c.bf16 %v3305_v4, %v3305_v4  ;;  %v3963_v4 = vunpack.c.l.b16 %v3340_v3 }
 0xb39   : > { %9311 = vmatmul.msk.bf16.gmra.mxu0 %vm913_vm3, %v11118_v34 }
 0xb3c   : > { %v3308_v27 = vpop.f32.mrf.mxu1 }
 0xb3d   : > { %v12049_v45 = vpop.f32.mrf.mxu0  ;;  %v3342_v2 = vpack.c.bf16 %v3308_v27, %v3308_v27  ;;  %v3964_v27 = vunpack.c.l.b16 %v3341_v24  ;;  %v14762_v24 = vld [vmem:[#allocation20_spill] sm:$0xff] }
 0xb3e   : > { %14758 = vst [vmem:[#allocation25_spill] sm:$0xff] %v12049_v45 }
 0xb3f   : > { %9188 = vmatmul.msk.bf16.gmra.mxu1 %vm2300_vm12, %v14754_v54  ;;  %v3965_v49 = vunpack.c.l.b16 %v3342_v2  ;;  %v3270_v54 = vpack.c.bf16 %v3251_v59, %v3251_v59 }
 0xb44   : > { %v3310_v29 = vpop.f32.mrf.mxu1 }
 0xb45   : > { %v3343_v11 = vpack.c.bf16 %v3310_v29, %v3310_v29  ;;  %v3339_v29 = vpack.c.bf16 %v3300_v9, %v3300_v9 }
 0xb47   : > { %v3966_v17 = vunpack.c.l.b16 %v3343_v11  ;;  %v3970_v11 = vpack.c.b16 %v3964_v27, %v3963_v4  ;;  %v3265_v27 = vpack.c.bf16 %v12003_v46, %v12003_v46 }
 0xb49   : > { %9312 = vmatmul.msk.bf16.gmra.mxu0 %vm913_vm3, %v11172_v31  ;;  %v3971_v62 = vpack.c.b16 %v3966_v17, %v3965_v49 }
 0xb4c   : > { %v3313_v55 = vpop.f32.mrf.mxu1 }
 0xb4d   : > { %v3344_v26 = vpack.c.bf16 %v3313_v55, %v3313_v55  ;;  %v12055_v55 = vpop.f32.mrf.mxu0 }
 0xb4e   : > { %14760 = vst [vmem:[#allocation24_spill] sm:$0xff] %v12055_v55 }
 0xb4f   : > { %9189 = vmatmul.msk.bf16.gmra.mxu1 %vm2300_vm12, %v14757_v19  ;;  %v3967_v51 = vunpack.c.l.b16 %v3344_v26  ;;  %v3338_v19 = vpack.c.bf16 %v3298_v30, %v3298_v30  ;;  %v4052_v26 = vunpack.c.l.b16 %v3270_v54 }
 0xb51   : > { %v3961_v35 = vunpack.c.l.b16 %v3338_v19  ;;  %v4047_v19 = vunpack.c.l.b16 %v3265_v27 }
 0xb54   : > { %v3315_v7 = vpop.f32.mrf.mxu1 }
 0xb55   : > { %v3345_v13 = vpack.c.bf16 %v3315_v7, %v3315_v7  ;;  %v3962_v7 = vunpack.c.l.b16 %v3339_v29 }
 0xb57   : > { %v3968_v58 = vunpack.c.l.b16 %v3345_v13  ;;  %v3269_v13 = vpack.c.bf16 %v3248_v20, %v3248_v20  ;;  %v3969_v59 = vpack.c.b16 %v3962_v7, %v3961_v35  ;;  %v3267_v20 = vpack.c.bf16 %v12029_v15, %v12029_v15 }
 0xb58   : > { %v3264_v15 = vpack.c.bf16 %v11994_v37, %v11994_v37  ;;  %v14767_v37 = vld [vmem:[#allocation22_spill] sm:$0xff] }
 0xb59   : > { %v3972_v5 = vpack.c.b16 %v3968_v58, %v3967_v51  ;;  %9313 = vmatmul.msk.bf16.gmra.mxu0 %vm913_vm3, %v14759_v60  ;;  %v4057_v51 = vpack.c.b16 %v4053_v48, %v4052_v26  ;;  %v3268_v58 = vpack.c.bf16 %v3246_v36, %v3246_v36  ;;  %v4051_v63 = vunpack.c.l.b16 %v3269_v13  ;;  %v14764_v26 = vld [vmem:[#allocation21_spill] sm:$0xff] }
 0xb5a   : > { %v3266_v36 = vpack.c.bf16 %v12015_v57, %v12015_v57  ;;  %v4049_v3 = vunpack.c.l.b16 %v3267_v20  ;;  %v4046_v57 = vunpack.c.l.b16 %v3264_v15 }
 0xb5b   : > { %3993 = vmatpush.bf16.msra.mxu1 %v3972_v5  ;;  %v12059_v5 = vpop.f32.mrf.mxu0  ;;  %v4080_v9 = vsel %vm2300_vm12, %v4057_v51, 0  ;;  %v4050_v30 = vunpack.c.l.b16 %v3268_v58 }
 0xb5c   : > { %v12053_v56 = vpop.f32.mrf.mxu1  ;;  %14761 = vst [vmem:[#allocation34_spill] sm:$0xff] %v12059_v5  ;;  %v4048_v54 = vunpack.c.l.b16 %v3266_v36  ;;  %v14770_v36 = vld [vmem:[#allocation23_spill] sm:$0xff] }
 0xb5d   : > { %v4056_v17 = vpack.c.b16 %v4051_v63, %v4050_v30 }
 0xb5f   : > { %3994 = vmatpush.bf16.msra.mxu1 %v3971_v62  ;;  %v4077_v49 = vsel %vm2300_vm12, %v4056_v17, 0  ;;  %v4055_v62 = vpack.c.b16 %v4049_v3, %v4048_v54 }
 0xb61   : > { %v4074_v4 = vsel %vm2300_vm12, %v4055_v62, 0 }
 0xb63   : > { %3995 = vmatpush.bf16.msra.mxu1 %v3970_v11  ;;  %v12071_v29 = vpop.f32.mrf.mxu0  ;;  %v4054_v11 = vpack.c.b16 %v4047_v19, %v4046_v57 }
 0xb64   : > { %v12057_v2 = vpop.f32.mrf.mxu1  ;;  %14763 = vst [vmem:[#allocation35_spill] sm:$0xff] %v12071_v29 }
 0xb65   : > { %v4071_v46 = vsel %vm2300_vm12, %v4054_v11, 0 }
 0xb67   : > { %3996 = vmatpush.bf16.msra.mxu1 %v3969_v59 }
 0xb69   : > { %9314 = vmatmul.msk.bf16.gmra.mxu0 %vm913_vm3, %v14762_v24 }
 0xb6b   : > { %4086 = vmatpush.bf16.xpose.msrb.mxu1 %v4080_v9  ;;  %v12082_v7 = vpop.f32.mrf.mxu0 }
 0xb6c   : > { %v12066_v10 = vpop.f32.mrf.mxu1  ;;  %14765 = vst [vmem:[#allocation36_spill] sm:$0xff] %v12082_v7 }
 0xb73   : > { %4087 = vmatpush.bf16.xpose.msrb.mxu1 %v4077_v49  ;;  %v12089_v35 = vpop.f32.mrf.mxu0 }
 0xb74   : > { %v12075_v48 = vpop.f32.mrf.mxu1  ;;  %14766 = vst [vmem:[#allocation37_spill] sm:$0xff] %v12089_v35  ;;  %v3517_v35 = vpack.c.bf16 %v12041_v6, %v12041_v6 }
 0xb79   : > { %9315 = vmatmul.msk.bf16.gmra.mxu0 %vm913_vm3, %v14764_v26 }
 0xb7b   : > { %4088 = vmatpush.bf16.xpose.msrb.mxu1 %v4074_v4  ;;  %v12095_v59 = vpop.f32.mrf.mxu0 }
 0xb7c   : > { %v12084_v13 = vpop.f32.mrf.mxu1  ;;  %14768 = vst [vmem:[#allocation38_spill] sm:$0xff] %v12095_v59  ;;  %v3515_v59 = vpack.c.bf16 %v12031_v52, %v12031_v52 }
 0xb7e   : > { %v4256_v60 = vunpack.c.l.b16 %v3515_v59 }
 0xb83   : > { %4089 = vmatpush.bf16.xpose.msrb.mxu1 %v4071_v46  ;;  %v12100_v17 = vpop.f32.mrf.mxu0 }
 0xb84   : > { %v12087_v51 = vpop.f32.mrf.mxu1  ;;  %14769 = vst [vmem:[#allocation39_spill] sm:$0xff] %v12100_v17 }
 0xb89   : > { %9316 = vmatmul.msk.bf16.gmra.mxu0 %vm913_vm3, %v14767_v37 }
 0xb8c   : > { %v12093_v58 = vpop.f32.mrf.mxu1 }
 0xb93   : > { %v3868_v63 = vpop.xlane.xlu0 %3867 }
 0xb94   : > { %v3872_v9 = vsub.f32 %v12005_v16, %v3868_v63  ;;  %v12098_v30 = vpop.f32.mrf.mxu1 }
 0xb95   : > { %v3353_v59 = vpack.c.bf16 %v12098_v30, %v12098_v30 }
 0xb96   : > { %v3874_v20 = vmul.f32 1.442695, %v3872_v9 }
 0xb98   : > { %9861 = vpow2.f32 %v3874_v20 }
 0xb99   : > { %9317 = vmatmul.msk.bf16.gmra.mxu0 %vm913_vm3, %v14770_v36 }
 0xb9b   : > { %v3871_v3 = vpop.xlane.xlu0 %3870 }
 0xb9c   : > { %v3873_v49 = vsub.f32 %v12017_v44, %v3871_v3  ;;  %v3673_v54 = vpop.f32.mrf.mxu1 }
 0xb9d   : > { %v3693_v11 = vsel %vm2354_vm1, %v3673_v54, -inf }
 0xb9e   : > { %v9862_v27 = vpop.eup %9861  ;;  %v3876_v62 = vmul.f32 1.442695, %v3873_v49 }
 0xb9f   : > { %v3878_v15 = vsel %vm2300_vm12, %v9862_v27, 0.0 }
 0xba0   : > { %9863 = vpow2.f32 %v3876_v62  ;;  %3879 = vadd.xlane.f32.xlu0 %v3878_v15 }
 0xba4   : > { %v12106_v16 = vpop.f32.mrf.mxu1 }
 0xba5   : > { %v3696_v44 = vsel %vm2354_vm1, %v12106_v16, -inf }
 0xba6   : > { %v9864_v19 = vpop.eup %9863 }
 0xba7   : > { %v3881_v4 = vsel %vm2300_vm12, %v9864_v19, 0.0 }
 0xba8   : > { %3882 = vadd.xlane.f32.xlu0 %v3881_v4 }
 0xbac   : > { %v12109_v57 = vpop.f32.mrf.mxu1 }
 0xbad   : > { %v3699_v20 = vsel %vm2354_vm1, %v12109_v57, -inf }
 0xbb0   : > { %3694 = vmax.xlane.f32.xlu0 %v3693_v11 }
 0xbb4   : > { %v12112_v46 = vpop.f32.mrf.mxu1 }
 0xbb5   : > { %v3702_v49 = vsel %vm2354_vm1, %v12112_v46, -inf }
 0xbb8   : > { %3697 = vmax.xlane.f32.xlu0 %v3696_v44 }
 0xbbc   : > { %v12116_v63 = vpop.f32.mrf.mxu1 }
 0xbbd   : > { %v3705_v9 = vsel %vm2354_vm1, %v12116_v63, -inf }
 0xbbe   : > { %3706 = vmax.xlane.f32.xlu1 %v3705_v9  ;;  %v3544_v9 = vpop.f32.mrf.mxu3 }
 0xbbf   : > { %v3584_v26 = vpack.c.bf16 %v3544_v9, %v3544_v9  ;;  %v3350_v9 = vpack.c.bf16 %v12084_v13, %v12084_v13 }
 0xbc0   : > { %3700 = vmax.xlane.f32.xlu0 %v3699_v20 }
 0xbc4   : > { %v12122_v3 = vpop.f32.mrf.mxu1 }
 0xbc5   : > { %v3708_v4 = vsel %vm2354_vm1, %v12122_v3, -inf }
 0xbc6   : > { %v3546_v17 = vpop.f32.mrf.mxu3 }
 0xbc7   : > { %v3585_v36 = vpack.c.bf16 %v3546_v17, %v3546_v17  ;;  %v3897_v17 = vunpack.c.l.b16 %v3584_v26  ;;  %v3352_v26 = vpack.c.bf16 %v12093_v58, %v12093_v58 }
 0xbc8   : > { %3703 = vmax.xlane.f32.xlu0 %v3702_v49 }
 0xbc9   : > { %v4385_v58 = vunpack.c.l.b16 %v3352_v26 }
 0xbcc   : > { %v12126_v62 = vpop.f32.mrf.mxu1 }
 0xbcd   : > { %v3711_v15 = vsel %vm2354_vm1, %v12126_v62, -inf }
 0xbce   : > { %3712 = vmax.xlane.f32.xlu1 %v3711_v15  ;;  %v12138_v29 = vpop.f32.mrf.mxu3 }
 0xbd0   : > { %3709 = vmax.xlane.f32.xlu0 %v3708_v4  ;;  %v3516_v4 = vpack.c.bf16 %v12035_v28, %v12035_v28  ;;  %v3513_v28 = vpack.c.bf16 %v12013_v21, %v12013_v21 }
 0xbd2   : > { %v4257_v6 = vunpack.c.l.b16 %v3516_v4 }
 0xbd4   : > { %v12132_v11 = vpop.f32.mrf.mxu1 }
 0xbd5   : > { %v3714_v44 = vsel %vm2354_vm1, %v12132_v11, -inf }
 0xbd8   : > { %3715 = vmax.xlane.f32.xlu0 %v3714_v44  ;;  %v4258_v44 = vunpack.c.l.b16 %v3517_v35  ;;  %v3898_v35 = vunpack.c.l.b16 %v3585_v36  ;;  %v3510_v36 = vpack.c.bf16 %v11980_v0, %v11980_v0 }
 0xbda   : > { %v4262_v31 = vpack.c.b16 %v4258_v44, %v4257_v6  ;;  %v4251_v0 = vunpack.c.l.b16 %v3510_v36 }
 0xc13   : > { %v3880_v20 = vpop.xlane.xlu0 %3879 }
 0xc14   : > { %9865 = vrcp.f32 %v3880_v20 }
 0xc1a   : > { %v9866_v15 = vpop.eup %9865 }
 0xc1b   : > { %v3883_v49 = vpop.xlane.xlu0 %3882  ;;  %v3886_v5 = vmul.f32 %v9866_v15, %v9862_v27 }
 0xc1c   : > { %9867 = vrcp.f32 %v3883_v49  ;;  %v3514_v49 = vpack.c.bf16 %v12023_v14, %v12023_v14  ;;  %v3551_v14 = vpop.f32.mrf.mxu3 }
 0xc22   : > { %v9868_v55 = vpop.eup %9867 }
 0xc23   : > { %v3695_v7 = vpop.xlane.xlu0 %3694  ;;  %v3887_v45 = vmul.f32 %v9868_v55, %v9864_v19  ;;  %v3512_v55 = vpack.c.bf16 %v12000_v23, %v12000_v23  ;;  %v4386_v19 = vunpack.c.l.b16 %v3353_v59 }
 0xc24   : > { %v3717_v20 = vsub.f32 %v3673_v54, %v3695_v7  ;;  %v4255_v7 = vunpack.c.l.b16 %v3514_v49  ;;  %v3554_v44 = vpop.f32.mrf.mxu3 }
 0xc25   : > { %v3888_v37 = vpack.c.bf16 %v3887_v45, %v3886_v5  ;;  %v3511_v45 = vpack.c.bf16 %v11990_v47, %v11990_v47  ;;  %v4254_v5 = vunpack.c.l.b16 %v3513_v28  ;;  %v4253_v23 = vunpack.c.l.b16 %v3512_v55 }
 0xc26   : > { %v3725_v24 = vmul.f32 1.442695, %v3717_v20  ;;  %v4261_v21 = vpack.c.b16 %v4256_v60, %v4255_v7  ;;  %v3349_v20 = vpack.c.bf16 %v12075_v48, %v12075_v48  ;;  %v4390_v6 = vpack.c.b16 %v4386_v19, %v4385_v58 }
 0xc27   : > { %v3922_v52 = vsel %vm2300_vm12, %v3888_v37, 0  ;;  %v3905_v37 = vpack.c.b16 %v3898_v35, %v3897_v17  ;;  %v4252_v27 = vunpack.c.l.b16 %v3511_v45  ;;  %v4260_v30 = vpack.c.b16 %v4254_v5, %v4253_v23 }
 0xc28   : > { %9869 = vpow2.f32 %v3725_v24  ;;  %3931 = vmatpush.bf16.xpose.msrb.mxu2 %v3922_v52  ;;  %v3348_v35 = vpack.c.bf16 %v12066_v10, %v12066_v10  ;;  %v4383_v55 = vunpack.c.l.b16 %v3350_v9  ;;  %v3586_v7 = vpack.c.bf16 %v12138_v29, %v12138_v29 }
 0xc29   : > { %v4259_v4 = vpack.c.b16 %v4252_v27, %v4251_v0  ;;  %v3347_v17 = vpack.c.bf16 %v12057_v2, %v12057_v2  ;;  %v3346_v10 = vpack.c.bf16 %v12053_v56, %v12053_v56 }
 0xc2a   : > { %v4381_v5 = vunpack.c.l.b16 %v3348_v35 }
 0xc2b   : > { %v3698_v54 = vpop.xlane.xlu0 %3697  ;;  %v4380_v29 = vunpack.c.l.b16 %v3347_v17  ;;  %v4379_v26 = vunpack.c.l.b16 %v3346_v10 }
 0xc2c   : > { %v3718_v24 = vsub.f32 %v12106_v16, %v3698_v54  ;;  %v3351_v16 = vpack.c.bf16 %v12087_v51, %v12087_v51  ;;  %v3587_v51 = vpack.c.bf16 %v3551_v14, %v3551_v14  ;;  %v3899_v54 = vunpack.c.l.b16 %v3586_v7  ;;  %v3556_v2 = vpop.f32.mrf.mxu3 }
 0xc2e   : > { %v3727_v47 = vmul.f32 1.442695, %v3718_v24  ;;  %v4384_v49 = vunpack.c.l.b16 %v3351_v16  ;;  %v3900_v45 = vunpack.c.l.b16 %v3587_v51  ;;  %v3589_v16 = vpack.c.bf16 %v3556_v2, %v3556_v2 }
 0xc2f   : > { %9191 = vmatmul.msk.bf16.vlgmr.msrb.gmra.mxu2 %vm2300_vm12, %v3905_v37  ;;  %v3431_v2 = vpack.c.bf16 %v11964_v33, %v11964_v33  ;;  %v3435_v33 = vpack.c.bf16 %v11998_v38, %v11998_v38 }
 0xc30   : > { %4274 = vmatpush.bf16.msra.mxu2 %v4262_v31  ;;  %v12158_v31 = vpop.eup %9869  ;;  %9871 = vpow2.f32 %v3727_v47  ;;  %v4389_v14 = vpack.c.b16 %v4384_v49, %v4383_v55  ;;  %v3906_v36 = vpack.c.b16 %v3900_v45, %v3899_v54 }
 0xc31   : > { %v3741_v60 = vsel %vm2354_vm1, %v12158_v31, 0.0 }
 0xc32   : > { %3742 = vadd.xlane.f32.xlu1 %v3741_v60  ;;  %v4387_v60 = vpack.c.b16 %v4380_v29, %v4379_v26  ;;  %v3430_v26 = vpack.c.bf16 %v11959_v1, %v11959_v1  ;;  %v3434_v1 = vpack.c.bf16 %v11988_v39, %v11988_v39 }
 0xc33   : > { %v3701_v15 = vpop.xlane.xlu0 %3700 }
 0xc34   : > { %4275 = vmatpush.bf16.msra.mxu2 %v4261_v21  ;;  %v3719_v28 = vsub.f32 %v12109_v57, %v3701_v15  ;;  %v4382_v57 = vunpack.c.l.b16 %v3349_v20  ;;  %v3707_v21 = vpop.xlane.xlu1 %3706  ;;  %v3559_v58 = vpop.f32.mrf.mxu3  ;;  %v3902_v15 = vunpack.c.l.b16 %v3589_v16  ;;  %v4218_v16 = vunpack.c.l.b16 %v3435_v33 }
 0xc35   : > { %v3721_v47 = vsub.f32 %v12116_v63, %v3707_v21  ;;  %v3588_v63 = vpack.c.bf16 %v3554_v44, %v3554_v44  ;;  %v3590_v17 = vpack.c.bf16 %v3559_v58, %v3559_v58  ;;  %v3428_v21 = vpack.c.bf16 %v11953_v8, %v11953_v8 }
 0xc36   : > { %v12172_v52 = vpop.eup %9871  ;;  %v3729_v13 = vmul.f32 1.442695, %v3719_v28  ;;  %v4388_v37 = vpack.c.b16 %v4382_v57, %v4381_v5  ;;  %v3433_v8 = vpack.c.bf16 %v11978_v22, %v11978_v22 }
 0xc37   : > { %v3744_v48 = vsel %vm2354_vm1, %v12172_v52, 0.0  ;;  %v3901_v20 = vunpack.c.l.b16 %v3588_v63  ;;  %v3903_v45 = vunpack.c.l.b16 %v3590_v17 }
 0xc38   : > { %4276 = vmatpush.bf16.msra.mxu2 %v4260_v30  ;;  %9873 = vpow2.f32 %v3729_v13  ;;  %3745 = vadd.xlane.f32.xlu0 %v3744_v48  ;;  %v3733_v30 = vmul.f32 1.442695, %v3721_v47  ;;  %v4214_v47 = vunpack.c.l.b16 %v3431_v2 }
 0xc39   : > { %v3907_v28 = vpack.c.b16 %v3902_v15, %v3901_v20 }
 0xc3b   : > { %v3704_v59 = vpop.xlane.xlu0 %3703 }
 0xc3c   : > { %4277 = vmatpush.bf16.msra.mxu2 %v4259_v4  ;;  %v3720_v24 = vsub.f32 %v12112_v46, %v3704_v59  ;;  %v3561_v44 = vpop.f32.mrf.mxu3 }
 0xc3d   : > { %v3591_v7 = vpack.c.bf16 %v3561_v44, %v3561_v44 }
 0xc3e   : > { %v12185_v23 = vpop.eup %9873  ;;  %v3731_v27 = vmul.f32 1.442695, %v3720_v24  ;;  %v4211_v24 = vunpack.c.l.b16 %v3428_v21  ;;  %v14775_v21 = vld [vmem:[#allocation28_spill] sm:$0xff] }
 0xc3f   : > { %9192 = vmatmul.msk.bf16.gmra.mxu2 %vm2300_vm12, %v3906_v36  ;;  %v3747_v56 = vsel %vm2354_vm1, %v12185_v23, 0.0  ;;  %v3904_v57 = vunpack.c.l.b16 %v3591_v7 }
 0xc40   : > { %4411 = vmatpush.bf16.msrb.mxu2 %v4390_v6  ;;  %9875 = vpow2.f32 %v3731_v27  ;;  %3748 = vadd.xlane.f32.xlu2 %v3747_v56  ;;  %v3432_v56 = vpack.c.bf16 %v11970_v32, %v11970_v32 }
 0xc41   : > { %9877 = vpow2.f32 %v3733_v30  ;;  %v3713_v49 = vpop.xlane.xlu1 %3712  ;;  %v3908_v5 = vpack.c.b16 %v3904_v57, %v3903_v45 }
 0xc42   : > { %v3723_v51 = vsub.f32 %v12126_v62, %v3713_v49  ;;  %v4215_v30 = vunpack.c.l.b16 %v3432_v56 }
 0xc43   : > { %v3710_v46 = vpop.xlane.xlu0 %3709 }
 0xc44   : > { %4412 = vmatpush.bf16.msrb.mxu2 %v4389_v14  ;;  %v3722_v0 = vsub.f32 %v12122_v3, %v3710_v46  ;;  %v3737_v35 = vmul.f32 1.442695, %v3723_v51 }
 0xc46   : > { %v12191_v19 = vpop.eup %9875  ;;  %v3735_v4 = vmul.f32 1.442695, %v3722_v0  ;;  %v4217_v0 = vunpack.c.l.b16 %v3434_v1 }
 0xc47   : > { %v3750_v9 = vsel %vm2354_vm1, %v12191_v19, 0.0  ;;  %v12196_v6 = vpop.eup %9877 }
 0xc48   : > { %4413 = vmatpush.bf16.msrb.mxu2 %v4388_v37  ;;  %3751 = vadd.xlane.f32.xlu0 %v3750_v9  ;;  %9879 = vpow2.f32 %v3735_v4  ;;  %v3753_v3 = vsel %vm2354_vm1, %v12196_v6, 0.0  ;;  %v4222_v63 = vpack.c.b16 %v4218_v16, %v4217_v0 }
 0xc49   : > { %9881 = vpow2.f32 %v3737_v35 }
 0xc4b   : > { %v3716_v55 = vpop.xlane.xlu0 %3715 }
 0xc4c   : > { %4414 = vmatpush.bf16.msrb.mxu2 %v4387_v60  ;;  %v3724_v48 = vsub.f32 %v12132_v11, %v3716_v55  ;;  %v3429_v11 = vpack.c.bf16 %v11955_v40, %v11955_v40  ;;  %v4213_v40 = vunpack.c.l.b16 %v3430_v26  ;;  %v4216_v60 = vunpack.c.l.b16 %v3433_v8  ;;  %v14780_v26 = vld [vmem:[#allocation33_spill] sm:$0xff] }
 0xc4e   : > { %v12202_v13 = vpop.eup %9879  ;;  %v3739_v14 = vmul.f32 1.442695, %v3724_v48  ;;  %v4212_v29 = vunpack.c.l.b16 %v3429_v11  ;;  %v4220_v27 = vpack.c.b16 %v4214_v47, %v4213_v40  ;;  %v4221_v46 = vpack.c.b16 %v4216_v60, %v4215_v30  ;;  %v14772_v11 = vld [vmem:[#allocation26_spill] sm:$0xff]  ;;  %v14781_v47 = vld [vmem:[#allocation32_spill] sm:$0xff] }
 0xc4f   : > { %9193 = vmatmul.msk.bf16.gmra.mxu2 %vm2300_vm12, %v3907_v28  ;;  %v3756_v62 = vsel %vm2354_vm1, %v12202_v13, 0.0  ;;  %v12207_v10 = vpop.eup %9881  ;;  %v14782_v40 = vpack.c.b16 %v14780_v26, %v14781_v47  ;;  %v12290_v47 = vpop.f32.mrf.mxu0 }
 0xc50   : > { %3754 = vadd.xlane.f32.xlu0 %v3753_v3  ;;  %9883 = vpow2.f32 %v3739_v14  ;;  %v3759_v54 = vsel %vm2354_vm1, %v12207_v10, 0.0  ;;  %v4219_v36 = vpack.c.b16 %v4212_v29, %v4211_v24 }
 0xc56   : > { %v9884_v59 = vpop.eup %9883 }
 0xc57   : > { %v3762_v37 = vsel %vm2354_vm1, %v9884_v59, 0.0 }
 0xc58   : > { %3757 = vadd.xlane.f32.xlu0 %v3756_v62 }
 0xc5f   : > { %9194 = vmatmul.msk.bf16.gmra.mxu2 %vm2300_vm12, %v3908_v5 }
 0xc60   : > { %3760 = vadd.xlane.f32.xlu0 %v3759_v54  ;;  %v14771_v54 = vld [vmem:[#allocation27_spill] sm:$0xff] }
 0xc61   : > { %14783 = vst [vmem:[#allocation27_spill] sm:$0xff] %v12290_v47 }
 0xc68   : > { %3763 = vadd.xlane.f32.xlu0 %v3762_v37  ;;  %v14777_v37 = vld [vmem:[#allocation31_spill] sm:$0xff] }
 0xc6c   : > { %4227 = vxpose.xlu1.c.b16.start [1/4] (short) (narrow) %v4219_v36, 16  ;;  %v14778_v36 = vld [vmem:[#allocation30_spill] sm:$0xff] }
 0xc6d   : > { %v14779_v2 = vpack.c.b16 %v14777_v37, %v14778_v36 }
 0xc7c   : > { %4228 = vxpose.xlu1.c.b16.cont [2/4] (short) (narrow) %v4220_v27, 16 }
 0xc8c   : > { %4229 = vxpose.xlu1.c.b16.cont [3/4] (short) (narrow) %v4221_v46, 16 }
 0xc9c   : > { %4230 = vxpose.xlu1.c.b16.end [4/4] (short) (narrow) %v4222_v63, 16 }
 0xca5   : > { %v3743_v9 = vpop.xlane.xlu1 %3742 }
 0xca6   : > { %9885 = vrcp.f32 %v3743_v9 }
 0xcab   : > { %v3746_v22 = vpop.xlane.xlu0 %3745 }
 0xcac   : > { %9887 = vrcp.f32 %v3746_v22  ;;  %v9886_v58 = vpop.eup %9885 }
 0xcad   : > { %v3773_v15 = vmul.f32 %v9886_v58, %v12158_v31 }
 0xcb2   : > { %v9888_v32 = vpop.eup %9887 }
 0xcb3   : > { %v3774_v4 = vmul.f32 %v9888_v32, %v12172_v52  ;;  %v3749_v49 = vpop.xlane.xlu2 %3748 }
 0xcb4   : > { %9889 = vrcp.f32 %v3749_v49 }
 0xcb5   : > { %v3781_v20 = vpack.c.bf16 %v3774_v4, %v3773_v15 }
 0xcb7   : > { %9195 = vmatmul.msk.bf16.vlgmr.msra.gmra.mxu1 %vm2354_vm1, %v3781_v20 }
 0xcba   : > { %v9890_v38 = vpop.eup %9889 }
 0xcbb   : > { %v3752_v39 = vpop.xlane.xlu0 %3751  ;;  %v3775_v51 = vmul.f32 %v9890_v38, %v12185_v23 }
 0xcbc   : > { %9891 = vrcp.f32 %v3752_v39 }
 0xcc2   : > { %v9892_v28 = vpop.eup %9891 }
 0xcc3   : > { %v3776_v3 = vmul.f32 %v9892_v28, %v12191_v19  ;;  %v3755_v44 = vpop.xlane.xlu0 %3754 }
 0xcc4   : > { %9893 = vrcp.f32 %v3755_v44 }
 0xcc5   : > { %v3782_v35 = vpack.c.bf16 %v3776_v3, %v3775_v51 }
 0xcc7   : > { %9196 = vmatmul.msk.bf16.gmra.mxu1 %vm2354_vm1, %v3782_v35 }
 0xcca   : > { %v9894_v52 = vpop.eup %9893 }
 0xccb   : > { %v3758_v31 = vpop.xlane.xlu0 %3757  ;;  %v3777_v7 = vmul.f32 %v9894_v52, %v12196_v6  ;;  %v14773_v6 = vpack.c.b16 %v14771_v54, %v14772_v11 }
 0xccc   : > { %9895 = vrcp.f32 %v3758_v31 }
 0xcd2   : > { %v9896_v55 = vpop.eup %9895 }
 0xcd3   : > { %v3778_v48 = vmul.f32 %v9896_v55, %v12202_v13  ;;  %v3761_v17 = vpop.xlane.xlu0 %3760  ;;  %v14774_v13 = vld [vmem:[#allocation29_spill] sm:$0xff] }
 0xcd4   : > { %9897 = vrcp.f32 %v3761_v17  ;;  %v14776_v29 = vpack.c.b16 %v14774_v13, %v14775_v21 }
 0xcd5   : > { %v3783_v62 = vpack.c.bf16 %v3778_v48, %v3777_v7 }
 0xcd7   : > { %9197 = vmatmul.msk.bf16.gmra.mxu1 %vm2354_vm1, %v3783_v62 }
 0xcda   : > { %v9898_v19 = vpop.eup %9897 }
 0xcdb   : > { %v3764_v23 = vpop.xlane.xlu0 %3763  ;;  %v3779_v14 = vmul.f32 %v9898_v19, %v12207_v10  ;;  %v9637_v10 = vld [vmem:[%s14638_s11 + $0x8] sm:$0xff] }
 0xcdc   : > { %9899 = vrcp.f32 %v3764_v23  ;;  %4484 = vmatpush.bf16.msra.mxu1 %v9637_v10 }
 0xce2   : > { %v9900_v57 = vpop.eup %9899 }
 0xce3   : > { %v3780_v45 = vmul.f32 %v9900_v57, %v9884_v59  ;;  %v3933_v59 = vpop.f32.mrf.mxu2 }
 0xce5   : > { %v3784_v5 = vpack.c.bf16 %v3780_v45, %v3779_v14 }
 0xce7   : > { %9198 = vmatmul.msk.bf16.gmra.mxu1 %vm2354_vm1, %v3784_v5 }
 0xceb   : > { %v3935_v27 = vpop.f32.mrf.mxu2 }
 0xcf3   : > { %v3938_v56 = vpop.f32.mrf.mxu2 }
 0xcf7   : > { %9199 = vmatmul.msk.bf16.vlgmr.msrb.gmra.mxu1 %vm2300_vm12, %v14773_v6 }
 0xcfb   : > { %v3940_v1 = vpop.f32.mrf.mxu2 }
 0xd03   : > { %v3943_v22 = vpop.f32.mrf.mxu2 }
 0xd07   : > { %9200 = vmatmul.msk.bf16.gmra.mxu1 %vm2300_vm12, %v14776_v29 }
 0xd0b   : > { %v3945_v15 = vpop.f32.mrf.mxu2 }
 0xd13   : > { %v3948_v38 = vpop.f32.mrf.mxu2 }
 0xd17   : > { %9201 = vmatmul.msk.bf16.gmra.mxu1 %vm2300_vm12, %v14779_v2 }
 0xd18   : > { %v4235_v24 = vpop.trf.xlu1 }
 0xd19   : > { %9203 = vmatmul.msk.bf16.vlgmr.msra.gmra.mxu2 %vm2354_vm1, %v4235_v24 }
 0xd1b   : > { %v3950_v51 = vpop.f32.mrf.mxu2 }
 0xd27   : > { %9202 = vmatmul.msk.bf16.gmra.mxu1 %vm2300_vm12, %v14782_v40 }
 0xd34   : > { %v3998_v8 = vpop.f32.mrf.mxu1 }
 0xd35   : > { %v3999_v30 = vadd.f32 %v3998_v8, %v3933_v59  ;;  %v12296_v8 = vpop.f32.mrf.mxu0 }
 0xd36   : > { %14784 = vst [vmem:[#allocation26_spill] sm:$0xff] %v12296_v8 }
 0xd3c   : > { %v4000_v60 = vpop.f32.mrf.mxu1 }
 0xd3d   : > { %v4001_v46 = vadd.f32 %v4000_v60, %v3935_v27  ;;  %v12300_v60 = vpop.f32.mrf.mxu0 }
 0xd3e   : > { %14785 = vst [vmem:[#allocation29_spill] sm:$0xff] %v12300_v60 }
 0xd3f   : > { %v4436_v33 = vpack.c.bf16 %v4001_v46, %v3999_v30 }
 0xd41   : > { %9218 = vmatmul.msk.bf16.vlgmr.msra.gmra.mxu1 %vm2300_vm12, %v4436_v33 }
 0xd44   : > { %v4003_v16 = vpop.f32.mrf.mxu1 }
 0xd45   : > { %v4004_v63 = vadd.f32 %v4003_v16, %v3938_v56  ;;  %v12306_v33 = vpop.f32.mrf.mxu0 }
 0xd46   : > { %14786 = vst [vmem:[#allocation28_spill] sm:$0xff] %v12306_v33 }
 0xd4c   : > { %v4005_v0 = vpop.f32.mrf.mxu1 }
 0xd4d   : > { %v4006_v9 = vadd.f32 %v4005_v0, %v3940_v1  ;;  %v12308_v1 = vpop.f32.mrf.mxu0 }
 0xd4e   : > { %14787 = vst [vmem:[#allocation31_spill] sm:$0xff] %v12308_v1 }
 0xd4f   : > { %v4437_v58 = vpack.c.bf16 %v4006_v9, %v4004_v63  ;;  %v3564_v9 = vpop.f32.mrf.mxu3 }
 0xd51   : > { %9219 = vmatmul.msk.bf16.gmra.mxu1 %vm2300_vm12, %v4437_v58 }
 0xd54   : > { %v4008_v32 = vpop.f32.mrf.mxu1 }
 0xd55   : > { %v4009_v20 = vadd.f32 %v4008_v32, %v3943_v22  ;;  %v12310_v16 = vpop.f32.mrf.mxu0 }
 0xd56   : > { %14788 = vst [vmem:[#allocation30_spill] sm:$0xff] %v12310_v16 }
 0xd57   : > { %v3566_v32 = vpop.f32.mrf.mxu3 }
 0xd5c   : > { %v4010_v4 = vpop.f32.mrf.mxu1 }
 0xd5d   : > { %v4011_v49 = vadd.f32 %v4010_v4, %v3945_v15  ;;  %v12312_v0 = vpop.f32.mrf.mxu0 }
 0xd5e   : > { %14789 = vst [vmem:[#allocation33_spill] sm:$0xff] %v12312_v0 }
 0xd5f   : > { %v4438_v39 = vpack.c.bf16 %v4011_v49, %v4009_v20  ;;  %v3569_v49 = vpop.f32.mrf.mxu3 }
 0xd61   : > { %9220 = vmatmul.msk.bf16.gmra.mxu1 %vm2300_vm12, %v4438_v39 }
 0xd64   : > { %v4013_v28 = vpop.f32.mrf.mxu1 }
 0xd65   : > { %v4014_v44 = vadd.f32 %v4013_v28, %v3948_v38  ;;  %v12314_v63 = vpop.f32.mrf.mxu0 }
 0xd66   : > { %14790 = vst [vmem:[#allocation32_spill] sm:$0xff] %v12314_v63 }
 0xd6c   : > { %v4015_v3 = vpop.f32.mrf.mxu1 }
 0xd6d   : > { %v4016_v35 = vadd.f32 %v4015_v3, %v3950_v51  ;;  %v12316_v22 = vpop.f32.mrf.mxu0 }
 0xd6f   : > { %v4439_v31 = vpack.c.bf16 %v4016_v35, %v4014_v44  ;;  %v3593_v35 = vpack.c.bf16 %v3566_v32, %v3566_v32 }
 0xd71   : > { %9221 = vmatmul.msk.bf16.gmra.mxu1 %vm2300_vm12, %v4439_v31 }
 0xd74   : > { %v12264_v52 = vpop.f32.mrf.mxu1 }
 0xd75   : > { %v4111_v59 = vsel %vm2354_vm1, %v12264_v52, -inf  ;;  %v12318_v15 = vpop.f32.mrf.mxu0 }
 0xd7c   : > { %v12266_v55 = vpop.f32.mrf.mxu1 }
 0xd7d   : > { %v4114_v26 = vsel %vm2354_vm1, %v12266_v55, -inf  ;;  %v12320_v38 = vpop.f32.mrf.mxu0 }
 0xd84   : > { %v12268_v7 = vpop.f32.mrf.mxu1 }
 0xd85   : > { %v4117_v40 = vsel %vm2354_vm1, %v12268_v7, -inf }
 0xd8c   : > { %v12270_v48 = vpop.f32.mrf.mxu1 }
 0xd8d   : > { %v4120_v27 = vsel %vm2354_vm1, %v12270_v48, -inf }
 0xd94   : > { %v12272_v17 = vpop.f32.mrf.mxu1 }
 0xd95   : > { %v4123_v62 = vsel %vm2354_vm1, %v12272_v17, -inf }
 0xd96   : > { %4124 = vmax.xlane.f32.xlu1 %v4123_v62 }
 0xd9c   : > { %v4279_v23 = vpop.f32.mrf.mxu2  ;;  %v12277_v57 = vpop.f32.mrf.mxu1 }
 0xd9d   : > { %v4284_v19 = vsel %vm2300_vm12, %v4279_v23, -inf  ;;  %v4126_v56 = vsel %vm2354_vm1, %v12277_v57, -inf }
 0xd9e   : > { %4285 = vmax.xlane.f32.xlu0 %v4284_v19 }
 0xda4   : > { %v4281_v14 = vpop.f32.mrf.mxu2  ;;  %v12280_v5 = vpop.f32.mrf.mxu1 }
 0xda5   : > { %v4287_v45 = vsel %vm2300_vm12, %v4281_v14, -inf  ;;  %v4129_v54 = vsel %vm2354_vm1, %v12280_v5, -inf }
 0xda6   : > { %4288 = vmax.xlane.f32.xlu0 %v4287_v45  ;;  %4130 = vmax.xlane.f32.xlu2 %v4129_v54  ;;  %v3571_v45 = vpop.f32.mrf.mxu3 }
 0xdac   : > { %v12302_v30 = vpop.f32.mrf.mxu1 }
 0xdad   : > { %v4132_v46 = vsel %vm2354_vm1, %v12302_v30, -inf }
 0xe11   : > { %v4286_v11 = vpop.xlane.xlu0 %4285 }
 0xe12   : > { %v4290_v6 = vsub.f32 %v4279_v23, %v4286_v11  ;;  %v3592_v23 = vpack.c.bf16 %v3564_v9, %v3564_v9 }
 0xe14   : > { %v4292_v13 = vmul.f32 1.442695, %v4290_v6  ;;  %v4315_v54 = vunpack.c.l.b16 %v3592_v23  ;;  %v12324_v6 = vpop.f32.mrf.mxu0 }
 0xe16   : > { %9901 = vpow2.f32 %v4292_v13 }
 0xe19   : > { %v4289_v21 = vpop.xlane.xlu0 %4288 }
 0xe1a   : > { %v4291_v29 = vsub.f32 %v4281_v14, %v4289_v21  ;;  %v4316_v14 = vunpack.c.l.b16 %v3593_v35 }
 0xe1c   : > { %v9902_v24 = vpop.eup %9901  ;;  %v4294_v37 = vmul.f32 1.442695, %v4291_v29  ;;  %v4323_v21 = vpack.c.b16 %v4316_v14, %v4315_v54 }
 0xe1d   : > { %v4296_v36 = vsel %vm2300_vm12, %v9902_v24, 0.0 }
 0xe1e   : > { %9903 = vpow2.f32 %v4294_v37  ;;  %4297 = vadd.xlane.f32.xlu0 %v4296_v36  ;;  %v4125_v37 = vpop.xlane.xlu1 %4124 }
 0xe24   : > { %v9904_v2 = vpop.eup %9903 }
 0xe25   : > { %v4299_v10 = vsel %vm2300_vm12, %v9904_v2, 0.0 }
 0xe26   : > { %4300 = vadd.xlane.f32.xlu0 %v4299_v10 }
 0xe2e   : > { %4112 = vmax.xlane.f32.xlu0 %v4111_v59  ;;  %v3595_v59 = vpack.c.bf16 %v3571_v45, %v3571_v45 }
 0xe30   : > { %v4318_v9 = vunpack.c.l.b16 %v3595_v59 }
 0xe36   : > { %4115 = vmax.xlane.f32.xlu0 %v4114_v26 }
 0xe3e   : > { %4118 = vmax.xlane.f32.xlu0 %v4117_v40  ;;  %v4139_v40 = vsub.f32 %v12272_v17, %v4125_v37 }
 0xe46   : > { %4121 = vmax.xlane.f32.xlu0 %v4120_v27 }
 0xe4e   : > { %4127 = vmax.xlane.f32.xlu0 %v4126_v56  ;;  %v3594_v56 = vpack.c.bf16 %v3569_v49, %v3569_v49 }
 0xe50   : > { %v4317_v32 = vunpack.c.l.b16 %v3594_v56 }
 0xe56   : > { %4133 = vmax.xlane.f32.xlu0 %v4132_v46 }
 0xe91   : > { %v4298_v58 = vpop.xlane.xlu0 %4297 }
 0xe92   : > { %9905 = vrcp.f32 %v4298_v58  ;;  %v4151_v58 = vmul.f32 1.442695, %v4139_v40 }
 0xe98   : > { %v9906_v20 = vpop.eup %9905 }
 0xe99   : > { %v4301_v4 = vpop.xlane.xlu0 %4300  ;;  %v4304_v51 = vmul.f32 %v9906_v20, %v9902_v24 }
 0xe9a   : > { %9907 = vrcp.f32 %v4301_v4  ;;  %v4131_v4 = vpop.xlane.xlu2 %4130 }
 0xe9b   : > { %v4141_v17 = vsub.f32 %v12280_v5, %v4131_v4 }
 0xe9d   : > { %v4155_v5 = vmul.f32 1.442695, %v4141_v17 }
 0xea0   : > { %v9908_v39 = vpop.eup %9907 }
 0xea1   : > { %v4113_v28 = vpop.xlane.xlu0 %4112  ;;  %v4305_v3 = vmul.f32 %v9908_v39, %v9904_v2  ;;  %v3574_v2 = vpop.f32.mrf.mxu3  ;;  %v4324_v39 = vpack.c.b16 %v4318_v9, %v4317_v32 }
 0xea2   : > { %v4135_v44 = vsub.f32 %v12264_v52, %v4113_v28  ;;  %v3596_v54 = vpack.c.bf16 %v3574_v2, %v3574_v2 }
 0xea3   : > { %v4306_v31 = vpack.c.bf16 %v4305_v3, %v4304_v51 }
 0xea4   : > { %v4143_v62 = vmul.f32 1.442695, %v4135_v44  ;;  %v9639_v44 = vld [vmem:[%s14632_s5 + $0x28] sm:$0xff] }
 0xea5   : > { %v4340_v19 = vsel %vm2300_vm12, %v4306_v31, 0 }
 0xea6   : > { %9909 = vpow2.f32 %v4143_v62  ;;  %4349 = vmatpush.bf16.xpose.msrb.mxu3 %v4340_v19 }
 0xea9   : > { %v4116_v11 = vpop.xlane.xlu0 %4115  ;;  %v3576_v51 = vpop.f32.mrf.mxu3 }
 0xeaa   : > { %v4136_v13 = vsub.f32 %v12266_v55, %v4116_v11  ;;  %v12335_v55 = vpop.f32.mrf.mxu0  ;;  %v3597_v19 = vpack.c.bf16 %v3576_v51, %v3576_v51 }
 0xeac   : > { %v12327_v29 = vpop.eup %9909  ;;  %v4145_v52 = vmul.f32 1.442695, %v4136_v13 }
 0xead   : > { %9204 = vmatmul.msk.bf16.vlgmr.msrb.gmra.mxu3 %vm2300_vm12, %v4323_v21  ;;  %v4159_v24 = vsel %vm2354_vm1, %v12327_v29, 0.0 }
 0xeae   : > { %9911 = vpow2.f32 %v4145_v52  ;;  %4160 = vadd.xlane.f32.xlu2 %v4159_v24  ;;  %4628 = vmatpush.bf16.msra.mxu3 %v9639_v44  ;;  %v4320_v52 = vunpack.c.l.b16 %v3597_v19 }
 0xeb1   : > { %v4119_v36 = vpop.xlane.xlu0 %4118  ;;  %v3579_v21 = vpop.f32.mrf.mxu3 }
 0xeb2   : > { %v4137_v10 = vsub.f32 %v12268_v7, %v4119_v36  ;;  %v12350_v35 = vpop.f32.mrf.mxu0 }
 0xeb4   : > { %v12333_v26 = vpop.eup %9911  ;;  %v4147_v27 = vmul.f32 1.442695, %v4137_v10 }
 0xeb5   : > { %v4162_v46 = vsel %vm2354_vm1, %v12333_v26, 0.0 }
 0xeb6   : > { %9913 = vpow2.f32 %v4147_v27  ;;  %4163 = vadd.xlane.f32.xlu0 %v4162_v46 }
 0xeb7   : > { %9915 = vpow2.f32 %v4151_v58 }
 0xeb9   : > { %v4122_v20 = vpop.xlane.xlu0 %4121  ;;  %v3581_v46 = vpop.f32.mrf.mxu3 }
 0xeba   : > { %v4138_v7 = vsub.f32 %v12270_v48, %v4122_v20  ;;  %v9638_v48 = vld [vmem:[%s14632_s5 + $0x20] sm:$0xff]  ;;  %v12364_v24 = vpop.f32.mrf.mxu0  ;;  %v3599_v58 = vpack.c.bf16 %v3581_v46, %v3581_v46 }
 0xebb   : > { %4629 = vmatpush.bf16.msra.mxu3 %v9638_v48 }
 0xebc   : > { %v12341_v28 = vpop.eup %9913  ;;  %v4149_v49 = vmul.f32 1.442695, %v4138_v7  ;;  %v4322_v20 = vunpack.c.l.b16 %v3599_v58 }
 0xebd   : > { %9205 = vmatmul.msk.bf16.gmra.mxu3 %vm2300_vm12, %v4324_v39  ;;  %v4165_v3 = vsel %vm2354_vm1, %v12341_v28, 0.0  ;;  %v12355_v62 = vpop.eup %9915 }
 0xebe   : > { %9917 = vpow2.f32 %v4149_v49  ;;  %4166 = vadd.xlane.f32.xlu2 %v4165_v3  ;;  %v4171_v13 = vsel %vm2354_vm1, %v12355_v62, 0.0  ;;  %v4918_v49 = vpack.c.bf16 %v12318_v15, %v12318_v15  ;;  %v4917_v3 = vpack.c.bf16 %v12316_v22, %v12316_v22 }
 0xebf   : > { %9919 = vpow2.f32 %v4155_v5  ;;  %v4919_v22 = vpack.c.bf16 %v12320_v38, %v12320_v38  ;;  %v4921_v38 = vpack.c.bf16 %v12335_v55, %v12335_v55 }
 0xec0   : > { %v5291_v48 = vunpack.c.l.b16 %v4918_v49  ;;  %v5290_v5 = vunpack.c.l.b16 %v4917_v3  ;;  %v4923_v3 = vpack.c.bf16 %v12364_v24, %v12364_v24 }
 0xec1   : > { %v4128_v31 = vpop.xlane.xlu0 %4127 }
 0xec2   : > { %v4140_v23 = vsub.f32 %v12277_v57, %v4128_v31  ;;  %v4319_v57 = vunpack.c.l.b16 %v3596_v54  ;;  %v4894_v9 = vpop.f32.mrf.mxu0 }
 0xec3   : > { %v4924_v49 = vpack.c.bf16 %v4894_v9, %v4894_v9 }
 0xec4   : > { %v12358_v14 = vpop.eup %9917  ;;  %v4153_v45 = vmul.f32 1.442695, %v4140_v23  ;;  %v4325_v2 = vpack.c.b16 %v4320_v52, %v4319_v57  ;;  %v5298_v23 = vpack.c.b16 %v5291_v48, %v5290_v5  ;;  %v5292_v52 = vunpack.c.l.b16 %v4919_v22 }
 0xec5   : > { %v4168_v11 = vsel %vm2354_vm1, %v12358_v14, 0.0  ;;  %v12366_v36 = vpop.eup %9919  ;;  %v5297_v55 = vunpack.c.l.b16 %v4924_v49  ;;  %v5296_v48 = vunpack.c.l.b16 %v4923_v3 }
 0xec6   : > { %9921 = vpow2.f32 %v4153_v45  ;;  %4169 = vadd.xlane.f32.xlu0 %v4168_v11  ;;  %4172 = vadd.xlane.f32.xlu2 %v4171_v13  ;;  %v4177_v56 = vsel %vm2354_vm1, %v12366_v36, 0.0  ;;  %v4920_v13 = vpack.c.bf16 %v12324_v6, %v12324_v6  ;;  %v4922_v6 = vpack.c.bf16 %v12350_v35, %v12350_v35 }
 0xec7   : > { %v5301_v5 = vpack.c.b16 %v5297_v55, %v5296_v48 }
 0xec8   : > { %v5295_v58 = vunpack.c.l.b16 %v4922_v6 }
 0xec9   : > { %v4134_v37 = vpop.xlane.xlu0 %4133 }
 0xeca   : > { %v4142_v10 = vsub.f32 %v12302_v30, %v4134_v37  ;;  %v3598_v30 = vpack.c.bf16 %v3579_v21, %v3579_v21  ;;  %v4897_v51 = vpop.f32.mrf.mxu0  ;;  %v5293_v21 = vunpack.c.l.b16 %v4920_v13 }
 0xecb   : > { %v4925_v19 = vpack.c.bf16 %v4897_v51, %v4897_v51 }
 0xecc   : > { %v12369_v59 = vpop.eup %9921  ;;  %v4157_v40 = vmul.f32 1.442695, %v4142_v10  ;;  %v4321_v7 = vunpack.c.l.b16 %v3598_v30  ;;  %v5299_v37 = vpack.c.b16 %v5293_v21, %v5292_v52  ;;  %v5294_v30 = vunpack.c.l.b16 %v4921_v38  ;;  %v9647_v38 = vld [vmem:[%s14636_s9 + $0x28] sm:$0xff] }
 0xecd   : > { %9206 = vmatmul.msk.bf16.gmra.mxu3 %vm2300_vm12, %v4325_v2  ;;  %v4174_v27 = vsel %vm2354_vm1, %v12369_v59, 0.0  ;;  %v5708_v11 = vunpack.c.l.b16 %v4925_v19 }
 0xece   : > { %9923 = vpow2.f32 %v4157_v40  ;;  %4175 = vadd.xlane.f32.xlu0 %v4174_v27  ;;  %4178 = vadd.xlane.f32.xlu2 %v4177_v56  ;;  %v4326_v39 = vpack.c.b16 %v4322_v20, %v4321_v7 }
 0xecf   : > { %4956 = vmatpush.bf16.msrb.mxu3 %v9647_v38  ;;  %v14792_v38 = vld [vmem:[#allocation19_spill] sm:$0xff] }
 0xed2   : > { %v4899_v17 = vpop.f32.mrf.mxu0 }
 0xed3   : > { %v4926_v31 = vpack.c.bf16 %v4899_v17, %v4899_v17 }
 0xed4   : > { %v12376_v32 = vpop.eup %9923 }
 0xed5   : > { %v4180_v4 = vsel %vm2354_vm1, %v12376_v32, 0.0  ;;  %v5709_v45 = vunpack.c.l.b16 %v4926_v31 }
 0xed6   : > { %4181 = vadd.xlane.f32.xlu0 %v4180_v4  ;;  %v5300_v4 = vpack.c.b16 %v5295_v58, %v5294_v30  ;;  %v9641_v30 = vld [vmem:[%s14633_s6 + $0x28] sm:$0xff] }
 0xed7   : > { %v5716_v15 = vpack.c.b16 %v5709_v45, %v5708_v11  ;;  %4710 = vmatpush.bf16.msra.mxu2 %v9641_v30 }
 0xeda   : > { %v4902_v44 = vpop.f32.mrf.mxu0 }
 0xedb   : > { %v4927_v2 = vpack.c.bf16 %v4902_v44, %v4902_v44 }
 0xedd   : > { %9207 = vmatmul.msk.bf16.gmra.mxu3 %vm2300_vm12, %v4326_v39  ;;  %v5710_v27 = vunpack.c.l.b16 %v4927_v2 }
 0xee2   : > { %v4904_v54 = vpop.f32.mrf.mxu0 }
 0xee3   : > { %v4928_v10 = vpack.c.bf16 %v4904_v54, %v4904_v54 }
 0xee5   : > { %v5711_v40 = vunpack.c.l.b16 %v4928_v10 }
 0xee7   : > { %v5717_v56 = vpack.c.b16 %v5711_v40, %v5710_v27 }
 0xeea   : > { %v4907_v57 = vpop.f32.mrf.mxu0 }
 0xeeb   : > { %v4929_v7 = vpack.c.bf16 %v4907_v57, %v4907_v57 }
 0xeed   : > { %9250 = vmatmul.msk.bf16.vlgmr.msra.gmra.mxu3 %vm913_vm3, %v10576_v61  ;;  %v5712_v17 = vunpack.c.l.b16 %v4929_v7 }
 0xef2   : > { %v4909_v46 = vpop.f32.mrf.mxu0 }
 0xef3   : > { %v4930_v20 = vpack.c.bf16 %v4909_v46, %v4909_v46 }
 0xef5   : > { %v5713_v51 = vunpack.c.l.b16 %v4930_v20 }
 0xef7   : > { %5306 = vxpose.xlu2.c.b16.start [1/4] (short) (narrow) %v5298_v23, 16  ;;  %v5718_v35 = vpack.c.b16 %v5713_v51, %v5712_v17  ;;  %v9640_v51 = vld [vmem:[%s14633_s6 + $0x20] sm:$0xff] }
 0xef8   : > { %4711 = vmatpush.bf16.msra.mxu2 %v9640_v51 }
 0xefa   : > { %v4912_v39 = vpop.f32.mrf.mxu0 }
 0xefb   : > { %v4931_v19 = vpack.c.bf16 %v4912_v39, %v4912_v39 }
 0xefd   : > { %9251 = vmatmul.msk.bf16.gmra.mxu3 %vm913_vm3, %v10628_v12  ;;  %v5714_v9 = vunpack.c.l.b16 %v4931_v19 }
 0xeff   : > { %5724 = vxpose.xlu0.c.b16.start [1/4] (short) (narrow) %v5716_v15, 16 }
 0xf02   : > { %v4914_v44 = vpop.f32.mrf.mxu0 }
 0xf03   : > { %v4932_v31 = vpack.c.bf16 %v4914_v44, %v4914_v44 }
 0xf05   : > { %v5715_v45 = vunpack.c.l.b16 %v4932_v31 }
 0xf07   : > { %5307 = vxpose.xlu2.c.b16.cont [2/4] (short) (narrow) %v5299_v37, 16  ;;  %v5719_v11 = vpack.c.b16 %v5715_v45, %v5714_v9 }
 0xf0d   : > { %9252 = vmatmul.msk.bf16.gmra.mxu3 %vm913_vm3, %v10655_v43 }
 0xf0f   : > { %5725 = vxpose.xlu0.c.b16.cont [2/4] (short) (narrow) %v5717_v56, 16 }
 0xf17   : > { %5308 = vxpose.xlu2.c.b16.cont [3/4] (short) (narrow) %v5300_v4, 16 }
 0xf1d   : > { %9253 = vmatmul.msk.bf16.gmra.mxu3 %vm913_vm3, %v10766_v50 }
 0xf1f   : > { %5726 = vxpose.xlu0.c.b16.cont [3/4] (short) (narrow) %v5718_v35, 16 }
 0xf21   : > { %v4161_v23 = vpop.xlane.xlu2 %4160 }
 0xf22   : > { %9925 = vrcp.f32 %v4161_v23 }
 0xf27   : > { %5309 = vxpose.xlu2.c.b16.end [4/4] (short) (narrow) %v5301_v5, 16 }
 0xf28   : > { %v9926_v13 = vpop.eup %9925 }
 0xf29   : > { %v4164_v54 = vpop.xlane.xlu0 %4163  ;;  %v4191_v22 = vmul.f32 %v9926_v13, %v12327_v29 }
 0xf2a   : > { %9927 = vrcp.f32 %v4164_v54 }
 0xf2d   : > { %9254 = vmatmul.msk.bf16.gmra.mxu3 %vm913_vm3, %v10795_v18 }
 0xf2f   : > { %5727 = vxpose.xlu0.c.b16.end [4/4] (short) (narrow) %v5719_v11, 16 }
 0xf30   : > { %v9928_v24 = vpop.eup %9927  ;;  %v12405_v15 = vpop.f32.mrf.mxu3 }
 0xf31   : > { %v4192_v21 = vmul.f32 %v9928_v24, %v12333_v26  ;;  %v4167_v57 = vpop.xlane.xlu2 %4166 }
 0xf32   : > { %9929 = vrcp.f32 %v4167_v57 }
 0xf33   : > { %v4199_v52 = vpack.c.bf16 %v4192_v21, %v4191_v22 }
 0xf35   : > { %9208 = vmatmul.msk.bf16.vlgmr.msrb.gmra.mxu2 %vm2354_vm1, %v4199_v52 }
 0xf38   : > { %v12410_v37 = vpop.f32.mrf.mxu3  ;;  %v9930_v2 = vpop.eup %9929 }
 0xf39   : > { %v4170_v10 = vpop.xlane.xlu0 %4169  ;;  %v4193_v29 = vmul.f32 %v9930_v2, %v12341_v28  ;;  %v4173_v46 = vpop.xlane.xlu2 %4172  ;;  %v9646_v28 = vld [vmem:[%s14636_s9 + $0x20] sm:$0xff] }
 0xf3a   : > { %9931 = vrcp.f32 %v4170_v10  ;;  %4957 = vmatpush.bf16.msrb.mxu3 %v9646_v28  ;;  %v14791_v10 = vld [vmem:[#allocation18_spill] sm:$0xff] }
 0xf3d   : > { %9255 = vmatmul.msk.bf16.gmra.mxu3 %vm913_vm3, %v10817_v53 }
 0xf40   : > { %v9932_v40 = vpop.eup %9931  ;;  %v12414_v27 = vpop.f32.mrf.mxu3 }
 0xf41   : > { %v4194_v26 = vmul.f32 %v9932_v40, %v12358_v14  ;;  %v4176_v6 = vpop.xlane.xlu0 %4175  ;;  %v4179_v35 = vpop.xlane.xlu2 %4178 }
 0xf42   : > { %9933 = vrcp.f32 %v4176_v6 }
 0xf43   : > { %v4200_v56 = vpack.c.bf16 %v4194_v26, %v4193_v29  ;;  %9935 = vrcp.f32 %v4173_v46 }
 0xf45   : > { %9209 = vmatmul.msk.bf16.gmra.mxu2 %vm2354_vm1, %v4200_v56 }
 0xf48   : > { %v12422_v58 = vpop.f32.mrf.mxu3  ;;  %v9934_v14 = vpop.eup %9933 }
 0xf49   : > { %v9936_v4 = vpop.eup %9935  ;;  %v4196_v20 = vmul.f32 %v9934_v14, %v12369_v59  ;;  %v4182_v17 = vpop.xlane.xlu0 %4181 }
 0xf4a   : > { %v4195_v39 = vmul.f32 %v9936_v4, %v12355_v62  ;;  %9937 = vrcp.f32 %v4182_v17  ;;  %v14793_v17 = vld [vmem:[#allocation20_spill] sm:$0xff] }
 0xf4b   : > { %9939 = vrcp.f32 %v4179_v35 }
 0xf4c   : > { %v4201_v49 = vpack.c.bf16 %v4196_v20, %v4195_v39 }
 0xf4d   : > { %9256 = vmatmul.msk.bf16.gmra.mxu3 %vm913_vm3, %v11010_v25 }
 0xf50   : > { %v12433_v7 = vpop.f32.mrf.mxu3  ;;  %v9938_v59 = vpop.eup %9937 }
 0xf51   : > { %v9940_v55 = vpop.eup %9939  ;;  %v4198_v62 = vmul.f32 %v9938_v59, %v12376_v32 }
 0xf52   : > { %v4197_v48 = vmul.f32 %v9940_v55, %v12366_v36  ;;  %v14794_v55 = vld [vmem:[#allocation21_spill] sm:$0xff] }
 0xf54   : > { %v4202_v5 = vpack.c.bf16 %v4198_v62, %v4197_v48 }
 0xf55   : > { %9210 = vmatmul.msk.bf16.gmra.mxu2 %vm2354_vm1, %v4201_v49 }
 0xf58   : > { %v12440_v3 = vpop.f32.mrf.mxu3 }
 0xf5d   : > { %9257 = vmatmul.msk.bf16.gmra.mxu3 %vm913_vm3, %v11064_v41 }
 0xf60   : > { %v12445_v44 = vpop.f32.mrf.mxu3 }
 0xf65   : > { %9211 = vmatmul.msk.bf16.gmra.mxu2 %vm2354_vm1, %v4202_v5 }
 0xf68   : > { %v12449_v31 = vpop.f32.mrf.mxu3 }
 0xf6d   : > { %9330 = vmatmul.msk.bf16.vlgmr.msrb.gmra.mxu3 %vm913_vm3, %v11089_v42 }
 0xf70   : > { %v4631_v23 = vpop.f32.mrf.mxu3 }
 0xf71   : > { %v4671_v19 = vpack.c.bf16 %v4631_v23, %v4631_v23 }
 0xf73   : > { %v12455_v32 = vunpack.c.l.b16 %v4671_v19 }
 0xf75   : > { %9270 = vmatmul.msk.bf16.vlgmr.msra.gmra.mxu2 %vm913_vm3, %v10576_v61 }
 0xf78   : > { %v4633_v45 = vpop.f32.mrf.mxu3 }
 0xf79   : > { %v4672_v54 = vpack.c.bf16 %v4633_v45, %v4633_v45 }
 0xf7b   : > { %v12457_v9 = vunpack.c.l.b16 %v4672_v54 }
 0xf7d   : > { %9331 = vmatmul.msk.bf16.gmra.mxu3 %vm913_vm3, %v11118_v34 }
 0xf80   : > { %v4636_v11 = vpop.f32.mrf.mxu3 }
 0xf81   : > { %v4673_v13 = vpack.c.bf16 %v4636_v11, %v4636_v11  ;;  %v14795_v11 = vld [vmem:[#allocation22_spill] sm:$0xff] }
 0xf83   : > { %v12465_v21 = vunpack.c.l.b16 %v4673_v13  ;;  %v9643_v13 = vld [vmem:[%s14634_s7 + $0x28] sm:$0xff] }
 0xf84   : > { %4792 = vmatpush.bf16.msrb.mxu1 %v9643_v13  ;;  %v12548_v13 = vpop.f32.mrf.mxu1 }
 0xf85   : > { %9271 = vmatmul.msk.bf16.gmra.mxu2 %vm913_vm3, %v10628_v12  ;;  %14797 = vst [vmem:[#allocation20_spill] sm:$0xff] %v12548_v13 }
 0xf88   : > { %v4638_v24 = vpop.f32.mrf.mxu3 }
 0xf89   : > { %v4674_v22 = vpack.c.bf16 %v4638_v24, %v4638_v24 }
 0xf8b   : > { %v12467_v52 = vunpack.c.l.b16 %v4674_v22 }
 0xf8d   : > { %9332 = vmatmul.msk.bf16.gmra.mxu3 %vm913_vm3, %v14791_v10 }
 0xf90   : > { %v4641_v2 = vpop.f32.mrf.mxu3 }
 0xf91   : > { %v4675_v40 = vpack.c.bf16 %v4641_v2, %v4641_v2 }
 0xf93   : > { %v12475_v6 = vunpack.c.l.b16 %v4675_v40  ;;  %v9648_v40 = vld [vmem:[%s14637_s10 + $0x20] sm:$0xff] }
 0xf95   : > { %9272 = vmatmul.msk.bf16.gmra.mxu2 %vm913_vm3, %v10655_v43 }
 0xf98   : > { %v4643_v29 = vpop.f32.mrf.mxu3 }
 0xf99   : > { %v4676_v26 = vpack.c.bf16 %v4643_v29, %v4643_v29 }
 0xf9b   : > { %v12477_v56 = vunpack.c.l.b16 %v4676_v26 }
 0xf9d   : > { %9333 = vmatmul.msk.bf16.gmra.mxu3 %vm913_vm3, %v14792_v38 }
 0xfa0   : > { %v4646_v28 = vpop.f32.mrf.mxu3 }
 0xfa1   : > { %v4677_v14 = vpack.c.bf16 %v4646_v28, %v4646_v28 }
 0xfa3   : > { %v12485_v20 = vunpack.c.l.b16 %v4677_v14  ;;  %v14796_v14 = vld [vmem:[#allocation23_spill] sm:$0xff] }
 0xfa5   : > { %9273 = vmatmul.msk.bf16.gmra.mxu2 %vm913_vm3, %v10766_v50 }
 0xfa8   : > { %v4648_v30 = vpop.f32.mrf.mxu3 }
 0xfa9   : > { %v4678_v4 = vpack.c.bf16 %v4648_v30, %v4648_v30 }
 0xfab   : > { %v12487_v39 = vunpack.c.l.b16 %v4678_v4 }
 0xfad   : > { %9334 = vmatmul.msk.bf16.gmra.mxu3 %vm913_vm3, %v14793_v17 }
 0xfb0   : > { %v12493_v49 = vpop.f32.mrf.mxu3 }
 0xfb5   : > { %9274 = vmatmul.msk.bf16.gmra.mxu2 %vm913_vm3, %v10795_v18 }
 0xfb8   : > { %v4416_v35 = vpop.f32.mrf.mxu2  ;;  %v12497_v59 = vpop.f32.mrf.mxu3 }
 0xfb9   : > { %v4417_v5 = vadd.f32 %v4416_v35, %v12405_v15  ;;  %v9649_v15 = vld [vmem:[%s14637_s10 + $0x28] sm:$0xff]  ;;  %v9642_v35 = vld [vmem:[%s14634_s7 + $0x20] sm:$0xff] }
 0xfba   : > { %5038 = vmatpush.bf16.msrb.mxu2 %v9649_v15  ;;  %4793 = vmatpush.bf16.msrb.mxu1 %v9642_v35 }
 0xfbd   : > { %9335 = vmatmul.msk.bf16.gmra.mxu3 %vm913_vm3, %v14794_v55 }
 0xfbe   : > { %5039 = vmatpush.bf16.msrb.mxu2 %v9648_v40 }
 0xfc0   : > { %v4418_v62 = vpop.f32.mrf.mxu2  ;;  %v12501_v48 = vpop.f32.mrf.mxu3 }
 0xfc1   : > { %v4419_v23 = vadd.f32 %v4418_v62, %v12410_v37 }
 0xfc3   : > { %v4440_v19 = vpack.c.bf16 %v4419_v23, %v4417_v5 }
 0xfc5   : > { %9222 = vmatmul.msk.bf16.gmra.mxu1 %vm2300_vm12, %v4440_v19  ;;  %9275 = vmatmul.msk.bf16.gmra.mxu2 %vm913_vm3, %v10817_v53 }
 0xfc8   : > { %v4421_v45 = vpop.f32.mrf.mxu2  ;;  %v12508_v54 = vpop.f32.mrf.mxu3 }
 0xfc9   : > { %v4422_v22 = vadd.f32 %v4421_v45, %v12414_v27 }
 0xfcd   : > { %9336 = vmatmul.msk.bf16.gmra.mxu3 %vm913_vm3, %v14795_v11 }
 0xfd0   : > { %v4423_v37 = vpop.f32.mrf.mxu2  ;;  %v12518_v24 = vpop.f32.mrf.mxu3 }
 0xfd1   : > { %v4424_v2 = vadd.f32 %v4423_v37, %v12422_v58 }
 0xfd3   : > { %v4441_v29 = vpack.c.bf16 %v4424_v2, %v4422_v22  ;;  %v12553_v2 = vpop.f32.mrf.mxu1 }
 0xfd4   : > { %14798 = vst [vmem:[#allocation21_spill] sm:$0xff] %v12553_v2 }
 0xfd5   : > { %9223 = vmatmul.msk.bf16.gmra.mxu1 %vm2300_vm12, %v4441_v29  ;;  %9276 = vmatmul.msk.bf16.gmra.mxu2 %vm913_vm3, %v11010_v25 }
 0xfd8   : > { %v4426_v26 = vpop.f32.mrf.mxu2  ;;  %v12528_v28 = vpop.f32.mrf.mxu3 }
 0xfd9   : > { %v4427_v58 = vadd.f32 %v4426_v26, %v12433_v7 }
 0xfdd   : > { %9337 = vmatmul.msk.bf16.gmra.mxu3 %vm913_vm3, %v14796_v14 }
 0xfe0   : > { %v4428_v27 = vpop.f32.mrf.mxu2  ;;  %v12532_v30 = vpop.f32.mrf.mxu3 }
 0xfe1   : > { %v4429_v4 = vadd.f32 %v4428_v27, %v12440_v3 }
 0xfe3   : > { %v4442_v62 = vpack.c.bf16 %v4429_v4, %v4427_v58  ;;  %v12565_v4 = vpop.f32.mrf.mxu1 }
 0xfe4   : > { %14799 = vst [vmem:[#allocation22_spill] sm:$0xff] %v12565_v4 }
 0xfe5   : > { %9224 = vmatmul.msk.bf16.gmra.mxu1 %vm2300_vm12, %v4442_v62  ;;  %9277 = vmatmul.msk.bf16.gmra.mxu2 %vm913_vm3, %v11064_v41 }
 0xfe8   : > { %v4431_v5 = vpop.f32.mrf.mxu2  ;;  %v12542_v23 = vpop.f32.mrf.mxu3 }
 0xfe9   : > { %v4432_v7 = vadd.f32 %v4431_v5, %v12445_v44 }
 0xff0   : > { %v4433_v19 = vpop.f32.mrf.mxu2  ;;  %v12544_v45 = vpop.f32.mrf.mxu3 }
 0xff1   : > { %v4434_v3 = vadd.f32 %v4433_v19, %v12449_v31 }
 0xff3   : > { %v4443_v15 = vpack.c.bf16 %v4434_v3, %v4432_v7  ;;  %v12569_v7 = vpop.f32.mrf.mxu1 }
 0xff4   : > { %14800 = vst [vmem:[#allocation23_spill] sm:$0xff] %v12569_v7 }
 0xff5   : > { %9225 = vmatmul.msk.bf16.gmra.mxu1 %vm2300_vm12, %v4443_v15  ;;  %9350 = vmatmul.msk.bf16.vlgmr.msrb.gmra.mxu2 %vm913_vm3, %v11089_v42 }
 0xff8   : > { %v4713_v37 = vpop.f32.mrf.mxu2  ;;  %v4961_v22 = vpop.f32.mrf.mxu3 }
 0xff9   : > { %v4753_v40 = vpack.c.bf16 %v4713_v37, %v4713_v37 }
 0xffb   : > { %v12555_v58 = vunpack.c.l.b16 %v4753_v40  ;;  %v12575_v37 = vpop.f32.mrf.mxu1 }
 0xffc   : > { %14801 = vst [vmem:[#allocation40_spill] sm:$0xff] %v12575_v37 }
0x1000   : > { %v4715_v29 = vpop.f32.mrf.mxu2  ;;  %v4964_v26 = vpop.f32.mrf.mxu3 }
0x1001   : > { %v4754_v27 = vpack.c.bf16 %v4715_v29, %v4715_v29 }
0x1003   : > { %v12557_v44 = vunpack.c.l.b16 %v4754_v27  ;;  %v12577_v27 = vpop.f32.mrf.mxu1 }
0x1004   : > { %14802 = vst [vmem:[#allocation41_spill] sm:$0xff] %v12577_v27  ;;  %v5001_v27 = vpack.c.bf16 %v4964_v26, %v4964_v26 }
0x1005   : > { %9290 = vmatmul.msk.bf16.vlgmr.msrb.gmra.mxu1 %vm913_vm3, %v10576_v61  ;;  %9351 = vmatmul.msk.bf16.gmra.mxu2 %vm913_vm3, %v11118_v34 }
0x1008   : > { %v12567_v35 = vpop.f32.mrf.mxu2  ;;  %v4966_v62 = vpop.f32.mrf.mxu3 }
0x1009   : > { %v5002_v8 = vpack.c.bf16 %v4966_v62, %v4966_v62 }
0x100b   : > { %v12583_v0 = vpop.f32.mrf.mxu1  ;;  %v5333_v4 = vunpack.c.l.b16 %v5002_v8 }
0x100c   : > { %14803 = vst [vmem:[#allocation42_spill] sm:$0xff] %v12583_v0 }
0x1010   : > { %v4720_v5 = vpop.f32.mrf.mxu2  ;;  %v4969_v19 = vpop.f32.mrf.mxu3 }
0x1011   : > { %v5003_v63 = vpack.c.bf16 %v4969_v19, %v4969_v19  ;;  %v4756_v62 = vpack.c.bf16 %v4720_v5, %v4720_v5 }
0x1013   : > { %v5334_v1 = vunpack.c.l.b16 %v5003_v63 }
0x1015   : > { %9291 = vmatmul.msk.bf16.gmra.mxu1 %vm913_vm3, %v10628_v12  ;;  %9352 = vmatmul.msk.bf16.gmra.mxu2 %vm913_vm3, %v14791_v10 }
0x1018   : > { %v4723_v3 = vpop.f32.mrf.mxu2  ;;  %v4971_v15 = vpop.f32.mrf.mxu3 }
0x1019   : > { %v5004_v36 = vpack.c.bf16 %v4971_v15, %v4971_v15  ;;  %v4757_v26 = vpack.c.bf16 %v4723_v3, %v4723_v3 }
0x101b   : > { %v5335_v7 = vunpack.c.l.b16 %v5004_v36 }
0x101d   : > { %v5340_v15 = vpack.c.b16 %v5335_v7, %v5334_v1  ;;  %v5128_v7 = vunpack.c.l.b16 %v4756_v62 }
0x1020   : > { %v4725_v40 = vpop.f32.mrf.mxu2  ;;  %v4974_v29 = vpop.f32.mrf.mxu3 }
0x1021   : > { %v5005_v51 = vpack.c.bf16 %v4974_v29, %v4974_v29  ;;  %v5000_v29 = vpack.c.bf16 %v4961_v22, %v4961_v22 }
0x1023   : > { %v5336_v16 = vunpack.c.l.b16 %v5005_v51  ;;  %v5332_v51 = vunpack.c.l.b16 %v5001_v27 }
0x1025   : > { %9292 = vmatmul.msk.bf16.gmra.mxu1 %vm913_vm3, %v10655_v43  ;;  %9353 = vmatmul.msk.bf16.gmra.mxu2 %vm913_vm3, %v14792_v38  ;;  %v5339_v8 = vpack.c.b16 %v5333_v4, %v5332_v51  ;;  %v4755_v4 = vpack.c.bf16 %v12567_v35, %v12567_v35 }
0x1028   : > { %v4728_v46 = vpop.f32.mrf.mxu2  ;;  %v4976_v57 = vpop.f32.mrf.mxu3 }
0x1029   : > { %v5006_v31 = vpack.c.bf16 %v4976_v57, %v4976_v57  ;;  %v4759_v60 = vpack.c.bf16 %v4728_v46, %v4728_v46  ;;  %v4999_v57 = vpack.c.bf16 %v12544_v45, %v12544_v45 }
0x102b   : > { %v5337_v33 = vunpack.c.l.b16 %v5006_v31  ;;  %v4758_v31 = vpack.c.bf16 %v4725_v40, %v4725_v40  ;;  %v5131_v36 = vunpack.c.l.b16 %v4759_v60 }
0x102d   : > { %v5341_v2 = vpack.c.b16 %v5337_v33, %v5336_v16  ;;  %v5331_v16 = vunpack.c.l.b16 %v5000_v29  ;;  %v5130_v1 = vunpack.c.l.b16 %v4758_v31  ;;  %v5127_v29 = vunpack.c.l.b16 %v4755_v4 }
0x102f   : > { %5353 = vmatpush.bf16.msrb.mxu0 %v5341_v2  ;;  %v12598_v2 = vpop.f32.mrf.mxu1 }
0x1030   : > { %v4730_v47 = vpop.f32.mrf.mxu2  ;;  %v12585_v37 = vpop.f32.mrf.mxu3  ;;  %14804 = vst [vmem:[#allocation43_spill] sm:$0xff] %v12598_v2 }
0x1031   : > { %v4760_v13 = vpack.c.bf16 %v4730_v47, %v4730_v47  ;;  %v5330_v47 = vunpack.c.l.b16 %v4999_v57  ;;  %v5134_v57 = vpack.c.b16 %v5128_v7, %v5127_v29 }
0x1033   : > { %v5132_v33 = vunpack.c.l.b16 %v4760_v13  ;;  %5354 = vmatpush.bf16.msrb.mxu0 %v5340_v15  ;;  %v5129_v13 = vunpack.c.l.b16 %v4757_v26  ;;  %v5338_v22 = vpack.c.b16 %v5331_v16, %v5330_v47  ;;  %v5153_v5 = vsel %vm2300_vm12, %v5134_v57, 0 }
0x1035   : > { %v5136_v63 = vpack.c.b16 %v5132_v33, %v5131_v36  ;;  %9293 = vmatmul.msk.bf16.gmra.mxu1 %vm913_vm3, %v10766_v50  ;;  %9354 = vmatmul.msk.bf16.gmra.mxu2 %vm913_vm3, %v14793_v17  ;;  %v5135_v19 = vpack.c.b16 %v5130_v1, %v5129_v13  ;;  %v14807_v36 = vpack.c.b16 %v12557_v44, %v12555_v58 }
0x1037   : > { %5355 = vmatpush.bf16.msrb.mxu0 %v5339_v8  ;;  %v5159_v46 = vsel %vm2300_vm12, %v5136_v63, 0  ;;  %v5156_v3 = vsel %vm2300_vm12, %v5135_v19, 0  ;;  %v5150_v33 = vsel %vm2300_vm12, %v14807_v36, 0 }
0x1038   : > { %v12594_v45 = vpop.f32.mrf.mxu2  ;;  %v12596_v60 = vpop.f32.mrf.mxu3  ;;  %5165 = vmatpush.bf16.xpose.msra.mxu1 %v5159_v46 }
0x103b   : > { %5356 = vmatpush.bf16.msrb.mxu0 %v5338_v22 }
0x1040   : > { %v12603_v40 = vpop.f32.mrf.mxu2  ;;  %v4984_v27 = vpop.f32.mrf.mxu3  ;;  %5166 = vmatpush.bf16.xpose.msra.mxu1 %v5156_v3 }
0x1042   : > { %v12605_v15 = vpop.f32.mrf.mxu1 }
0x1043   : > { %14805 = vst [vmem:[#allocation44_spill] sm:$0xff] %v12605_v15 }
0x1045   : > { %9294 = vmatmul.msk.bf16.gmra.mxu1 %vm913_vm3, %v10795_v18  ;;  %9355 = vmatmul.msk.bf16.gmra.mxu2 %vm913_vm3, %v14794_v55 }
0x1048   : > { %v12612_v35 = vpop.f32.mrf.mxu2  ;;  %v4986_v51 = vpop.f32.mrf.mxu3  ;;  %5167 = vmatpush.bf16.xpose.msra.mxu1 %v5153_v5 }
0x1049   : > { %v5010_v5 = vpack.c.bf16 %v4986_v51, %v4986_v51 }
0x104a   : > { %v12614_v31 = vpop.f32.mrf.mxu1 }
0x104b   : > { %14806 = vst [vmem:[#allocation45_spill] sm:$0xff] %v12614_v31 }
0x1050   : > { %v4740_v16 = vpop.f32.mrf.mxu2  ;;  %v4989_v26 = vpop.f32.mrf.mxu3  ;;  %5168 = vmatpush.bf16.xpose.msra.mxu1 %v5150_v33 }
0x1051   : > { %v5011_v3 = vpack.c.bf16 %v4989_v26, %v4989_v26 }
0x1052   : > { %v12620_v63 = vpop.f32.mrf.mxu1 }
0x1053   : > { %14808 = vst [vmem:[#allocation46_spill] sm:$0xff] %v12620_v63  ;;  %v5752_v31 = vunpack.c.l.b16 %v5011_v3  ;;  %v5751_v63 = vunpack.c.l.b16 %v5010_v5 }
0x1055   : > { %9295 = vmatmul.msk.bf16.gmra.mxu1 %vm913_vm3, %v10817_v53  ;;  %9356 = vmatmul.msk.bf16.gmra.mxu2 %vm913_vm3, %v14795_v11 }
0x1058   : > { %v4743_v8 = vpop.f32.mrf.mxu2  ;;  %v4991_v47 = vpop.f32.mrf.mxu3 }
0x1059   : > { %v5012_v19 = vpack.c.bf16 %v4991_v47, %v4991_v47 }
0x105a   : > { %v12626_v1 = vpop.f32.mrf.mxu1 }
0x105b   : > { %14809 = vst [vmem:[#allocation47_spill] sm:$0xff] %v12626_v1  ;;  %v5753_v36 = vunpack.c.l.b16 %v5012_v19  ;;  %v5009_v1 = vpack.c.bf16 %v4984_v27, %v4984_v27 }
0x105d   : > { %v5758_v47 = vpack.c.b16 %v5753_v36, %v5752_v31 }
0x1060   : > { %v4745_v46 = vpop.f32.mrf.mxu2  ;;  %v4994_v13 = vpop.f32.mrf.mxu3 }
0x1061   : > { %v5013_v44 = vpack.c.bf16 %v4994_v13, %v4994_v13  ;;  %v5008_v13 = vpack.c.bf16 %v12596_v60, %v12596_v60  ;;  %v4766_v51 = vpack.c.bf16 %v4745_v46, %v4745_v46  ;;  %v4763_v46 = vpack.c.bf16 %v12612_v35, %v12612_v35 }
0x1062   : > { %v12628_v58 = vpop.f32.mrf.mxu1 }
0x1063   : > { %14810 = vst [vmem:[#allocation48_spill] sm:$0xff] %v12628_v58  ;;  %v5754_v29 = vunpack.c.l.b16 %v5013_v44  ;;  %v5750_v44 = vunpack.c.l.b16 %v5009_v1  ;;  %v5749_v27 = vunpack.c.l.b16 %v5008_v13  ;;  %v5545_v36 = vunpack.c.l.b16 %v4763_v46 }
0x1064   : > { %v4762_v13 = vpack.c.bf16 %v12603_v40, %v12603_v40  ;;  %v4680_v40 = vpack.c.bf16 %v12497_v59, %v12497_v59 }
0x1065   : > { %9296 = vmatmul.msk.bf16.gmra.mxu1 %vm913_vm3, %v11010_v25  ;;  %9357 = vmatmul.msk.bf16.gmra.mxu2 %vm913_vm3, %v14796_v14  ;;  %v5757_v60 = vpack.c.b16 %v5751_v63, %v5750_v44  ;;  %v14814_v44 = vpack.c.b16 %v12457_v9, %v12455_v32 }
0x1066   : > { %v5544_v35 = vunpack.c.l.b16 %v4762_v13  ;;  %v5524_v9 = vunpack.c.l.b16 %v4680_v40  ;;  %v9652_v13 = vld [vmem:[%s14632_s5 + $0x38] sm:$0xff]  ;;  %v4686_v40 = vpack.c.bf16 %v12542_v23, %v12542_v23 }
0x1068   : > { %v4748_v22 = vpop.f32.mrf.mxu2  ;;  %v4996_v62 = vpop.f32.mrf.mxu3 }
0x1069   : > { %v5014_v4 = vpack.c.bf16 %v4996_v62, %v4996_v62  ;;  %v4767_v2 = vpack.c.bf16 %v4748_v22, %v4748_v22  ;;  %v5007_v62 = vpack.c.bf16 %v12585_v37, %v12585_v37  ;;  %v4765_v22 = vpack.c.bf16 %v4743_v8, %v4743_v8 }
0x106a   : > { %v12634_v7 = vpop.f32.mrf.mxu1 }
0x106b   : > { %14811 = vst [vmem:[#allocation49_spill] sm:$0xff] %v12634_v7  ;;  %v5755_v57 = vunpack.c.l.b16 %v5014_v4  ;;  %v5549_v19 = vunpack.c.l.b16 %v4767_v2  ;;  %v5547_v37 = vunpack.c.l.b16 %v4765_v22  ;;  %v4764_v2 = vpack.c.bf16 %v4740_v16, %v4740_v16 }
0x106c   : > { %v4761_v16 = vpack.c.bf16 %v12594_v45, %v12594_v45  ;;  %v4679_v45 = vpack.c.bf16 %v12493_v49, %v12493_v49  ;;  %v4682_v49 = vpack.c.bf16 %v12508_v54, %v12508_v54 }
0x106d   : > { %v5759_v33 = vpack.c.b16 %v5755_v57, %v5754_v29  ;;  %v5748_v29 = vunpack.c.l.b16 %v5007_v62  ;;  %v5546_v5 = vunpack.c.l.b16 %v4764_v2 }
0x106e   : > { %v5526_v2 = vunpack.c.l.b16 %v4682_v49 }
0x106f   : > { %5771 = vmatpush.bf16.msrb.mxu1 %v5759_v33  ;;  %v5756_v57 = vpack.c.b16 %v5749_v27, %v5748_v29 }
0x1070   : > { %v4750_v58 = vpop.f32.mrf.mxu2 }
0x1071   : > { %v4768_v15 = vpack.c.bf16 %v4750_v58, %v4750_v58  ;;  %v5548_v58 = vunpack.c.l.b16 %v4766_v51 }
0x1072   : > { %v12640_v26 = vpop.f32.mrf.mxu1 }
0x1073   : > { %14812 = vst [vmem:[#allocation50_spill] sm:$0xff] %v12640_v26  ;;  %v5550_v4 = vunpack.c.l.b16 %v4768_v15  ;;  %5772 = vmatpush.bf16.msrb.mxu1 %v5758_v47  ;;  %v5553_v8 = vpack.c.b16 %v5548_v58, %v5547_v37  ;;  %v5552_v47 = vpack.c.b16 %v5546_v5, %v5545_v36  ;;  %v14815_v58 = vpack.c.b16 %v12467_v52, %v12465_v21  ;;  %v5314_v37 = vpop.trf.xlu2 }
0x1074   : > { %9362 = vmatmul.msk.bf16.vlgmr.msrb.gmra.mxu0 %vm2354_vm1, %v5314_v37  ;;  %v14816_v5 = vpack.c.b16 %v12477_v56, %v12475_v6  ;;  %v4683_v36 = vpack.c.bf16 %v12518_v24, %v12518_v24  ;;  %v9651_v56 = vld [vmem:[%s14632_s5 + $0x30] sm:$0xff] }
0x1075   : > { %v5554_v3 = vpack.c.b16 %v5550_v4, %v5549_v19  ;;  %9297 = vmatmul.msk.bf16.gmra.mxu1 %vm913_vm3, %v11064_v41  ;;  %v5574_v63 = vsel %vm2300_vm12, %v5553_v8, 0  ;;  %v5571_v51 = vsel %vm2300_vm12, %v5552_v47, 0  ;;  %v5543_v19 = vunpack.c.l.b16 %v4761_v16 }
0x1076   : > { %v5527_v6 = vunpack.c.l.b16 %v4683_v36 }
0x1077   : > { %5773 = vmatpush.bf16.msrb.mxu1 %v5757_v60  ;;  %v5577_v31 = vsel %vm2300_vm12, %v5554_v3, 0  ;;  %v5551_v27 = vpack.c.b16 %v5544_v35, %v5543_v19  ;;  %v5523_v60 = vunpack.c.l.b16 %v4679_v45 }
0x1078   : > { %5583 = vmatpush.bf16.xpose.msra.mxu2 %v5577_v31  ;;  %v12647_v15 = vpop.f32.mrf.mxu2 }
0x1079   : > { %v5568_v32 = vsel %vm2300_vm12, %v5551_v27, 0  ;;  %v5531_v29 = vpack.c.b16 %v5524_v9, %v5523_v60 }
0x107a   : > { %v12645_v1 = vpop.f32.mrf.mxu1 }
0x107b   : > { %14813 = vst [vmem:[#allocation51_spill] sm:$0xff] %v12645_v1  ;;  %5774 = vmatpush.bf16.msrb.mxu1 %v5756_v57  ;;  %v4681_v57 = vpack.c.bf16 %v12501_v48, %v12501_v48 }
0x107d   : > { %v5525_v46 = vunpack.c.l.b16 %v4681_v57 }
0x107f   : > { %v5532_v52 = vpack.c.b16 %v5526_v2, %v5525_v46 }
0x1080   : > { %5584 = vmatpush.bf16.xpose.msra.mxu2 %v5574_v63  ;;  %v12658_v62 = vpop.f32.mrf.mxu2  ;;  %v4684_v63 = vpack.c.bf16 %v12528_v28, %v12528_v28  ;;  %v14817_v28 = vpack.c.b16 %v12487_v39, %v12485_v20  ;;  %v4685_v20 = vpack.c.bf16 %v12532_v30, %v12532_v30 }
0x1082   : > { %v12652_v33 = vpop.f32.mrf.mxu1  ;;  %v5528_v47 = vunpack.c.l.b16 %v4684_v63  ;;  %v5529_v46 = vunpack.c.l.b16 %v4685_v20 }
0x1083   : > { %v4835_v30 = vpack.c.bf16 %v12652_v33, %v12652_v33 }
0x1085   : > { %9358 = vmatmul.msk.bf16.vlgmr.msra.gmra.mxu1 %vm2300_vm12, %v14814_v44  ;;  %v5533_v44 = vpack.c.b16 %v5528_v47, %v5527_v6  ;;  %v5458_v63 = vunpack.c.l.b16 %v4835_v30 }
0x1088   : > { %5585 = vmatpush.bf16.xpose.msra.mxu2 %v5571_v51  ;;  %v12671_v22 = vpop.f32.mrf.mxu2 }
0x108a   : > { %v12665_v4 = vpop.f32.mrf.mxu1 }
0x108b   : > { %v4836_v23 = vpack.c.bf16 %v12665_v4, %v12665_v4 }
0x1090   : > { %5586 = vmatpush.bf16.xpose.msra.mxu2 %v5568_v32  ;;  %v12679_v59 = vpop.f32.mrf.mxu2 }
0x1092   : > { %v4800_v3 = vpop.f32.mrf.mxu1 }
0x1093   : > { %v4837_v49 = vpack.c.bf16 %v4800_v3, %v4800_v3 }
0x1095   : > { %9359 = vmatmul.msk.bf16.gmra.mxu1 %vm2300_vm12, %v14815_v58  ;;  %v5530_v58 = vunpack.c.l.b16 %v4686_v40 }
0x1097   : > { %9371 = vmatmul.msk.bf16.vlgmr.msra.gmra.mxu2 %vm2300_vm12, %v5531_v29 }
0x1098   : > { %v12686_v21 = vpop.f32.mrf.mxu2  ;;  %6062 = vmatpush.bf16.msrb.mxu2 %v9652_v13 }
0x109a   : > { %v4802_v31 = vpop.f32.mrf.mxu1 }
0x109b   : > { %v4838_v39 = vpack.c.bf16 %v4802_v31, %v4802_v31  ;;  %v5460_v31 = vunpack.c.l.b16 %v4837_v49 }
0x109c   : > { %6063 = vmatpush.bf16.msrb.mxu2 %v9651_v56 }
0x10a0   : > { %v12695_v48 = vpop.f32.mrf.mxu2 }
0x10a2   : > { %v4805_v8 = vpop.f32.mrf.mxu1 }
0x10a3   : > { %v4839_v45 = vpack.c.bf16 %v4805_v8, %v4805_v8  ;;  %v5461_v8 = vunpack.c.l.b16 %v4838_v39 }
0x10a5   : > { %9360 = vmatmul.msk.bf16.gmra.mxu1 %vm2300_vm12, %v14816_v5  ;;  %v5462_v37 = vunpack.c.l.b16 %v4839_v45  ;;  %v5534_v5 = vpack.c.b16 %v5530_v58, %v5529_v46  ;;  %v5467_v3 = vpack.c.b16 %v5461_v8, %v5460_v31 }
0x10a7   : > { %9372 = vmatmul.msk.bf16.gmra.mxu2 %vm2300_vm12, %v5532_v52 }
0x10a8   : > { %v12709_v24 = vpop.f32.mrf.mxu2 }
0x10aa   : > { %v4807_v54 = vpop.f32.mrf.mxu1 }
0x10ab   : > { %v4840_v19 = vpack.c.bf16 %v4807_v54, %v4807_v54  ;;  %v5459_v54 = vunpack.c.l.b16 %v4836_v23 }
0x10ad   : > { %v5463_v60 = vunpack.c.l.b16 %v4840_v19  ;;  %v5466_v47 = vpack.c.b16 %v5459_v54, %v5458_v63 }
0x10af   : > { %v5468_v52 = vpack.c.b16 %v5463_v60, %v5462_v37 }
0x10b0   : > { %v12716_v57 = vpop.f32.mrf.mxu2 }
0x10b2   : > { %v4810_v16 = vpop.f32.mrf.mxu1 }
0x10b3   : > { %v4841_v35 = vpack.c.bf16 %v4810_v16, %v4810_v16 }
0x10b5   : > { %9361 = vmatmul.msk.bf16.gmra.mxu1 %vm2300_vm12, %v14817_v28  ;;  %v5464_v32 = vunpack.c.l.b16 %v4841_v35  ;;  %v5732_v35 = vpop.trf.xlu0 }
0x10b7   : > { %9373 = vmatmul.msk.bf16.gmra.mxu2 %vm2300_vm12, %v5533_v44 }
0x10b8   : > { %v12727_v13 = vpop.f32.mrf.mxu2 }
0x10ba   : > { %v4812_v51 = vpop.f32.mrf.mxu1 }
0x10bb   : > { %v4842_v27 = vpack.c.bf16 %v4812_v51, %v4812_v51 }
0x10bd   : > { %v5465_v9 = vunpack.c.l.b16 %v4842_v27 }
0x10bf   : > { %v5469_v29 = vpack.c.b16 %v5465_v9, %v5464_v32 }
0x10c0   : > { %v12731_v16 = vpop.f32.mrf.mxu2 }
0x10c1   : > { %5490 = vmatpush.bf16.msra.mxu0 %v5469_v29 }
0x10c2   : > { %v12718_v2 = vpop.f32.mrf.mxu1 }
0x10c5   : > { %5491 = vmatpush.bf16.msra.mxu0 %v5468_v52  ;;  %9375 = vmatmul.msk.bf16.vlgmr.msrb.gmra.mxu1 %vm2354_vm1, %v5732_v35  ;;  %v9659_v35 = vld [vmem:[%s14636_s9 + $0x30] sm:$0xff] }
0x10c7   : > { %9374 = vmatmul.msk.bf16.gmra.mxu2 %vm2300_vm12, %v5534_v5 }
0x10c8   : > { %v12737_v6 = vpop.f32.mrf.mxu2 }
0x10c9   : > { %5492 = vmatpush.bf16.msra.mxu0 %v5467_v3  ;;  %v9660_v3 = vld [vmem:[%s14636_s9 + $0x38] sm:$0xff] }
0x10ca   : > { %v12725_v36 = vpop.f32.mrf.mxu1  ;;  %6390 = vmatpush.bf16.msra.mxu2 %v9660_v3 }
0x10cd   : > { %5493 = vmatpush.bf16.msra.mxu0 %v5466_v47 }
0x10ce   : > { %6391 = vmatpush.bf16.msra.mxu2 %v9659_v35 }
0x10d0   : > { %v12743_v44 = vpop.f32.mrf.mxu2 }
0x10d2   : > { %v12729_v4 = vpop.f32.mrf.mxu1 }
0x10d7   : > { %9410 = vmatmul.msk.bf16.vlgmr.msrb.gmra.mxu2 %vm913_vm3, %v10576_v61 }
0x10d8   : > { %v12750_v19 = vpop.f32.mrf.mxu2 }
0x10da   : > { %v12735_v33 = vpop.f32.mrf.mxu1 }
0x10e0   : > { %v12756_v40 = vpop.f32.mrf.mxu2 }
0x10e2   : > { %v12739_v56 = vpop.f32.mrf.mxu1 }
0x10e7   : > { %9411 = vmatmul.msk.bf16.gmra.mxu2 %vm913_vm3, %v10628_v12 }
0x10e8   : > { %v12764_v9 = vpop.f32.mrf.mxu2 }
0x10ea   : > { %v12745_v28 = vpop.f32.mrf.mxu1 }
0x10f0   : > { %v12770_v60 = vpop.f32.mrf.mxu2 }
0x10f2   : > { %v12748_v51 = vpop.f32.mrf.mxu1 }
0x10f7   : > { %9412 = vmatmul.msk.bf16.gmra.mxu2 %vm913_vm3, %v10655_v43 }
0x10fa   : > { %v12754_v27 = vpop.f32.mrf.mxu1 }
0x1102   : > { %v12758_v45 = vpop.f32.mrf.mxu1 }
0x1103   : > { %v5190_v32 = vsel %vm2354_vm1, %v12758_v45, -inf }
0x1104   : > { %5191 = vmax.xlane.f32.xlu1 %v5190_v32 }
0x1107   : > { %9413 = vmatmul.msk.bf16.gmra.mxu2 %vm913_vm3, %v10766_v50 }
0x110a   : > { %v12766_v20 = vpop.f32.mrf.mxu1 }
0x110b   : > { %v5193_v39 = vsel %vm2354_vm1, %v12766_v20, -inf }
0x110c   : > { %5194 = vmax.xlane.f32.xlu1 %v5193_v39 }
0x1112   : > { %v12772_v29 = vpop.f32.mrf.mxu1 }
0x1113   : > { %v5196_v58 = vsel %vm2354_vm1, %v12772_v29, -inf }
0x1114   : > { %5197 = vmax.xlane.f32.xlu1 %v5196_v58 }
0x1117   : > { %9414 = vmatmul.msk.bf16.gmra.mxu2 %vm913_vm3, %v10795_v18 }
0x111a   : > { %v12778_v49 = vpop.f32.mrf.mxu1  ;;  %v12780_v37 = vpop.f32.mrf.mxu2 }
0x111b   : > { %v5199_v46 = vsel %vm2354_vm1, %v12778_v49, -inf  ;;  %v5608_v52 = vsel %vm2354_vm1, %v12780_v37, -inf }
0x111c   : > { %5200 = vmax.xlane.f32.xlu1 %v5199_v46 }
0x1122   : > { %v12784_v23 = vpop.f32.mrf.mxu1  ;;  %v12786_v8 = vpop.f32.mrf.mxu2 }
0x1123   : > { %v5202_v5 = vsel %vm2354_vm1, %v12784_v23, -inf }
0x1124   : > { %5609 = vmax.xlane.f32.xlu1 %v5608_v52  ;;  %5203 = vmax.xlane.f32.xlu2 %v5202_v5  ;;  %v12820_v52 = vpop.f32.mrf.mxu0 }
0x1125   : > { %v5363_v5 = vsel %vm2300_vm12, %v12820_v52, -inf }
0x1127   : > { %9415 = vmatmul.msk.bf16.gmra.mxu2 %vm913_vm3, %v10817_v53 }
0x112a   : > { %v12794_v30 = vpop.f32.mrf.mxu1  ;;  %v12796_v31 = vpop.f32.mrf.mxu2 }
0x112b   : > { %v5205_v54 = vsel %vm2354_vm1, %v12794_v30, -inf }
0x112c   : > { %5206 = vmax.xlane.f32.xlu0 %v5205_v54  ;;  %v12828_v3 = vpop.f32.mrf.mxu0 }
0x1132   : > { %v12803_v63 = vpop.f32.mrf.mxu1  ;;  %v12805_v47 = vpop.f32.mrf.mxu2 }
0x1133   : > { %v5208_v32 = vsel %vm2354_vm1, %v12803_v63, -inf }
0x1134   : > { %5209 = vmax.xlane.f32.xlu1 %v5208_v32  ;;  %v5366_v32 = vsel %vm2300_vm12, %v12828_v3, -inf }
0x1137   : > { %9416 = vmatmul.msk.bf16.gmra.mxu2 %vm913_vm3, %v11010_v25 }
0x113a   : > { %v12814_v39 = vpop.f32.mrf.mxu1  ;;  %v12816_v58 = vpop.f32.mrf.mxu2 }
0x113b   : > { %v5211_v46 = vsel %vm2354_vm1, %v12814_v39, -inf }
0x113c   : > { %5212 = vmax.xlane.f32.xlu1 %v5211_v46 }
0x1142   : > { %v12824_v54 = vpop.f32.mrf.mxu2 }
0x1144   : > { %5364 = vmax.xlane.f32.xlu1 %v5363_v5 }
0x1147   : > { %9417 = vmatmul.msk.bf16.gmra.mxu2 %vm913_vm3, %v11064_v41 }
0x114a   : > { %v12830_v35 = vpop.f32.mrf.mxu2 }
0x114c   : > { %5367 = vmax.xlane.f32.xlu1 %v5366_v32 }
0x1152   : > { %v12834_v46 = vpop.f32.mrf.mxu2 }
0x1157   : > { %9490 = vmatmul.msk.bf16.vlgmr.msra.gmra.mxu2 %vm913_vm3, %v11089_v42 }
0x115a   : > { %v6065_v1 = vpop.f32.mrf.mxu2 }
0x115b   : > { %v6105_v7 = vpack.c.bf16 %v6065_v1, %v6065_v1 }
0x115d   : > { %v12838_v0 = vunpack.c.l.b16 %v6105_v7 }
0x115f   : > { %14818 = vst [vmem:[#allocation52_spill] sm:$0xff] %v12838_v0 }
0x1162   : > { %v6067_v26 = vpop.f32.mrf.mxu2 }
0x1163   : > { %v6106_v5 = vpack.c.bf16 %v6067_v26, %v6067_v26 }
0x1165   : > { %v12840_v41 = vunpack.c.l.b16 %v6106_v5 }
0x1167   : > { %14819 = vst [vmem:[#allocation53_spill] sm:$0xff] %v12840_v41  ;;  %9491 = vmatmul.msk.bf16.gmra.mxu2 %vm913_vm3, %v11118_v34 }
0x116a   : > { %v6070_v32 = vpop.f32.mrf.mxu2 }
0x116b   : > { %v6107_v53 = vpack.c.bf16 %v6070_v32, %v6070_v32 }
0x116d   : > { %v12846_v43 = vunpack.c.l.b16 %v6107_v53 }
0x116f   : > { %14820 = vst [vmem:[#allocation54_spill] sm:$0xff] %v12846_v43 }
0x1172   : > { %v6072_v18 = vpop.f32.mrf.mxu2 }
0x1173   : > { %v6108_v50 = vpack.c.bf16 %v6072_v18, %v6072_v18 }
0x1175   : > { %v12848_v42 = vunpack.c.l.b16 %v6108_v50 }
0x1177   : > { %14821 = vst [vmem:[#allocation55_spill] sm:$0xff] %v12848_v42  ;;  %9492 = vmatmul.msk.bf16.gmra.mxu2 %vm913_vm3, %v14791_v10  ;;  %v5192_v26 = vpop.xlane.xlu1 %5191 }
0x1178   : > { %v5214_v1 = vsub.f32 %v12758_v45, %v5192_v26  ;;  %v12864_v26 = vpop.f32.mrf.mxu1 }
0x117a   : > { %v5222_v5 = vmul.f32 1.442695, %v5214_v1  ;;  %v6075_v25 = vpop.f32.mrf.mxu2 }
0x117b   : > { %v6109_v32 = vpack.c.bf16 %v6075_v25, %v6075_v25 }
0x117c   : > { %9941 = vpow2.f32 %v5222_v5 }
0x117d   : > { %v12860_v43 = vunpack.c.l.b16 %v6109_v32 }
0x117f   : > { %v5195_v0 = vpop.xlane.xlu1 %5194  ;;  %14822 = vst [vmem:[#allocation56_spill] sm:$0xff] %v12860_v43 }
0x1180   : > { %v5215_v18 = vsub.f32 %v12766_v20, %v5195_v0  ;;  %v5781_v0 = vsel %vm2300_vm12, %v12864_v26, -inf }
0x1182   : > { %v12855_v41 = vpop.eup %9941  ;;  %v6077_v50 = vpop.f32.mrf.mxu2  ;;  %v5224_v45 = vmul.f32 1.442695, %v5215_v18 }
0x1183   : > { %v6110_v53 = vpack.c.bf16 %v6077_v50, %v6077_v50  ;;  %v5238_v7 = vsel %vm2354_vm1, %v12855_v41, 0.0 }
0x1184   : > { %5239 = vadd.xlane.f32.xlu1 %v5238_v7  ;;  %9943 = vpow2.f32 %v5224_v45  ;;  %v12884_v45 = vpop.f32.mrf.mxu1 }
0x1185   : > { %v12862_v42 = vunpack.c.l.b16 %v6110_v53 }
0x1187   : > { %14823 = vst [vmem:[#allocation57_spill] sm:$0xff] %v12862_v42  ;;  %9493 = vmatmul.msk.bf16.gmra.mxu2 %vm913_vm3, %v14792_v38  ;;  %v12872_v1 = vpop.xlane.xlu1 %5197 }
0x118a   : > { %v6080_v20 = vpop.f32.mrf.mxu2  ;;  %v12874_v7 = vpop.eup %9943 }
0x118b   : > { %v6111_v5 = vpack.c.bf16 %v6080_v20, %v6080_v20  ;;  %v5241_v50 = vsel %vm2354_vm1, %v12874_v7, 0.0 }
0x118c   : > { %5782 = vmax.xlane.f32.xlu1 %v5781_v0 }
0x118d   : > { %v12878_v53 = vunpack.c.l.b16 %v6111_v5 }
0x118f   : > { %14824 = vst [vmem:[#allocation58_spill] sm:$0xff] %v12878_v53  ;;  %v12880_v25 = vpop.xlane.xlu1 %5200 }
0x1192   : > { %v6082_v32 = vpop.f32.mrf.mxu2 }
0x1193   : > { %v6112_v18 = vpack.c.bf16 %v6082_v32, %v6082_v32 }
0x1194   : > { %5242 = vadd.xlane.f32.xlu1 %v5241_v50  ;;  %v5784_v50 = vsel %vm2300_vm12, %v12884_v45, -inf }
0x1195   : > { %v12882_v43 = vunpack.c.l.b16 %v6112_v18 }
0x1197   : > { %9494 = vmatmul.msk.bf16.gmra.mxu2 %vm913_vm3, %v14793_v17  ;;  %v5204_v20 = vpop.xlane.xlu2 %5203  ;;  %v5610_v42 = vpop.xlane.xlu1 %5609 }
0x1198   : > { %v5218_v32 = vsub.f32 %v12784_v23, %v5204_v20 }
0x119a   : > { %v5230_v5 = vmul.f32 1.442695, %v5218_v32 }
0x119c   : > { %5785 = vmax.xlane.f32.xlu1 %v5784_v50  ;;  %9945 = vpow2.f32 %v5230_v5  ;;  %v5632_v5 = vsub.f32 %v12780_v37, %v5610_v42  ;;  %v5629_v42 = vsel %vm2354_vm1, %v12834_v46, -inf }
0x119f   : > { %v5207_v18 = vpop.xlane.xlu0 %5206 }
0x11a0   : > { %v5219_v38 = vsub.f32 %v12794_v30, %v5207_v18  ;;  %v5626_v18 = vsel %vm2354_vm1, %v12830_v35, -inf }
0x11a2   : > { %v5232_v10 = vmul.f32 1.442695, %v5219_v38  ;;  %v12894_v34 = vpop.eup %9945 }
0x11a3   : > { %v5250_v0 = vsel %vm2354_vm1, %v12894_v34, 0.0 }
0x11a4   : > { %9947 = vpow2.f32 %v5232_v10  ;;  %5251 = vadd.xlane.f32.xlu2 %v5250_v0  ;;  %v5623_v10 = vsel %vm2354_vm1, %v12824_v54, -inf }
0x11a7   : > { %9495 = vmatmul.msk.bf16.gmra.mxu2 %vm913_vm3, %v14794_v55  ;;  %v5210_v23 = vpop.xlane.xlu1 %5209 }
0x11a8   : > { %v5220_v20 = vsub.f32 %v12803_v63, %v5210_v23  ;;  %v5640_v23 = vmul.f32 1.442695, %v5632_v5 }
0x11aa   : > { %v12901_v32 = vpop.eup %9947  ;;  %v5234_v50 = vmul.f32 1.442695, %v5220_v20 }
0x11ab   : > { %v5253_v30 = vsel %vm2354_vm1, %v12901_v32, 0.0 }
0x11ac   : > { %9949 = vpow2.f32 %v5234_v50  ;;  %5254 = vadd.xlane.f32.xlu0 %v5253_v30  ;;  %5624 = vmax.xlane.f32.xlu2 %v5623_v10 }
0x11ad   : > { %9951 = vpow2.f32 %v5640_v23 }
0x11af   : > { %v5213_v38 = vpop.xlane.xlu1 %5212 }
0x11b2   : > { %v12907_v0 = vpop.eup %9949 }
0x11b3   : > { %v5256_v63 = vsel %vm2354_vm1, %v12907_v0, 0.0  ;;  %v12919_v10 = vpop.eup %9951 }
0x11b4   : > { %5257 = vadd.xlane.f32.xlu0 %v5256_v63  ;;  %5627 = vmax.xlane.f32.xlu2 %v5626_v18  ;;  %v5656_v53 = vsel %vm2354_vm1, %v12919_v10, 0.0 }
0x11b7   : > { %9496 = vmatmul.msk.bf16.gmra.mxu2 %vm913_vm3, %v14795_v11  ;;  %v5365_v20 = vpop.xlane.xlu1 %5364 }
0x11b8   : > { %v5369_v50 = vsub.f32 %v12820_v52, %v5365_v20 }
0x11ba   : > { %v5371_v30 = vmul.f32 1.442695, %v5369_v50 }
0x11bc   : > { %9953 = vpow2.f32 %v5371_v30  ;;  %5630 = vmax.xlane.f32.xlu0 %v5629_v42  ;;  %v5217_v30 = vsub.f32 %v12778_v49, %v12880_v25  ;;  %v5614_v49 = vsel %vm2354_vm1, %v12796_v31, -inf  ;;  %v12950_v25 = vpop.f32.mrf.mxu2 }
0x11bd   : > { %14825 = vst [vmem:[#allocation59_spill] sm:$0xff] %v12950_v25 }
0x11be   : > { %v5228_v42 = vmul.f32 1.442695, %v5217_v30  ;;  %v5620_v30 = vsel %vm2354_vm1, %v12816_v58, -inf }
0x11bf   : > { %v5368_v37 = vpop.xlane.xlu1 %5367 }
0x11c0   : > { %v5370_v63 = vsub.f32 %v12828_v3, %v5368_v37  ;;  %v5216_v3 = vsub.f32 %v12772_v29, %v12872_v1 }
0x11c2   : > { %v12922_v18 = vpop.eup %9953  ;;  %v5373_v5 = vmul.f32 1.442695, %v5370_v63  ;;  %v5226_v50 = vmul.f32 1.442695, %v5216_v3 }
0x11c3   : > { %v5375_v52 = vsel %vm2300_vm12, %v12922_v18, 0.0 }
0x11c4   : > { %9955 = vpow2.f32 %v5373_v5  ;;  %5657 = vadd.xlane.f32.xlu0 %v5656_v53  ;;  %5376 = vadd.xlane.f32.xlu1 %v5375_v52  ;;  %v5611_v53 = vsel %vm2354_vm1, %v12786_v8, -inf  ;;  %v5221_v5 = vsub.f32 %v12814_v39, %v5213_v38  ;;  %v5617_v52 = vsel %vm2354_vm1, %v12805_v47, -inf }
0x11c5   : > { %9957 = vpow2.f32 %v5226_v50  ;;  %v12955_v50 = vpop.f32.mrf.mxu2 }
0x11c6   : > { %9959 = vpow2.f32 %v5228_v42  ;;  %v5236_v3 = vmul.f32 1.442695, %v5221_v5 }
0x11c7   : > { %9497 = vmatmul.msk.bf16.gmra.mxu2 %vm913_vm3, %v14796_v14 }
0x11c8   : > { %9961 = vpow2.f32 %v5236_v3 }
0x11ca   : > { %v12930_v23 = vpop.eup %9955 }
0x11cb   : > { %v5378_v20 = vsel %vm2300_vm12, %v12930_v23, 0.0  ;;  %v12940_v37 = vpop.eup %9957 }
0x11cc   : > { %5379 = vadd.xlane.f32.xlu1 %v5378_v20  ;;  %v5244_v29 = vsel %vm2354_vm1, %v12940_v37, 0.0  ;;  %v12944_v1 = vpop.eup %9959 }
0x11cd   : > { %v5247_v63 = vsel %vm2354_vm1, %v12944_v1, 0.0  ;;  %v12964_v38 = vpop.f32.mrf.mxu2 }
0x11ce   : > { %v12959_v42 = vpop.eup %9961  ;;  %14826 = vst [vmem:[#allocation60_spill] sm:$0xff] %v12964_v38 }
0x11cf   : > { %v5259_v39 = vsel %vm2354_vm1, %v12959_v42, 0.0 }
0x11d4   : > { %5612 = vmax.xlane.f32.xlu1 %v5611_v53 }
0x11dc   : > { %5245 = vadd.xlane.f32.xlu1 %v5244_v29 }
0x11e4   : > { %5248 = vadd.xlane.f32.xlu1 %v5247_v63 }
0x11ec   : > { %5615 = vmax.xlane.f32.xlu1 %v5614_v49 }
0x11f4   : > { %5618 = vmax.xlane.f32.xlu1 %v5617_v52 }
0x11f7   : > { %v5240_v20 = vpop.xlane.xlu1 %5239 }
0x11fc   : > { %5621 = vmax.xlane.f32.xlu1 %v5620_v30 }
0x11ff   : > { %v5783_v53 = vpop.xlane.xlu1 %5782 }
0x1200   : > { %v5787_v29 = vsub.f32 %v12864_v26, %v5783_v53  ;;  %v12970_v26 = vpop.f32.mrf.mxu2 }
0x1201   : > { %14827 = vst [vmem:[#allocation61_spill] sm:$0xff] %v12970_v26 }
0x1202   : > { %v5789_v63 = vmul.f32 1.442695, %v5787_v29 }
0x1204   : > { %9963 = vpow2.f32 %v5789_v63  ;;  %5260 = vadd.xlane.f32.xlu1 %v5259_v39 }
0x1205   : > { %9965 = vrcp.f32 %v5240_v20 }
0x1207   : > { %v5243_v49 = vpop.xlane.xlu1 %5242 }
0x1208   : > { %9967 = vrcp.f32 %v5243_v49  ;;  %v12976_v49 = vpop.f32.mrf.mxu2 }
0x1209   : > { %14828 = vst [vmem:[#allocation62_spill] sm:$0xff] %v12976_v49 }
0x120a   : > { %v12966_v5 = vpop.eup %9963 }
0x120b   : > { %v5793_v52 = vsel %vm2300_vm12, %v12966_v5, 0.0  ;;  %v9966_v3 = vpop.eup %9965 }
0x120c   : > { %5794 = vadd.xlane.f32.xlu1 %v5793_v52  ;;  %v5270_v53 = vmul.f32 %v9966_v3, %v12855_v41 }
0x120e   : > { %v9968_v30 = vpop.eup %9967 }
0x120f   : > { %v5271_v29 = vmul.f32 %v9968_v30, %v12874_v7  ;;  %v5786_v63 = vpop.xlane.xlu1 %5785 }
0x1210   : > { %v5788_v39 = vsub.f32 %v12884_v45, %v5786_v63  ;;  %v12982_v26 = vpop.f32.mrf.mxu2 }
0x1211   : > { %v5278_v20 = vpack.c.bf16 %v5271_v29, %v5270_v53  ;;  %14829 = vst [vmem:[#allocation63_spill] sm:$0xff] %v12982_v26  ;;  %v4849_v29 = vpack.c.bf16 %v12748_v51, %v12748_v51  ;;  %v5081_v26 = vpack.c.bf16 %v12647_v15, %v12647_v15  ;;  %v4844_v15 = vpack.c.bf16 %v12725_v36, %v12725_v36 }
0x1212   : > { %v5791_v38 = vmul.f32 1.442695, %v5788_v39  ;;  %v4848_v39 = vpack.c.bf16 %v12745_v28, %v12745_v28 }
0x1213   : > { %9367 = vmatmul.msk.bf16.vlgmr.msra.gmra.mxu0 %vm2354_vm1, %v5278_v20  ;;  %v5882_v49 = vunpack.c.l.b16 %v4849_v29  ;;  %v5394_v29 = vunpack.c.l.b16 %v5081_v26 }
0x1214   : > { %9969 = vpow2.f32 %v5791_v38  ;;  %v4850_v38 = vpack.c.bf16 %v12754_v27, %v12754_v27  ;;  %v4847_v27 = vpack.c.bf16 %v12739_v56, %v12739_v56  ;;  %v4845_v56 = vpack.c.bf16 %v12729_v4, %v12729_v4 }
0x1216   : > { %v5883_v20 = vunpack.c.l.b16 %v4850_v38  ;;  %v4846_v38 = vpack.c.bf16 %v12735_v33, %v12735_v33 }
0x1218   : > { %v12984_v41 = vpop.f32.mrf.mxu2 }
0x1219   : > { %14830 = vst [vmem:[#allocation64_spill] sm:$0xff] %v12984_v41 }
0x121a   : > { %v12978_v25 = vpop.eup %9969 }
0x121b   : > { %v5796_v52 = vsel %vm2300_vm12, %v12978_v25, 0.0 }
0x121c   : > { %5797 = vadd.xlane.f32.xlu2 %v5796_v52 }
0x1220   : > { %v12986_v7 = vpop.f32.mrf.mxu2 }
0x1221   : > { %14831 = vst [vmem:[#allocation65_spill] sm:$0xff] %v12986_v7  ;;  %v5082_v7 = vpack.c.bf16 %v12658_v62, %v12658_v62 }
0x1223   : > { %v5395_v62 = vunpack.c.l.b16 %v5082_v7  ;;  %v5877_v7 = vunpack.c.l.b16 %v4844_v15 }
0x1228   : > { %v12988_v30 = vpop.f32.mrf.mxu2 }
0x1237   : > { %v5377_v45 = vpop.xlane.xlu1 %5376 }
0x1238   : > { %9971 = vrcp.f32 %v5377_v45 }
0x123e   : > { %v9972_v53 = vpop.eup %9971 }
0x123f   : > { %v5380_v3 = vpop.xlane.xlu1 %5379  ;;  %v5383_v41 = vmul.f32 %v9972_v53, %v12922_v18  ;;  %v5881_v18 = vunpack.c.l.b16 %v4848_v39  ;;  %v5887_v53 = vpack.c.b16 %v5883_v20, %v5882_v49  ;;  %v5402_v49 = vpack.c.b16 %v5395_v62, %v5394_v29 }
0x1240   : > { %9973 = vrcp.f32 %v5380_v3  ;;  %v4843_v20 = vpack.c.bf16 %v12718_v2, %v12718_v2 }
0x1242   : > { %v5876_v36 = vunpack.c.l.b16 %v4843_v20 }
0x1244   : > { %v5884_v2 = vpack.c.b16 %v5877_v7, %v5876_v36 }
0x1246   : > { %v9974_v63 = vpop.eup %9973 }
0x1247   : > { %v5613_v52 = vpop.xlane.xlu1 %5612  ;;  %v5384_v45 = vmul.f32 %v9974_v63, %v12930_v23  ;;  %v13007_v23 = vpop.f32.mrf.mxu2  ;;  %v5879_v63 = vunpack.c.l.b16 %v4846_v38  ;;  %v5083_v38 = vpack.c.bf16 %v12671_v22, %v12671_v22 }
0x1248   : > { %v5633_v3 = vsub.f32 %v12786_v8, %v5613_v52  ;;  %v5878_v52 = vunpack.c.l.b16 %v4845_v56 }
0x1249   : > { %v5385_v51 = vpack.c.bf16 %v5384_v45, %v5383_v41  ;;  %v5880_v41 = vunpack.c.l.b16 %v4847_v27 }
0x124a   : > { %v5642_v28 = vmul.f32 1.442695, %v5633_v3  ;;  %v5252_v3 = vpop.xlane.xlu2 %5251  ;;  %v5885_v26 = vpack.c.b16 %v5879_v63, %v5878_v52 }
0x124b   : > { %v5419_v8 = vsel %vm2300_vm12, %v5385_v51, 0  ;;  %v5886_v39 = vpack.c.b16 %v5881_v18, %v5880_v41  ;;  %v5255_v18 = vpop.xlane.xlu0 %5254  ;;  %v5396_v41 = vunpack.c.l.b16 %v5083_v38 }
0x124c   : > { %9975 = vpow2.f32 %v5642_v28  ;;  %5428 = vmatpush.bf16.xpose.msra.mxu3 %v5419_v8  ;;  %v5084_v28 = vpack.c.bf16 %v12679_v59, %v12679_v59 }
0x124e   : > { %v5397_v8 = vunpack.c.l.b16 %v5084_v28 }
0x124f   : > { %v5246_v33 = vpop.xlane.xlu1 %5245  ;;  %v13021_v27 = vpop.f32.mrf.mxu2 }
0x1250   : > { %9977 = vrcp.f32 %v5246_v33  ;;  %v5403_v59 = vpack.c.b16 %v5397_v8, %v5396_v41 }
0x1252   : > { %v13016_v45 = vpop.eup %9975  ;;  %v5625_v62 = vpop.xlane.xlu2 %5624 }
0x1253   : > { %9363 = vmatmul.msk.bf16.vlgmr.msra.gmra.mxu3 %vm2300_vm12, %v5402_v49  ;;  %v5659_v4 = vsel %vm2354_vm1, %v13016_v45, 0.0  ;;  %v5637_v20 = vsub.f32 %v12824_v54, %v5625_v62  ;;  %v5258_v52 = vpop.xlane.xlu0 %5257 }
0x1254   : > { %5908 = vmatpush.bf16.msrb.mxu3 %v5887_v53  ;;  %5660 = vadd.xlane.f32.xlu1 %v5659_v4 }
0x1255   : > { %v5650_v7 = vmul.f32 1.442695, %v5637_v20  ;;  %v5088_v20 = vpack.c.bf16 %v12716_v57, %v12716_v57 }
0x1256   : > { %v9978_v53 = vpop.eup %9977 }
0x1257   : > { %v5249_v51 = vpop.xlane.xlu1 %5248  ;;  %v13027_v29 = vpop.f32.mrf.mxu2  ;;  %v5272_v15 = vmul.f32 %v9978_v53, %v12940_v37 }
0x1258   : > { %5909 = vmatpush.bf16.msrb.mxu3 %v5886_v39  ;;  %9979 = vrcp.f32 %v5249_v51 }
0x1259   : > { %9981 = vrcp.f32 %v5255_v18 }
0x125a   : > { %v5628_v37 = vpop.xlane.xlu2 %5627 }
0x125b   : > { %v5638_v51 = vsub.f32 %v12830_v35, %v5628_v37  ;;  %v5631_v62 = vpop.xlane.xlu0 %5630 }
0x125c   : > { %5910 = vmatpush.bf16.msrb.mxu3 %v5885_v26 }
0x125d   : > { %v5652_v18 = vmul.f32 1.442695, %v5638_v51 }
0x125e   : > { %v9980_v56 = vpop.eup %9979 }
0x125f   : > { %v5273_v63 = vmul.f32 %v9980_v56, %v12944_v1  ;;  %v5616_v33 = vpop.xlane.xlu1 %5615  ;;  %v9982_v26 = vpop.eup %9981 }
0x1260   : > { %5911 = vmatpush.bf16.msrb.mxu3 %v5884_v2  ;;  %v5634_v39 = vsub.f32 %v12796_v31, %v5616_v33  ;;  %v5086_v31 = vpack.c.bf16 %v12695_v48, %v12695_v48  ;;  %v13038_v36 = vpop.f32.mrf.mxu2  ;;  %v5275_v48 = vmul.f32 %v9982_v26, %v12901_v32  ;;  %v5639_v33 = vsub.f32 %v12834_v46, %v5631_v62 }
0x1261   : > { %v5279_v49 = vpack.c.bf16 %v5273_v63, %v5272_v15 }
0x1262   : > { %v5644_v22 = vmul.f32 1.442695, %v5634_v39  ;;  %v5654_v32 = vmul.f32 1.442695, %v5639_v33 }
0x1263   : > { %9364 = vmatmul.msk.bf16.gmra.mxu3 %vm2300_vm12, %v5403_v59  ;;  %9368 = vmatmul.msk.bf16.gmra.mxu0 %vm2354_vm1, %v5279_v49 }
0x1264   : > { %9983 = vpow2.f32 %v5644_v22 }
0x1265   : > { %9985 = vrcp.f32 %v5252_v3  ;;  %v5085_v3 = vpack.c.bf16 %v12686_v21, %v12686_v21 }
0x1266   : > { %9987 = vpow2.f32 %v5650_v7  ;;  %v5087_v7 = vpack.c.bf16 %v12709_v24, %v12709_v24 }
0x1267   : > { %v5619_v4 = vpop.xlane.xlu1 %5618  ;;  %v5398_v53 = vunpack.c.l.b16 %v5085_v3 }
0x1268   : > { %v5635_v1 = vsub.f32 %v12805_v47, %v5619_v4  ;;  %v5399_v47 = vunpack.c.l.b16 %v5086_v31  ;;  %v13055_v59 = vpop.f32.mrf.mxu2  ;;  %v5400_v57 = vunpack.c.l.b16 %v5087_v7  ;;  %v9654_v7 = vld [vmem:[%s14633_s6 + $0x38] sm:$0xff] }
0x126a   : > { %v13040_v54 = vpop.eup %9983  ;;  %v5646_v2 = vmul.f32 1.442695, %v5635_v1  ;;  %v5404_v21 = vpack.c.b16 %v5399_v47, %v5398_v53  ;;  %v5401_v1 = vunpack.c.l.b16 %v5088_v20 }
0x126b   : > { %v5662_v28 = vsel %vm2354_vm1, %v13040_v54, 0.0  ;;  %v9986_v38 = vpop.eup %9985 }
0x126c   : > { %9989 = vpow2.f32 %v5646_v2  ;;  %5663 = vadd.xlane.f32.xlu2 %v5662_v28  ;;  %v5274_v8 = vmul.f32 %v9986_v38, %v12894_v34  ;;  %v13049_v35 = vpop.eup %9987  ;;  %v5405_v24 = vpack.c.b16 %v5401_v1, %v5400_v57  ;;  %v9662_v1 = vld [vmem:[%s14637_s10 + $0x38] sm:$0xff] }
0x126d   : > { %9991 = vpow2.f32 %v5652_v18 }
0x126e   : > { %v5280_v15 = vpack.c.bf16 %v5275_v48, %v5274_v8 }
0x126f   : > { %v5622_v56 = vpop.xlane.xlu1 %5621 }
0x1270   : > { %v5636_v41 = vsub.f32 %v12816_v58, %v5622_v56  ;;  %v5671_v58 = vsel %vm2354_vm1, %v13049_v35, 0.0  ;;  %v13075_v26 = vpop.f32.mrf.mxu2  ;;  %v5090_v56 = vpack.c.bf16 %v12731_v16, %v12731_v16  ;;  %v5091_v16 = vpack.c.bf16 %v12737_v6, %v12737_v6  ;;  %v9653_v6 = vld [vmem:[%s14633_s6 + $0x30] sm:$0xff] }
0x1272   : > { %v13052_v63 = vpop.eup %9989  ;;  %v5648_v39 = vmul.f32 1.442695, %v5636_v41 }
0x1273   : > { %9365 = vmatmul.msk.bf16.gmra.mxu3 %vm2300_vm12, %v5404_v21  ;;  %9369 = vmatmul.msk.bf16.gmra.mxu0 %vm2354_vm1, %v5280_v15  ;;  %v5665_v34 = vsel %vm2354_vm1, %v13052_v63, 0.0  ;;  %v13063_v46 = vpop.eup %9991  ;;  %v5089_v21 = vpack.c.bf16 %v12727_v13, %v12727_v13  ;;  %v5814_v13 = vunpack.c.l.b16 %v5091_v16 }
0x1274   : > { %9993 = vpow2.f32 %v5648_v39  ;;  %5666 = vadd.xlane.f32.xlu0 %v5665_v34  ;;  %5672 = vadd.xlane.f32.xlu2 %v5671_v58  ;;  %v5813_v39 = vunpack.c.l.b16 %v5090_v56 }
0x1275   : > { %9995 = vrcp.f32 %v5258_v52  ;;  %v5674_v52 = vsel %vm2354_vm1, %v13063_v46, 0.0  ;;  %v5812_v34 = vunpack.c.l.b16 %v5089_v21 }
0x1277   : > { %v5261_v49 = vpop.xlane.xlu1 %5260  ;;  %v5820_v58 = vpack.c.b16 %v5813_v39, %v5812_v34 }
0x1278   : > { %9997 = vrcp.f32 %v5261_v49  ;;  %v13085_v47 = vpop.f32.mrf.mxu2 }
0x1279   : > { %9999 = vpow2.f32 %v5654_v32 }
0x127a   : > { %v13067_v22 = vpop.eup %9993 }
0x127b   : > { %v5668_v37 = vsel %vm2354_vm1, %v13067_v22, 0.0  ;;  %v9996_v4 = vpop.eup %9995 }
0x127c   : > { %5669 = vadd.xlane.f32.xlu1 %v5668_v37  ;;  %5675 = vadd.xlane.f32.xlu0 %v5674_v52  ;;  %v5276_v51 = vmul.f32 %v9996_v4, %v12907_v0  ;;  %v5094_v37 = vpack.c.bf16 %v12756_v40, %v12756_v40  ;;  %v9650_v40 = vld [vmem:[%s14638_s11 + $0x10] sm:$0xff] }
0x127d   : > { %5981 = vmatpush.bf16.msrb.mxu0 %v9650_v40 }
0x127e   : > { %v9998_v31 = vpop.eup %9997  ;;  %v5817_v4 = vunpack.c.l.b16 %v5094_v37 }
0x127f   : > { %v5277_v2 = vmul.f32 %v9998_v31, %v12959_v42  ;;  %v13079_v3 = vpop.eup %9999  ;;  %v5795_v48 = vpop.xlane.xlu1 %5794 }
0x1280   : > { %v5677_v38 = vsel %vm2354_vm1, %v13079_v3, 0.0  ;;  %10001 = vrcp.f32 %v5795_v48  ;;  %v13087_v0 = vpop.f32.mrf.mxu2 }
0x1281   : > { %v5281_v28 = vpack.c.bf16 %v5277_v2, %v5276_v51  ;;  %v9661_v51 = vld [vmem:[%s14637_s10 + $0x30] sm:$0xff]  ;;  %v5658_v2 = vpop.xlane.xlu0 %5657 }
0x1283   : > { %9366 = vmatmul.msk.bf16.gmra.mxu3 %vm2300_vm12, %v5405_v24  ;;  %9370 = vmatmul.msk.bf16.gmra.mxu0 %vm2354_vm1, %v5281_v28  ;;  %v5096_v28 = vpack.c.bf16 %v12770_v60, %v12770_v60 }
0x1284   : > { %5678 = vadd.xlane.f32.xlu1 %v5677_v38  ;;  %v5095_v38 = vpack.c.bf16 %v12764_v9, %v12764_v9 }
0x1286   : > { %v10002_v42 = vpop.eup %10001 }
0x1287   : > { %v5801_v8 = vmul.f32 %v10002_v42, %v12966_v5 }
0x1288   : > { %v13095_v15 = vpop.f32.mrf.mxu2 }
0x128f   : > { %v5798_v18 = vpop.xlane.xlu2 %5797 }
0x1290   : > { %10003 = vrcp.f32 %v5798_v18  ;;  %v13099_v5 = vpop.f32.mrf.mxu2  ;;  %v5819_v18 = vunpack.c.l.b16 %v5096_v28 }
0x1291   : > { %10005 = vrcp.f32 %v5658_v2 }
0x1296   : > { %v10004_v53 = vpop.eup %10003 }
0x1297   : > { %v5802_v62 = vmul.f32 %v10004_v53, %v12978_v25  ;;  %v5092_v25 = vpack.c.bf16 %v12743_v44, %v12743_v44  ;;  %v5093_v44 = vpack.c.bf16 %v12750_v19, %v12750_v19  ;;  %v10006_v48 = vpop.eup %10005 }
0x1298   : > { %v13105_v49 = vpop.f32.mrf.mxu2  ;;  %v5688_v56 = vmul.f32 %v10006_v48, %v12919_v10 }
0x1299   : > { %v5803_v41 = vpack.c.bf16 %v5802_v62, %v5801_v8  ;;  %v5815_v32 = vunpack.c.l.b16 %v5092_v25  ;;  %v5816_v31 = vunpack.c.l.b16 %v5093_v44  ;;  %v5495_v8 = vpop.f32.mrf.mxu0  ;;  %v5818_v62 = vunpack.c.l.b16 %v5095_v38 }
0x129b   : > { %v5837_v33 = vsel %vm2300_vm12, %v5803_v41, 0  ;;  %v5821_v20 = vpack.c.b16 %v5815_v32, %v5814_v13  ;;  %v5822_v57 = vpack.c.b16 %v5817_v4, %v5816_v31  ;;  %v5823_v21 = vpack.c.b16 %v5819_v18, %v5818_v62 }
0x129c   : > { %5846 = vmatpush.bf16.xpose.msra.mxu1 %v5837_v33  ;;  %v6443_v31 = vpack.c.bf16 %v13099_v5, %v13099_v5 }
0x12a0   : > { %v6423_v52 = vpop.f32.mrf.mxu2 }
0x12a1   : > { %v5497_v34 = vpop.f32.mrf.mxu0 }
0x12a3   : > { %9376 = vmatmul.msk.bf16.vlgmr.msra.gmra.mxu1 %vm2300_vm12, %v5820_v58 }
0x12a4   : > { %6144 = vmatpush.bf16.msrb.mxu1 %v9654_v7  ;;  %v6445_v7 = vpack.c.bf16 %v6423_v52, %v6423_v52  ;;  %v6442_v52 = vpack.c.bf16 %v13095_v15, %v13095_v15 }
0x12a6   : > { %v7186_v40 = vunpack.c.l.b16 %v6445_v7  ;;  %v7183_v38 = vunpack.c.l.b16 %v6442_v52  ;;  %v9655_v7 = vld [vmem:[%s14634_s7 + $0x30] sm:$0xff] }
0x12a8   : > { %6145 = vmatpush.bf16.msrb.mxu1 %v9653_v6  ;;  %v6425_v19 = vpop.f32.mrf.mxu2  ;;  %v6444_v6 = vpack.c.bf16 %v13105_v49, %v13105_v49 }
0x12a9   : > { %v6446_v25 = vpack.c.bf16 %v6425_v19, %v6425_v19  ;;  %v6441_v19 = vpack.c.bf16 %v13087_v0, %v13087_v0 }
0x12ab   : > { %v7187_v44 = vunpack.c.l.b16 %v6446_v25  ;;  %v7182_v18 = vunpack.c.l.b16 %v6441_v19 }
0x12ac   : > { %6472 = vmatpush.bf16.msra.mxu1 %v9662_v1 }
0x12ad   : > { %v7192_v49 = vpack.c.b16 %v7187_v44, %v7186_v40  ;;  %v7190_v15 = vpack.c.b16 %v7183_v38, %v7182_v18  ;;  %v14832_v44 = vld [vmem:[#allocation10_spill] sm:$0xff] }
0x12b0   : > { %6473 = vmatpush.bf16.msra.mxu1 %v9661_v51  ;;  %v6428_v42 = vpop.f32.mrf.mxu2 }
0x12b1   : > { %v6447_v58 = vpack.c.bf16 %v6428_v42, %v6428_v42 }
0x12b3   : > { %9377 = vmatmul.msk.bf16.gmra.mxu1 %vm2300_vm12, %v5821_v20  ;;  %v7188_v10 = vunpack.c.l.b16 %v6447_v58 }
0x12b8   : > { %v6430_v39 = vpop.f32.mrf.mxu2 }
0x12b9   : > { %v6448_v9 = vpack.c.bf16 %v6430_v39, %v6430_v39 }
0x12bb   : > { %v7189_v16 = vunpack.c.l.b16 %v6448_v9 }
0x12bd   : > { %v7193_v4 = vpack.c.b16 %v7189_v16, %v7188_v10 }
0x12c3   : > { %9378 = vmatmul.msk.bf16.gmra.mxu1 %vm2300_vm12, %v5822_v57  ;;  %v7185_v57 = vunpack.c.l.b16 %v6444_v6 }
0x12c7   : > { %v5661_v24 = vpop.xlane.xlu1 %5660 }
0x12c8   : > { %10007 = vrcp.f32 %v5661_v24  ;;  %v7184_v24 = vunpack.c.l.b16 %v6443_v31 }
0x12ca   : > { %v7191_v48 = vpack.c.b16 %v7185_v57, %v7184_v24  ;;  %v14833_v24 = vld [vmem:[#allocation11_spill] sm:$0xff] }
0x12ce   : > { %v10008_v53 = vpop.eup %10007 }
0x12cf   : > { %v5689_v41 = vmul.f32 %v10008_v53, %v13016_v45 }
0x12d1   : > { %v5696_v33 = vpack.c.bf16 %v5689_v41, %v5688_v56 }
0x12d3   : > { %9379 = vmatmul.msk.bf16.gmra.mxu1 %vm2300_vm12, %v5823_v21  ;;  %9380 = vmatmul.msk.bf16.vlgmr.msrb.gmra.mxu3 %vm2354_vm1, %v5696_v33 }
0x12d6   : > { %v5430_v60 = vpop.f32.mrf.mxu3 }
0x12d7   : > { %v5496_v13 = vadd.f32 %v5495_v8, %v5430_v60 }
0x12de   : > { %v5432_v32 = vpop.f32.mrf.mxu3 }
0x12df   : > { %v5498_v20 = vadd.f32 %v5497_v34, %v5432_v32  ;;  %v5664_v1 = vpop.xlane.xlu2 %5663 }
0x12e0   : > { %v5500_v37 = vpop.f32.mrf.mxu0  ;;  %10009 = vrcp.f32 %v5664_v1 }
0x12e1   : > { %v5933_v45 = vpack.c.bf16 %v5498_v20, %v5496_v13 }
0x12e3   : > { %9390 = vmatmul.msk.bf16.vlgmr.msrb.gmra.mxu0 %vm2300_vm12, %v5933_v45  ;;  %9430 = vmatmul.msk.bf16.vlgmr.msrb.gmra.mxu1 %vm913_vm3, %v10576_v61 }
0x12e4   : > { %7205 = vmatpush.bf16.msrb.mxu1 %v7193_v4 }
0x12e6   : > { %v5435_v51 = vpop.f32.mrf.mxu3  ;;  %v10010_v5 = vpop.eup %10009 }
0x12e7   : > { %v5667_v2 = vpop.xlane.xlu0 %5666  ;;  %v5690_v8 = vmul.f32 %v10010_v5, %v13040_v54  ;;  %v5501_v62 = vadd.f32 %v5500_v37, %v5435_v51  ;;  %v5673_v39 = vpop.xlane.xlu2 %5672  ;;  %v9656_v54 = vld [vmem:[%s14634_s7 + $0x38] sm:$0xff] }
0x12e8   : > { %10011 = vrcp.f32 %v5667_v2  ;;  %7206 = vmatpush.bf16.msrb.mxu1 %v7192_v49  ;;  %v5502_v28 = vpop.f32.mrf.mxu0  ;;  %6226 = vmatpush.bf16.msra.mxu3 %v9656_v54 }
0x12ec   : > { %7207 = vmatpush.bf16.msrb.mxu1 %v7191_v48  ;;  %6227 = vmatpush.bf16.msra.mxu3 %v9655_v7  ;;  %v14835_v48 = vld [vmem:[#allocation13_spill] sm:$0xff]  ;;  %v14841_v7 = vld [vmem:[#allocation22_spill] sm:$0xff] }
0x12ee   : > { %v10012_v42 = vpop.eup %10011  ;;  %v5437_v53 = vpop.f32.mrf.mxu3 }
0x12ef   : > { %v5691_v56 = vmul.f32 %v10012_v42, %v13052_v63  ;;  %v5503_v41 = vadd.f32 %v5502_v28, %v5437_v53  ;;  %v5670_v33 = vpop.xlane.xlu1 %5669  ;;  %v5676_v6 = vpop.xlane.xlu0 %5675  ;;  %v14836_v42 = vld [vmem:[#allocation14_spill] sm:$0xff] }
0x12f0   : > { %7208 = vmatpush.bf16.msrb.mxu1 %v7190_v15  ;;  %v5505_v0 = vpop.f32.mrf.mxu0  ;;  %10013 = vrcp.f32 %v5670_v33  ;;  %v14837_v15 = vld [vmem:[#allocation15_spill] sm:$0xff] }
0x12f1   : > { %v5934_v21 = vpack.c.bf16 %v5503_v41, %v5501_v62  ;;  %v5697_v60 = vpack.c.bf16 %v5691_v56, %v5690_v8  ;;  %10015 = vrcp.f32 %v5673_v39  ;;  %v14838_v56 = vld [vmem:[#allocation20_spill] sm:$0xff]  ;;  %v14839_v41 = vld [vmem:[#allocation25_spill] sm:$0xff] }
0x12f3   : > { %9381 = vmatmul.msk.bf16.gmra.mxu3 %vm2354_vm1, %v5697_v60  ;;  %9391 = vmatmul.msk.bf16.gmra.mxu0 %vm2300_vm12, %v5934_v21 }
0x12f4   : > { %9431 = vmatmul.msk.bf16.gmra.mxu1 %vm913_vm3, %v10628_v12 }
0x12f6   : > { %v5440_v63 = vpop.f32.mrf.mxu3  ;;  %v10014_v34 = vpop.eup %10013 }
0x12f7   : > { %v10016_v58 = vpop.eup %10015  ;;  %v5692_v25 = vmul.f32 %v10014_v34, %v13067_v22  ;;  %v5506_v13 = vadd.f32 %v5505_v0, %v5440_v63  ;;  %v5679_v10 = vpop.xlane.xlu1 %5678  ;;  %v4566_v0 = vadd.f32 %v14839_v41, %v14838_v56  ;;  %v14840_v34 = vld [vmem:[#allocation16_spill] sm:$0xff]  ;;  %v14848_v56 = vld [vmem:[#allocation38_spill] sm:$0xff] }
0x12f8   : > { %v5507_v9 = vpop.f32.mrf.mxu0  ;;  %v5693_v32 = vmul.f32 %v10016_v58, %v13049_v35  ;;  %10017 = vrcp.f32 %v5679_v10  ;;  %v14842_v10 = vld [vmem:[#allocation34_spill] sm:$0xff] }
0x12f9   : > { %10019 = vrcp.f32 %v5676_v6 }
0x12fa   : > { %v5698_v45 = vpack.c.bf16 %v5693_v32, %v5692_v25 }
0x12fe   : > { %v5442_v16 = vpop.f32.mrf.mxu3  ;;  %v10018_v4 = vpop.eup %10017 }
0x12ff   : > { %v5508_v20 = vadd.f32 %v5507_v9, %v5442_v16  ;;  %v10020_v1 = vpop.eup %10019  ;;  %v5695_v31 = vmul.f32 %v10018_v4, %v13079_v3  ;;  %v14834_v3 = vld [vmem:[#allocation12_spill] sm:$0xff] }
0x1300   : > { %v5510_v22 = vpop.f32.mrf.mxu0  ;;  %v5694_v57 = vmul.f32 %v10020_v1, %v13063_v46 }
0x1301   : > { %v5935_v37 = vpack.c.bf16 %v5508_v20, %v5506_v13 }
0x1302   : > { %v5699_v19 = vpack.c.bf16 %v5695_v31, %v5694_v57  ;;  %v14845_v57 = vld [vmem:[#allocation36_spill] sm:$0xff] }
0x1303   : > { %9382 = vmatmul.msk.bf16.gmra.mxu3 %vm2354_vm1, %v5698_v45  ;;  %9392 = vmatmul.msk.bf16.gmra.mxu0 %vm2300_vm12, %v5935_v37  ;;  %v4571_v37 = vadd.f32 %v14842_v10, %v14841_v7 }
0x1304   : > { %9432 = vmatmul.msk.bf16.gmra.mxu1 %vm913_vm3, %v14832_v44 }
0x1306   : > { %v5445_v35 = vpop.f32.mrf.mxu3 }
0x1307   : > { %v5511_v51 = vadd.f32 %v5510_v22, %v5445_v35 }
0x1308   : > { %v5512_v40 = vpop.f32.mrf.mxu0 }
0x130e   : > { %v5447_v52 = vpop.f32.mrf.mxu3 }
0x130f   : > { %v5513_v49 = vadd.f32 %v5512_v40, %v5447_v52  ;;  %v9658_v40 = vld [vmem:[%s14635_s8 + $0x38] sm:$0xff] }
0x1310   : > { %v14844_v52 = vld [vmem:[#allocation40_spill] sm:$0xff]  ;;  %6308 = vmatpush.bf16.msra.mxu0 %v9658_v40 }
0x1311   : > { %v5936_v2 = vpack.c.bf16 %v5513_v49, %v5511_v51  ;;  %v4576_v51 = vadd.f32 %v14845_v57, %v14844_v52 }
0x1313   : > { %9383 = vmatmul.msk.bf16.gmra.mxu3 %vm2354_vm1, %v5699_v19  ;;  %9393 = vmatmul.msk.bf16.gmra.mxu0 %vm2300_vm12, %v5936_v2 }
0x1314   : > { %9433 = vmatmul.msk.bf16.gmra.mxu1 %vm913_vm3, %v14833_v24 }
0x1320   : > { %v5848_v28 = vpop.f32.mrf.mxu1 }
0x1323   : > { %9450 = vmatmul.msk.bf16.vlgmr.msra.gmra.mxu3 %vm913_vm3, %v10576_v61 }
0x1324   : > { %9434 = vmatmul.msk.bf16.gmra.mxu1 %vm913_vm3, %v14834_v3 }
0x1328   : > { %v5850_v38 = vpop.f32.mrf.mxu1 }
0x1330   : > { %v5853_v46 = vpop.f32.mrf.mxu1 }
0x1333   : > { %9451 = vmatmul.msk.bf16.gmra.mxu3 %vm913_vm3, %v10628_v12 }
0x1334   : > { %9435 = vmatmul.msk.bf16.gmra.mxu1 %vm913_vm3, %v14835_v48 }
0x1338   : > { %v5855_v5 = vpop.f32.mrf.mxu1 }
0x1340   : > { %v5858_v18 = vpop.f32.mrf.mxu1 }
0x1343   : > { %9452 = vmatmul.msk.bf16.gmra.mxu3 %vm913_vm3, %v14832_v44  ;;  %v14843_v44 = vld [vmem:[#allocation17_spill] sm:$0xff] }
0x1344   : > { %9436 = vmatmul.msk.bf16.gmra.mxu1 %vm913_vm3, %v14836_v42 }
0x1348   : > { %v5860_v61 = vpop.f32.mrf.mxu1 }
0x1350   : > { %v13183_v53 = vpop.f32.mrf.mxu1 }
0x1353   : > { %9453 = vmatmul.msk.bf16.gmra.mxu3 %vm913_vm3, %v14833_v24 }
0x1354   : > { %9437 = vmatmul.msk.bf16.gmra.mxu1 %vm913_vm3, %v14837_v15 }
0x1356   : > { %v5913_v12 = vpop.f32.mrf.mxu3 }
0x1357   : > { %v5914_v21 = vadd.f32 %v5913_v12, %v5848_v28 }
0x1358   : > { %v13189_v8 = vpop.f32.mrf.mxu1 }
0x135e   : > { %v5915_v62 = vpop.f32.mrf.mxu3 }
0x135f   : > { %v5916_v33 = vadd.f32 %v5915_v62, %v5850_v38  ;;  %v14846_v38 = vld [vmem:[#allocation18_spill] sm:$0xff] }
0x1360   : > { %v5983_v60 = vpop.f32.mrf.mxu0  ;;  %v6147_v39 = vpop.f32.mrf.mxu1 }
0x1361   : > { %v5937_v54 = vpack.c.bf16 %v5916_v33, %v5914_v21  ;;  %v13193_v63 = vadd.f32 %v5983_v60, %v4566_v0  ;;  %v6187_v9 = vpack.c.bf16 %v6147_v39, %v6147_v39  ;;  %v9657_v60 = vld [vmem:[%s14635_s8 + $0x30] sm:$0xff] }
0x1362   : > { %6309 = vmatpush.bf16.msra.mxu0 %v9657_v60 }
0x1363   : > { %9394 = vmatmul.msk.bf16.gmra.mxu0 %vm2300_vm12, %v5937_v54  ;;  %9454 = vmatmul.msk.bf16.gmra.mxu3 %vm913_vm3, %v14834_v3  ;;  %v13202_v32 = vunpack.c.l.b16 %v6187_v9  ;;  %v14849_v9 = vld [vmem:[#allocation19_spill] sm:$0xff] }
0x1364   : > { %9510 = vmatmul.msk.bf16.vlgmr.msra.gmra.mxu1 %vm913_vm3, %v14840_v34 }
0x1368   : > { %v13200_v58 = vpop.f32.mrf.mxu0  ;;  %v6149_v25 = vpop.f32.mrf.mxu1 }
0x1369   : > { %v6188_v16 = vpack.c.bf16 %v6149_v25, %v6149_v25 }
0x136b   : > { %v13204_v13 = vunpack.c.l.b16 %v6188_v16 }
0x136d   : > { %v6567_v20 = vpack.c.b16 %v13204_v13, %v13202_v32 }
0x1370   : > { %v5988_v45 = vpop.f32.mrf.mxu0 }
0x1371   : > { %v13210_v6 = vadd.f32 %v5988_v45, %v4571_v37  ;;  %v13212_v22 = vpop.f32.mrf.mxu1 }
0x1373   : > { %9455 = vmatmul.msk.bf16.gmra.mxu3 %vm913_vm3, %v14835_v48 }
0x1374   : > { %9511 = vmatmul.msk.bf16.gmra.mxu1 %vm913_vm3, %v14843_v44 }
0x1376   : > { %v5918_v35 = vpop.f32.mrf.mxu3 }
0x1377   : > { %v5919_v49 = vadd.f32 %v5918_v35, %v5853_v46 }
0x1378   : > { %v13218_v4 = vpop.f32.mrf.mxu0 }
0x1379   : > { %v6154_v1 = vpop.f32.mrf.mxu1 }
0x137e   : > { %v5920_v31 = vpop.f32.mrf.mxu3 }
0x137f   : > { %v5921_v2 = vadd.f32 %v5920_v31, %v5855_v5  ;;  %v14847_v5 = vld [vmem:[#allocation42_spill] sm:$0xff] }
0x1380   : > { %v5993_v19 = vpop.f32.mrf.mxu0  ;;  %v4581_v41 = vadd.f32 %v14848_v56, %v14847_v5 }
0x1381   : > { %v5938_v24 = vpack.c.bf16 %v5921_v2, %v5919_v49  ;;  %v13225_v28 = vadd.f32 %v5993_v19, %v4576_v51  ;;  %v6157_v3 = vpop.f32.mrf.mxu1  ;;  %v6190_v19 = vpack.c.bf16 %v6154_v1, %v6154_v1  ;;  %v6440_v1 = vpack.c.bf16 %v13085_v47, %v13085_v47 }
0x1382   : > { %v6191_v45 = vpack.c.bf16 %v6157_v3, %v6157_v3  ;;  %v6437_v47 = vpack.c.bf16 %v13038_v36, %v13038_v36 }
0x1383   : > { %9395 = vmatmul.msk.bf16.gmra.mxu0 %vm2300_vm12, %v5938_v24  ;;  %9456 = vmatmul.msk.bf16.gmra.mxu3 %vm913_vm3, %v14836_v42 }
0x1384   : > { %9512 = vmatmul.msk.bf16.gmra.mxu1 %vm913_vm3, %v14846_v38  ;;  %v6563_v2 = vunpack.c.l.b16 %v6191_v45  ;;  %v6768_v36 = vunpack.c.l.b16 %v6437_v47  ;;  %v14857_v47 = vld [vmem:[#allocation27_spill] sm:$0xff] }
0x1386   : > { %v5923_v48 = vpop.f32.mrf.mxu3 }
0x1387   : > { %v5924_v0 = vadd.f32 %v5923_v48, %v5858_v18 }
0x1388   : > { %v13232_v12 = vpop.f32.mrf.mxu0 }
0x1389   : > { %v6159_v62 = vpop.f32.mrf.mxu1 }
0x138a   : > { %v6192_v7 = vpack.c.bf16 %v6159_v62, %v6159_v62 }
0x138c   : > { %v6564_v57 = vunpack.c.l.b16 %v6192_v7  ;;  %v6433_v7 = vpack.c.bf16 %v12988_v30, %v12988_v30 }
0x138e   : > { %v5925_v46 = vpop.f32.mrf.mxu3  ;;  %v6569_v24 = vpack.c.b16 %v6564_v57, %v6563_v2  ;;  %v14853_v57 = vld [vmem:[#allocation55_spill] sm:$0xff] }
0x138f   : > { %v5926_v21 = vadd.f32 %v5925_v46, %v5860_v61 }
0x1390   : > { %v5998_v33 = vpop.f32.mrf.mxu0  ;;  %v6590_v48 = vsel %vm2300_vm12, %v6569_v24, 0 }
0x1391   : > { %v5939_v39 = vpack.c.bf16 %v5926_v21, %v5924_v0  ;;  %v13239_v42 = vadd.f32 %v5998_v33, %v4581_v41  ;;  %v6162_v54 = vpop.f32.mrf.mxu1  ;;  %v6438_v21 = vpack.c.bf16 %v13055_v59, %v13055_v59  ;;  %v6771_v33 = vunpack.c.l.b16 %v6440_v1 }
0x1392   : > { %v6193_v61 = vpack.c.bf16 %v6162_v54, %v6162_v54  ;;  %v6436_v54 = vpack.c.bf16 %v13027_v29, %v13027_v29  ;;  %v6584_v59 = vsel %vm2300_vm12, %v6567_v20, 0  ;;  %v14850_v20 = vld [vmem:[#allocation53_spill] sm:$0xff] }
0x1393   : > { %9396 = vmatmul.msk.bf16.gmra.mxu0 %vm2300_vm12, %v5939_v39  ;;  %9457 = vmatmul.msk.bf16.gmra.mxu3 %vm913_vm3, %v14837_v15 }
0x1394   : > { %9513 = vmatmul.msk.bf16.gmra.mxu1 %vm913_vm3, %v14849_v9  ;;  %v6565_v10 = vunpack.c.l.b16 %v6193_v61  ;;  %v6435_v61 = vpack.c.bf16 %v13021_v27, %v13021_v27 }
0x1396   : > { %v5928_v18 = vpop.f32.mrf.mxu3 }
0x1397   : > { %v5929_v40 = vadd.f32 %v5928_v18, %v13183_v53  ;;  %v6189_v53 = vpack.c.bf16 %v13212_v22, %v13212_v22  ;;  %v6439_v22 = vpack.c.bf16 %v13075_v26, %v13075_v26  ;;  %v6769_v26 = vunpack.c.l.b16 %v6438_v21 }
0x1399   : > { %v6164_v25 = vpop.f32.mrf.mxu1  ;;  %v6561_v46 = vunpack.c.l.b16 %v6189_v53  ;;  %v6770_v60 = vunpack.c.l.b16 %v6439_v22  ;;  %v6774_v29 = vpack.c.b16 %v6769_v26, %v6768_v36 }
0x139a   : > { %v6194_v16 = vpack.c.bf16 %v6164_v25, %v6164_v25  ;;  %v6434_v25 = vpack.c.bf16 %v13007_v23, %v13007_v23 }
0x139b   : > { %v6775_v18 = vpack.c.b16 %v6771_v33, %v6770_v60  ;;  %v14856_v33 = vld [vmem:[#allocation44_spill] sm:$0xff] }
0x139c   : > { %v6566_v37 = vunpack.c.l.b16 %v6194_v16  ;;  %v6767_v16 = vunpack.c.l.b16 %v6436_v54  ;;  %v6765_v13 = vunpack.c.l.b16 %v6434_v25  ;;  %v4586_v60 = vadd.f32 %v14857_v47, %v14856_v33 }
0x139e   : > { %v6570_v35 = vpack.c.b16 %v6566_v37, %v6565_v10  ;;  %v5930_v31 = vpop.f32.mrf.mxu3  ;;  %v6766_v10 = vunpack.c.l.b16 %v6435_v61  ;;  %v14851_v37 = vld [vmem:[#allocation52_spill] sm:$0xff] }
0x139f   : > { %v5931_v52 = vadd.f32 %v5930_v31, %v13189_v8  ;;  %v6562_v8 = vunpack.c.l.b16 %v6190_v19  ;;  %v14852_v45 = vpack.c.b16 %v14850_v20, %v14851_v37  ;;  %v6764_v31 = vunpack.c.l.b16 %v6433_v7  ;;  %v13310_v19 = vpop.f32.mrf.mxu0 }
0x13a0   : > { %v6593_v15 = vsel %vm2300_vm12, %v6570_v35, 0  ;;  %v6773_v27 = vpack.c.b16 %v6767_v16, %v6766_v10 }
0x13a1   : > { %v5940_v51 = vpack.c.bf16 %v5931_v52, %v5929_v40  ;;  %v13249_v49 = vpop.f32.mrf.mxu1  ;;  %6599 = vmatpush.bf16.xpose.msrb.mxu3 %v6593_v15  ;;  %v6568_v5 = vpack.c.b16 %v6562_v8, %v6561_v46  ;;  %v6772_v30 = vpack.c.b16 %v6765_v13, %v6764_v31  ;;  %v14854_v15 = vld [vmem:[#allocation54_spill] sm:$0xff] }
0x13a3   : > { %9397 = vmatmul.msk.bf16.gmra.mxu0 %vm2300_vm12, %v5940_v51  ;;  %v6587_v41 = vsel %vm2300_vm12, %v6568_v5, 0  ;;  %v14855_v51 = vpack.c.b16 %v14853_v57, %v14854_v15 }
0x13a4   : > { %9514 = vmatmul.msk.bf16.gmra.mxu1 %vm913_vm3, %v14793_v17 }
0x13a6   : > { %v13256_v3 = vpop.f32.mrf.mxu3 }
0x13a9   : > { %v13259_v62 = vpop.f32.mrf.mxu1  ;;  %6600 = vmatpush.bf16.xpose.msrb.mxu3 %v6590_v48 }
0x13ae   : > { %v13261_v56 = vpop.f32.mrf.mxu3 }
0x13b1   : > { %v13266_v0 = vpop.f32.mrf.mxu1  ;;  %6601 = vmatpush.bf16.xpose.msrb.mxu3 %v6587_v41 }
0x13b3   : > { %9470 = vmatmul.msk.bf16.vlgmr.msra.gmra.mxu0 %vm913_vm3, %v14840_v34 }
0x13b4   : > { %9515 = vmatmul.msk.bf16.gmra.mxu1 %vm913_vm3, %v14794_v55 }
0x13b6   : > { %v13278_v39 = vpop.f32.mrf.mxu3 }
0x13b9   : > { %v13286_v34 = vpop.f32.mrf.mxu1  ;;  %6602 = vmatpush.bf16.xpose.msrb.mxu3 %v6584_v59  ;;  %v14859_v59 = vld [vmem:[#allocation56_spill] sm:$0xff] }
0x13be   : > { %v6236_v32 = vpop.f32.mrf.mxu3 }
0x13bf   : > { %v6272_v37 = vpack.c.bf16 %v6236_v32, %v6236_v32  ;;  %v6270_v32 = vpack.c.bf16 %v13261_v56, %v13261_v56 }
0x13c0   : > { %9518 = vmatmul.msk.bf16.vlgmr.msrb.gmra.mxu3 %vm2300_vm12, %v14852_v45 }
0x13c1   : > { %6787 = vmatpush.bf16.msra.mxu3 %v6775_v18  ;;  %v6177_v35 = vpop.f32.mrf.mxu1  ;;  %v14858_v18 = vld [vmem:[#allocation57_spill] sm:$0xff]  ;;  %v6895_v57 = vunpack.c.l.b16 %v6272_v37 }
0x13c2   : > { %v6199_v41 = vpack.c.bf16 %v6177_v35, %v6177_v35  ;;  %v14860_v61 = vpack.c.b16 %v14858_v18, %v14859_v59  ;;  %v6198_v35 = vpack.c.bf16 %v13286_v34, %v13286_v34  ;;  %v6269_v34 = vpack.c.bf16 %v13256_v3, %v13256_v3 }
0x13c3   : > { %9471 = vmatmul.msk.bf16.gmra.mxu0 %vm913_vm3, %v14843_v44 }
0x13c4   : > { %9516 = vmatmul.msk.bf16.gmra.mxu1 %vm913_vm3, %v14795_v11  ;;  %v6981_v20 = vunpack.c.l.b16 %v6199_v41 }
0x13c5   : > { %6788 = vmatpush.bf16.msra.mxu3 %v6774_v29 }
0x13c6   : > { %v6239_v23 = vpop.f32.mrf.mxu3 }
0x13c7   : > { %v6273_v16 = vpack.c.bf16 %v6239_v23, %v6239_v23 }
0x13c9   : > { %6789 = vmatpush.bf16.msra.mxu3 %v6773_v27  ;;  %v6179_v40 = vpop.f32.mrf.mxu1  ;;  %v6896_v23 = vunpack.c.l.b16 %v6273_v16 }
0x13ca   : > { %v6200_v48 = vpack.c.bf16 %v6179_v40, %v6179_v40  ;;  %v6197_v40 = vpack.c.bf16 %v13266_v0, %v13266_v0  ;;  %v6893_v0 = vunpack.c.l.b16 %v6270_v32  ;;  %v14865_v32 = vld [vmem:[#allocation48_spill] sm:$0xff] }
0x13cc   : > { %v6982_v26 = vunpack.c.l.b16 %v6200_v48  ;;  %v6195_v48 = vpack.c.bf16 %v13249_v49, %v13249_v49 }
0x13cd   : > { %6790 = vmatpush.bf16.msra.mxu3 %v6772_v30  ;;  %v6271_v30 = vpack.c.bf16 %v13278_v39, %v13278_v39 }
0x13ce   : > { %v6241_v52 = vpop.f32.mrf.mxu3  ;;  %v6987_v31 = vpack.c.b16 %v6982_v26, %v6981_v20 }
0x13d0   : > { %9519 = vmatmul.msk.bf16.gmra.mxu3 %vm2300_vm12, %v14855_v51  ;;  %v7008_v51 = vsel %vm2300_vm12, %v6987_v31, 0 }
0x13d1   : > { %v6182_v2 = vpop.f32.mrf.mxu1 }
0x13d2   : > { %v6201_v24 = vpack.c.bf16 %v6182_v2, %v6182_v2  ;;  %v6894_v2 = vunpack.c.l.b16 %v6271_v30 }
0x13d3   : > { %9472 = vmatmul.msk.bf16.gmra.mxu0 %vm913_vm3, %v14846_v38  ;;  %v6274_v38 = vpack.c.bf16 %v6241_v52, %v6241_v52 }
0x13d4   : > { %9517 = vmatmul.msk.bf16.gmra.mxu1 %vm913_vm3, %v14796_v14  ;;  %v6983_v46 = vunpack.c.l.b16 %v6201_v24  ;;  %v6901_v24 = vpack.c.b16 %v6895_v57, %v6894_v2  ;;  %v14866_v57 = vld [vmem:[#allocation31_spill] sm:$0xff] }
0x13d5   : > { %v6897_v45 = vunpack.c.l.b16 %v6274_v38 }
0x13d6   : > { %v6244_v44 = vpop.f32.mrf.mxu3 }
0x13d7   : > { %v6275_v1 = vpack.c.bf16 %v6244_v44, %v6244_v44  ;;  %v6902_v15 = vpack.c.b16 %v6897_v45, %v6896_v23  ;;  %v6979_v44 = vunpack.c.l.b16 %v6197_v40 }
0x13d9   : > { %v6184_v53 = vpop.f32.mrf.mxu1  ;;  %v6898_v29 = vunpack.c.l.b16 %v6275_v1  ;;  %v14861_v1 = vld [vmem:[#allocation58_spill] sm:$0xff] }
0x13da   : > { %v6202_v8 = vpack.c.bf16 %v6184_v53, %v6184_v53  ;;  %v6196_v53 = vpack.c.bf16 %v13259_v62, %v13259_v62  ;;  %v14862_v41 = vpack.c.b16 %v12882_v43, %v14861_v1  ;;  %v6977_v62 = vunpack.c.l.b16 %v6195_v48  ;;  %v14869_v1 = vld [vmem:[#allocation33_spill] sm:$0xff] }
0x13dc   : > { %v6984_v5 = vunpack.c.l.b16 %v6202_v8  ;;  %v6892_v8 = vunpack.c.l.b16 %v6269_v34 }
0x13de   : > { %v6988_v22 = vpack.c.b16 %v6984_v5, %v6983_v46  ;;  %v6246_v21 = vpop.f32.mrf.mxu3  ;;  %v6900_v3 = vpack.c.b16 %v6893_v0, %v6892_v8  ;;  %v6978_v5 = vunpack.c.l.b16 %v6196_v53 }
0x13df   : > { %v6276_v54 = vpack.c.bf16 %v6246_v21, %v6246_v21 }
0x13e0   : > { %9520 = vmatmul.msk.bf16.gmra.mxu3 %vm2300_vm12, %v14860_v61  ;;  %v6003_v36 = vpop.f32.mrf.mxu0  ;;  %v7011_v25 = vsel %vm2300_vm12, %v6988_v22, 0  ;;  %v6985_v33 = vpack.c.b16 %v6978_v5, %v6977_v62  ;;  %v14868_v5 = vld [vmem:[#allocation50_spill] sm:$0xff] }
0x13e1   : > { %v6899_v7 = vunpack.c.l.b16 %v6276_v54  ;;  %v13319_v10 = vadd.f32 %v6003_v36, %v4586_v60  ;;  %v13321_v13 = vpop.f32.mrf.mxu1  ;;  %7017 = vmatpush.bf16.xpose.msrb.mxu3 %v7011_v25  ;;  %v14863_v36 = vld [vmem:[#allocation46_spill] sm:$0xff] }
0x13e2   : > { %v7002_v38 = vsel %vm2300_vm12, %v6985_v33, 0 }
0x13e3   : > { %v6903_v27 = vpack.c.b16 %v6899_v7, %v6898_v29  ;;  %9473 = vmatmul.msk.bf16.gmra.mxu0 %vm913_vm3, %v14849_v9  ;;  %v6980_v9 = vunpack.c.l.b16 %v6198_v35 }
0x13e5   : > { %6924 = vmatpush.bf16.msrb.mxu2 %v6903_v27  ;;  %v6986_v56 = vpack.c.b16 %v6980_v9, %v6979_v44 }
0x13e6   : > { %v13331_v52 = vpop.f32.mrf.mxu3 }
0x13e7   : > { %v7005_v22 = vsel %vm2300_vm12, %v6986_v56, 0 }
0x13e8   : > { %v13353_v47 = vpop.f32.mrf.mxu0 }
0x13e9   : > { %v13338_v39 = vpop.f32.mrf.mxu1  ;;  %7018 = vmatpush.bf16.xpose.msrb.mxu3 %v7008_v51  ;;  %6925 = vmatpush.bf16.msrb.mxu2 %v6902_v15  ;;  %v4596_v15 = vadd.f32 %v14866_v57, %v14865_v32 }
0x13ed   : > { %6926 = vmatpush.bf16.msrb.mxu2 %v6901_v24 }
0x13ee   : > { %v13344_v46 = vpop.f32.mrf.mxu3 }
0x13f0   : > { %9521 = vmatmul.msk.bf16.gmra.mxu3 %vm2300_vm12, %v14862_v41  ;;  %v4601_v41 = vadd.f32 %v14869_v1, %v14868_v5 }
0x13f1   : > { %v6480_v21 = vpop.f32.mrf.mxu1  ;;  %7019 = vmatpush.bf16.xpose.msrb.mxu3 %v7005_v22  ;;  %6927 = vmatpush.bf16.msrb.mxu2 %v6900_v3 }
0x13f2   : > { %v6517_v60 = vpack.c.bf16 %v6480_v21, %v6480_v21 }
0x13f3   : > { %9474 = vmatmul.msk.bf16.gmra.mxu0 %vm913_vm3, %v14793_v17  ;;  %v14864_v17 = vld [vmem:[#allocation29_spill] sm:$0xff] }
0x13f4   : > { %v13356_v26 = vunpack.c.l.b16 %v6517_v60  ;;  %v4591_v25 = vadd.f32 %v14864_v17, %v14863_v36 }
0x13f6   : > { %v6254_v49 = vpop.f32.mrf.mxu3 }
0x13f9   : > { %v6482_v54 = vpop.f32.mrf.mxu1  ;;  %7020 = vmatpush.bf16.xpose.msrb.mxu3 %v7002_v38 }
0x13fa   : > { %v6518_v43 = vpack.c.bf16 %v6482_v54, %v6482_v54 }
0x13fc   : > { %v13358_v18 = vunpack.c.l.b16 %v6518_v43 }
0x13fe   : > { %v6256_v61 = vpop.f32.mrf.mxu3 }
0x13ff   : > { %v6280_v43 = vpack.c.bf16 %v6256_v61, %v6256_v61 }
0x1400   : > { %v6008_v16 = vpop.f32.mrf.mxu0 }
0x1401   : > { %v13364_v29 = vadd.f32 %v6008_v16, %v4591_v25  ;;  %v6485_v7 = vpop.f32.mrf.mxu1  ;;  %v6279_v25 = vpack.c.bf16 %v6254_v49, %v6254_v49 }
0x1402   : > { %v6519_v37 = vpack.c.bf16 %v6485_v7, %v6485_v7  ;;  %v6278_v7 = vpack.c.bf16 %v13344_v46, %v13344_v46 }
0x1403   : > { %9475 = vmatmul.msk.bf16.gmra.mxu0 %vm913_vm3, %v14794_v55  ;;  %v7312_v61 = vunpack.c.l.b16 %v6279_v25 }
0x1404   : > { %v13370_v31 = vunpack.c.l.b16 %v6519_v37  ;;  %v7313_v37 = vunpack.c.l.b16 %v6280_v43 }
0x1406   : > { %v6259_v20 = vpop.f32.mrf.mxu3 }
0x1407   : > { %v6281_v62 = vpack.c.bf16 %v6259_v20, %v6259_v20 }
0x1408   : > { %v13368_v45 = vpop.f32.mrf.mxu0 }
0x1409   : > { %v6487_v27 = vpop.f32.mrf.mxu1  ;;  %v7314_v16 = vunpack.c.l.b16 %v6281_v62 }
0x140a   : > { %v6520_v35 = vpack.c.bf16 %v6487_v27, %v6487_v27 }
0x140c   : > { %v13372_v30 = vunpack.c.l.b16 %v6520_v35 }
0x140e   : > { %v6261_v40 = vpop.f32.mrf.mxu3 }
0x140f   : > { %v6282_v22 = vpack.c.bf16 %v6261_v40, %v6261_v40  ;;  %v6277_v40 = vpack.c.bf16 %v13331_v52, %v13331_v52 }
0x1410   : > { %v6013_v9 = vpop.f32.mrf.mxu0 }
0x1411   : > { %v13378_v51 = vadd.f32 %v6013_v9, %v4596_v15  ;;  %v6490_v55 = vpop.f32.mrf.mxu1  ;;  %v7315_v36 = vunpack.c.l.b16 %v6282_v22  ;;  %v7311_v15 = vunpack.c.l.b16 %v6278_v7 }
0x1412   : > { %v6521_v2 = vpack.c.bf16 %v6490_v55, %v6490_v55  ;;  %v7310_v55 = vunpack.c.l.b16 %v6277_v40 }
0x1413   : > { %9476 = vmatmul.msk.bf16.gmra.mxu0 %vm913_vm3, %v14795_v11  ;;  %v7320_v27 = vpack.c.b16 %v7315_v36, %v7314_v16 }
0x1414   : > { %v13384_v53 = vunpack.c.l.b16 %v6521_v2 }
0x1416   : > { %v6264_v34 = vpop.f32.mrf.mxu3 }
0x1417   : > { %v6283_v8 = vpack.c.bf16 %v6264_v34, %v6264_v34  ;;  %v7318_v34 = vpack.c.b16 %v7311_v15, %v7310_v55 }
0x1418   : > { %v13382_v44 = vpop.f32.mrf.mxu0 }
0x1419   : > { %14867 = vst [vmem:[#allocation10_spill] sm:$0xff] %v13382_v44  ;;  %v6492_v0 = vpop.f32.mrf.mxu1  ;;  %v7316_v33 = vunpack.c.l.b16 %v6283_v8 }
0x141a   : > { %v6522_v24 = vpack.c.bf16 %v6492_v0, %v6492_v0 }
0x141c   : > { %v13386_v56 = vunpack.c.l.b16 %v6522_v24 }
0x141e   : > { %v6266_v3 = vpop.f32.mrf.mxu3 }
0x141f   : > { %v6284_v11 = vpack.c.bf16 %v6266_v3, %v6266_v3 }
0x1420   : > { %v6018_v21 = vpop.f32.mrf.mxu0 }
0x1421   : > { %v7317_v60 = vunpack.c.l.b16 %v6284_v11  ;;  %v13392_v38 = vadd.f32 %v6018_v21, %v4601_v41  ;;  %v6495_v54 = vpop.f32.mrf.mxu1 }
0x1422   : > { %v6523_v20 = vpack.c.bf16 %v6495_v54, %v6495_v54 }
0x1423   : > { %14870 = vst [vmem:[#allocation11_spill] sm:$0xff] %v13392_v38  ;;  %v7321_v17 = vpack.c.b16 %v7317_v60, %v7316_v33  ;;  %9477 = vmatmul.msk.bf16.gmra.mxu0 %vm913_vm3, %v14796_v14  ;;  %v7319_v14 = vpack.c.b16 %v7313_v37, %v7312_v61  ;;  %v6515_v38 = vpack.c.bf16 %v13321_v13, %v13321_v13 }
0x1424   : > { %v13402_v49 = vunpack.c.l.b16 %v6523_v20 }
0x1425   : > { %7342 = vmatpush.bf16.msra.mxu1 %v7321_v17 }
0x1428   : > { %v13398_v35 = vpop.f32.mrf.mxu0 }
0x1429   : > { %14871 = vst [vmem:[#allocation12_spill] sm:$0xff] %v13398_v35  ;;  %v6497_v32 = vpop.f32.mrf.mxu1  ;;  %7343 = vmatpush.bf16.msra.mxu1 %v7320_v27 }
0x142a   : > { %v6524_v57 = vpack.c.bf16 %v6497_v32, %v6497_v32 }
0x142c   : > { %v13404_v9 = vunpack.c.l.b16 %v6524_v57 }
0x142d   : > { %7344 = vmatpush.bf16.msra.mxu1 %v7319_v14 }
0x1430   : > { %v6311_v2 = vpop.f32.mrf.mxu0 }
0x1431   : > { %v6500_v0 = vpop.f32.mrf.mxu1  ;;  %7345 = vmatpush.bf16.msra.mxu1 %v7318_v34  ;;  %v6351_v52 = vpack.c.bf16 %v6311_v2, %v6311_v2 }
0x1432   : > { %v6525_v24 = vpack.c.bf16 %v6500_v0, %v6500_v0 }
0x1433   : > { %v6724_v41 = vunpack.c.l.b16 %v6351_v52 }
0x1434   : > { %v13408_v11 = vunpack.c.l.b16 %v6525_v24 }
0x1438   : > { %v6313_v8 = vpop.f32.mrf.mxu0 }
0x1439   : > { %v6352_v3 = vpack.c.bf16 %v6313_v8, %v6313_v8  ;;  %v6502_v5 = vpop.f32.mrf.mxu1 }
0x143a   : > { %v6526_v1 = vpack.c.bf16 %v6502_v5, %v6502_v5 }
0x143b   : > { %v6725_v22 = vunpack.c.l.b16 %v6352_v3 }
0x143c   : > { %v13410_v21 = vunpack.c.l.b16 %v6526_v1 }
0x143d   : > { %v6732_v62 = vpack.c.b16 %v6725_v22, %v6724_v41 }
0x143f   : > { %6740 = vxpose.xlu2.c.b16.start [1/4] (short) (narrow) %v6732_v62, 16 }
0x1440   : > { %v6316_v60 = vpop.f32.mrf.mxu0 }
0x1441   : > { %v6505_v54 = vpop.f32.mrf.mxu1  ;;  %v6353_v17 = vpack.c.bf16 %v6316_v60, %v6316_v60 }
0x1442   : > { %v6527_v25 = vpack.c.bf16 %v6505_v54, %v6505_v54 }
0x1443   : > { %v13414_v43 = vpop.f32.mrf.mxu3  ;;  %v6726_v20 = vunpack.c.l.b16 %v6353_v17 }
0x1444   : > { %v6624_v36 = vsel %vm2354_vm1, %v13414_v43, -inf  ;;  %v13420_v32 = vunpack.c.l.b16 %v6527_v25 }
0x1445   : > { %6625 = vmax.xlane.f32.xlu1 %v6624_v36 }
0x1448   : > { %v6318_v16 = vpop.f32.mrf.mxu0 }
0x1449   : > { %v6354_v7 = vpack.c.bf16 %v6318_v16, %v6318_v16  ;;  %v6507_v37 = vpop.f32.mrf.mxu1 }
0x144a   : > { %v6528_v27 = vpack.c.bf16 %v6507_v37, %v6507_v37 }
0x144b   : > { %v6727_v40 = vunpack.c.l.b16 %v6354_v7  ;;  %v13418_v61 = vpop.f32.mrf.mxu3 }
0x144c   : > { %v13422_v57 = vunpack.c.l.b16 %v6528_v27  ;;  %v6627_v15 = vsel %vm2354_vm1, %v13418_v61, -inf }
0x144d   : > { %v6733_v14 = vpack.c.b16 %v6727_v40, %v6726_v20  ;;  %6628 = vmax.xlane.f32.xlu1 %v6627_v15 }
0x144f   : > { %6741 = vxpose.xlu2.c.b16.cont [2/4] (short) (narrow) %v6733_v14, 16 }
0x1450   : > { %v6321_v34 = vpop.f32.mrf.mxu0 }
0x1451   : > { %v6355_v52 = vpack.c.bf16 %v6321_v34, %v6321_v34 }
0x1453   : > { %v13428_v2 = vpop.f32.mrf.mxu3  ;;  %v6728_v3 = vunpack.c.l.b16 %v6355_v52 }
0x1454   : > { %v6630_v0 = vsel %vm2354_vm1, %v13428_v2, -inf }
0x1455   : > { %6631 = vmax.xlane.f32.xlu1 %v6630_v0 }
0x1458   : > { %v6323_v24 = vpop.f32.mrf.mxu0 }
0x1459   : > { %v6356_v8 = vpack.c.bf16 %v6323_v24, %v6323_v24 }
0x145b   : > { %v6729_v5 = vunpack.c.l.b16 %v6356_v8  ;;  %v13432_v1 = vpop.f32.mrf.mxu3 }
0x145c   : > { %v6633_v41 = vsel %vm2354_vm1, %v13432_v1, -inf }
0x145d   : > { %v6734_v22 = vpack.c.b16 %v6729_v5, %v6728_v3  ;;  %6634 = vmax.xlane.f32.xlu1 %v6633_v41 }
0x145f   : > { %6742 = vxpose.xlu2.c.b16.cont [3/4] (short) (narrow) %v6734_v22, 16 }
0x1460   : > { %v6326_v62 = vpop.f32.mrf.mxu0 }
0x1461   : > { %v6357_v36 = vpack.c.bf16 %v6326_v62, %v6326_v62 }
0x1463   : > { %v13436_v60 = vpop.f32.mrf.mxu3  ;;  %v6730_v16 = vunpack.c.l.b16 %v6357_v36 }
0x1464   : > { %v6636_v54 = vsel %vm2354_vm1, %v13436_v60, -inf }
0x1465   : > { %6637 = vmax.xlane.f32.xlu1 %v6636_v54 }
0x1468   : > { %v6328_v17 = vpop.f32.mrf.mxu0 }
0x1469   : > { %v6358_v25 = vpack.c.bf16 %v6328_v17, %v6328_v17 }
0x146b   : > { %v6731_v7 = vunpack.c.l.b16 %v6358_v25  ;;  %v13440_v37 = vpop.f32.mrf.mxu3 }
0x146c   : > { %v6639_v27 = vsel %vm2354_vm1, %v13440_v37, -inf }
0x146d   : > { %v6735_v20 = vpack.c.b16 %v6731_v7, %v6730_v16  ;;  %6640 = vmax.xlane.f32.xlu1 %v6639_v27 }
0x146f   : > { %6743 = vxpose.xlu2.c.b16.end [4/4] (short) (narrow) %v6735_v20, 16 }
0x1470   : > { %v6331_v40 = vpop.f32.mrf.mxu0 }
0x1471   : > { %v6359_v34 = vpack.c.bf16 %v6331_v40, %v6331_v40 }
0x1473   : > { %v13444_v15 = vpop.f32.mrf.mxu3  ;;  %v7142_v24 = vunpack.c.l.b16 %v6359_v34 }
0x1474   : > { %v6642_v14 = vsel %vm2354_vm1, %v13444_v15, -inf }
0x1475   : > { %6643 = vmax.xlane.f32.xlu1 %v6642_v14 }
0x1478   : > { %v6333_v0 = vpop.f32.mrf.mxu0 }
0x1479   : > { %v6360_v52 = vpack.c.bf16 %v6333_v0, %v6333_v0 }
0x147b   : > { %v7143_v8 = vunpack.c.l.b16 %v6360_v52  ;;  %v13448_v3 = vpop.f32.mrf.mxu3 }
0x147c   : > { %v6645_v5 = vsel %vm2354_vm1, %v13448_v3, -inf }
0x147d   : > { %v7150_v41 = vpack.c.b16 %v7143_v8, %v7142_v24  ;;  %6646 = vmax.xlane.f32.xlu1 %v6645_v5 }
0x147f   : > { %7158 = vxpose.xlu0.c.b16.start [1/4] (short) (narrow) %v7150_v41, 16 }
0x1480   : > { %v6336_v22 = vpop.f32.mrf.mxu0 }
0x1481   : > { %v6361_v62 = vpack.c.bf16 %v6336_v22, %v6336_v22 }
0x1483   : > { %v7144_v17 = vunpack.c.l.b16 %v6361_v62 }
0x1488   : > { %v6338_v54 = vpop.f32.mrf.mxu0 }
0x1489   : > { %v6362_v36 = vpack.c.bf16 %v6338_v54, %v6338_v54  ;;  %v6114_v54 = vpack.c.bf16 %v12955_v50, %v12955_v50  ;;  %v14875_v50 = vld [vmem:[#allocation63_spill] sm:$0xff] }
0x148b   : > { %v7145_v25 = vunpack.c.l.b16 %v6362_v36  ;;  %v14872_v36 = vld [vmem:[#allocation59_spill] sm:$0xff] }
0x148d   : > { %v7151_v16 = vpack.c.b16 %v7145_v25, %v7144_v17  ;;  %v6113_v17 = vpack.c.bf16 %v14872_v36, %v14872_v36  ;;  %v6958_v25 = vunpack.c.l.b16 %v6114_v54 }
0x148f   : > { %7159 = vxpose.xlu0.c.b16.cont [2/4] (short) (narrow) %v7151_v16, 16  ;;  %v6957_v16 = vunpack.c.l.b16 %v6113_v17  ;;  %v14877_v17 = vld [vmem:[#allocation65_spill] sm:$0xff] }
0x1490   : > { %v6341_v7 = vpop.f32.mrf.mxu0 }
0x1491   : > { %v6363_v27 = vpack.c.bf16 %v6341_v7, %v6341_v7  ;;  %v6965_v7 = vpack.c.b16 %v6958_v25, %v6957_v16  ;;  %v6120_v25 = vpack.c.bf16 %v14877_v17, %v14877_v17  ;;  %v14878_v16 = vld [vmem:[#allocation64_spill] sm:$0xff] }
0x1493   : > { %v7146_v14 = vunpack.c.l.b16 %v6363_v27  ;;  %v14873_v27 = vld [vmem:[#allocation61_spill] sm:$0xff] }
0x1498   : > { %v6343_v20 = vpop.f32.mrf.mxu0 }
0x1499   : > { %v6364_v40 = vpack.c.bf16 %v6343_v20, %v6343_v20  ;;  %v6116_v20 = vpack.c.bf16 %v14873_v27, %v14873_v27  ;;  %v6964_v27 = vunpack.c.l.b16 %v6120_v25 }
0x149b   : > { %v7147_v34 = vunpack.c.l.b16 %v6364_v40  ;;  %v14874_v40 = vld [vmem:[#allocation60_spill] sm:$0xff] }
0x149d   : > { %v7152_v0 = vpack.c.b16 %v7147_v34, %v7146_v14  ;;  %v6960_v14 = vunpack.c.l.b16 %v6116_v20 }
0x149f   : > { %7160 = vxpose.xlu0.c.b16.cont [3/4] (short) (narrow) %v7152_v0, 16 }
0x14a0   : > { %v6346_v52 = vpop.f32.mrf.mxu0 }
0x14a1   : > { %v6365_v24 = vpack.c.bf16 %v6346_v52, %v6346_v52  ;;  %v6118_v52 = vpack.c.bf16 %v14875_v50, %v14875_v50 }
0x14a3   : > { %v7148_v41 = vunpack.c.l.b16 %v6365_v24  ;;  %v14876_v24 = vld [vmem:[#allocation62_spill] sm:$0xff] }
0x14a8   : > { %v6348_v8 = vpop.f32.mrf.mxu0 }
0x14a9   : > { %v6366_v5 = vpack.c.bf16 %v6348_v8, %v6348_v8  ;;  %v6117_v8 = vpack.c.bf16 %v14876_v24, %v14876_v24 }
0x14ab   : > { %v7149_v22 = vunpack.c.l.b16 %v6366_v5  ;;  %v6962_v5 = vunpack.c.l.b16 %v6118_v52 }
0x14ad   : > { %v7153_v55 = vpack.c.b16 %v7149_v22, %v7148_v41  ;;  %v6961_v22 = vunpack.c.l.b16 %v6117_v8 }
0x14af   : > { %7161 = vxpose.xlu0.c.b16.end [4/4] (short) (narrow) %v7153_v55, 16  ;;  %v6115_v55 = vpack.c.bf16 %v14874_v40, %v14874_v40  ;;  %v6967_v54 = vpack.c.b16 %v6962_v5, %v6961_v22 }
0x14b1   : > { %v6959_v34 = vunpack.c.l.b16 %v6115_v55 }
0x14b3   : > { %v6966_v0 = vpack.c.b16 %v6960_v14, %v6959_v34 }
0x14b8   : > { %v6626_v41 = vpop.xlane.xlu1 %6625 }
0x14c0   : > { %v6629_v24 = vpop.xlane.xlu1 %6628 }
0x14c8   : > { %v6632_v8 = vpop.xlane.xlu1 %6631 }
0x14d0   : > { %v6635_v5 = vpop.xlane.xlu1 %6634 }
0x14e0   : > { %v6748_v62 = vpop.trf.xlu2 }
0x14e1   : > { %9522 = vmatmul.msk.bf16.vlgmr.msra.gmra.mxu3 %vm2354_vm1, %v6748_v62  ;;  %v6648_v62 = vsub.f32 %v13414_v43, %v6626_v41  ;;  %v6638_v41 = vpop.xlane.xlu1 %6637 }
0x14e3   : > { %v6656_v36 = vmul.f32 1.442695, %v6648_v62 }
0x14e5   : > { %10021 = vpow2.f32 %v6656_v36 }
0x14e9   : > { %v6641_v22 = vpop.xlane.xlu1 %6640 }
0x14eb   : > { %v13473_v20 = vpop.eup %10021 }
0x14ec   : > { %v6672_v14 = vsel %vm2354_vm1, %v13473_v20, 0.0 }
0x14f1   : > { %9531 = vmatmul.msk.bf16.vlgmr.msrb.gmra.mxu3 %vm2300_vm12, %v6965_v7  ;;  %v6119_v7 = vpack.c.bf16 %v14878_v16, %v14878_v16 }
0x14f3   : > { %v6963_v40 = vunpack.c.l.b16 %v6119_v7 }
0x14f5   : > { %v6968_v55 = vpack.c.b16 %v6964_v27, %v6963_v40  ;;  %v6649_v27 = vsub.f32 %v13418_v61, %v6629_v24 }
0x1501   : > { %9532 = vmatmul.msk.bf16.gmra.mxu3 %vm2300_vm12, %v6966_v0 }
0x1511   : > { %9533 = vmatmul.msk.bf16.gmra.mxu3 %vm2300_vm12, %v6967_v54  ;;  %v13483_v54 = vpop.xlane.xlu1 %6643 }
0x1519   : > { %v13487_v17 = vpop.xlane.xlu1 %6646 }
0x1520   : > { %6673 = vadd.xlane.f32.xlu0 %v6672_v14  ;;  %v13494_v14 = vpop.f32.mrf.mxu1 }
0x1521   : > { %9534 = vmatmul.msk.bf16.gmra.mxu3 %vm2300_vm12, %v6968_v55 }
0x1528   : > { %v13502_v61 = vpop.f32.mrf.mxu1 }
0x152b   : > { %v7166_v43 = vpop.trf.xlu0 }
0x152c   : > { %9535 = vmatmul.msk.bf16.vlgmr.msrb.gmra.mxu1 %vm2354_vm1, %v7166_v43  ;;  %v6658_v43 = vmul.f32 1.442695, %v6649_v27 }
0x1564   : > { %v6792_v34 = vpop.f32.mrf.mxu3 }
0x1565   : > { %v6797_v0 = vsel %vm2300_vm12, %v6792_v34, -inf }
0x1566   : > { %6798 = vmax.xlane.f32.xlu1 %v6797_v0 }
0x156c   : > { %v6794_v50 = vpop.f32.mrf.mxu3 }
0x156d   : > { %v6800_v52 = vsel %vm2300_vm12, %v6794_v50, -inf }
0x156e   : > { %6801 = vmax.xlane.f32.xlu1 %v6800_v52 }
0x1574   : > { %v13481_v62 = vpop.f32.mrf.mxu3 }
0x157c   : > { %v13485_v36 = vpop.f32.mrf.mxu3 }
0x1584   : > { %v13489_v25 = vpop.f32.mrf.mxu3 }
0x158c   : > { %v13492_v40 = vpop.f32.mrf.mxu3 }
0x1594   : > { %v13500_v23 = vpop.f32.mrf.mxu3 }
0x15a9   : > { %v13514_v27 = vpop.f32.mrf.mxu1 }
0x15d9   : > { %v6799_v16 = vpop.xlane.xlu1 %6798 }
0x15da   : > { %v6803_v7 = vsub.f32 %v6792_v34, %v6799_v16 }
0x15dc   : > { %v6805_v55 = vmul.f32 1.442695, %v6803_v7  ;;  %v13512_v7 = vpop.f32.mrf.mxu3 }
0x15de   : > { %10023 = vpow2.f32 %v6805_v55  ;;  %v7057_v55 = vsel %vm2354_vm1, %v13512_v7, -inf }
0x15df   : > { %10025 = vpow2.f32 %v6658_v43 }
0x15e1   : > { %v6802_v0 = vpop.xlane.xlu1 %6801 }
0x15e2   : > { %v6804_v52 = vsub.f32 %v6794_v50, %v6802_v0 }
0x15e4   : > { %v13496_v33 = vpop.eup %10023  ;;  %v6807_v46 = vmul.f32 1.442695, %v6804_v52  ;;  %v13521_v0 = vpop.f32.mrf.mxu3 }
0x15e5   : > { %v6809_v48 = vsel %vm2300_vm12, %v13496_v33, 0.0  ;;  %v13504_v34 = vpop.eup %10025  ;;  %v13523_v52 = vpop.f32.mrf.mxu1 }
0x15e6   : > { %10027 = vpow2.f32 %v6807_v46  ;;  %6810 = vadd.xlane.f32.xlu1 %v6809_v48  ;;  %v6675_v50 = vsel %vm2354_vm1, %v13504_v34, 0.0  ;;  %v7215_v48 = vsel %vm2300_vm12, %v13514_v27, -inf  ;;  %v6650_v46 = vsub.f32 %v13428_v2, %v6632_v8 }
0x15e7   : > { %v7218_v59 = vsel %vm2300_vm12, %v13523_v52, -inf }
0x15e8   : > { %v6660_v43 = vmul.f32 1.442695, %v6650_v46 }
0x15ea   : > { %10029 = vpow2.f32 %v6660_v43  ;;  %v6653_v43 = vsub.f32 %v13440_v37, %v6641_v22  ;;  %v6654_v37 = vsub.f32 %v13444_v15, %v13483_v54  ;;  %v7048_v22 = vsel %vm2354_vm1, %v13489_v25, -inf }
0x15ec   : > { %v13506_v24 = vpop.eup %10027 }
0x15ed   : > { %v6812_v16 = vsel %vm2300_vm12, %v13506_v24, 0.0 }
0x15ee   : > { %6676 = vadd.xlane.f32.xlu1 %v6675_v50  ;;  %6813 = vadd.xlane.f32.xlu2 %v6812_v16  ;;  %v6651_v50 = vsub.f32 %v13432_v1, %v6635_v5  ;;  %v7060_v16 = vsel %vm2354_vm1, %v13521_v0, -inf  ;;  %v6652_v5 = vsub.f32 %v13436_v60, %v6638_v41 }
0x15f0   : > { %v6662_v2 = vmul.f32 1.442695, %v6651_v50  ;;  %v13530_v8 = vpop.eup %10029  ;;  %v7045_v50 = vsel %vm2354_vm1, %v13485_v36, -inf }
0x15f2   : > { %10031 = vpow2.f32 %v6662_v2 }
0x15f6   : > { %7058 = vmax.xlane.f32.xlu2 %v7057_v55  ;;  %7216 = vmax.xlane.f32.xlu1 %v7215_v48  ;;  %v6678_v48 = vsel %vm2354_vm1, %v13530_v8, 0.0  ;;  %v7042_v55 = vsel %vm2354_vm1, %v13481_v62, -inf }
0x15f8   : > { %v13534_v46 = vpop.eup %10031 }
0x15f9   : > { %v6681_v1 = vsel %vm2354_vm1, %v13534_v46, 0.0 }
0x15fe   : > { %7061 = vmax.xlane.f32.xlu2 %v7060_v16  ;;  %7219 = vmax.xlane.f32.xlu1 %v7218_v59  ;;  %v6664_v59 = vmul.f32 1.442695, %v6652_v5  ;;  %v6666_v16 = vmul.f32 1.442695, %v6653_v43  ;;  %v6655_v5 = vsub.f32 %v13448_v3, %v13487_v17  ;;  %v7054_v3 = vsel %vm2354_vm1, %v13500_v23, -inf }
0x1600   : > { %10033 = vpow2.f32 %v6664_v59  ;;  %v6670_v59 = vmul.f32 1.442695, %v6655_v5 }
0x1601   : > { %10035 = vpow2.f32 %v6666_v16  ;;  %v6674_v16 = vpop.xlane.xlu0 %6673 }
0x1606   : > { %6679 = vadd.xlane.f32.xlu1 %v6678_v48  ;;  %v13544_v2 = vpop.eup %10033 }
0x1607   : > { %v6684_v48 = vsel %vm2354_vm1, %v13544_v2, 0.0  ;;  %v13548_v60 = vpop.eup %10035 }
0x1608   : > { %v6687_v41 = vsel %vm2354_vm1, %v13548_v60, 0.0 }
0x160e   : > { %6682 = vadd.xlane.f32.xlu1 %v6681_v1  ;;  %v6668_v1 = vmul.f32 1.442695, %v6654_v37 }
0x1610   : > { %10037 = vpow2.f32 %v6668_v1 }
0x1611   : > { %10039 = vpow2.f32 %v6670_v59 }
0x1616   : > { %7043 = vmax.xlane.f32.xlu1 %v7042_v55  ;;  %v7051_v55 = vsel %vm2354_vm1, %v13492_v40, -inf  ;;  %v13560_v43 = vpop.eup %10037 }
0x1617   : > { %v6690_v15 = vsel %vm2354_vm1, %v13560_v43, 0.0  ;;  %v13564_v54 = vpop.eup %10039 }
0x161e   : > { %7046 = vmax.xlane.f32.xlu1 %v7045_v50  ;;  %v6693_v50 = vsel %vm2354_vm1, %v13564_v54, 0.0 }
0x1626   : > { %6685 = vadd.xlane.f32.xlu1 %v6684_v48 }
0x162e   : > { %6688 = vadd.xlane.f32.xlu1 %v6687_v41 }
0x1636   : > { %7049 = vmax.xlane.f32.xlu1 %v7048_v22 }
0x163e   : > { %7052 = vmax.xlane.f32.xlu1 %v7051_v55 }
0x1646   : > { %6691 = vadd.xlane.f32.xlu1 %v6690_v15 }
0x164e   : > { %6694 = vadd.xlane.f32.xlu1 %v6693_v50 }
0x1656   : > { %7055 = vmax.xlane.f32.xlu1 %v7054_v3 }
0x1659   : > { %v6811_v17 = vpop.xlane.xlu1 %6810 }
0x165a   : > { %10041 = vrcp.f32 %v6811_v17 }
0x165b   : > { %10043 = vrcp.f32 %v6674_v16  ;;  %v6516_v16 = vpack.c.bf16 %v13338_v39, %v13338_v39 }
0x1660   : > { %v10042_v37 = vpop.eup %10041 }
0x1661   : > { %v6814_v48 = vpop.xlane.xlu2 %6813  ;;  %v6677_v41 = vpop.xlane.xlu1 %6676  ;;  %v6817_v59 = vmul.f32 %v10042_v37, %v13496_v33  ;;  %v6829_v33 = vunpack.c.l.b16 %v6516_v16 }
0x1662   : > { %10045 = vrcp.f32 %v6814_v48  ;;  %v10044_v22 = vpop.eup %10043 }
0x1663   : > { %10047 = vrcp.f32 %v6677_v41  ;;  %v6704_v50 = vmul.f32 %v10044_v22, %v13473_v20  ;;  %v6828_v20 = vunpack.c.l.b16 %v6515_v38 }
0x1668   : > { %v10046_v1 = vpop.eup %10045 }
0x1669   : > { %v10048_v5 = vpop.eup %10047  ;;  %v7217_v55 = vpop.xlane.xlu1 %7216  ;;  %v6818_v15 = vmul.f32 %v10046_v1, %v13506_v24 }
0x166a   : > { %v6705_v3 = vmul.f32 %v10048_v5, %v13504_v34  ;;  %v7221_v17 = vsub.f32 %v13514_v27, %v7217_v55  ;;  %v6836_v27 = vpack.c.b16 %v6829_v33, %v6828_v20  ;;  %v13587_v1 = vpop.f32.mrf.mxu3  ;;  %v14879_v5 = vpack.c.b16 %v13358_v18, %v13356_v26 }
0x166b   : > { %v6819_v48 = vpack.c.bf16 %v6818_v15, %v6817_v59  ;;  %v7063_v38 = vsel %vm2354_vm1, %v13587_v1, -inf  ;;  %v14880_v20 = vpack.c.b16 %v13372_v30, %v13370_v31  ;;  %v14881_v31 = vpack.c.b16 %v13386_v56, %v13384_v53 }
0x166c   : > { %v6712_v41 = vpack.c.bf16 %v6705_v3, %v6704_v50  ;;  %v7223_v35 = vmul.f32 1.442695, %v7221_v17 }
0x166d   : > { %v6853_v44 = vsel %vm2300_vm12, %v6819_v48, 0 }
0x166e   : > { %9527 = vmatmul.msk.bf16.vlgmr.msrb.gmra.mxu2 %vm2354_vm1, %v6712_v41  ;;  %6862 = vmatpush.bf16.xpose.msrb.mxu0 %v6853_v44  ;;  %10049 = vpow2.f32 %v7223_v35 }
0x1671   : > { %v7220_v34 = vpop.xlane.xlu1 %7219 }
0x1672   : > { %v7222_v24 = vsub.f32 %v13523_v52, %v7220_v34 }
0x1674   : > { %v7225_v37 = vmul.f32 1.442695, %v7222_v24  ;;  %v13582_v39 = vpop.eup %10049  ;;  %v7059_v24 = vpop.xlane.xlu2 %7058 }
0x1675   : > { %9523 = vmatmul.msk.bf16.vlgmr.msrb.gmra.mxu0 %vm2300_vm12, %v6836_v27  ;;  %v7227_v13 = vsel %vm2300_vm12, %v13582_v39, 0.0 }
0x1676   : > { %10051 = vpow2.f32 %v7225_v37  ;;  %7228 = vadd.xlane.f32.xlu1 %v7227_v13 }
0x1679   : > { %v6680_v22 = vpop.xlane.xlu1 %6679 }
0x167a   : > { %10053 = vrcp.f32 %v6680_v22 }
0x167c   : > { %v13589_v44 = vpop.eup %10051  ;;  %v7062_v56 = vpop.xlane.xlu2 %7061 }
0x167d   : > { %v7230_v35 = vsel %vm2300_vm12, %v13589_v44, 0.0 }
0x167e   : > { %7064 = vmax.xlane.f32.xlu1 %v7063_v38  ;;  %7231 = vadd.xlane.f32.xlu0 %v7230_v35 }
0x1680   : > { %v10054_v55 = vpop.eup %10053 }
0x1681   : > { %v6683_v52 = vpop.xlane.xlu1 %6682  ;;  %v6706_v15 = vmul.f32 %v10054_v55, %v13530_v8 }
0x1682   : > { %10055 = vrcp.f32 %v6683_v52  ;;  %v7071_v52 = vsub.f32 %v13512_v7, %v7059_v24 }
0x1684   : > { %v7084_v53 = vmul.f32 1.442695, %v7071_v52 }
0x1685   : > { %9524 = vmatmul.msk.bf16.gmra.mxu0 %vm2300_vm12, %v14879_v5 }
0x1688   : > { %v10056_v59 = vpop.eup %10055 }
0x1689   : > { %v6707_v50 = vmul.f32 %v10056_v59, %v13534_v46  ;;  %v7044_v3 = vpop.xlane.xlu1 %7043 }
0x168a   : > { %v7066_v17 = vsub.f32 %v13481_v62, %v7044_v3 }
0x168b   : > { %v6713_v16 = vpack.c.bf16 %v6707_v50, %v6706_v15 }
0x168c   : > { %v7074_v48 = vmul.f32 1.442695, %v7066_v17 }
0x168d   : > { %9528 = vmatmul.msk.bf16.gmra.mxu2 %vm2354_vm1, %v6713_v16 }
0x168e   : > { %10057 = vpow2.f32 %v7074_v48 }
0x1691   : > { %v7047_v41 = vpop.xlane.xlu1 %7046 }
0x1692   : > { %v7067_v33 = vsub.f32 %v13485_v36, %v7047_v41 }
0x1694   : > { %v13604_v26 = vpop.eup %10057  ;;  %v7076_v18 = vmul.f32 1.442695, %v7067_v33 }
0x1695   : > { %9525 = vmatmul.msk.bf16.gmra.mxu0 %vm2300_vm12, %v14880_v20  ;;  %v7090_v8 = vsel %vm2354_vm1, %v13604_v26, 0.0 }
0x1696   : > { %10059 = vpow2.f32 %v7076_v18  ;;  %7091 = vadd.xlane.f32.xlu0 %v7090_v8 }
0x1699   : > { %v6686_v62 = vpop.xlane.xlu1 %6685 }
0x169a   : > { %10061 = vrcp.f32 %v6686_v62 }
0x169c   : > { %v13612_v46 = vpop.eup %10059 }
0x169d   : > { %v7093_v34 = vsel %vm2354_vm1, %v13612_v46, 0.0 }
0x169e   : > { %7094 = vadd.xlane.f32.xlu2 %v7093_v34 }
0x16a0   : > { %v10062_v30 = vpop.eup %10061 }
0x16a1   : > { %v6689_v36 = vpop.xlane.xlu1 %6688  ;;  %v6708_v37 = vmul.f32 %v10062_v30, %v13544_v2  ;;  %v7072_v2 = vsub.f32 %v13521_v0, %v7062_v56 }
0x16a2   : > { %10063 = vrcp.f32 %v6689_v36 }
0x16a3   : > { %v7086_v7 = vmul.f32 1.442695, %v7072_v2 }
0x16a5   : > { %9526 = vmatmul.msk.bf16.gmra.mxu0 %vm2300_vm12, %v14881_v31 }
0x16a8   : > { %v10064_v27 = vpop.eup %10063 }
0x16a9   : > { %v6709_v13 = vmul.f32 %v10064_v27, %v13548_v60  ;;  %v7050_v22 = vpop.xlane.xlu1 %7049 }
0x16aa   : > { %v7068_v38 = vsub.f32 %v13489_v25, %v7050_v22 }
0x16ab   : > { %v6714_v35 = vpack.c.bf16 %v6709_v13, %v6708_v37 }
0x16ac   : > { %v7078_v5 = vmul.f32 1.442695, %v7068_v38 }
0x16ad   : > { %9529 = vmatmul.msk.bf16.gmra.mxu2 %vm2354_vm1, %v6714_v35 }
0x16ae   : > { %10065 = vpow2.f32 %v7078_v5 }
0x16af   : > { %10067 = vpow2.f32 %v7084_v53 }
0x16b1   : > { %v7053_v55 = vpop.xlane.xlu1 %7052 }
0x16b2   : > { %v7069_v59 = vsub.f32 %v13492_v40, %v7053_v55 }
0x16b4   : > { %v13626_v15 = vpop.eup %10065  ;;  %v7080_v60 = vmul.f32 1.442695, %v7069_v59 }
0x16b5   : > { %v7096_v25 = vsel %vm2354_vm1, %v13626_v15, 0.0  ;;  %v13631_v3 = vpop.eup %10067 }
0x16b6   : > { %10069 = vpow2.f32 %v7080_v60  ;;  %7097 = vadd.xlane.f32.xlu1 %v7096_v25  ;;  %v7105_v40 = vsel %vm2354_vm1, %v13631_v3, 0.0 }
0x16b7   : > { %10071 = vpow2.f32 %v7086_v7 }
0x16b9   : > { %v6692_v50 = vpop.xlane.xlu1 %6691 }
0x16ba   : > { %10073 = vrcp.f32 %v6692_v50 }
0x16bc   : > { %v13633_v17 = vpop.eup %10069 }
0x16bd   : > { %v7099_v16 = vsel %vm2354_vm1, %v13633_v17, 0.0  ;;  %v13639_v48 = vpop.eup %10071 }
0x16be   : > { %7106 = vadd.xlane.f32.xlu1 %v7105_v40  ;;  %7100 = vadd.xlane.f32.xlu0 %v7099_v16  ;;  %v7108_v41 = vsel %vm2354_vm1, %v13639_v48, 0.0 }
0x16c0   : > { %v10074_v33 = vpop.eup %10073 }
0x16c1   : > { %v6695_v0 = vpop.xlane.xlu1 %6694  ;;  %v6710_v20 = vmul.f32 %v10074_v33, %v13560_v43  ;;  %v9663_v43 = vld [vmem:[%s14638_s11 + $0x18] sm:$0xff]  ;;  %v14883_v33 = vpack.c.b16 %v13410_v21, %v13408_v11  ;;  %v14884_v11 = vpack.c.b16 %v13422_v57, %v13420_v32  ;;  %v6530_v21 = vpack.c.bf16 %v13502_v61, %v13502_v61 }
0x16c2   : > { %10075 = vrcp.f32 %v6695_v0  ;;  %7415 = vmatpush.bf16.msra.mxu2 %v9663_v43 }
0x16c3   : > { %v7253_v43 = vunpack.c.l.b16 %v6530_v21 }
0x16c6   : > { %7109 = vadd.xlane.f32.xlu0 %v7108_v41 }
0x16c8   : > { %v10076_v18 = vpop.eup %10075 }
0x16c9   : > { %v6711_v8 = vmul.f32 %v10076_v18, %v13564_v54  ;;  %v7056_v62 = vpop.xlane.xlu1 %7055 }
0x16ca   : > { %v7070_v34 = vsub.f32 %v13500_v23, %v7056_v62 }
0x16cb   : > { %v6715_v36 = vpack.c.bf16 %v6711_v8, %v6710_v20 }
0x16cc   : > { %v7082_v31 = vmul.f32 1.442695, %v7070_v34 }
0x16cd   : > { %9530 = vmatmul.msk.bf16.gmra.mxu2 %vm2354_vm1, %v6715_v36 }
0x16ce   : > { %10077 = vpow2.f32 %v7082_v31 }
0x16d4   : > { %v13647_v30 = vpop.eup %10077 }
0x16d5   : > { %v7102_v24 = vsel %vm2354_vm1, %v13647_v30, 0.0 }
0x16d6   : > { %7103 = vadd.xlane.f32.xlu2 %v7102_v24 }
0x16e9   : > { %v7229_v54 = vpop.xlane.xlu1 %7228 }
0x16ea   : > { %10079 = vrcp.f32 %v7229_v54 }
0x16f0   : > { %v10080_v35 = vpop.eup %10079 }
0x16f1   : > { %v6929_v27 = vpop.f32.mrf.mxu2  ;;  %v7065_v23 = vpop.xlane.xlu1 %7064  ;;  %v7235_v5 = vmul.f32 %v10080_v35, %v13582_v39  ;;  %v14882_v39 = vpack.c.b16 %v13404_v9, %v13402_v49 }
0x16f2   : > { %v7232_v37 = vpop.xlane.xlu0 %7231  ;;  %v7073_v13 = vsub.f32 %v13587_v1, %v7065_v23  ;;  %v6864_v22 = vpop.f32.mrf.mxu0 }
0x16f3   : > { %10081 = vrcp.f32 %v7232_v37  ;;  %v6930_v59 = vadd.f32 %v6929_v27, %v6864_v22 }
0x16f4   : > { %v7088_v38 = vmul.f32 1.442695, %v7073_v13 }
0x16f6   : > { %10083 = vpow2.f32 %v7088_v38 }
0x16f9   : > { %v10082_v52 = vpop.eup %10081  ;;  %v6931_v56 = vpop.f32.mrf.mxu2 }
0x16fa   : > { %v7236_v53 = vmul.f32 %v10082_v52, %v13589_v44  ;;  %v6866_v55 = vpop.f32.mrf.mxu0 }
0x16fb   : > { %v6932_v2 = vadd.f32 %v6931_v56, %v6866_v55 }
0x16fc   : > { %v7237_v60 = vpack.c.bf16 %v7236_v53, %v7235_v5  ;;  %v13657_v25 = vpop.eup %10083 }
0x16fd   : > { %v7367_v7 = vpack.c.bf16 %v6932_v2, %v6930_v59  ;;  %v7111_v1 = vsel %vm2354_vm1, %v13657_v25, 0.0 }
0x16fe   : > { %v7271_v50 = vsel %vm2300_vm12, %v7237_v60, 0  ;;  %7112 = vadd.xlane.f32.xlu2 %v7111_v1 }
0x16ff   : > { %7280 = vmatpush.bf16.xpose.msra.mxu0 %v7271_v50  ;;  %9550 = vmatmul.msk.bf16.vlgmr.msra.gmra.mxu2 %vm2300_vm12, %v7367_v7 }
0x1702   : > { %v6869_v40 = vpop.f32.mrf.mxu0 }
0x1706   : > { %9536 = vmatmul.msk.bf16.vlgmr.msra.gmra.mxu0 %vm2300_vm12, %v14882_v39 }
0x1709   : > { %v7092_v44 = vpop.xlane.xlu0 %7091 }
0x170a   : > { %10085 = vrcp.f32 %v7092_v44  ;;  %v6871_v20 = vpop.f32.mrf.mxu0 }
0x1710   : > { %v6934_v16 = vpop.f32.mrf.mxu2  ;;  %v10086_v41 = vpop.eup %10085 }
0x1711   : > { %v7095_v0 = vpop.xlane.xlu2 %7094  ;;  %v7122_v62 = vmul.f32 %v10086_v41, %v13604_v26  ;;  %v6935_v49 = vadd.f32 %v6934_v16, %v6869_v40  ;;  %v6529_v26 = vpack.c.bf16 %v13494_v14, %v13494_v14 }
0x1712   : > { %10087 = vrcp.f32 %v7095_v0  ;;  %v6874_v24 = vpop.f32.mrf.mxu0 }
0x1713   : > { %v7252_v23 = vunpack.c.l.b16 %v6529_v26 }
0x1715   : > { %v7257_v37 = vpack.c.b16 %v7253_v43, %v7252_v23 }
0x1716   : > { %9537 = vmatmul.msk.bf16.gmra.mxu0 %vm2300_vm12, %v14883_v33 }
0x1718   : > { %v10088_v18 = vpop.eup %10087  ;;  %v6936_v8 = vpop.f32.mrf.mxu2 }
0x1719   : > { %v7123_v9 = vmul.f32 %v10088_v18, %v13612_v46  ;;  %v6937_v34 = vadd.f32 %v6936_v8, %v6871_v20  ;;  %v13698_v20 = vld [vmem:[%s14629_s2] sm:$0xff] }
0x171a   : > { %v6876_v57 = vpop.f32.mrf.mxu0  ;;  %v13701_v8 = vperm.slane %v13698_v20, 6 }
0x171b   : > { %v7130_v36 = vpack.c.bf16 %v7123_v9, %v7122_v62  ;;  %v7368_v31 = vpack.c.bf16 %v6937_v34, %v6935_v49  ;;  %v14886_v34 = vld [vmem:[#allocation24_spill] sm:$0xff] }
0x171d   : > { %9540 = vmatmul.msk.bf16.vlgmr.msra.gmra.mxu1 %vm2354_vm1, %v7130_v36  ;;  %9551 = vmatmul.msk.bf16.gmra.mxu2 %vm2300_vm12, %v7368_v31 }
0x1722   : > { %v6879_v59 = vpop.f32.mrf.mxu0 }
0x1726   : > { %9538 = vmatmul.msk.bf16.gmra.mxu0 %vm2300_vm12, %v14884_v11 }
0x1729   : > { %v7098_v46 = vpop.xlane.xlu1 %7097 }
0x172a   : > { %10089 = vrcp.f32 %v7098_v46 }
0x1730   : > { %v6939_v54 = vpop.f32.mrf.mxu2  ;;  %v10090_v32 = vpop.eup %10089 }
0x1731   : > { %v7101_v27 = vpop.xlane.xlu0 %7100  ;;  %v6940_v38 = vadd.f32 %v6939_v54, %v6874_v24  ;;  %v7124_v35 = vmul.f32 %v10090_v32, %v13626_v15  ;;  %v7107_v53 = vpop.xlane.xlu1 %7106 }
0x1732   : > { %10091 = vrcp.f32 %v7101_v27 }
0x1733   : > { %10093 = vrcp.f32 %v7107_v53 }
0x1736   : > { %9539 = vmatmul.msk.bf16.gmra.mxu0 %vm2300_vm12, %v7257_v37 }
0x1738   : > { %v6941_v13 = vpop.f32.mrf.mxu2  ;;  %v10092_v22 = vpop.eup %10091 }
0x1739   : > { %v6942_v61 = vadd.f32 %v6941_v13, %v6876_v57  ;;  %v7125_v14 = vmul.f32 %v10092_v22, %v13633_v17  ;;  %v10094_v55 = vpop.eup %10093  ;;  %v6881_v17 = vpop.f32.mrf.mxu0  ;;  %v14887_v57 = vld [vmem:[#allocation23_spill] sm:$0xff] }
0x173a   : > { %v7127_v7 = vmul.f32 %v10094_v55, %v13631_v3  ;;  %v7110_v16 = vpop.xlane.xlu0 %7109  ;;  %v14888_v13 = vld [vmem:[#allocation35_spill] sm:$0xff] }
0x173b   : > { %v7369_v52 = vpack.c.bf16 %v6942_v61, %v6940_v38  ;;  %v7131_v5 = vpack.c.bf16 %v7125_v14, %v7124_v35  ;;  %v4573_v22 = vadd.f32 %v14888_v13, %v14887_v57 }
0x173d   : > { %9552 = vmatmul.msk.bf16.gmra.mxu2 %vm2300_vm12, %v7369_v52  ;;  %9541 = vmatmul.msk.bf16.gmra.mxu1 %vm2354_vm1, %v7131_v5  ;;  %v6026_v35 = vadd.f32 %v13218_v4, %v4573_v22 }
0x1749   : > { %v7104_v56 = vpop.xlane.xlu2 %7103 }
0x174a   : > { %10095 = vrcp.f32 %v7104_v56 }
0x174b   : > { %10097 = vrcp.f32 %v7110_v16 }
0x1750   : > { %v10096_v2 = vpop.eup %10095  ;;  %v6944_v60 = vpop.f32.mrf.mxu2 }
0x1751   : > { %v7126_v15 = vmul.f32 %v10096_v2, %v13647_v30  ;;  %v6945_v39 = vadd.f32 %v6944_v60, %v6879_v59  ;;  %v10098_v41 = vpop.eup %10097 }
0x1752   : > { %v7128_v3 = vmul.f32 %v10098_v41, %v13639_v48  ;;  %v14885_v48 = vld [vmem:[#allocation21_spill] sm:$0xff] }
0x1753   : > { %v7132_v1 = vpack.c.bf16 %v7127_v7, %v7126_v15 }
0x1755   : > { %9542 = vmatmul.msk.bf16.gmra.mxu1 %vm2354_vm1, %v7132_v1  ;;  %v14889_v1 = vld [vmem:[#allocation41_spill] sm:$0xff] }
0x1758   : > { %v6946_v50 = vpop.f32.mrf.mxu2 }
0x1759   : > { %v6947_v44 = vadd.f32 %v6946_v50, %v6881_v17  ;;  %v14890_v17 = vld [vmem:[#allocation37_spill] sm:$0xff] }
0x175a   : > { %v4578_v50 = vadd.f32 %v14890_v17, %v14889_v1 }
0x175b   : > { %v7370_v40 = vpack.c.bf16 %v6947_v44, %v6945_v39 }
0x175d   : > { %9553 = vmatmul.msk.bf16.gmra.mxu2 %vm2300_vm12, %v7370_v40  ;;  %v6028_v40 = vadd.f32 %v13232_v12, %v4578_v50 }
0x1771   : > { %v7113_v0 = vpop.xlane.xlu2 %7112 }
0x1772   : > { %10099 = vrcp.f32 %v7113_v0 }
0x1778   : > { %v10100_v33 = vpop.eup %10099 }
0x1779   : > { %v7129_v30 = vmul.f32 %v10100_v33, %v13657_v25  ;;  %v4568_v25 = vadd.f32 %v14886_v34, %v14885_v48 }
0x177b   : > { %v7133_v18 = vpack.c.bf16 %v7129_v30, %v7128_v3  ;;  %v6024_v31 = vadd.f32 %v13200_v58, %v4568_v25 }
0x177d   : > { %9543 = vmatmul.msk.bf16.gmra.mxu1 %vm2354_vm1, %v7133_v18 }
0x1782   : > { %v7417_v62 = vpop.f32.mrf.mxu2 }
0x1783   : > { %v7457_v49 = vadd.f32 %v7417_v62, %v13193_v63  ;;  %v7282_v24 = vpop.f32.mrf.mxu0 }
0x1785   : > { %v13705_v9 = vadd.f32 %v13701_v8, %v7457_v49 }
0x1787   : > { %v7490_v36 = vsel %vm913_vm3, %v13705_v9, 0.0 }
0x1788   : > { %7491 = vadd.xlane.f32.xlu1 %v7490_v36 }
0x178a   : > { %v7419_v11 = vpop.f32.mrf.mxu2 }
0x178b   : > { %v7458_v21 = vadd.f32 %v7419_v11, %v6024_v31  ;;  %v7284_v27 = vpop.f32.mrf.mxu0 }
0x178d   : > { %v13713_v26 = vadd.f32 %v13701_v8, %v7458_v21 }
0x178f   : > { %v7493_v63 = vsel %vm913_vm3, %v13713_v26, 0.0 }
0x1790   : > { %7494 = vadd.xlane.f32.xlu0 %v7493_v63  ;;  %v14891_v63 = vld [vmem:[#allocation9_spill] sm:$0xff] }
0x1793   : > { %v7287_v53 = vpop.f32.mrf.mxu0 }
0x179a   : > { %v7347_v46 = vpop.f32.mrf.mxu1 }
0x179b   : > { %v7348_v37 = vadd.f32 %v7347_v46, %v7282_v24  ;;  %v7289_v2 = vpop.f32.mrf.mxu0  ;;  %v14892_v46 = vld [vmem:[#allocation43_spill] sm:$0xff] }
0x17a0   : > { %v7422_v43 = vpop.f32.mrf.mxu2 }
0x17a1   : > { %v7459_v54 = vadd.f32 %v7422_v43, %v13210_v6  ;;  %v14893_v43 = vld [vmem:[#allocation39_spill] sm:$0xff] }
0x17a2   : > { %v7349_v23 = vpop.f32.mrf.mxu1 }
0x17a3   : > { %v13719_v32 = vadd.f32 %v13701_v8, %v7459_v54  ;;  %v7350_v58 = vadd.f32 %v7349_v23, %v7284_v27  ;;  %v7292_v33 = vpop.f32.mrf.mxu0  ;;  %v4583_v54 = vadd.f32 %v14893_v43, %v14892_v46  ;;  %v14896_v46 = vld [vmem:[#allocation47_spill] sm:$0xff]  ;;  %v14897_v43 = vld [vmem:[#allocation28_spill] sm:$0xff] }
0x17a5   : > { %v7371_v38 = vpack.c.bf16 %v7350_v58, %v7348_v37  ;;  %v7496_v61 = vsel %vm913_vm3, %v13719_v32, 0.0 }
0x17a6   : > { %7497 = vadd.xlane.f32.xlu2 %v7496_v61 }
0x17a7   : > { %9554 = vmatmul.msk.bf16.gmra.mxu2 %vm2300_vm12, %v7371_v38 }
0x17a8   : > { %v7424_v6 = vpop.f32.mrf.mxu2 }
0x17a9   : > { %v7460_v14 = vadd.f32 %v7424_v6, %v6026_v35 }
0x17ab   : > { %v13728_v52 = vadd.f32 %v13701_v8, %v7460_v14  ;;  %v7294_v30 = vpop.f32.mrf.mxu0 }
0x17ad   : > { %v7499_v5 = vsel %vm913_vm3, %v13728_v52, 0.0 }
0x17ae   : > { %7500 = vadd.xlane.f32.xlu1 %v7499_v5 }
0x17b3   : > { %v7297_v31 = vpop.f32.mrf.mxu0 }
0x17ba   : > { %v7352_v56 = vpop.f32.mrf.mxu1 }
0x17bb   : > { %v7353_v7 = vadd.f32 %v7352_v56, %v7287_v53  ;;  %v7299_v58 = vpop.f32.mrf.mxu0 }
0x17c0   : > { %v7427_v55 = vpop.f32.mrf.mxu2 }
0x17c1   : > { %v7461_v59 = vadd.f32 %v7427_v55, %v13225_v28 }
0x17c2   : > { %v7354_v4 = vpop.f32.mrf.mxu1 }
0x17c3   : > { %v13734_v60 = vadd.f32 %v13701_v8, %v7461_v59  ;;  %v7355_v15 = vadd.f32 %v7354_v4, %v7289_v2 }
0x17c5   : > { %v7502_v39 = vsel %vm913_vm3, %v13734_v60, 0.0  ;;  %v7372_v44 = vpack.c.bf16 %v7355_v15, %v7353_v7 }
0x17c6   : > { %7503 = vadd.xlane.f32.xlu0 %v7502_v39 }
0x17c7   : > { %9555 = vmatmul.msk.bf16.gmra.mxu2 %vm2300_vm12, %v7372_v44 }
0x17c8   : > { %v7429_v28 = vpop.f32.mrf.mxu2 }
0x17c9   : > { %v7462_v16 = vadd.f32 %v7429_v28, %v6028_v40  ;;  %v14894_v40 = vld [vmem:[#allocation45_spill] sm:$0xff]  ;;  %v14895_v28 = vld [vmem:[#allocation26_spill] sm:$0xff] }
0x17cb   : > { %v13743_v0 = vadd.f32 %v13701_v8, %v7462_v16  ;;  %v4588_v16 = vadd.f32 %v14895_v28, %v14894_v40 }
0x17cd   : > { %v7505_v41 = vsel %vm913_vm3, %v13743_v0, 0.0 }
0x17ce   : > { %7506 = vadd.xlane.f32.xlu2 %v7505_v41 }
0x17d2   : > { %v7357_v3 = vpop.f32.mrf.mxu1 }
0x17d3   : > { %v7358_v62 = vadd.f32 %v7357_v3, %v7292_v33 }
0x17da   : > { %v7359_v18 = vpop.f32.mrf.mxu1 }
0x17db   : > { %v7360_v49 = vadd.f32 %v7359_v18, %v7294_v30 }
0x17dd   : > { %v7373_v48 = vpack.c.bf16 %v7360_v49, %v7358_v62 }
0x17df   : > { %9556 = vmatmul.msk.bf16.gmra.mxu2 %vm2300_vm12, %v7373_v48 }
0x17e0   : > { %v7432_v12 = vpop.f32.mrf.mxu2 }
0x17e1   : > { %v7463_v34 = vadd.f32 %v7432_v12, %v13239_v42  ;;  %v6030_v42 = vadd.f32 %v13310_v19, %v4583_v54  ;;  %v4593_v54 = vadd.f32 %v14897_v43, %v14896_v46 }
0x17e3   : > { %v13750_v25 = vadd.f32 %v13701_v8, %v7463_v34 }
0x17e5   : > { %v7508_v36 = vsel %vm913_vm3, %v13750_v25, 0.0 }
0x17e6   : > { %7509 = vadd.xlane.f32.xlu2 %v7508_v36 }
0x17e8   : > { %v7434_v23 = vpop.f32.mrf.mxu2 }
0x17e9   : > { %v7464_v57 = vadd.f32 %v7434_v23, %v6030_v42 }
0x17fa   : > { %v7362_v11 = vpop.f32.mrf.mxu1 }
0x17fb   : > { %v7492_v21 = vpop.xlane.xlu1 %7491  ;;  %v7363_v38 = vadd.f32 %v7362_v11, %v7297_v31 }
0x17fc   : > { %v7538_v24 = vmul.f32 %v7492_v21, %v14891_v63 }
0x17fe   : > { %v13758_v27 = vsub.f32 %v13705_v9, %v7538_v24  ;;  %v13766_v9 = vadd.f32 %v13701_v8, %v7464_v57 }
0x1800   : > { %v7570_v37 = vmul.f32 %v13758_v27, %v13758_v27  ;;  %v7511_v53 = vsel %vm913_vm3, %v13766_v9, 0.0 }
0x1802   : > { %v7364_v13 = vpop.f32.mrf.mxu1  ;;  %v7586_v22 = vsel %vm913_vm3, %v7570_v37, 0.0 }
0x1803   : > { %v7365_v61 = vadd.f32 %v7364_v13, %v7299_v58  ;;  %7587 = vadd.xlane.f32.xlu1 %v7586_v22  ;;  %v7495_v35 = vpop.xlane.xlu0 %7494 }
0x1804   : > { %v7539_v6 = vmul.f32 %v7495_v35, %v14891_v63 }
0x1805   : > { %v7374_v14 = vpack.c.bf16 %v7365_v61, %v7363_v38 }
0x1806   : > { %v13769_v19 = vsub.f32 %v13713_v26, %v7539_v6 }
0x1807   : > { %9557 = vmatmul.msk.bf16.gmra.mxu2 %vm2300_vm12, %v7374_v14  ;;  %v14898_v14 = vld [vmem:[#allocation49_spill] sm:$0xff] }
0x1808   : > { %v7571_v5 = vmul.f32 %v13769_v19, %v13769_v19 }
0x180a   : > { %v7589_v56 = vsel %vm913_vm3, %v7571_v5, 0.0  ;;  %v14899_v5 = vld [vmem:[#allocation30_spill] sm:$0xff] }
0x180b   : > { %7512 = vadd.xlane.f32.xlu1 %v7511_v53  ;;  %7590 = vadd.xlane.f32.xlu0 %v7589_v56  ;;  %v4598_v53 = vadd.f32 %v14899_v5, %v14898_v14 }
0x1819   : > { %v7498_v55 = vpop.xlane.xlu2 %7497 }
0x181a   : > { %v7540_v59 = vmul.f32 %v7498_v55, %v14891_v63 }
0x181c   : > { %v13779_v2 = vsub.f32 %v13719_v32, %v7540_v59 }
0x181e   : > { %v7572_v26 = vmul.f32 %v13779_v2, %v13779_v2 }
0x1820   : > { %v7592_v4 = vsel %vm913_vm3, %v7572_v26, 0.0 }
0x1821   : > { %v7501_v7 = vpop.xlane.xlu1 %7500  ;;  %7593 = vadd.xlane.f32.xlu0 %v7592_v4 }
0x1822   : > { %v7541_v15 = vmul.f32 %v7501_v7, %v14891_v63  ;;  %v9665_v7 = vld [vmem:[%s14639_s12 + $0x8] sm:$0xff] }
0x1823   : > { %7931 = vmatpush.bf16.msra.mxu3 %v9665_v7 }
0x1824   : > { %v13786_v1 = vsub.f32 %v13728_v52, %v7541_v15  ;;  %v6032_v52 = vadd.f32 %v13353_v47, %v4588_v16 }
0x1826   : > { %v7573_v17 = vmul.f32 %v13786_v1, %v13786_v1 }
0x1828   : > { %v7595_v50 = vsel %vm913_vm3, %v7573_v17, 0.0 }
0x1829   : > { %7596 = vadd.xlane.f32.xlu2 %v7595_v50 }
0x182a   : > { %v7437_v32 = vpop.f32.mrf.mxu2 }
0x182b   : > { %v7465_v39 = vadd.f32 %v7437_v32, %v13319_v10  ;;  %v9664_v32 = vld [vmem:[%s14639_s12] sm:$0xff] }
0x182c   : > { %7932 = vmatpush.bf16.msra.mxu3 %v9664_v32  ;;  %v14903_v32 = vld [vmem:[#allocation32_spill] sm:$0xff] }
0x182d   : > { %v13793_v44 = vadd.f32 %v13701_v8, %v7465_v39 }
0x182f   : > { %v7514_v41 = vsel %vm913_vm3, %v13793_v44, 0.0 }
0x1830   : > { %7515 = vadd.xlane.f32.xlu1 %v7514_v41 }
0x1832   : > { %v7439_v33 = vpop.f32.mrf.mxu2 }
0x1833   : > { %v7466_v3 = vadd.f32 %v7439_v33, %v6032_v52 }
0x1835   : > { %v13801_v30 = vadd.f32 %v13701_v8, %v7466_v3 }
0x1837   : > { %v7517_v10 = vsel %vm913_vm3, %v13801_v30, 0.0 }
0x1838   : > { %7518 = vadd.xlane.f32.xlu0 %v7517_v10 }
0x1839   : > { %v7504_v18 = vpop.xlane.xlu0 %7503 }
0x183a   : > { %v7542_v62 = vmul.f32 %v7504_v18, %v14891_v63 }
0x183c   : > { %v13807_v49 = vsub.f32 %v13734_v60, %v7542_v62 }
0x183e   : > { %v7574_v48 = vmul.f32 %v13807_v49, %v13807_v49 }
0x1840   : > { %v7598_v47 = vsel %vm913_vm3, %v7574_v48, 0.0 }
0x1841   : > { %v7507_v12 = vpop.xlane.xlu2 %7506  ;;  %7599 = vadd.xlane.f32.xlu2 %v7598_v47 }
0x1842   : > { %v7543_v34 = vmul.f32 %v7507_v12, %v14891_v63 }
0x1844   : > { %v13814_v36 = vsub.f32 %v13743_v0, %v7543_v34  ;;  %v6034_v0 = vadd.f32 %v13368_v45, %v4593_v54 }
0x1846   : > { %v7575_v31 = vmul.f32 %v13814_v36, %v13814_v36 }
0x1848   : > { %v7601_v11 = vsel %vm913_vm3, %v7575_v31, 0.0 }
0x1849   : > { %7602 = vadd.xlane.f32.xlu1 %v7601_v11 }
0x184a   : > { %v7442_v60 = vpop.f32.mrf.mxu2 }
0x184b   : > { %v7467_v21 = vadd.f32 %v7442_v60, %v13364_v29  ;;  %v14901_v60 = vld [vmem:[#allocation11_spill] sm:$0xff] }
0x184d   : > { %v13821_v24 = vadd.f32 %v13701_v8, %v7467_v21 }
0x184f   : > { %v7520_v23 = vsel %vm913_vm3, %v13821_v24, 0.0 }
0x1850   : > { %7521 = vadd.xlane.f32.xlu0 %v7520_v23 }
0x1852   : > { %v7444_v42 = vpop.f32.mrf.mxu2 }
0x1853   : > { %v7468_v37 = vadd.f32 %v7444_v42, %v6034_v0  ;;  %v13876_v42 = vperm.slane %v13698_v20, 7 }
0x1855   : > { %v13829_v58 = vadd.f32 %v13701_v8, %v7468_v37 }
0x1857   : > { %v7523_v29 = vsel %vm913_vm3, %v13829_v58, 0.0 }
0x1858   : > { %7524 = vadd.xlane.f32.xlu2 %v7523_v29  ;;  %v13882_v29 = vld [vmem:[%s14629_s2 + $0x8] sm:$0x7] }
0x1859   : > { %v7510_v57 = vpop.xlane.xlu2 %7509 }
0x185a   : > { %v7544_v13 = vmul.f32 %v7510_v57, %v14891_v63 }
0x185c   : > { %v13835_v22 = vsub.f32 %v13750_v25, %v7544_v13  ;;  %v14900_v25 = vld [vmem:[#allocation10_spill] sm:$0xff] }
0x185d   : > { %v6036_v55 = vadd.f32 %v14900_v25, %v4598_v53 }
0x185e   : > { %v7576_v38 = vmul.f32 %v13835_v22, %v13835_v22 }
0x1860   : > { %v7604_v45 = vsel %vm913_vm3, %v7576_v38, 0.0 }
0x1861   : > { %7605 = vadd.xlane.f32.xlu1 %v7604_v45 }
0x1862   : > { %v7447_v61 = vpop.f32.mrf.mxu2 }
0x1863   : > { %v7469_v35 = vadd.f32 %v7447_v61, %v13378_v51  ;;  %v13886_v61 = vperm.slane %v13882_v29, 0 }
0x1865   : > { %v13842_v6 = vadd.f32 %v13701_v8, %v7469_v35 }
0x1867   : > { %v7526_v56 = vsel %vm913_vm3, %v13842_v6, 0.0 }
0x1868   : > { %7527 = vadd.xlane.f32.xlu2 %v7526_v56 }
0x186a   : > { %v7449_v59 = vpop.f32.mrf.mxu2 }
0x186b   : > { %v7470_v26 = vadd.f32 %v7449_v59, %v6036_v55 }
0x186d   : > { %v13850_v4 = vadd.f32 %v13701_v8, %v7470_v26 }
0x186f   : > { %v7529_v51 = vsel %vm913_vm3, %v13850_v4, 0.0 }
0x1870   : > { %7530 = vadd.xlane.f32.xlu1 %v7529_v51 }
0x1876   : > { %v7588_v15 = vpop.xlane.xlu1 %7587 }
0x1877   : > { %v7634_v17 = vmul.f32 %v7588_v15, %v14891_v63 }
0x1879   : > { %v7650_v50 = vadd.f32 1e-05, %v7634_v17 }
0x187b   : > { %10101 = vrsqrt.f32 %v7650_v50  ;;  %vm7672_vm4 = vweird.f32 %v7650_v50 }
0x187e   : > { %v7513_v39 = vpop.xlane.xlu1 %7512  ;;  %v7591_v40 = vpop.xlane.xlu0 %7590 }
0x187f   : > { %v7545_v28 = vmul.f32 %v7513_v39, %v14891_v63  ;;  %v7635_v16 = vmul.f32 %v7591_v40, %v14891_v63 }
0x1881   : > { %v10102_v41 = vpop.eup %10101  ;;  %v13864_v52 = vsub.f32 %v13766_v9, %v7545_v28  ;;  %v7651_v33 = vadd.f32 1e-05, %v7635_v16 }
0x1882   : > { %v7667_v3 = vmul.f32 %v10102_v41, %v7650_v50  ;;  %vm7673_vm12 = vweird.f32 %v10102_v41  ;;  %v14902_v50 = vld [vmem:[#allocation51_spill] sm:$0xff] }
0x1883   : > { %10103 = vrsqrt.f32 %v7651_v33  ;;  %v7577_v10 = vmul.f32 %v13864_v52, %v13864_v52  ;;  %vm7674_vm5 = vmor %vm7672_vm4, %vm7673_vm12  ;;  %vm7682_vm7 = vweird.f32 %v7651_v33  ;;  %v4603_v39 = vadd.f32 %v14903_v32, %v14902_v50 }
0x1884   : > { %v7668_v18 = vmul.f32 %v10102_v41, %v7667_v3 }
0x1885   : > { %v7607_v62 = vsel %vm913_vm3, %v7577_v10, 0.0 }
0x1886   : > { %v7669_v48 = vmul.f32 0.5, %v7668_v18  ;;  %7608 = vadd.xlane.f32.xlu0 %v7607_v62 }
0x1888   : > { %v7670_v47 = vsub.f32 1.5, %v7669_v48 }
0x1889   : > { %v10104_v12 = vpop.eup %10103 }
0x188a   : > { %v7671_v34 = vmul.f32 %v10102_v41, %v7670_v47  ;;  %v7677_v31 = vmul.f32 %v10104_v12, %v7651_v33  ;;  %v7452_v11 = vpop.f32.mrf.mxu2  ;;  %vm7683_vm6 = vweird.f32 %v10104_v12 }
0x188b   : > { %v7471_v9 = vadd.f32 %v7452_v11, %v14901_v60  ;;  %vm7684_vm2 = vmor %vm7682_vm7, %vm7683_vm6 }
0x188c   : > { %v7678_v21 = vmul.f32 %v10104_v12, %v7677_v31  ;;  %v7675_v43 = vsel %vm7674_vm5, %v10102_v41, %v7671_v34  ;;  %v14904_v41 = vld [vmem:[#allocation12_spill] sm:$0xff] }
0x188d   : > { %v13871_v46 = vadd.f32 %v13701_v8, %v7471_v9  ;;  %v7826_v37 = vmul.f32 %v7675_v43, %v13758_v27  ;;  %v6038_v33 = vadd.f32 %v14904_v41, %v4603_v39 }
0x188e   : > { %v7679_v54 = vmul.f32 0.5, %v7678_v21 }
0x188f   : > { %v7532_v23 = vsel %vm913_vm3, %v13871_v46, 0.0  ;;  %v7843_v20 = vmul.f32 %v13876_v42, %v7826_v37 }
0x1890   : > { %v7680_v0 = vsub.f32 1.5, %v7679_v54  ;;  %7533 = vadd.xlane.f32.xlu1 %v7532_v23 }
0x1891   : > { %v13892_v5 = vadd.f32 %v13886_v61, %v7843_v20 }
0x1892   : > { %v7681_v57 = vmul.f32 %v10104_v12, %v7680_v0  ;;  %v7454_v3 = vpop.f32.mrf.mxu2 }
0x1893   : > { %v7472_v48 = vadd.f32 %v7454_v3, %v6038_v33 }
0x1894   : > { %v7594_v13 = vpop.xlane.xlu0 %7593  ;;  %v7685_v38 = vsel %vm7684_vm2, %v10104_v12, %v7681_v57 }
0x1895   : > { %v7636_v45 = vmul.f32 %v7594_v13, %v14891_v63  ;;  %v7827_v35 = vmul.f32 %v7685_v38, %v13769_v19  ;;  %v13913_v60 = vadd.f32 %v13701_v8, %v7472_v48 }
0x1897   : > { %v7652_v27 = vadd.f32 1e-05, %v7636_v45  ;;  %v7844_v14 = vmul.f32 %v13876_v42, %v7827_v35  ;;  %v7535_v8 = vsel %vm913_vm3, %v13913_v60, 0.0 }
0x1899   : > { %10105 = vrsqrt.f32 %v7652_v27  ;;  %v13895_v53 = vadd.f32 %v13886_v61, %v7844_v14  ;;  %vm7692_vm9 = vweird.f32 %v7652_v27 }
0x189b   : > { %v7876_v56 = vpack.c.bf16 %v13895_v53, %v13892_v5 }
0x189c   : > { %v7597_v25 = vpop.xlane.xlu2 %7596 }
0x189d   : > { %v7637_v55 = vmul.f32 %v7597_v25, %v14891_v63  ;;  %9566 = vmatmul.msk.bf16.vlgmr.msra.gmra.mxu3 %vm913_vm3, %v7876_v56 }
0x189f   : > { %v10106_v59 = vpop.eup %10105  ;;  %v7653_v19 = vadd.f32 1e-05, %v7637_v55 }
0x18a0   : > { %v7687_v26 = vmul.f32 %v10106_v59, %v7652_v27  ;;  %vm7693_vm8 = vweird.f32 %v10106_v59 }
0x18a1   : > { %10107 = vrsqrt.f32 %v7653_v19  ;;  %vm7694_vm10 = vmor %vm7692_vm9, %vm7693_vm8  ;;  %vm7702_vm13 = vweird.f32 %v7653_v19 }
0x18a2   : > { %v7688_v51 = vmul.f32 %v10106_v59, %v7687_v26 }
0x18a3   : > { %v7516_v7 = vpop.xlane.xlu1 %7515 }
0x18a4   : > { %v7689_v15 = vmul.f32 0.5, %v7688_v51  ;;  %v7546_v17 = vmul.f32 %v7516_v7, %v14891_v63 }
0x18a6   : > { %v7690_v40 = vsub.f32 1.5, %v7689_v15  ;;  %v13905_v28 = vsub.f32 %v13793_v44, %v7546_v17 }
0x18a7   : > { %v10108_v16 = vpop.eup %10107 }
0x18a8   : > { %v7691_v10 = vmul.f32 %v10106_v59, %v7690_v40  ;;  %v7697_v18 = vmul.f32 %v10108_v16, %v7653_v19  ;;  %v7578_v62 = vmul.f32 %v13905_v28, %v13905_v28  ;;  %vm7703_vm11 = vweird.f32 %v10108_v16 }
0x18a9   : > { %vm7704_vm14 = vmor %vm7702_vm13, %vm7703_vm11 }
0x18aa   : > { %v7698_v47 = vmul.f32 %v10108_v16, %v7697_v18  ;;  %v7610_v12 = vsel %vm913_vm3, %v7578_v62, 0.0  ;;  %v7695_v44 = vsel %vm7694_vm10, %v10106_v59, %v7691_v10 }
0x18ab   : > { %7611 = vadd.xlane.f32.xlu0 %v7610_v12  ;;  %v7519_v34 = vpop.xlane.xlu0 %7518  ;;  %v7828_v43 = vmul.f32 %v7695_v44, %v13779_v2 }
0x18ac   : > { %v7699_v31 = vmul.f32 0.5, %v7698_v47  ;;  %v7547_v11 = vmul.f32 %v7519_v34, %v14891_v63 }
0x18ae   : > { %v7700_v9 = vsub.f32 1.5, %v7699_v31  ;;  %v13916_v21 = vsub.f32 %v13801_v30, %v7547_v11  ;;  %v7845_v30 = vmul.f32 %v13876_v42, %v7828_v43 }
0x18b0   : > { %v7701_v54 = vmul.f32 %v10108_v16, %v7700_v9  ;;  %v7579_v23 = vmul.f32 %v13916_v21, %v13916_v21  ;;  %v13929_v20 = vadd.f32 %v13886_v61, %v7845_v30 }
0x18b2   : > { %v7705_v0 = vsel %vm7704_vm14, %v10108_v16, %v7701_v54  ;;  %v7613_v37 = vsel %vm913_vm3, %v7579_v23, 0.0 }
0x18b3   : > { %v7829_v57 = vmul.f32 %v7705_v0, %v13786_v1  ;;  %7614 = vadd.xlane.f32.xlu2 %v7613_v37  ;;  %7536 = vadd.xlane.f32.xlu0 %v7535_v8 }
0x18b4   : > { %v7600_v13 = vpop.xlane.xlu2 %7599 }
0x18b5   : > { %v7638_v2 = vmul.f32 %v7600_v13, %v14891_v63  ;;  %v7846_v38 = vmul.f32 %v13876_v42, %v7829_v57 }
0x18b7   : > { %v7654_v45 = vadd.f32 1e-05, %v7638_v2  ;;  %v13932_v35 = vadd.f32 %v13886_v61, %v7846_v38 }
0x18b9   : > { %10109 = vrsqrt.f32 %v7654_v45  ;;  %v7877_v1 = vpack.c.bf16 %v13932_v35, %v13929_v20  ;;  %vm7712_vm0 = vweird.f32 %v7654_v45 }
0x18bb   : > { %9567 = vmatmul.msk.bf16.gmra.mxu3 %vm913_vm3, %v7877_v1 }
0x18bc   : > { %v7603_v27 = vpop.xlane.xlu1 %7602 }
0x18bd   : > { %v7639_v14 = vmul.f32 %v7603_v27, %v14891_v63 }
0x18bf   : > { %v10110_v56 = vpop.eup %10109  ;;  %v7655_v25 = vadd.f32 1e-05, %v7639_v14 }
0x18c0   : > { %v7707_v55 = vmul.f32 %v10110_v56, %v7654_v45  ;;  %vm7713_vm15 = vweird.f32 %v10110_v56 }
0x18c1   : > { %10111 = vrsqrt.f32 %v7655_v25  ;;  %vm7714_vm1 = vmor %vm7712_vm0, %vm7713_vm15  ;;  %vm7722_vm4 = vweird.f32 %v7655_v25 }
0x18c2   : > { %v7708_v59 = vmul.f32 %v10110_v56, %v7707_v55 }
0x18c3   : > { %v7522_v26 = vpop.xlane.xlu0 %7521 }
0x18c4   : > { %v7709_v19 = vmul.f32 0.5, %v7708_v59  ;;  %v7548_v51 = vmul.f32 %v7522_v26, %v14891_v63 }
0x18c6   : > { %v7710_v7 = vsub.f32 1.5, %v7709_v19  ;;  %v13940_v17 = vsub.f32 %v13821_v24, %v7548_v51 }
0x18c7   : > { %v10112_v15 = vpop.eup %10111 }
0x18c8   : > { %v7711_v50 = vmul.f32 %v10110_v56, %v7710_v7  ;;  %v7717_v32 = vmul.f32 %v10112_v15, %v7655_v25  ;;  %v7580_v39 = vmul.f32 %v13940_v17, %v13940_v17  ;;  %vm7723_vm12 = vweird.f32 %v10112_v15 }
0x18c9   : > { %vm7724_vm5 = vmor %vm7722_vm4, %vm7723_vm12 }
0x18ca   : > { %v7718_v40 = vmul.f32 %v10112_v15, %v7717_v32  ;;  %v7616_v16 = vsel %vm913_vm3, %v7580_v39, 0.0  ;;  %v7715_v41 = vsel %vm7714_vm1, %v10110_v56, %v7711_v50 }
0x18cb   : > { %v7525_v3 = vpop.xlane.xlu2 %7524  ;;  %7617 = vadd.xlane.f32.xlu2 %v7616_v16  ;;  %v7830_v24 = vmul.f32 %v7715_v41, %v13807_v49 }
0x18cc   : > { %v7719_v33 = vmul.f32 0.5, %v7718_v40  ;;  %v7549_v10 = vmul.f32 %v7525_v3, %v14891_v63 }
0x18cd   : > { %v7847_v31 = vmul.f32 %v13876_v42, %v7830_v24 }
0x18ce   : > { %v7720_v18 = vsub.f32 1.5, %v7719_v33  ;;  %v13948_v62 = vsub.f32 %v13829_v58, %v7549_v10 }
0x18cf   : > { %v13957_v49 = vadd.f32 %v13886_v61, %v7847_v31 }
0x18d0   : > { %v7721_v48 = vmul.f32 %v10112_v15, %v7720_v18  ;;  %v7581_v47 = vmul.f32 %v13948_v62, %v13948_v62 }
0x18d2   : > { %v7725_v12 = vsel %vm7724_vm5, %v10112_v15, %v7721_v48  ;;  %v7619_v44 = vsel %vm913_vm3, %v7581_v47, 0.0 }
0x18d3   : > { %v7831_v34 = vmul.f32 %v7725_v12, %v13814_v36  ;;  %7620 = vadd.xlane.f32.xlu1 %v7619_v44 }
0x18d4   : > { %v7606_v43 = vpop.xlane.xlu1 %7605 }
0x18d5   : > { %v7848_v11 = vmul.f32 %v13876_v42, %v7831_v34  ;;  %v7640_v30 = vmul.f32 %v7606_v43, %v14891_v63  ;;  %v14002_v34 = vperm.slane %v13882_v29, 1 }
0x18d7   : > { %v13960_v58 = vadd.f32 %v13886_v61, %v7848_v11  ;;  %v7656_v38 = vadd.f32 1e-05, %v7640_v30 }
0x18d9   : > { %v7878_v9 = vpack.c.bf16 %v13960_v58, %v13957_v49  ;;  %10113 = vrsqrt.f32 %v7656_v38  ;;  %vm7732_vm7 = vweird.f32 %v7656_v38 }
0x18db   : > { %v7528_v54 = vpop.xlane.xlu2 %7527  ;;  %9568 = vmatmul.msk.bf16.gmra.mxu3 %vm913_vm3, %v7878_v9 }
0x18dc   : > { %v7550_v36 = vmul.f32 %v7528_v54, %v14891_v63 }
0x18de   : > { %v13967_v23 = vsub.f32 %v13842_v6, %v7550_v36 }
0x18df   : > { %v10114_v45 = vpop.eup %10113 }
0x18e0   : > { %v7582_v0 = vmul.f32 %v13967_v23, %v13967_v23  ;;  %v7727_v1 = vmul.f32 %v10114_v45, %v7656_v38  ;;  %vm7733_vm6 = vweird.f32 %v10114_v45 }
0x18e1   : > { %vm7734_vm2 = vmor %vm7732_vm7, %vm7733_vm6 }
0x18e2   : > { %v7622_v37 = vsel %vm913_vm3, %v7582_v0, 0.0  ;;  %v7728_v27 = vmul.f32 %v10114_v45, %v7727_v1 }
0x18e3   : > { %v7531_v8 = vpop.xlane.xlu1 %7530  ;;  %7623 = vadd.xlane.f32.xlu0 %v7622_v37 }
0x18e4   : > { %v7551_v57 = vmul.f32 %v7531_v8, %v14891_v63  ;;  %v7729_v55 = vmul.f32 0.5, %v7728_v27 }
0x18e6   : > { %v13975_v13 = vsub.f32 %v13850_v4, %v7551_v57  ;;  %v7730_v59 = vsub.f32 1.5, %v7729_v55 }
0x18e8   : > { %v7583_v2 = vmul.f32 %v13975_v13, %v13975_v13  ;;  %v7731_v51 = vmul.f32 %v10114_v45, %v7730_v59 }
0x18ea   : > { %v7625_v6 = vsel %vm913_vm3, %v7583_v2, 0.0  ;;  %v7735_v39 = vsel %vm7734_vm2, %v10114_v45, %v7731_v51 }
0x18eb   : > { %7626 = vadd.xlane.f32.xlu2 %v7625_v6  ;;  %v7832_v33 = vmul.f32 %v7735_v39, %v13835_v22 }
0x18ed   : > { %v7849_v18 = vmul.f32 %v13876_v42, %v7832_v33 }
0x18ef   : > { %v13993_v48 = vadd.f32 %v13886_v61, %v7849_v18 }
0x18f9   : > { %v7609_v14 = vpop.xlane.xlu0 %7608 }
0x18fa   : > { %v7641_v56 = vmul.f32 %v7609_v14, %v14891_v63 }
0x18fc   : > { %v7657_v25 = vadd.f32 1e-05, %v7641_v56 }
0x18fe   : > { %10115 = vrsqrt.f32 %v7657_v25  ;;  %vm7742_vm9 = vweird.f32 %v7657_v25 }
0x1903   : > { %v7534_v4 = vpop.xlane.xlu1 %7533 }
0x1904   : > { %v10116_v19 = vpop.eup %10115  ;;  %v7552_v26 = vmul.f32 %v7534_v4, %v14891_v63 }
0x1905   : > { %v7737_v7 = vmul.f32 %v10116_v19, %v7657_v25  ;;  %vm7743_vm8 = vweird.f32 %v10116_v19 }
0x1906   : > { %v13983_v15 = vsub.f32 %v13871_v46, %v7552_v26  ;;  %vm7744_vm10 = vmor %vm7742_vm9, %vm7743_vm8 }
0x1907   : > { %v7738_v50 = vmul.f32 %v10116_v19, %v7737_v7 }
0x1908   : > { %v7584_v32 = vmul.f32 %v13983_v15, %v13983_v15 }
0x1909   : > { %v7739_v40 = vmul.f32 0.5, %v7738_v50 }
0x190a   : > { %v7628_v16 = vsel %vm913_vm3, %v7584_v32, 0.0 }
0x190b   : > { %v7740_v41 = vsub.f32 1.5, %v7739_v40  ;;  %7629 = vadd.xlane.f32.xlu1 %v7628_v16 }
0x190d   : > { %v7741_v3 = vmul.f32 %v10116_v19, %v7740_v41 }
0x190f   : > { %v7745_v46 = vsel %vm7744_vm10, %v10116_v19, %v7741_v3 }
0x1910   : > { %v7833_v10 = vmul.f32 %v7745_v46, %v13864_v52 }
0x1912   : > { %v7850_v24 = vmul.f32 %v13876_v42, %v7833_v10 }
0x1914   : > { %v13996_v47 = vadd.f32 %v13886_v61, %v7850_v24 }
0x1916   : > { %v7879_v12 = vpack.c.bf16 %v13996_v47, %v13993_v48 }
0x1918   : > { %9569 = vmatmul.msk.bf16.gmra.mxu3 %vm913_vm3, %v7879_v12 }
0x191e   : > { %v7612_v22 = vpop.xlane.xlu0 %7611 }
0x191f   : > { %v7642_v52 = vmul.f32 %v7612_v22, %v14891_v63 }
0x1920   : > { %v7934_v31 = vpop.f32.mrf.mxu3 }
0x1921   : > { %v7658_v44 = vadd.f32 1e-05, %v7642_v52  ;;  %v14006_v11 = vadd.f32 %v7934_v31, %v14002_v34 }
0x1923   : > { %10117 = vrsqrt.f32 %v7658_v44  ;;  %v14009_v9 = vmul.f32 0.70710677, %v14006_v11  ;;  %vm7752_vm13 = vweird.f32 %v7658_v44 }
0x1925   : > { %v8006_v43 = vmul.f32 %v14009_v9, %v14009_v9 }
0x1926   : > { %v7615_v54 = vpop.xlane.xlu2 %7614  ;;  %v7537_v36 = vpop.xlane.xlu0 %7536 }
0x1927   : > { %v7643_v0 = vmul.f32 %v7615_v54, %v14891_v63  ;;  %v7553_v29 = vmul.f32 %v7537_v36, %v14891_v63  ;;  %v14015_v37 = vmin.f32 %v8006_v43, 16.0 }
0x1928   : > { %v7936_v2 = vpop.f32.mrf.mxu3 }
0x1929   : > { %v10118_v8 = vpop.eup %10117  ;;  %v7659_v57 = vadd.f32 1e-05, %v7643_v0  ;;  %v14018_v30 = vsub.f32 %v13913_v60, %v7553_v29  ;;  %v8008_v6 = vmul.f32 2.1237322e-06, %v14015_v37  ;;  %v8019_v45 = vmul.f32 3.8918573e-05, %v14015_v37 }
0x192a   : > { %v7747_v38 = vmul.f32 %v10118_v8, %v7658_v44  ;;  %v14023_v1 = vadd.f32 %v7936_v2, %v14002_v34  ;;  %vm7753_vm11 = vweird.f32 %v10118_v8 }
0x192b   : > { %10119 = vrsqrt.f32 %v7659_v57  ;;  %v7585_v27 = vmul.f32 %v14018_v30, %v14018_v30  ;;  %v8009_v56 = vadd.f32 0.00028619796, %v8008_v6  ;;  %v8020_v25 = vadd.f32 0.001143296, %v8019_v45  ;;  %vm7754_vm14 = vmor %vm7752_vm13, %vm7753_vm11 }
0x192c   : > { %v7748_v14 = vmul.f32 %v10118_v8, %v7747_v38  ;;  %v14028_v55 = vmul.f32 0.70710677, %v14023_v1  ;;  %vm7762_vm0 = vweird.f32 %v7659_v57 }
0x192d   : > { %v7631_v60 = vsel %vm913_vm3, %v7585_v27, 0.0  ;;  %v8010_v4 = vmul.f32 %v8009_v56, %v14015_v37  ;;  %v8021_v19 = vmul.f32 %v8020_v25, %v14015_v37 }
0x192e   : > { %v7749_v59 = vmul.f32 0.5, %v7748_v14  ;;  %7632 = vadd.xlane.f32.xlu0 %v7631_v60  ;;  %v8046_v26 = vmul.f32 %v14028_v55, %v14028_v55 }
0x192f   : > { %v8022_v7 = vadd.f32 0.014752088, %v8021_v19  ;;  %v8011_v32 = vadd.f32 0.0036580483, %v8010_v4 }
0x1930   : > { %v7750_v51 = vsub.f32 1.5, %v7749_v59  ;;  %v14035_v39 = vmin.f32 %v8046_v26, 16.0 }
0x1931   : > { %v10120_v50 = vpop.eup %10119  ;;  %v8023_v40 = vmul.f32 %v8022_v7, %v14015_v37  ;;  %v8012_v18 = vmul.f32 %v8011_v32, %v14015_v37 }
0x1932   : > { %v7757_v16 = vmul.f32 %v10120_v50, %v7659_v57  ;;  %v7751_v41 = vmul.f32 %v10118_v8, %v7750_v51  ;;  %v8048_v33 = vmul.f32 2.1237322e-06, %v14035_v39  ;;  %v8059_v3 = vmul.f32 3.8918573e-05, %v14035_v39 }
0x1933   : > { %v8024_v46 = vadd.f32 0.112945676, %v8023_v40  ;;  %vm7763_vm15 = vweird.f32 %v10120_v50  ;;  %v8013_v29 = vadd.f32 0.05243302, %v8012_v18 }
0x1934   : > { %v7758_v10 = vmul.f32 %v10120_v50, %v7757_v16  ;;  %v8049_v24 = vadd.f32 0.00028619796, %v8048_v33  ;;  %v8060_v12 = vadd.f32 0.001143296, %v8059_v3  ;;  %v7755_v31 = vsel %vm7754_vm14, %v10118_v8, %v7751_v41  ;;  %vm7764_vm1 = vmor %vm7762_vm0, %vm7763_vm15  ;;  %v9667_v3 = vld [vmem:[%s14640_s13 + $0x8] sm:$0xff] }
0x1935   : > { %v8025_v22 = vmul.f32 %v8024_v46, %v14015_v37  ;;  %v7834_v44 = vmul.f32 %v7755_v31, %v13905_v28  ;;  %v8014_v25 = vmul.f32 %v8013_v29, %v14015_v37  ;;  %8733 = vmatpush.bf16.msrb.mxu0 %v9667_v3  ;;  %v9666_v31 = vld [vmem:[%s14640_s13] sm:$0xff] }
0x1936   : > { %v7759_v52 = vmul.f32 0.5, %v7758_v10  ;;  %v8050_v43 = vmul.f32 %v8049_v24, %v14035_v39  ;;  %v8061_v54 = vmul.f32 %v8060_v12, %v14035_v39 }
0x1937   : > { %v8026_v36 = vadd.f32 0.4994258, %v8025_v22  ;;  %v7851_v28 = vmul.f32 %v13876_v42, %v7834_v44  ;;  %v8015_v32 = vadd.f32 0.18741608, %v8014_v25 }
0x1938   : > { %v7760_v0 = vsub.f32 1.5, %v7759_v52  ;;  %v8051_v2 = vadd.f32 0.0036580483, %v8050_v43  ;;  %v8062_v38 = vadd.f32 0.014752088, %v8061_v54 }
0x1939   : > { %v8027_v6 = vmul.f32 %v8026_v36, %v14015_v37  ;;  %v14063_v41 = vadd.f32 %v13886_v61, %v7851_v28  ;;  %v8016_v43 = vmul.f32 %v8015_v32, %v14015_v37  ;;  %8734 = vmatpush.bf16.msrb.mxu0 %v9666_v31 }
0x193a   : > { %v7761_v45 = vmul.f32 %v10120_v50, %v7760_v0  ;;  %v8052_v27 = vmul.f32 %v8051_v2, %v14035_v39  ;;  %v8063_v8 = vmul.f32 %v8062_v38, %v14035_v39 }
0x193b   : > { %v8028_v14 = vadd.f32 1.0, %v8027_v6  ;;  %v8017_v25 = vadd.f32 1.1283791, %v8016_v43 }
0x193c   : > { %v7765_v56 = vsel %vm7764_vm1, %v10120_v50, %v7761_v45  ;;  %v8064_v59 = vadd.f32 0.112945676, %v8063_v8  ;;  %v8053_v19 = vadd.f32 0.05243302, %v8052_v27 }
0x193d   : > { %v7835_v60 = vmul.f32 %v7765_v56, %v13916_v21  ;;  %10121 = vrcp.f32 %v8028_v14  ;;  %v8038_v38 = vand.u32 2147483647, %v8028_v14  ;;  %v8040_v44 = vand.u32 2147483648, %v8028_v14 }
0x193e   : > { %v7939_v4 = vpop.f32.mrf.mxu3  ;;  %v8065_v26 = vmul.f32 %v8064_v59, %v14035_v39  ;;  %v7618_v51 = vpop.xlane.xlu2 %7617  ;;  %v8054_v46 = vmul.f32 %v8053_v19, %v14035_v39  ;;  %vm8034_vm4 = vweird.f32 %v8028_v14 }
0x193f   : > { %v14053_v57 = vadd.f32 %v7939_v4, %v14002_v34  ;;  %v7644_v7 = vmul.f32 %v7618_v51, %v14891_v63  ;;  %v7852_v50 = vmul.f32 %v13876_v42, %v7835_v60  ;;  %vm8039_vm6 = vcmp.eq.f32.partialorder %v8038_v38, 8.507059e+37 }
0x1940   : > { %v8066_v40 = vadd.f32 0.4994258, %v8065_v26  ;;  %v8055_v29 = vadd.f32 0.18741608, %v8054_v46  ;;  %v8041_v51 = vor.u32 1.1754944e-38, %v8040_v44  ;;  %v8018_v46 = vmul.f32 %v8017_v25, %v14009_v9 }
0x1941   : > { %v14058_v21 = vmul.f32 0.70710677, %v14053_v57  ;;  %v14060_v16 = vadd.f32 1e-05, %v7644_v7  ;;  %v14066_v33 = vadd.f32 %v13886_v61, %v7852_v50 }
0x1942   : > { %v8067_v10 = vmul.f32 %v8066_v40, %v14035_v39  ;;  %v8056_v28 = vmul.f32 %v8055_v29, %v14035_v39  ;;  %v14109_v39 = vmul.f32 0.5, %v14006_v11 }
0x1943   : > { %v10122_v18 = vpop.eup %10121  ;;  %v8086_v24 = vmul.f32 %v14058_v21, %v14058_v21  ;;  %10123 = vrsqrt.f32 %v14060_v16  ;;  %v7880_v12 = vpack.c.bf16 %v14066_v33, %v14063_v41  ;;  %vm7772_vm8 = vweird.f32 %v14060_v16 }
0x1944   : > { %v8030_v22 = vmul.f32 %v10122_v18, %v8028_v14  ;;  %v14078_v52 = vadd.f32 1.0, %v8067_v10  ;;  %vm8035_vm12 = vweird.f32 %v10122_v18 }
0x1945   : > { %v14084_v54 = vmin.f32 %v8086_v24, 16.0  ;;  %9570 = vmatmul.msk.bf16.gmra.mxu3 %vm913_vm3, %v7880_v12  ;;  %vm8036_vm5 = vmor %vm8034_vm4, %vm8035_vm12  ;;  %v8057_v12 = vadd.f32 1.1283791, %v8056_v28 }
0x1946   : > { %v7941_v36 = vpop.f32.mrf.mxu3  ;;  %v8031_v0 = vsub.f32 1.0, %v8030_v22  ;;  %10125 = vrcp.f32 %v14078_v52  ;;  %v7621_v2 = vpop.xlane.xlu1 %7620  ;;  %vm8074_vm9 = vweird.f32 %v14078_v52 }
0x1947   : > { %v8088_v6 = vmul.f32 2.1237322e-06, %v14084_v54  ;;  %v7645_v45 = vmul.f32 %v7621_v2, %v14891_v63  ;;  %v8099_v37 = vmul.f32 3.8918573e-05, %v14084_v54  ;;  %v14092_v8 = vadd.f32 %v7941_v36, %v14002_v34 }
0x1948   : > { %v8032_v27 = vmul.f32 %v10122_v18, %v8031_v0  ;;  %v8080_v36 = vand.u32 2147483648, %v14078_v52 }
0x1949   : > { %v14094_v56 = vpop.eup %10123  ;;  %v8089_v60 = vadd.f32 0.00028619796, %v8088_v6  ;;  %v14096_v59 = vadd.f32 1e-05, %v7645_v45  ;;  %v8100_v19 = vadd.f32 0.001143296, %v8099_v37  ;;  %v8058_v45 = vmul.f32 %v8057_v12, %v14028_v55 }
0x194a   : > { %v8033_v4 = vadd.f32 %v10122_v18, %v8032_v27  ;;  %v7767_v26 = vmul.f32 %v14094_v56, %v14060_v16  ;;  %v14106_v3 = vmul.f32 0.70710677, %v14092_v8  ;;  %vm7773_vm7 = vweird.f32 %v14094_v56 }
0x194b   : > { %v8090_v7 = vmul.f32 %v8089_v60, %v14084_v54  ;;  %10127 = vrsqrt.f32 %v14096_v59  ;;  %v8101_v14 = vmul.f32 %v8100_v19, %v14084_v54  ;;  %v8078_v6 = vand.u32 2147483647, %v14078_v52  ;;  %vm14129_vm10 = vmor %vm7772_vm8, %vm7773_vm7 }
0x194c   : > { %v10126_v50 = vpop.eup %10125  ;;  %v8037_v32 = vsel %vm8036_vm5, %v10122_v18, %v8033_v4  ;;  %v7768_v40 = vmul.f32 %v14094_v56, %v7767_v26  ;;  %v8126_v18 = vmul.f32 %v14106_v3, %v14106_v3  ;;  %v8081_v55 = vor.u32 1.1754944e-38, %v8080_v36 }
0x194d   : > { %v8042_v10 = vsel %vm8039_vm6, %v8041_v51, %v8037_v32  ;;  %v8070_v24 = vmul.f32 %v10126_v50, %v14078_v52  ;;  %v8102_v22 = vadd.f32 0.014752088, %v8101_v14  ;;  %v8091_v0 = vadd.f32 0.0036580483, %v8090_v7 }
0x194e   : > { %v7769_v31 = vmul.f32 0.5, %v7768_v40  ;;  %v8043_v29 = vmul.f32 %v8042_v10, %v8018_v46  ;;  %v14118_v9 = vmin.f32 %v8126_v18, 16.0  ;;  %vm8075_vm2 = vweird.f32 %v10126_v50 }
0x194f   : > { %v8071_v43 = vsub.f32 1.0, %v8070_v24  ;;  %v8103_v11 = vmul.f32 %v8102_v22, %v14084_v54  ;;  %v8092_v4 = vmul.f32 %v8091_v0, %v14084_v54  ;;  %vm8076_vm11 = vmor %vm8074_vm9, %vm8075_vm2  ;;  %vm8079_vm13 = vcmp.eq.f32.partialorder %v8078_v6, 8.507059e+37 }
0x1950   : > { %v7770_v2 = vsub.f32 1.5, %v7769_v31  ;;  %v8128_v16 = vmul.f32 2.1237322e-06, %v14118_v9  ;;  %v9574_v19 = vclamps-f32 %v8043_v29, 1.0  ;;  %v8139_v24 = vmul.f32 3.8918573e-05, %v14118_v9 }
0x1951   : > { %v10128_v38 = vpop.eup %10127  ;;  %v8072_v44 = vmul.f32 %v10126_v50, %v8071_v43  ;;  %v8104_v27 = vadd.f32 0.112945676, %v8103_v11  ;;  %v8093_v22 = vadd.f32 0.05243302, %v8092_v4  ;;  %vm7782_vm15 = vweird.f32 %v14096_v59 }
0x1952   : > { %v7771_v37 = vmul.f32 %v14094_v56, %v7770_v2  ;;  %v7777_v25 = vmul.f32 %v10128_v38, %v14096_v59  ;;  %v8129_v32 = vadd.f32 0.00028619796, %v8128_v16  ;;  %v8646_v43 = vadd.f32 1.0, %v9574_v19 }
0x1953   : > { %v8073_v60 = vadd.f32 %v10126_v50, %v8072_v44  ;;  %v8105_v26 = vmul.f32 %v8104_v27, %v14084_v54  ;;  %v8140_v0 = vadd.f32 0.001143296, %v8139_v24  ;;  %vm7783_vm14 = vweird.f32 %v10128_v38 }
0x1954   : > { %v7778_v51 = vmul.f32 %v10128_v38, %v7777_v25  ;;  %v7775_v52 = vsel %vm14129_vm10, %v14094_v56, %v7771_v37  ;;  %v8130_v31 = vmul.f32 %v8129_v32, %v14118_v9  ;;  %v7975_v27 = vmul.f32 0.5, %v14023_v1  ;;  %vm7784_vm0 = vmor %vm7782_vm15, %vm7783_vm14 }
0x1955   : > { %v8077_v7 = vsel %vm8076_vm11, %v10126_v50, %v8073_v60  ;;  %v8106_v46 = vadd.f32 0.4994258, %v8105_v26  ;;  %v7836_v56 = vmul.f32 %v7775_v52, %v13940_v17  ;;  %v8141_v6 = vmul.f32 %v8140_v0, %v14118_v9 }
0x1956   : > { %v7624_v14 = vpop.xlane.xlu0 %7623  ;;  %v8082_v40 = vsel %vm8079_vm13, %v8081_v55, %v8077_v7  ;;  %v7779_v10 = vmul.f32 0.5, %v7778_v51  ;;  %v8131_v11 = vadd.f32 0.0036580483, %v8130_v31  ;;  %v8662_v25 = vmul.f32 %v8646_v43, %v14109_v39 }
0x1957   : > { %v8083_v12 = vmul.f32 %v8082_v40, %v8058_v45  ;;  %v7646_v18 = vmul.f32 %v7624_v14, %v14891_v63  ;;  %v8107_v50 = vmul.f32 %v8106_v46, %v14084_v54  ;;  %v8094_v60 = vmul.f32 %v8093_v22, %v14084_v54 }
0x1958   : > { %v7780_v36 = vsub.f32 1.5, %v7779_v10  ;;  %v8132_v28 = vmul.f32 %v8131_v11, %v14118_v9  ;;  %v8142_v16 = vadd.f32 0.014752088, %v8141_v6  ;;  %v7853_v1 = vmul.f32 %v13876_v42, %v7836_v56 }
0x1959   : > { %v9575_v29 = vclamps-f32 %v8083_v12, 1.0  ;;  %v14143_v2 = vadd.f32 1.0, %v8107_v50  ;;  %v14146_v45 = vadd.f32 1e-05, %v7646_v18  ;;  %v8095_v52 = vadd.f32 0.18741608, %v8094_v60 }
0x195a   : > { %v7781_v44 = vmul.f32 %v10128_v38, %v7780_v36  ;;  %v8143_v39 = vmul.f32 %v8142_v16, %v14118_v9  ;;  %v8133_v32 = vadd.f32 0.05243302, %v8132_v28  ;;  %v14172_v10 = vadd.f32 %v13886_v61, %v7853_v1 }
0x195b   : > { %v8647_v37 = vadd.f32 1.0, %v9575_v29  ;;  %10129 = vrcp.f32 %v14143_v2  ;;  %v8096_v11 = vmul.f32 %v8095_v52, %v14084_v54  ;;  %vm8114_vm12 = vweird.f32 %v14143_v2 }
0x195c   : > { %v7785_v4 = vsel %vm7784_vm0, %v10128_v38, %v7781_v44  ;;  %10131 = vrsqrt.f32 %v14146_v45  ;;  %v8144_v14 = vadd.f32 0.112945676, %v8143_v39  ;;  %v8134_v36 = vmul.f32 %v8133_v32, %v14118_v9 }
0x195d   : > { %v8663_v17 = vmul.f32 %v8647_v37, %v7975_v27  ;;  %v7837_v26 = vmul.f32 %v7785_v4, %v13948_v62  ;;  %v8097_v16 = vadd.f32 1.1283791, %v8096_v11  ;;  %v8120_v39 = vand.u32 2147483648, %v14143_v2 }
0x195e   : > { %v7944_v19 = vpop.f32.mrf.mxu3  ;;  %v7627_v55 = vpop.xlane.xlu2 %7626  ;;  %v8145_v22 = vmul.f32 %v8144_v14, %v14118_v9  ;;  %vm7792_vm6 = vweird.f32 %v14146_v45 }
0x195f   : > { %v8678_v59 = vpack.c.bf16 %v8663_v17, %v8662_v25  ;;  %v14159_v51 = vadd.f32 %v7944_v19, %v14002_v34  ;;  %v7647_v7 = vmul.f32 %v7627_v55, %v14891_v63  ;;  %v7854_v38 = vmul.f32 %v13876_v42, %v7837_v26 }
0x1960   : > { %v8146_v0 = vadd.f32 0.4994258, %v8145_v22  ;;  %v8135_v17 = vadd.f32 0.18741608, %v8134_v36  ;;  %v8121_v36 = vor.u32 1.1754944e-38, %v8120_v39 }
0x1961   : > { %9598 = vmatmul.msk.bf16.vlgmr.msrb.gmra.mxu0 %vm913_vm3, %v8678_v59  ;;  %v14164_v62 = vpop.eup %10129  ;;  %v14167_v40 = vmul.f32 0.70710677, %v14159_v51  ;;  %v14169_v46 = vadd.f32 1e-05, %v7647_v7  ;;  %v14175_v24 = vadd.f32 %v13886_v61, %v7854_v38  ;;  %v8118_v59 = vand.u32 2147483647, %v14143_v2 }
0x1962   : > { %v8110_v12 = vmul.f32 %v14164_v62, %v14143_v2  ;;  %v14180_v31 = vpop.eup %10131  ;;  %v8147_v27 = vmul.f32 %v8146_v0, %v14118_v9  ;;  %vm8115_vm1 = vweird.f32 %v14164_v62  ;;  %v8136_v38 = vmul.f32 %v8135_v17, %v14118_v9 }
0x1963   : > { %v8166_v18 = vmul.f32 %v14167_v40, %v14167_v40  ;;  %10133 = vrsqrt.f32 %v14169_v46  ;;  %v7881_v43 = vpack.c.bf16 %v14175_v24, %v14172_v10  ;;  %v7787_v29 = vmul.f32 %v14180_v31, %v14146_v45  ;;  %vm14217_vm5 = vmor %vm8114_vm12, %vm8115_vm1 }
0x1964   : > { %v8111_v50 = vsub.f32 1.0, %v8110_v12  ;;  %v14201_v4 = vadd.f32 1.0, %v8147_v27  ;;  %vm7793_vm4 = vweird.f32 %v14180_v31  ;;  %vm8119_vm7 = vcmp.eq.f32.partialorder %v8118_v59, 8.507059e+37 }
0x1965   : > { %v14191_v44 = vmin.f32 %v8166_v18, 16.0  ;;  %9571 = vmatmul.msk.bf16.gmra.mxu3 %vm913_vm3, %v7881_v43  ;;  %v7788_v37 = vmul.f32 %v14180_v31, %v7787_v29  ;;  %vm14229_vm2 = vmor %vm7792_vm6, %vm7793_vm4  ;;  %vm7802_vm8 = vweird.f32 %v14169_v46  ;;  %v8137_v29 = vadd.f32 1.1283791, %v8136_v38 }
0x1966   : > { %v7946_v56 = vpop.f32.mrf.mxu3  ;;  %v8112_v6 = vmul.f32 %v14164_v62, %v8111_v50  ;;  %10135 = vrcp.f32 %v14201_v4  ;;  %v8098_v50 = vmul.f32 %v8097_v16, %v14058_v21  ;;  %v8158_v27 = vand.u32 2147483647, %v14201_v4 }
0x1967   : > { %v14198_v25 = vadd.f32 %v7946_v56, %v14002_v34  ;;  %v8179_v60 = vmul.f32 3.8918573e-05, %v14191_v44  ;;  %v7789_v28 = vmul.f32 0.5, %v7788_v37  ;;  %v8168_v19 = vmul.f32 2.1237322e-06, %v14191_v44 }
0x1968   : > { %v8113_v26 = vadd.f32 %v14164_v62, %v8112_v6  ;;  %v8160_v59 = vand.u32 2147483648, %v14201_v4  ;;  %v8138_v14 = vmul.f32 %v8137_v29, %v14106_v3  ;;  %vm8154_vm13 = vweird.f32 %v14201_v4 }
0x1969   : > { %v10134_v54 = vpop.eup %10133  ;;  %v8180_v55 = vadd.f32 0.001143296, %v8179_v60  ;;  %v14208_v1 = vmul.f32 0.70710677, %v14198_v25  ;;  %v7790_v7 = vsub.f32 1.5, %v7789_v28  ;;  %vm8159_vm15 = vcmp.eq.f32.partialorder %v8158_v27, 8.507059e+37 }
0x196a   : > { %v7797_v32 = vmul.f32 %v10134_v54, %v14169_v46  ;;  %v8169_v22 = vadd.f32 0.00028619796, %v8168_v19  ;;  %v8117_v2 = vsel %vm14217_vm5, %v14164_v62, %v8113_v26  ;;  %vm7803_vm9 = vweird.f32 %v10134_v54 }
0x196b   : > { %v8181_v52 = vmul.f32 %v8180_v55, %v14191_v44  ;;  %v7791_v12 = vmul.f32 %v14180_v31, %v7790_v7  ;;  %v8206_v43 = vmul.f32 %v14208_v1, %v14208_v1  ;;  %v8122_v6 = vsel %vm8119_vm7, %v8121_v36, %v8117_v2  ;;  %vm7804_vm11 = vmor %vm7802_vm8, %vm7803_vm9 }
0x196c   : > { %v7798_v18 = vmul.f32 %v10134_v54, %v7797_v32  ;;  %v10136_v45 = vpop.eup %10135  ;;  %v8170_v60 = vmul.f32 %v8169_v22, %v14191_v44  ;;  %v8123_v26 = vmul.f32 %v8122_v6, %v8098_v50 }
0x196d   : > { %v8182_v9 = vadd.f32 0.014752088, %v8181_v52  ;;  %v7795_v62 = vsel %vm14229_vm2, %v14180_v31, %v7791_v12  ;;  %v8150_v21 = vmul.f32 %v10136_v45, %v14201_v4  ;;  %v14240_v37 = vmin.f32 %v8206_v43, 16.0 }
0x196e   : > { %v7799_v11 = vmul.f32 0.5, %v7798_v18  ;;  %v7838_v19 = vmul.f32 %v7795_v62, %v13967_v23  ;;  %vm8155_vm10 = vweird.f32 %v10136_v45  ;;  %v8171_v2 = vadd.f32 0.0036580483, %v8170_v60 }
0x196f   : > { %v8183_v56 = vmul.f32 %v8182_v9, %v14191_v44  ;;  %v8151_v16 = vsub.f32 1.0, %v8150_v21  ;;  %v8208_v31 = vmul.f32 2.1237322e-06, %v14240_v37  ;;  %v8219_v55 = vmul.f32 3.8918573e-05, %v14240_v37  ;;  %vm8156_vm14 = vmor %vm8154_vm13, %vm8155_vm10 }
0x1970   : > { %v7800_v28 = vsub.f32 1.5, %v7799_v11  ;;  %v7855_v18 = vmul.f32 %v13876_v42, %v7838_v19  ;;  %v8161_v43 = vor.u32 1.1754944e-38, %v8160_v59  ;;  %v9576_v0 = vclamps-f32 %v8123_v26, 1.0 }
0x1971   : > { %v8184_v17 = vadd.f32 0.112945676, %v8183_v56  ;;  %v8152_v38 = vmul.f32 %v10136_v45, %v8151_v16  ;;  %v8209_v52 = vadd.f32 0.00028619796, %v8208_v31  ;;  %v8220_v32 = vadd.f32 0.001143296, %v8219_v55 }
0x1972   : > { %v7801_v7 = vmul.f32 %v10134_v54, %v7800_v28  ;;  %v14260_v11 = vadd.f32 %v13886_v61, %v7855_v18  ;;  %v8648_v60 = vadd.f32 1.0, %v9576_v0  ;;  %v7976_v28 = vmul.f32 0.5, %v14053_v57 }
0x1973   : > { %v8185_v39 = vmul.f32 %v8184_v17, %v14191_v44  ;;  %v8153_v22 = vadd.f32 %v10136_v45, %v8152_v38  ;;  %v8210_v46 = vmul.f32 %v8209_v52, %v14240_v37  ;;  %v8221_v36 = vmul.f32 %v8220_v32, %v14240_v37 }
0x1974   : > { %v7805_v12 = vsel %vm7804_vm11, %v10134_v54, %v7801_v7  ;;  %v7977_v16 = vmul.f32 0.5, %v14092_v8  ;;  %v8664_v59 = vmul.f32 %v8648_v60, %v7976_v28 }
0x1975   : > { %v8186_v23 = vadd.f32 0.4994258, %v8185_v39  ;;  %v7839_v9 = vmul.f32 %v7805_v12, %v13975_v13  ;;  %v8157_v3 = vsel %vm8156_vm14, %v10136_v45, %v8153_v22  ;;  %v8222_v62 = vadd.f32 0.014752088, %v8221_v36 }
0x1976   : > { %v8162_v54 = vsel %vm8159_vm15, %v8161_v43, %v8157_v3  ;;  %v8172_v13 = vmul.f32 %v8171_v2, %v14191_v44  ;;  %v8211_v21 = vadd.f32 0.0036580483, %v8210_v46 }
0x1977   : > { %v8187_v50 = vmul.f32 %v8186_v23, %v14191_v44  ;;  %v7856_v4 = vmul.f32 %v13876_v42, %v7839_v9  ;;  %v8163_v56 = vmul.f32 %v8162_v54, %v8138_v14  ;;  %v8223_v45 = vmul.f32 %v8222_v62, %v14240_v37 }
0x1978   : > { %v8173_v31 = vadd.f32 0.05243302, %v8172_v13  ;;  %v8212_v26 = vmul.f32 %v8211_v21, %v14240_v37 }
0x1979   : > { %v8188_v29 = vadd.f32 1.0, %v8187_v50  ;;  %v14263_v6 = vadd.f32 %v13886_v61, %v7856_v4  ;;  %v9577_v17 = vclamps-f32 %v8163_v56, 1.0  ;;  %v8224_v55 = vadd.f32 0.112945676, %v8223_v45 }
0x197a   : > { %v8174_v32 = vmul.f32 %v8173_v31, %v14191_v44  ;;  %v8213_v23 = vadd.f32 0.05243302, %v8212_v26 }
0x197b   : > { %10137 = vrcp.f32 %v8188_v29  ;;  %v7882_v27 = vpack.c.bf16 %v14263_v6, %v14260_v11  ;;  %v8649_v19 = vadd.f32 1.0, %v9577_v17  ;;  %v8225_v7 = vmul.f32 %v8224_v55, %v14240_v37 }
0x197c   : > { %v8175_v2 = vadd.f32 0.18741608, %v8174_v32  ;;  %v8214_v18 = vmul.f32 %v8213_v23, %v14240_v37  ;;  %v8200_v0 = vand.u32 2147483648, %v8188_v29  ;;  %vm8194_vm1 = vweird.f32 %v8188_v29 }
0x197d   : > { %9572 = vmatmul.msk.bf16.gmra.mxu3 %vm913_vm3, %v7882_v27  ;;  %v8665_v39 = vmul.f32 %v8649_v19, %v7977_v16  ;;  %v8226_v57 = vadd.f32 0.4994258, %v8225_v7  ;;  %v8198_v4 = vand.u32 2147483647, %v8188_v29 }
0x197e   : > { %v7630_v22 = vpop.xlane.xlu1 %7629  ;;  %v8176_v46 = vmul.f32 %v8175_v2, %v14191_v44  ;;  %v8215_v3 = vadd.f32 0.18741608, %v8214_v18  ;;  %v8201_v21 = vor.u32 1.1754944e-38, %v8200_v0 }
0x197f   : > { %v8679_v52 = vpack.c.bf16 %v8665_v39, %v8664_v59  ;;  %v8227_v8 = vmul.f32 %v8226_v57, %v14240_v37  ;;  %v7648_v50 = vmul.f32 %v7630_v22, %v14891_v63  ;;  %vm8199_vm4 = vcmp.eq.f32.partialorder %v8198_v4, 8.507059e+37 }
0x1980   : > { %v8177_v62 = vadd.f32 1.1283791, %v8176_v46  ;;  %v8216_v60 = vmul.f32 %v8215_v3, %v14240_v37  ;;  %v7979_v22 = vmul.f32 0.5, %v14198_v25 }
0x1981   : > { %v10138_v38 = vpop.eup %10137  ;;  %9599 = vmatmul.msk.bf16.gmra.mxu0 %vm913_vm3, %v8679_v52  ;;  %v8228_v43 = vadd.f32 1.0, %v8227_v8  ;;  %v14279_v54 = vadd.f32 1e-05, %v7648_v50 }
0x1982   : > { %v8190_v14 = vmul.f32 %v10138_v38, %v8188_v29  ;;  %vm8195_vm0 = vweird.f32 %v10138_v38  ;;  %v8178_v45 = vmul.f32 %v8177_v62, %v14167_v40  ;;  %v8217_v28 = vadd.f32 1.1283791, %v8216_v60 }
0x1983   : > { %10139 = vrcp.f32 %v8228_v43  ;;  %vm8196_vm12 = vmor %vm8194_vm1, %vm8195_vm0  ;;  %v8240_v16 = vand.u32 2147483648, %v8228_v43  ;;  %v8238_v31 = vand.u32 2147483647, %v8228_v43  ;;  %vm8234_vm6 = vweird.f32 %v8228_v43 }
0x1984   : > { %v8191_v12 = vsub.f32 1.0, %v8190_v14  ;;  %10141 = vrsqrt.f32 %v14279_v54  ;;  %v8218_v39 = vmul.f32 %v8217_v28, %v14208_v1  ;;  %v7978_v1 = vmul.f32 0.5, %v14159_v51 }
0x1985   : > { %v8241_v37 = vor.u32 1.1754944e-38, %v8240_v16  ;;  %vm8239_vm2 = vcmp.eq.f32.partialorder %v8238_v31, 8.507059e+37  ;;  %vm7812_vm9 = vweird.f32 %v14279_v54 }
0x1986   : > { %v8192_v9 = vmul.f32 %v10138_v38, %v8191_v12 }
0x1988   : > { %v8193_v36 = vadd.f32 %v10138_v38, %v8192_v9 }
0x1989   : > { %v10140_v13 = vpop.eup %10139 }
0x198a   : > { %v8197_v56 = vsel %vm8196_vm12, %v10138_v38, %v8193_v36  ;;  %v8230_v17 = vmul.f32 %v10140_v13, %v8228_v43  ;;  %vm8235_vm5 = vweird.f32 %v10140_v13  ;;  %v14284_v55 = vpop.eup %10141 }
0x198b   : > { %v8202_v44 = vsel %vm8199_vm4, %v8201_v21, %v8197_v56  ;;  %vm8236_vm7 = vmor %vm8234_vm6, %vm8235_vm5  ;;  %v7807_v40 = vmul.f32 %v14284_v55, %v14279_v54  ;;  %vm7813_vm8 = vweird.f32 %v14284_v55 }
0x198c   : > { %v8231_v27 = vsub.f32 1.0, %v8230_v17  ;;  %v8203_v29 = vmul.f32 %v8202_v44, %v8178_v45  ;;  %vm7814_vm10 = vmor %vm7812_vm9, %vm7813_vm8 }
0x198d   : > { %v7808_v8 = vmul.f32 %v14284_v55, %v7807_v40 }
0x198e   : > { %v8232_v19 = vmul.f32 %v10140_v13, %v8231_v27  ;;  %v9578_v59 = vclamps-f32 %v8203_v29, 1.0 }
0x198f   : > { %v7809_v0 = vmul.f32 0.5, %v7808_v8 }
0x1990   : > { %v8233_v26 = vadd.f32 %v10140_v13, %v8232_v19  ;;  %v8650_v23 = vadd.f32 1.0, %v9578_v59 }
0x1991   : > { %v7810_v60 = vsub.f32 1.5, %v7809_v0 }
0x1992   : > { %v8237_v7 = vsel %vm8236_vm7, %v10140_v13, %v8233_v26  ;;  %v8666_v50 = vmul.f32 %v8650_v23, %v7978_v1 }
0x1993   : > { %v8242_v38 = vsel %vm8239_vm2, %v8241_v37, %v8237_v7  ;;  %v7811_v29 = vmul.f32 %v14284_v55, %v7810_v60 }
0x1994   : > { %v8243_v32 = vmul.f32 %v8242_v38, %v8218_v39 }
0x1996   : > { %v9579_v57 = vclamps-f32 %v8243_v32, 1.0 }
0x1998   : > { %v8651_v2 = vadd.f32 1.0, %v9579_v57 }
0x199a   : > { %v8667_v46 = vmul.f32 %v8651_v2, %v7979_v22 }
0x199b   : > { %v7949_v52 = vpop.f32.mrf.mxu3 }
0x199c   : > { %v14290_v14 = vadd.f32 %v7949_v52, %v14002_v34  ;;  %v8680_v62 = vpack.c.bf16 %v8667_v46, %v8666_v50  ;;  %v7815_v52 = vsel %vm7814_vm10, %v14284_v55, %v7811_v29 }
0x199d   : > { %v7840_v54 = vmul.f32 %v7815_v52, %v13983_v15 }
0x199e   : > { %v14293_v12 = vmul.f32 0.70710677, %v14290_v14  ;;  %9600 = vmatmul.msk.bf16.gmra.mxu0 %vm913_vm3, %v8680_v62 }
0x19a0   : > { %v8246_v9 = vmul.f32 %v14293_v12, %v14293_v12 }
0x19a1   : > { %v7633_v18 = vpop.xlane.xlu0 %7632 }
0x19a2   : > { %v7649_v43 = vmul.f32 %v7633_v18, %v14891_v63  ;;  %v14301_v36 = vmin.f32 %v8246_v9, 16.0 }
0x19a3   : > { %v7951_v4 = vpop.f32.mrf.mxu3 }
0x19a4   : > { %v7665_v3 = vadd.f32 1e-05, %v7649_v43  ;;  %v8248_v56 = vmul.f32 2.1237322e-06, %v14301_v36  ;;  %v8259_v51 = vmul.f32 3.8918573e-05, %v14301_v36  ;;  %v14306_v25 = vadd.f32 %v7951_v4, %v14002_v34 }
0x19a6   : > { %10143 = vrsqrt.f32 %v7665_v3  ;;  %v8249_v13 = vadd.f32 0.00028619796, %v8248_v56  ;;  %v8260_v21 = vadd.f32 0.001143296, %v8259_v51  ;;  %v14310_v63 = vmul.f32 0.70710677, %v14306_v25 }
0x19a7   : > { %vm7822_vm13 = vweird.f32 %v7665_v3 }
0x19a8   : > { %v8261_v17 = vmul.f32 %v8260_v21, %v14301_v36  ;;  %v8286_v44 = vmul.f32 %v14310_v63, %v14310_v63  ;;  %v8250_v45 = vmul.f32 %v8249_v13, %v14301_v36  ;;  %v7857_v13 = vmul.f32 %v13876_v42, %v7840_v54 }
0x19aa   : > { %v8262_v27 = vadd.f32 0.014752088, %v8261_v17  ;;  %v14316_v16 = vmin.f32 %v8286_v44, 16.0  ;;  %v8251_v59 = vadd.f32 0.0036580483, %v8250_v45  ;;  %v14339_v44 = vadd.f32 %v13886_v61, %v7857_v13 }
0x19ac   : > { %v10144_v28 = vpop.eup %10143  ;;  %v8263_v19 = vmul.f32 %v8262_v27, %v14301_v36  ;;  %v8288_v26 = vmul.f32 2.1237322e-06, %v14316_v16  ;;  %v8299_v37 = vmul.f32 3.8918573e-05, %v14316_v16  ;;  %v8252_v1 = vmul.f32 %v8251_v59, %v14301_v36 }
0x19ad   : > { %v7817_v31 = vmul.f32 %v10144_v28, %v7665_v3  ;;  %vm7823_vm11 = vweird.f32 %v10144_v28 }
0x19ae   : > { %v8264_v39 = vadd.f32 0.112945676, %v8263_v19  ;;  %v8289_v38 = vadd.f32 0.00028619796, %v8288_v26  ;;  %v8300_v40 = vadd.f32 0.001143296, %v8299_v37  ;;  %vm7824_vm14 = vmor %vm7822_vm13, %vm7823_vm11 }
0x19af   : > { %v7818_v7 = vmul.f32 %v10144_v28, %v7817_v31  ;;  %v8253_v46 = vadd.f32 0.05243302, %v8252_v1 }
0x19b0   : > { %v8265_v32 = vmul.f32 %v8264_v39, %v14301_v36  ;;  %v8290_v57 = vmul.f32 %v8289_v38, %v14316_v16  ;;  %v8301_v8 = vmul.f32 %v8300_v40, %v14316_v16 }
0x19b1   : > { %v7819_v23 = vmul.f32 0.5, %v7818_v7  ;;  %v8254_v3 = vmul.f32 %v8253_v46, %v14301_v36 }
0x19b2   : > { %v8266_v22 = vadd.f32 0.4994258, %v8265_v32  ;;  %v8291_v9 = vadd.f32 0.0036580483, %v8290_v57  ;;  %v8302_v18 = vadd.f32 0.014752088, %v8301_v8 }
0x19b3   : > { %v7820_v2 = vsub.f32 1.5, %v7819_v23  ;;  %v8255_v29 = vadd.f32 0.18741608, %v8254_v3 }
0x19b4   : > { %v8267_v43 = vmul.f32 %v8266_v22, %v14301_v36  ;;  %v8303_v55 = vmul.f32 %v8302_v18, %v14316_v16  ;;  %v8292_v56 = vmul.f32 %v8291_v9, %v14316_v16 }
0x19b5   : > { %v7821_v50 = vmul.f32 %v10144_v28, %v7820_v2  ;;  %v8256_v37 = vmul.f32 %v8255_v29, %v14301_v36 }
0x19b6   : > { %v8268_v0 = vadd.f32 1.0, %v8267_v43  ;;  %v8304_v51 = vadd.f32 0.112945676, %v8303_v55  ;;  %v8293_v60 = vadd.f32 0.05243302, %v8292_v56 }
0x19b7   : > { %v7825_v4 = vsel %vm7824_vm14, %v10144_v28, %v7821_v50  ;;  %v8257_v40 = vadd.f32 1.1283791, %v8256_v37 }
0x19b8   : > { %v7841_v62 = vmul.f32 %v7825_v4, %v14018_v30  ;;  %10145 = vrcp.f32 %v8268_v0  ;;  %v8305_v15 = vmul.f32 %v8304_v51, %v14316_v16  ;;  %v8278_v7 = vand.u32 2147483647, %v8268_v0 }
0x19b9   : > { %vm8274_vm0 = vweird.f32 %v8268_v0  ;;  %v8258_v2 = vmul.f32 %v8257_v40, %v14293_v12 }
0x19ba   : > { %v7858_v21 = vmul.f32 %v13876_v42, %v7841_v62  ;;  %v8306_v17 = vadd.f32 0.4994258, %v8305_v15  ;;  %v8294_v42 = vmul.f32 %v8293_v60, %v14316_v16  ;;  %vm8279_vm12 = vcmp.eq.f32.partialorder %v8278_v7, 8.507059e+37 }
0x19bc   : > { %v14342_v45 = vadd.f32 %v13886_v61, %v7858_v21  ;;  %v8307_v30 = vmul.f32 %v8306_v17, %v14316_v16  ;;  %v8280_v61 = vand.u32 2147483648, %v8268_v0  ;;  %v8295_v39 = vadd.f32 0.18741608, %v8294_v42 }
0x19bd   : > { %v7980_v42 = vmul.f32 0.5, %v14290_v14 }
0x19be   : > { %v7883_v27 = vpack.c.bf16 %v14342_v45, %v14339_v44  ;;  %v10146_v28 = vpop.eup %10145  ;;  %v8308_v31 = vadd.f32 1.0, %v8307_v30  ;;  %v8281_v23 = vor.u32 1.1754944e-38, %v8280_v61  ;;  %v8296_v57 = vmul.f32 %v8295_v39, %v14316_v16 }
0x19bf   : > { %v8270_v19 = vmul.f32 %v10146_v28, %v8268_v0  ;;  %vm8275_vm15 = vweird.f32 %v10146_v28 }
0x19c0   : > { %9573 = vmatmul.msk.bf16.gmra.mxu3 %vm913_vm3, %v7883_v27  ;;  %10147 = vrcp.f32 %v8308_v31  ;;  %vm8276_vm1 = vmor %vm8274_vm0, %vm8275_vm15  ;;  %v8297_v9 = vadd.f32 1.1283791, %v8296_v57  ;;  %v8320_v18 = vand.u32 2147483648, %v8308_v31  ;;  %v8318_v46 = vand.u32 2147483647, %v8308_v31 }
0x19c1   : > { %v8271_v26 = vsub.f32 1.0, %v8270_v19  ;;  %vm8314_vm5 = vweird.f32 %v8308_v31  ;;  %v10167_v57 = vld [vmem:[%s14629_s2 + $0x8] sm:$0x7] }
0x19c2   : > { %v8321_v4 = vor.u32 1.1754944e-38, %v8320_v18  ;;  %v8298_v56 = vmul.f32 %v8297_v9, %v14310_v63  ;;  %vm8319_vm7 = vcmp.eq.f32.partialorder %v8318_v46, 8.507059e+37 }
0x19c3   : > { %v8272_v59 = vmul.f32 %v10146_v28, %v8271_v26 }
0x19c5   : > { %v8273_v38 = vadd.f32 %v10146_v28, %v8272_v59 }
0x19c6   : > { %v10148_v52 = vpop.eup %10147 }
0x19c7   : > { %v8277_v32 = vsel %vm8276_vm1, %v10146_v28, %v8273_v38  ;;  %v8310_v8 = vmul.f32 %v10148_v52, %v8308_v31  ;;  %vm8315_vm4 = vweird.f32 %v10148_v52  ;;  %v7981_v31 = vmul.f32 0.5, %v14306_v25 }
0x19c8   : > { %v7954_v1 = vpop.f32.mrf.mxu3  ;;  %v8282_v22 = vsel %vm8279_vm12, %v8281_v23, %v8277_v32  ;;  %vm8316_vm6 = vmor %vm8314_vm5, %vm8315_vm4 }
0x19c9   : > { %v14352_v36 = vadd.f32 %v7954_v1, %v14002_v34  ;;  %v8311_v54 = vsub.f32 1.0, %v8310_v8  ;;  %v8283_v50 = vmul.f32 %v8282_v22, %v8258_v2  ;;  %v14386_v8 = vperm.slane %v10167_v57, 2 }
0x19cb   : > { %v14356_v43 = vmul.f32 0.70710677, %v14352_v36  ;;  %v8312_v55 = vmul.f32 %v10148_v52, %v8311_v54  ;;  %v9580_v12 = vclamps-f32 %v8283_v50, 1.0 }
0x19cd   : > { %v8326_v16 = vmul.f32 %v14356_v43, %v14356_v43  ;;  %v8313_v0 = vadd.f32 %v10148_v52, %v8312_v55  ;;  %v8652_v28 = vadd.f32 1.0, %v9580_v12 }
0x19cf   : > { %v14360_v62 = vmin.f32 %v8326_v16, 16.0  ;;  %v8317_v51 = vsel %vm8316_vm6, %v10148_v52, %v8313_v0  ;;  %v8668_v39 = vmul.f32 %v8652_v28, %v7980_v42 }
0x19d0   : > { %v7956_v13 = vpop.f32.mrf.mxu3  ;;  %v8322_v15 = vsel %vm8319_vm7, %v8321_v4, %v8317_v51 }
0x19d1   : > { %v8328_v21 = vmul.f32 2.1237322e-06, %v14360_v62  ;;  %v8339_v3 = vmul.f32 3.8918573e-05, %v14360_v62  ;;  %v14366_v60 = vadd.f32 %v7956_v13, %v14002_v34  ;;  %v8323_v17 = vmul.f32 %v8322_v15, %v8298_v56 }
0x19d3   : > { %v8329_v30 = vadd.f32 0.00028619796, %v8328_v21  ;;  %v8340_v27 = vadd.f32 0.001143296, %v8339_v3  ;;  %v9581_v29 = vclamps-f32 %v8323_v17, 1.0 }
0x19d4   : > { %v14369_v19 = vmul.f32 0.70710677, %v14366_v60 }
0x19d5   : > { %v8341_v63 = vmul.f32 %v8340_v27, %v14360_v62  ;;  %v8653_v26 = vadd.f32 1.0, %v9581_v29  ;;  %v8330_v59 = vmul.f32 %v8329_v30, %v14360_v62 }
0x19d6   : > { %v8366_v37 = vmul.f32 %v14369_v19, %v14369_v19 }
0x19d7   : > { %v8342_v61 = vadd.f32 0.014752088, %v8341_v63  ;;  %v8669_v7 = vmul.f32 %v8653_v26, %v7981_v31  ;;  %v8331_v25 = vadd.f32 0.0036580483, %v8330_v59 }
0x19d8   : > { %v14377_v38 = vmin.f32 %v8366_v37, 16.0 }
0x19d9   : > { %v8343_v40 = vmul.f32 %v8342_v61, %v14360_v62  ;;  %v8681_v52 = vpack.c.bf16 %v8669_v7, %v8668_v39  ;;  %v8332_v50 = vmul.f32 %v8331_v25, %v14360_v62 }
0x19da   : > { %v8368_v32 = vmul.f32 2.1237322e-06, %v14377_v38  ;;  %v8379_v14 = vmul.f32 3.8918573e-05, %v14377_v38 }
0x19db   : > { %v8344_v23 = vadd.f32 0.112945676, %v8343_v40  ;;  %9601 = vmatmul.msk.bf16.gmra.mxu0 %vm913_vm3, %v8681_v52  ;;  %v8333_v51 = vadd.f32 0.05243302, %v8332_v50 }
0x19dc   : > { %v8369_v1 = vadd.f32 0.00028619796, %v8368_v32  ;;  %v8380_v22 = vadd.f32 0.001143296, %v8379_v14 }
0x19dd   : > { %v8345_v2 = vmul.f32 %v8344_v23, %v14360_v62  ;;  %v8334_v30 = vmul.f32 %v8333_v51, %v14360_v62 }
0x19de   : > { %v8370_v54 = vmul.f32 %v8369_v1, %v14377_v38  ;;  %v8381_v9 = vmul.f32 %v8380_v22, %v14377_v38  ;;  %v8736_v18 = vpop.f32.mrf.mxu0 }
0x19df   : > { %v8346_v55 = vadd.f32 0.4994258, %v8345_v2  ;;  %v8737_v46 = vadd.f32 %v8736_v18, %v14386_v8  ;;  %v8335_v37 = vadd.f32 0.18741608, %v8334_v30 }
0x19e0   : > { %v8371_v16 = vadd.f32 0.0036580483, %v8370_v54  ;;  %v8382_v0 = vadd.f32 0.014752088, %v8381_v9 }
0x19e1   : > { %v8347_v4 = vmul.f32 %v8346_v55, %v14360_v62  ;;  %v8776_v12 = vadd.f32 %v8737_v46, %v13892_v5 }
0x19e2   : > { %v8383_v56 = vmul.f32 %v8382_v0, %v14377_v38  ;;  %v8372_v15 = vmul.f32 %v8371_v16, %v14377_v38 }
0x19e3   : > { %v8348_v13 = vadd.f32 1.0, %v8347_v4  ;;  %8792 = vst.msk [vmem:[%s14399_s27] sm:$0xff] %vm913_vm3, %v8776_v12 }
0x19e4   : > { %v8384_v21 = vadd.f32 0.112945676, %v8383_v56  ;;  %v8373_v27 = vadd.f32 0.05243302, %v8372_v15 }
0x19e5   : > { %10149 = vrcp.f32 %v8348_v13  ;;  %v8360_v14 = vand.u32 2147483648, %v8348_v13  ;;  %v8358_v23 = vand.u32 2147483647, %v8348_v13  ;;  %vm8354_vm8 = vweird.f32 %v8348_v13 }
0x19e6   : > { %v8385_v3 = vmul.f32 %v8384_v21, %v14377_v38  ;;  %v8738_v17 = vpop.f32.mrf.mxu0  ;;  %v8374_v61 = vmul.f32 %v8373_v27, %v14377_v38 }
0x19e7   : > { %v8739_v5 = vadd.f32 %v8738_v17, %v14386_v8  ;;  %v8361_v55 = vor.u32 1.1754944e-38, %v8360_v14  ;;  %vm8359_vm10 = vcmp.eq.f32.partialorder %v8358_v23, 8.507059e+37 }
0x19e8   : > { %v8386_v28 = vadd.f32 0.4994258, %v8385_v3  ;;  %v7959_v63 = vpop.f32.mrf.mxu3  ;;  %v8375_v25 = vadd.f32 0.18741608, %v8374_v61 }
0x19e9   : > { %v8777_v29 = vadd.f32 %v8739_v5, %v13895_v53  ;;  %v14410_v31 = vadd.f32 %v7959_v63, %v14002_v34  ;;  %v8336_v53 = vmul.f32 %v8335_v37, %v14360_v62 }
0x19ea   : > { %v8387_v42 = vmul.f32 %v8386_v28, %v14377_v38  ;;  %v8376_v46 = vmul.f32 %v8375_v25, %v14377_v38 }
0x19eb   : > { %v10150_v26 = vpop.eup %10149  ;;  %8793 = vst.msk [vmem:[%s14399_s27 + $0x8] sm:$0xff] %vm913_vm3, %v8777_v29  ;;  %v14416_v7 = vmul.f32 0.70710677, %v14410_v31  ;;  %v8337_v54 = vadd.f32 1.1283791, %v8336_v53 }
0x19ec   : > { %v8350_v59 = vmul.f32 %v10150_v26, %v8348_v13  ;;  %v8388_v39 = vadd.f32 1.0, %v8387_v42  ;;  %vm8355_vm2 = vweird.f32 %v10150_v26  ;;  %v8377_v3 = vadd.f32 1.1283791, %v8376_v46 }
0x19ed   : > { %v8406_v52 = vmul.f32 %v14416_v7, %v14416_v7  ;;  %vm8356_vm9 = vmor %vm8354_vm8, %vm8355_vm2  ;;  %v8338_v13 = vmul.f32 %v8337_v54, %v14356_v43  ;;  %v7983_v46 = vmul.f32 0.5, %v14366_v60 }
0x19ee   : > { %v8351_v40 = vsub.f32 1.0, %v8350_v59  ;;  %10151 = vrcp.f32 %v8388_v39  ;;  %v8400_v17 = vand.u32 2147483648, %v8388_v39  ;;  %v8398_v28 = vand.u32 2147483647, %v8388_v39 }
0x19ef   : > { %v14421_v57 = vmin.f32 %v8406_v52, 16.0  ;;  %vm8394_vm13 = vweird.f32 %v8388_v39  ;;  %v8378_v37 = vmul.f32 %v8377_v3, %v14369_v19 }
0x19f0   : > { %v8352_v32 = vmul.f32 %v10150_v26, %v8351_v40  ;;  %v7961_v1 = vpop.f32.mrf.mxu3  ;;  %v8401_v59 = vor.u32 1.1754944e-38, %v8400_v17  ;;  %vm8399_vm15 = vcmp.eq.f32.partialorder %v8398_v28, 8.507059e+37 }
0x19f1   : > { %v14424_v2 = vadd.f32 %v7961_v1, %v14002_v34  ;;  %v8408_v62 = vmul.f32 2.1237322e-06, %v14421_v57  ;;  %v8419_v9 = vmul.f32 3.8918573e-05, %v14421_v57 }
0x19f2   : > { %v8353_v22 = vadd.f32 %v10150_v26, %v8352_v32 }
0x19f3   : > { %v14430_v16 = vmul.f32 0.70710677, %v14424_v2  ;;  %v8409_v4 = vadd.f32 0.00028619796, %v8408_v62  ;;  %v8420_v56 = vadd.f32 0.001143296, %v8419_v9 }
0x19f4   : > { %v10152_v18 = vpop.eup %10151  ;;  %v8357_v50 = vsel %vm8356_vm9, %v10150_v26, %v8353_v22 }
0x19f5   : > { %v8390_v0 = vmul.f32 %v10152_v18, %v8388_v39  ;;  %v8362_v12 = vsel %vm8359_vm10, %v8361_v55, %v8357_v50  ;;  %v8446_v51 = vmul.f32 %v14430_v16, %v14430_v16  ;;  %v8410_v21 = vmul.f32 %v8409_v4, %v14421_v57 }
0x19f6   : > { %v8421_v38 = vmul.f32 %v8420_v56, %v14421_v57  ;;  %v8363_v5 = vmul.f32 %v8362_v12, %v8338_v13  ;;  %vm8395_vm11 = vweird.f32 %v10152_v18  ;;  %v7982_v55 = vmul.f32 0.5, %v14352_v36 }
0x19f7   : > { %v8391_v15 = vsub.f32 1.0, %v8390_v0  ;;  %v14437_v30 = vmin.f32 %v8446_v51, 16.0  ;;  %v8411_v26 = vadd.f32 0.0036580483, %v8410_v21  ;;  %vm8396_vm14 = vmor %vm8394_vm13, %vm8395_vm11 }
0x19f8   : > { %v8422_v29 = vadd.f32 0.014752088, %v8421_v38  ;;  %v9582_v53 = vclamps-f32 %v8363_v5, 1.0 }
0x19f9   : > { %v8392_v27 = vmul.f32 %v10152_v18, %v8391_v15  ;;  %v8448_v63 = vmul.f32 2.1237322e-06, %v14437_v30  ;;  %v8459_v43 = vmul.f32 3.8918573e-05, %v14437_v30  ;;  %v8412_v39 = vmul.f32 %v8411_v26, %v14421_v57 }
0x19fa   : > { %v8423_v61 = vmul.f32 %v8422_v29, %v14421_v57  ;;  %v8654_v62 = vadd.f32 1.0, %v9582_v53 }
0x19fb   : > { %v8393_v42 = vadd.f32 %v10152_v18, %v8392_v27  ;;  %v8449_v40 = vadd.f32 0.00028619796, %v8448_v63  ;;  %v8460_v32 = vadd.f32 0.001143296, %v8459_v43  ;;  %v8413_v4 = vadd.f32 0.05243302, %v8412_v39 }
0x19fc   : > { %v8424_v25 = vadd.f32 0.112945676, %v8423_v61  ;;  %v8670_v36 = vmul.f32 %v8654_v62, %v7982_v55 }
0x19fd   : > { %v8397_v52 = vsel %vm8396_vm14, %v10152_v18, %v8393_v42  ;;  %v8450_v23 = vmul.f32 %v8449_v40, %v14437_v30  ;;  %v8461_v22 = vmul.f32 %v8460_v32, %v14437_v30  ;;  %v8414_v63 = vmul.f32 %v8413_v4, %v14421_v57 }
0x19fe   : > { %v8402_v14 = vsel %vm8399_vm15, %v8401_v59, %v8397_v52  ;;  %v8425_v19 = vmul.f32 %v8424_v25, %v14421_v57  ;;  %v8741_v56 = vpop.f32.mrf.mxu0 }
0x19ff   : > { %v8403_v1 = vmul.f32 %v8402_v14, %v8378_v37  ;;  %v8451_v54 = vadd.f32 0.0036580483, %v8450_v23  ;;  %v8462_v50 = vadd.f32 0.014752088, %v8461_v22  ;;  %v8742_v21 = vadd.f32 %v8741_v56, %v14386_v8 }
0x1a00   : > { %v8426_v18 = vadd.f32 0.4994258, %v8425_v19  ;;  %v7964_v51 = vpop.f32.mrf.mxu3  ;;  %v8415_v40 = vadd.f32 0.18741608, %v8414_v63 }
0x1a01   : > { %v9583_v9 = vclamps-f32 %v8403_v1, 1.0  ;;  %v8463_v12 = vmul.f32 %v8462_v50, %v14437_v30  ;;  %v8452_v15 = vmul.f32 %v8451_v54, %v14437_v30  ;;  %v14454_v3 = vadd.f32 %v7964_v51, %v14002_v34 }
0x1a02   : > { %v8427_v13 = vmul.f32 %v8426_v18, %v14421_v57  ;;  %v8778_v5 = vadd.f32 %v8742_v21, %v13929_v20  ;;  %v8416_v54 = vmul.f32 %v8415_v40, %v14421_v57 }
0x1a03   : > { %v8655_v0 = vadd.f32 1.0, %v9583_v9  ;;  %v8464_v38 = vadd.f32 0.112945676, %v8463_v12  ;;  %v14459_v29 = vmul.f32 0.70710677, %v14454_v3 }
0x1a04   : > { %v8428_v60 = vadd.f32 1.0, %v8427_v13  ;;  %v8453_v42 = vadd.f32 0.05243302, %v8452_v15  ;;  %8794 = vst.msk [vmem:[%s14399_s27 + $0x10] sm:$0xff] %vm913_vm3, %v8778_v5  ;;  %v8417_v57 = vadd.f32 1.1283791, %v8416_v54 }
0x1a05   : > { %v8671_v17 = vmul.f32 %v8655_v0, %v7983_v46  ;;  %v8465_v28 = vmul.f32 %v8464_v38, %v14437_v30  ;;  %v8486_v43 = vmul.f32 %v14459_v29, %v14459_v29 }
0x1a06   : > { %10153 = vrcp.f32 %v8428_v60  ;;  %v8743_v59 = vpop.f32.mrf.mxu0  ;;  %v8454_v53 = vmul.f32 %v8453_v42, %v14437_v30  ;;  %v8438_v46 = vand.u32 2147483647, %v8428_v60  ;;  %v8440_v0 = vand.u32 2147483648, %v8428_v60 }
0x1a07   : > { %v8682_v27 = vpack.c.bf16 %v8671_v17, %v8670_v36  ;;  %v8466_v26 = vadd.f32 0.4994258, %v8465_v28  ;;  %v14468_v37 = vmin.f32 %v8486_v43, 16.0  ;;  %v8744_v52 = vadd.f32 %v8743_v59, %v14386_v8 }
0x1a08   : > { %v7966_v61 = vpop.f32.mrf.mxu3  ;;  %v8455_v62 = vadd.f32 0.18741608, %v8454_v53  ;;  %vm8434_vm1 = vweird.f32 %v8428_v60  ;;  %vm8439_vm4 = vcmp.eq.f32.partialorder %v8438_v46, 8.507059e+37  ;;  %v8441_v38 = vor.u32 1.1754944e-38, %v8440_v0 }
0x1a09   : > { %9602 = vmatmul.msk.bf16.gmra.mxu0 %vm913_vm3, %v8682_v27  ;;  %v8467_v20 = vmul.f32 %v8466_v26, %v14437_v30  ;;  %v14473_v32 = vadd.f32 %v7966_v61, %v14002_v34  ;;  %v8488_v25 = vmul.f32 2.1237322e-06, %v14468_v37  ;;  %v8499_v1 = vmul.f32 3.8918573e-05, %v14468_v37 }
0x1a0a   : > { %v8779_v39 = vadd.f32 %v8744_v52, %v13932_v35  ;;  %v8456_v51 = vmul.f32 %v8455_v62, %v14437_v30  ;;  %v8418_v30 = vmul.f32 %v8417_v57, %v14416_v7 }
0x1a0b   : > { %v14475_v14 = vadd.f32 1.0, %v8467_v20  ;;  %v14481_v22 = vmul.f32 0.70710677, %v14473_v32  ;;  %v8489_v9 = vadd.f32 0.00028619796, %v8488_v25 }
0x1a0c   : > { %v10154_v23 = vpop.eup %10153  ;;  %8795 = vst.msk [vmem:[%s14399_s27 + $0x18] sm:$0xff] %vm913_vm3, %v8779_v39  ;;  %v8500_v55 = vadd.f32 0.001143296, %v8499_v1  ;;  %v8457_v43 = vadd.f32 1.1283791, %v8456_v51 }
0x1a0d   : > { %v8430_v19 = vmul.f32 %v10154_v23, %v8428_v60  ;;  %10155 = vrcp.f32 %v14475_v14  ;;  %v8526_v18 = vmul.f32 %v14481_v22, %v14481_v22  ;;  %v8490_v35 = vmul.f32 %v8489_v9, %v14468_v37 }
0x1a0e   : > { %vm8435_vm0 = vweird.f32 %v10154_v23  ;;  %v8501_v12 = vmul.f32 %v8500_v55, %v14468_v37  ;;  %v8480_v59 = vand.u32 2147483648, %v14475_v14  ;;  %vm8474_vm6 = vweird.f32 %v14475_v14 }
0x1a0f   : > { %v8431_v50 = vsub.f32 1.0, %v8430_v19  ;;  %v14491_v56 = vmin.f32 %v8526_v18, 16.0  ;;  %vm8436_vm12 = vmor %vm8434_vm1, %vm8435_vm0  ;;  %v8491_v27 = vadd.f32 0.0036580483, %v8490_v35  ;;  %v8458_v18 = vmul.f32 %v8457_v43, %v14430_v16 }
0x1a10   : > { %v8502_v21 = vadd.f32 0.014752088, %v8501_v12  ;;  %v8481_v62 = vor.u32 1.1754944e-38, %v8480_v59 }
0x1a11   : > { %v8432_v4 = vmul.f32 %v10154_v23, %v8431_v50  ;;  %v8528_v36 = vmul.f32 2.1237322e-06, %v14491_v56  ;;  %v8539_v17 = vmul.f32 3.8918573e-05, %v14491_v56  ;;  %v8492_v1 = vmul.f32 %v8491_v27, %v14468_v37 }
0x1a12   : > { %v8503_v63 = vmul.f32 %v8502_v21, %v14468_v37 }
0x1a13   : > { %v10156_v13 = vpop.eup %10155  ;;  %v8433_v15 = vadd.f32 %v10154_v23, %v8432_v4  ;;  %v8529_v42 = vadd.f32 0.00028619796, %v8528_v36  ;;  %v8540_v60 = vadd.f32 0.001143296, %v8539_v17  ;;  %v8493_v35 = vadd.f32 0.05243302, %v8492_v1 }
0x1a14   : > { %v8470_v5 = vmul.f32 %v10156_v13, %v14475_v14  ;;  %v8504_v61 = vadd.f32 0.112945676, %v8503_v63  ;;  %vm8475_vm5 = vweird.f32 %v10156_v13  ;;  %v7984_v17 = vmul.f32 0.5, %v14410_v31 }
0x1a15   : > { %v8437_v28 = vsel %vm8436_vm12, %v10154_v23, %v8433_v15  ;;  %v8530_v40 = vmul.f32 %v8529_v42, %v14491_v56  ;;  %v8541_v53 = vmul.f32 %v8540_v60, %v14491_v56  ;;  %v8478_v23 = vand.u32 2147483647, %v14475_v14  ;;  %vm8476_vm7 = vmor %vm8474_vm6, %vm8475_vm5 }
0x1a16   : > { %v8442_v26 = vsel %vm8439_vm4, %v8441_v38, %v8437_v28  ;;  %v8471_v20 = vsub.f32 1.0, %v8470_v5  ;;  %v8505_v39 = vmul.f32 %v8504_v61, %v14468_v37  ;;  %v7985_v38 = vmul.f32 0.5, %v14424_v2 }
0x1a17   : > { %v8443_v52 = vmul.f32 %v8442_v26, %v8418_v30  ;;  %v8542_v7 = vadd.f32 0.014752088, %v8541_v53  ;;  %v8531_v54 = vadd.f32 0.0036580483, %v8530_v40  ;;  %vm8479_vm2 = vcmp.eq.f32.partialorder %v8478_v23, 8.507059e+37 }
0x1a18   : > { %v8472_v25 = vmul.f32 %v10156_v13, %v8471_v20  ;;  %v8506_v9 = vadd.f32 0.4994258, %v8505_v39  ;;  %v8494_v16 = vmul.f32 %v8493_v35, %v14468_v37 }
0x1a19   : > { %v8543_v50 = vmul.f32 %v8542_v7, %v14491_v56  ;;  %v9584_v55 = vclamps-f32 %v8443_v52, 1.0  ;;  %v8532_v57 = vmul.f32 %v8531_v54, %v14491_v56 }
0x1a1a   : > { %v8473_v19 = vadd.f32 %v10156_v13, %v8472_v25  ;;  %v8507_v4 = vmul.f32 %v8506_v9, %v14468_v37  ;;  %v8495_v43 = vadd.f32 0.18741608, %v8494_v16  ;;  %v7986_v16 = vmul.f32 0.5, %v14454_v3 }
0x1a1b   : > { %v8544_v51 = vadd.f32 0.112945676, %v8543_v50  ;;  %v8656_v15 = vadd.f32 1.0, %v9584_v55  ;;  %v8533_v27 = vadd.f32 0.05243302, %v8532_v57 }
0x1a1c   : > { %v8477_v46 = vsel %vm8476_vm7, %v10156_v13, %v8473_v19  ;;  %v8508_v14 = vadd.f32 1.0, %v8507_v4  ;;  %v8746_v13 = vpop.f32.mrf.mxu0  ;;  %v8496_v40 = vmul.f32 %v8495_v43, %v14468_v37 }
0x1a1d   : > { %v8482_v0 = vsel %vm8479_vm2, %v8481_v62, %v8477_v46  ;;  %v8545_v36 = vmul.f32 %v8544_v51, %v14491_v56  ;;  %v8747_v63 = vadd.f32 %v8746_v13, %v14386_v8  ;;  %v8672_v42 = vmul.f32 %v8656_v15, %v7984_v17 }
0x1a1e   : > { %v8483_v12 = vmul.f32 %v8482_v0, %v8458_v18  ;;  %10157 = vrcp.f32 %v8508_v14  ;;  %v8534_v2 = vmul.f32 %v8533_v27, %v14491_v56  ;;  %v8520_v23 = vand.u32 2147483648, %v8508_v14 }
0x1a1f   : > { %v8546_v28 = vadd.f32 0.4994258, %v8545_v36  ;;  %v8780_v26 = vadd.f32 %v8747_v63, %v13957_v49  ;;  %v8518_v39 = vand.u32 2147483647, %v8508_v14  ;;  %v8497_v19 = vadd.f32 1.1283791, %v8496_v40 }
0x1a20   : > { %v9585_v21 = vclamps-f32 %v8483_v12, 1.0  ;;  %v8535_v25 = vadd.f32 0.18741608, %v8534_v2  ;;  %vm8514_vm9 = vweird.f32 %v8508_v14  ;;  %v8521_v37 = vor.u32 1.1754944e-38, %v8520_v23 }
0x1a21   : > { %v8547_v30 = vmul.f32 %v8546_v28, %v14491_v56  ;;  %8796 = vst.msk [vmem:[%s14399_s27 + $0x20] sm:$0xff] %vm913_vm3, %v8780_v26  ;;  %vm8519_vm11 = vcmp.eq.f32.partialorder %v8518_v39, 8.507059e+37  ;;  %v8498_v18 = vmul.f32 %v8497_v19, %v14459_v29  ;;  %v7987_v13 = vmul.f32 0.5, %v14473_v32 }
0x1a22   : > { %v8657_v5 = vadd.f32 1.0, %v9585_v21  ;;  %v8536_v9 = vmul.f32 %v8535_v25, %v14491_v56 }
0x1a23   : > { %v8548_v20 = vadd.f32 1.0, %v8547_v30 }
0x1a24   : > { %v8673_v60 = vmul.f32 %v8657_v5, %v7985_v38  ;;  %v10158_v59 = vpop.eup %10157  ;;  %v8748_v53 = vpop.f32.mrf.mxu0  ;;  %v8537_v35 = vadd.f32 1.1283791, %v8536_v9 }
0x1a25   : > { %v8510_v61 = vmul.f32 %v10158_v59, %v8508_v14  ;;  %10159 = vrcp.f32 %v8548_v20  ;;  %v8749_v49 = vadd.f32 %v8748_v53, %v14386_v8  ;;  %vm8515_vm8 = vweird.f32 %v10158_v59 }
0x1a26   : > { %v8683_v31 = vpack.c.bf16 %v8673_v60, %v8672_v42  ;;  %vm8516_vm10 = vmor %vm8514_vm9, %vm8515_vm8  ;;  %v8560_v4 = vand.u32 2147483648, %v8548_v20  ;;  %v8558_v57 = vand.u32 2147483647, %v8548_v20  ;;  %vm8554_vm14 = vweird.f32 %v8548_v20 }
0x1a27   : > { %v8511_v52 = vsub.f32 1.0, %v8510_v61  ;;  %v8781_v7 = vadd.f32 %v8749_v49, %v13960_v58  ;;  %v8538_v15 = vmul.f32 %v8537_v35, %v14481_v22 }
0x1a28   : > { %9603 = vmatmul.msk.bf16.gmra.mxu0 %vm913_vm3, %v8683_v31  ;;  %v8561_v56 = vor.u32 1.1754944e-38, %v8560_v4  ;;  %vm8559_vm0 = vcmp.eq.f32.partialorder %v8558_v57, 8.507059e+37 }
0x1a29   : > { %v8512_v1 = vmul.f32 %v10158_v59, %v8511_v52  ;;  %8797 = vst.msk [vmem:[%s14399_s27 + $0x28] sm:$0xff] %vm913_vm3, %v8781_v7 }
0x1a2b   : > { %v10160_v54 = vpop.eup %10159  ;;  %v8513_v62 = vadd.f32 %v10158_v59, %v8512_v1 }
0x1a2c   : > { %v8550_v50 = vmul.f32 %v10160_v54, %v8548_v20  ;;  %vm8555_vm13 = vweird.f32 %v10160_v54 }
0x1a2d   : > { %v8517_v55 = vsel %vm8516_vm10, %v10158_v59, %v8513_v62  ;;  %vm8556_vm15 = vmor %vm8554_vm14, %vm8555_vm13 }
0x1a2e   : > { %v8522_v46 = vsel %vm8519_vm11, %v8521_v37, %v8517_v55  ;;  %v8551_v0 = vsub.f32 1.0, %v8550_v50 }
0x1a2f   : > { %v8523_v58 = vmul.f32 %v8522_v46, %v8498_v18 }
0x1a30   : > { %v8552_v12 = vmul.f32 %v10160_v54, %v8551_v0 }
0x1a31   : > { %v9586_v14 = vclamps-f32 %v8523_v58, 1.0 }
0x1a32   : > { %v8553_v51 = vadd.f32 %v10160_v54, %v8552_v12 }
0x1a33   : > { %v8658_v29 = vadd.f32 1.0, %v9586_v14 }
0x1a34   : > { %v8557_v21 = vsel %vm8556_vm15, %v10160_v54, %v8553_v51 }
0x1a35   : > { %v8562_v36 = vsel %vm8559_vm0, %v8561_v56, %v8557_v21  ;;  %v8674_v27 = vmul.f32 %v8658_v29, %v7986_v16 }
0x1a36   : > { %v8563_v17 = vmul.f32 %v8562_v36, %v8538_v15 }
0x1a38   : > { %v9587_v38 = vclamps-f32 %v8563_v17, 1.0 }
0x1a3a   : > { %v8659_v5 = vadd.f32 1.0, %v9587_v38 }
0x1a3c   : > { %v8675_v28 = vmul.f32 %v8659_v5, %v7987_v13 }
0x1a3e   : > { %v8684_v42 = vpack.c.bf16 %v8675_v28, %v8674_v27 }
0x1a40   : > { %9604 = vmatmul.msk.bf16.gmra.mxu0 %vm913_vm3, %v8684_v42 }
0x1a43   : > { %v7969_v63 = vpop.f32.mrf.mxu3 }
0x1a44   : > { %v14532_v60 = vadd.f32 %v7969_v63, %v14002_v34 }
0x1a46   : > { %v14536_v22 = vmul.f32 0.70710677, %v14532_v60 }
0x1a48   : > { %v8566_v30 = vmul.f32 %v14536_v22, %v14536_v22 }
0x1a4a   : > { %v8567_v26 = vmin.f32 %v8566_v30, 16.0 }
0x1a4b   : > { %v7971_v3 = vpop.f32.mrf.mxu3 }
0x1a4c   : > { %v8568_v43 = vmul.f32 2.1237322e-06, %v8567_v26  ;;  %v8579_v32 = vmul.f32 3.8918573e-05, %v8567_v26  ;;  %v14541_v31 = vadd.f32 %v7971_v3, %v14002_v34 }
0x1a4e   : > { %v8569_v2 = vadd.f32 0.00028619796, %v8568_v43  ;;  %v8580_v20 = vadd.f32 0.001143296, %v8579_v32  ;;  %v14544_v59 = vmul.f32 0.70710677, %v14541_v31 }
0x1a50   : > { %v8581_v61 = vmul.f32 %v8580_v20, %v8567_v26  ;;  %v8606_v40 = vmul.f32 %v14544_v59, %v14544_v59  ;;  %v8570_v53 = vmul.f32 %v8569_v2, %v8567_v26 }
0x1a52   : > { %v8582_v52 = vadd.f32 0.014752088, %v8581_v61  ;;  %v8607_v25 = vmin.f32 %v8606_v40, 16.0  ;;  %v8571_v39 = vadd.f32 0.0036580483, %v8570_v53 }
0x1a54   : > { %v8583_v49 = vmul.f32 %v8582_v52, %v8567_v26  ;;  %v8608_v23 = vmul.f32 2.1237322e-06, %v8607_v25  ;;  %v8619_v1 = vmul.f32 3.8918573e-05, %v8607_v25  ;;  %v8572_v37 = vmul.f32 %v8571_v39, %v8567_v26 }
0x1a56   : > { %v8584_v7 = vadd.f32 0.112945676, %v8583_v49  ;;  %v8609_v19 = vadd.f32 0.00028619796, %v8608_v23  ;;  %v8620_v34 = vadd.f32 0.001143296, %v8619_v1 }
0x1a57   : > { %v8573_v12 = vadd.f32 0.05243302, %v8572_v37 }
0x1a58   : > { %v8585_v54 = vmul.f32 %v8584_v7, %v8567_v26  ;;  %v8610_v62 = vmul.f32 %v8609_v19, %v8607_v25  ;;  %v8621_v9 = vmul.f32 %v8620_v34, %v8607_v25  ;;  %v8751_v55 = vpop.f32.mrf.mxu0 }
0x1a59   : > { %v8752_v0 = vadd.f32 %v8751_v55, %v14386_v8  ;;  %v8574_v15 = vmul.f32 %v8573_v12, %v8567_v26 }
0x1a5a   : > { %v8586_v50 = vadd.f32 0.4994258, %v8585_v54  ;;  %v8611_v18 = vadd.f32 0.0036580483, %v8610_v62  ;;  %v8622_v46 = vadd.f32 0.014752088, %v8621_v9 }
0x1a5b   : > { %v8782_v58 = vadd.f32 %v8752_v0, %v13993_v48  ;;  %v8575_v48 = vadd.f32 0.18741608, %v8574_v15  ;;  %v7989_v0 = vmul.f32 0.5, %v14541_v31 }
0x1a5c   : > { %v8587_v35 = vmul.f32 %v8586_v50, %v8567_v26  ;;  %v8623_v4 = vmul.f32 %v8622_v46, %v8607_v25  ;;  %v8612_v51 = vmul.f32 %v8611_v18, %v8607_v25  ;;  %v7988_v46 = vmul.f32 0.5, %v14532_v60 }
0x1a5d   : > { %8798 = vst.msk [vmem:[%s14399_s27 + $0x30] sm:$0xff] %vm913_vm3, %v8782_v58  ;;  %v8576_v42 = vmul.f32 %v8575_v48, %v8567_v26 }
0x1a5e   : > { %v8588_v57 = vadd.f32 1.0, %v8587_v35  ;;  %v8624_v56 = vadd.f32 0.112945676, %v8623_v4  ;;  %v8613_v36 = vadd.f32 0.05243302, %v8612_v51 }
0x1a5f   : > { %v8577_v20 = vadd.f32 1.1283791, %v8576_v42 }
0x1a60   : > { %10161 = vrcp.f32 %v8588_v57  ;;  %v8625_v14 = vmul.f32 %v8624_v56, %v8607_v25  ;;  %v8753_v21 = vpop.f32.mrf.mxu0  ;;  %v8614_v27 = vmul.f32 %v8613_v36, %v8607_v25  ;;  %v8600_v3 = vand.u32 2147483648, %v8588_v57 }
0x1a61   : > { %v8754_v29 = vadd.f32 %v8753_v21, %v14386_v8  ;;  %v8598_v32 = vand.u32 2147483647, %v8588_v57  ;;  %vm8594_vm12 = vweird.f32 %v8588_v57  ;;  %v8578_v23 = vmul.f32 %v8577_v20, %v14536_v22 }
0x1a62   : > { %v8626_v17 = vadd.f32 0.4994258, %v8625_v14  ;;  %v8615_v43 = vadd.f32 0.18741608, %v8614_v27  ;;  %v8601_v40 = vor.u32 1.1754944e-38, %v8600_v3 }
0x1a63   : > { %v8783_v16 = vadd.f32 %v8754_v29, %v13996_v47  ;;  %vm8599_vm5 = vcmp.eq.f32.partialorder %v8598_v32, 8.507059e+37 }
0x1a64   : > { %v8627_v38 = vmul.f32 %v8626_v17, %v8607_v25  ;;  %v8616_v53 = vmul.f32 %v8615_v43, %v8607_v25 }
0x1a65   : > { %8799 = vst.msk [vmem:[%s14399_s27 + $0x38] sm:$0xff] %vm913_vm3, %v8783_v16 }
0x1a66   : > { %v10162_v13 = vpop.eup %10161  ;;  %v8628_v28 = vadd.f32 1.0, %v8627_v38  ;;  %v8617_v26 = vadd.f32 1.1283791, %v8616_v53 }
0x1a67   : > { %v8590_v5 = vmul.f32 %v10162_v13, %v8588_v57  ;;  %vm8595_vm1 = vweird.f32 %v10162_v13 }
0x1a68   : > { %10163 = vrcp.f32 %v8628_v28  ;;  %vm8596_vm4 = vmor %vm8594_vm12, %vm8595_vm1  ;;  %v8640_v39 = vand.u32 2147483648, %v8628_v28  ;;  %v8638_v34 = vand.u32 2147483647, %v8628_v28  ;;  %vm8634_vm7 = vweird.f32 %v8628_v28 }
0x1a69   : > { %v8591_v63 = vsub.f32 1.0, %v8590_v5  ;;  %v8618_v37 = vmul.f32 %v8617_v26, %v14544_v59 }
0x1a6a   : > { %v8641_v62 = vor.u32 1.1754944e-38, %v8640_v39  ;;  %vm8639_vm8 = vcmp.eq.f32.partialorder %v8638_v34, 8.507059e+37 }
0x1a6b   : > { %v8592_v30 = vmul.f32 %v10162_v13, %v8591_v63 }
0x1a6d   : > { %v8593_v2 = vadd.f32 %v10162_v13, %v8592_v30 }
0x1a6e   : > { %v10164_v47 = vpop.eup %10163 }
0x1a6f   : > { %v8597_v61 = vsel %vm8596_vm4, %v10162_v13, %v8593_v2  ;;  %v8630_v52 = vmul.f32 %v10164_v47, %v8628_v28  ;;  %vm8635_vm6 = vweird.f32 %v10164_v47 }
0x1a70   : > { %v8602_v49 = vsel %vm8599_vm5, %v8601_v40, %v8597_v61  ;;  %vm8636_vm2 = vmor %vm8634_vm7, %vm8635_vm6 }
0x1a71   : > { %v8631_v1 = vsub.f32 1.0, %v8630_v52  ;;  %v8603_v7 = vmul.f32 %v8602_v49, %v8578_v23 }
0x1a73   : > { %v8632_v19 = vmul.f32 %v10164_v47, %v8631_v1  ;;  %v9588_v9 = vclamps-f32 %v8603_v7, 1.0 }
0x1a75   : > { %v8633_v54 = vadd.f32 %v10164_v47, %v8632_v19  ;;  %v8660_v22 = vadd.f32 1.0, %v9588_v9 }
0x1a77   : > { %v8637_v25 = vsel %vm8636_vm2, %v10164_v47, %v8633_v54  ;;  %v8676_v4 = vmul.f32 %v8660_v22, %v7988_v46 }
0x1a78   : > { %v8642_v50 = vsel %vm8639_vm8, %v8641_v62, %v8637_v25 }
0x1a79   : > { %v8643_v55 = vmul.f32 %v8642_v50, %v8618_v37 }
0x1a7b   : > { %v9589_v18 = vclamps-f32 %v8643_v55, 1.0 }
0x1a7d   : > { %v8661_v35 = vadd.f32 1.0, %v9589_v18 }
0x1a7f   : > { %v8677_v58 = vmul.f32 %v8661_v35, %v7989_v0 }
0x1a81   : > { %v8685_v12 = vpack.c.bf16 %v8677_v58, %v8676_v4 }
0x1a83   : > { %9605 = vmatmul.msk.bf16.gmra.mxu0 %vm913_vm3, %v8685_v12 }
0x1a86   : > { %v8756_v59 = vpop.f32.mrf.mxu0 }
0x1a87   : > { %v8757_v57 = vadd.f32 %v8756_v59, %v14386_v8 }
0x1a89   : > { %v8784_v51 = vadd.f32 %v8757_v57, %v14063_v41 }
0x1a8b   : > { %8800 = vst.msk [vmem:[%s14399_s27 + $0x40] sm:$0xff] %vm913_vm3, %v8784_v51 }
0x1a8e   : > { %v8758_v56 = vpop.f32.mrf.mxu0 }
0x1a8f   : > { %v8759_v60 = vadd.f32 %v8758_v56, %v14386_v8 }
0x1a91   : > { %v8785_v31 = vadd.f32 %v8759_v60, %v14066_v33 }
0x1a93   : > { %8801 = vst.msk [vmem:[%s14399_s27 + $0x48] sm:$0xff] %vm913_vm3, %v8785_v31 }
0x1aa5   : > { %v8761_v14 = vpop.f32.mrf.mxu0 }
0x1aa6   : > { %v8762_v15 = vadd.f32 %v8761_v14, %v14386_v8 }
0x1aa8   : > { %v8786_v21 = vadd.f32 %v8762_v15, %v14172_v10 }
0x1aaa   : > { %8802 = vst.msk [vmem:[%s14399_s27 + $0x50] sm:$0xff] %vm913_vm3, %v8786_v21 }
0x1aad   : > { %v8763_v41 = vpop.f32.mrf.mxu0 }
0x1aae   : > { %v8764_v36 = vadd.f32 %v8763_v41, %v14386_v8 }
0x1ab0   : > { %v8787_v17 = vadd.f32 %v8764_v36, %v14175_v24 }
0x1ab2   : > { %8803 = vst.msk [vmem:[%s14399_s27 + $0x58] sm:$0xff] %vm913_vm3, %v8787_v17 }
0x1abd   : > { %v8766_v33 = vpop.f32.mrf.mxu0 }
0x1abe   : > { %v8767_v29 = vadd.f32 %v8766_v33, %v14386_v8 }
0x1ac0   : > { %v8788_v38 = vadd.f32 %v8767_v29, %v14260_v11 }
0x1ac2   : > { %8804 = vst.msk [vmem:[%s14399_s27 + $0x60] sm:$0xff] %vm913_vm3, %v8788_v38 }
0x1ac5   : > { %v8768_v10 = vpop.f32.mrf.mxu0 }
0x1ac6   : > { %v8769_v16 = vadd.f32 %v8768_v10, %v14386_v8 }
0x1ac8   : > { %v8789_v13 = vadd.f32 %v8769_v16, %v14263_v6 }
0x1aca   : > { %8805 = vst.msk [vmem:[%s14399_s27 + $0x68] sm:$0xff] %vm913_vm3, %v8789_v13 }
0x1b00   : > { %v8771_v24 = vpop.f32.mrf.mxu0 }
0x1b01   : > { %v8772_v48 = vadd.f32 %v8771_v24, %v14386_v8 }
0x1b03   : > { %v8790_v5 = vadd.f32 %v8772_v48, %v14339_v44 }
0x1b05   : > { %8806 = vst.msk [vmem:[%s14399_s27 + $0x70] sm:$0xff] %vm913_vm3, %v8790_v5 }
0x1b08   : > { %v8773_v11 = vpop.f32.mrf.mxu0 }
0x1b09   : > { %v8774_v6 = vadd.f32 %v8773_v11, %v14386_v8 }
0x1b0b   : > { %v8791_v27 = vadd.f32 %v8774_v6, %v14342_v45 }
0x1b0d   : > { %8807 = vst.msk [vmem:[%s14399_s27 + $0x78] sm:$0xff] %vm913_vm3, %v8791_v27 }
0x1b0e   : > { %10195 = shalt.err (!%p10192_p3)
}
0x1b0f   : > { %s10233_s22 = smov 128   ;;  %s10234_s27 = smov 8  }
0x1b10   : > { %9671 = dma.vmem_to_hbm [thread:$0]  (%p10348_p5), %s8823_s15, 2048, %s8825_s19, %s8809_s17, %s10233_s22, %s10233_s22, %s10234_s27  }
0x1b11 PF: > { %p9677_p4 = scmp.ge.s32.totalorder %s10230_s16, 2  ;;  %s8839_s26 = sand.u32 1, %s10218_s29  }
0x1b12   : > { %s8840_s28 = scalar_lea.sflag [#allocation3], %s8839_s26 }
0x1b13   : > { %p9674_p7 = pnand %p9677_p4, %p10352_p6 }
0x1b15   : > { %p9675_p8 = pneg %p9674_p7 }
0x1b17   : > { %10213 = dma.done.wait (%p9675_p8), %s8840_s28, 2048  }
0x1b18   : > { %10215 = vsyncadd (%p9675_p8), %s8840_s28, 4294965248  ;;  %s14912_s16 = sld [smem:[#allocation6_spill]]  ;;  %s14915_s29 = smov %s10222_s30 }
0x1b19   : > { %s14913_s24 = sld [smem:[#allocation5_spill]] }
0x1b1a   : > { %s14914_s15 = sld [smem:[#allocation7_spill]] }
0x1b1e   : > { %p24_p9 = scmp.ge.s32.totalorder %s14912_s16, 4  }
0x1b1f   : > { %s14916_s30 = smov %s14913_s24 }
0x1b20   :  { %26 = sbr.rel (!%p24_p9) target bundleno = 5 (0x5), region = 137 }
0x1b25   :  { %8846 = vsyncpa [#allocation3], 1 }
0x1b26   :  { %8848 = vsyncpa [#allocation3 + $0x1], 1 }

</bundles_post_ra>
